<compile_context>
chip_gen: v5e
topology: v5e:2x2
jax: 0.10.0
libtpu: 0.0.40
codegen_flags: <defaults>
</compile_context>

<pallas_src>
import functools

import jax
import jax.numpy as jnp
import numpy as np
from jax import lax
from jax.experimental import pallas as pl
from jax.experimental.pallas import tpu as pltpu

LRELU_SLOPE = 0.01   # nn.LeakyReLU() default
GN_EPS = 1e-5        # nn.GroupNorm default eps

# Tap positions (padded-coordinate convention: tap (td,th,tw) multiplies
# input[z+td-1, y+th-1, x+tw-1]).
TAPS_331 = tuple((dd, hh, 1) for dd in range(3) for hh in range(3))  # kernel (3,3,1), pad (1,1,0)
TAPS_133 = tuple((1, hh, ww) for hh in range(3) for ww in range(3))  # kernel (1,3,3), pad (0,1,1)
TAPS_313 = tuple((dd, 1, ww) for dd in range(3) for ww in range(3))  # kernel (3,1,3), pad (1,0,1)
TAPS_A = tuple(sorted(set(TAPS_331) | set(TAPS_313)))                # union basis: 15 taps


def _make_fused_kernel(D, H, W, Cin, Cout, G, pad):
    """Whole ResContextBlock forward for one batch element (transposed layout)."""
    M = D * H * W
    K1 = len(TAPS_A) * Cin
    # (source sublane-offset in act scratch, tap) -- layer-1 reads x (rows [0,Cin)),
    # layer-2 reads a1 (rows [0,Cin)) for branch 1 and a2 (rows [Cin,2Cin)) for branch 2.
    entries1 = tuple((0, t) for t in TAPS_A)
    entries2 = tuple((0, t) for t in TAPS_133) + tuple((Cin, t) for t in TAPS_331)
    K2 = len(entries2) * Cin
    need_pin = (Cin // G) > 1    # channels-per-group > 1 -> need group averaging
    need_pout = (Cout // G) > 1

    def _leaky(y):
        return jnp.where(y > 0, y, LRELU_SLOPE * y)

    def _gn(y, g_ref, b_ref, p_ref):
        # GroupNorm over (all voxels, channels-in-group); channels in sublanes, voxels in lanes.
        inv_m = jnp.float32(1.0 / M)
        s1 = jnp.sum(y, axis=1, keepdims=True) * inv_m        # per-channel mean   (C, 1)
        s2 = jnp.sum(y * y, axis=1, keepdims=True) * inv_m    # per-channel E[x^2] (C, 1)
        if p_ref is None:                                     # channels-per-group == 1 fast path
            mean, ex2 = s1, s2
        else:                                                 # host-built block-diag group avg
            mean = jnp.dot(p_ref[...], s1, preferred_element_type=jnp.float32)
            ex2 = jnp.dot(p_ref[...], s2, preferred_element_type=jnp.float32)
        var = jnp.maximum(ex2 - mean * mean, 0.0)             # clamp: no rsqrt NaN
        yn = (y - mean) * lax.rsqrt(var + GN_EPS)
        return yn * g_ref[...] + b_ref[...]

    def _assemble(entries, act_ref, m_ref, cols_ref):
        # Transposed im2col: row block e of cols holds mask_e * src[:, m + o_e].
        # Reads are static lane-offset windows of the lane-padded scratch; stores are
        # lane-dense (M lanes) bf16 blocks at aligned sublane offsets (no masked stores).
        for e, (row0, (td, th, tw)) in enumerate(entries):
            off = (td - 1) * (H * W) + (th - 1) * W + (tw - 1)
            v = act_ref[pl.ds(row0, Cin), pl.ds(pad + off, M)]
            if (td, th, tw) != (1, 1, 1):                      # center tap needs no boundary mask
                v = v * m_ref[pl.ds(td * 9 + th * 3 + tw, 1), :]
            cols_ref[pl.ds(e * Cin, Cin), :] = v.astype(cols_ref.dtype)

    def kernel(*refs):
        it = iter(refs)
        x_ref = next(it)                        # (1, Cin, M)   f32  (NCDHW, spatial flattened)
        m_ref = next(it)                        # (32, M)       f32  boundary masks (27 used)
        wa_ref = next(it)                       # (2*Cin, K1)   bf16 layer-1 union weights^T
        wb_ref = next(it)                       # (2*Cout, K2)  bf16 layer-2 block-diag weights^T
        ga_ref, ba_ref = next(it), next(it)     # (2*Cin, 1)    f32  GN affine, layer 1
        gb_ref, bb_ref = next(it), next(it)     # (2*Cout, 1)   f32  GN affine, layer 2
        pin_ref = next(it) if need_pin else None
        pout_ref = next(it) if need_pout else None
        out_ref = next(it)                      # (1, Cout, M)  f32
        cols_ref, act_ref = next(it), next(it)  # (K2, M) bf16 ; (2*Cin, M + 2*pad) f32

        # Zero only the lane halos; the interior is fully rewritten every step, so this
        # stays megacore-safe when the batch axis is split across TensorCores.
        zpad = jnp.zeros((2 * Cin, pad), jnp.float32)
        act_ref[:, pl.ds(0, pad)] = zpad
        act_ref[:, pl.ds(pad + M, pad)] = zpad

        # ---- layer 1: both branches' first conv as ONE (2Cin, K1) @ (K1, M) matmul ----
        act_ref[pl.ds(0, Cin), pl.ds(pad, M)] = x_ref[0]
        _assemble(entries1, act_ref, m_ref, cols_ref)
        ya = jnp.dot(wa_ref[...], cols_ref[pl.ds(0, K1), :],
                     preferred_element_type=jnp.float32)       # (2Cin, M) f32
        a = _leaky(_gn(ya, ga_ref, ba_ref, pin_ref))
        # Intermediates go straight back to the (reused) padded scratch:
        # rows [0,Cin) <- a1 (branch 1), rows [Cin,2Cin) <- a2 (branch 2); x is dead now.
        act_ref[:, pl.ds(pad, M)] = a

        # ---- layer 2: both second convs as ONE block-diagonal (2Cout, K2) @ (K2, M) matmul ----
        _assemble(entries2, act_ref, m_ref, cols_ref)
        yb = jnp.dot(wb_ref[...], cols_ref[...],
                     preferred_element_type=jnp.float32)       # (2Cout, M) f32
        yb = _gn(yb, gb_ref, bb_ref, pout_ref)

        # residual add (shortcut + resA) and lane-dense (Cout, M) store; the wrapper
        # reshapes this straight back to NCDHW (no transposes anywhere).
        out_ref[0] = (yb[:Cout, :] + yb[Cout:, :]).astype(out_ref.dtype)

    return kernel, K1, K2


def _boundary_masks(D, H, W):
    """masks[td*9+th*3+tw, m] = 1 if voxel m shifted by (td-1, th-1, tw-1) stays in bounds."""
    z, y, x = np.meshgrid(np.arange(D), np.arange(H), np.arange(W), indexing="ij")
    z, y, x = z.ravel(), y.ravel(), x.ravel()
    masks = np.zeros((32, D * H * W), np.float32)      # 27 rows used, padded to 32
    for td in range(3):
        for th in range(3):
            for tw in range(3):
                ok = ((z + td - 1 >= 0) & (z + td - 1 < D) &
                      (y + th - 1 >= 0) & (y + th - 1 < H) &
                      (x + tw - 1 >= 0) & (x + tw - 1 < W))
                masks[td * 9 + th * 3 + tw] = ok.astype(np.float32)
    return jnp.asarray(masks)


def _group_avg_matrix(C, G):
    """(2C, 2C) block-diagonal group-averaging matrix (one C x C block per branch)."""
    cpg = C // G
    ch = np.arange(C)
    blk = ((ch[:, None] // cpg) == (ch[None, :] // cpg)).astype(np.float32) / cpg
    two = np.zeros((2 * C, 2 * C), np.float32)
    two[:C, :C] = blk
    two[C:, C:] = blk
    return jnp.asarray(two)


def _prep_weights(params, Cin, Cout):
    """Scatter/transpose conv weights into the layouts the kernel consumes (bf16 operands)."""
    # Layer 1: both first convs in the shared 15-tap union basis, concatenated along Cout.
    pos = {t: i for i, t in enumerate(TAPS_A)}
    wa = jnp.zeros((len(TAPS_A), Cin, 2 * Cin), jnp.float32)
    for t, tap in enumerate(TAPS_331):
        wa = wa.at[pos[tap], :, :Cin].set(params["w1a"][t])
    for t, tap in enumerate(TAPS_313):
        wa = wa.at[pos[tap], :, Cin:].set(params["w2a"][t])
    waT = wa.reshape(len(TAPS_A) * Cin, 2 * Cin).T.astype(jnp.bfloat16)
    # Layer 2: block-diagonal fusion of conv1x3x3 (branch 1) and conv3x3x1 (branch 2).
    wb = jnp.zeros((18, Cin, 2 * Cout), jnp.float32)
    wb = wb.at[0:9, :, :Cout].set(params["w1b"])     # TAPS_133 order, output cols [0, Cout)
    wb = wb.at[9:18, :, Cout:].set(params["w2b"])    # TAPS_331 order, output cols [Cout, 2Cout)
    wbT = wb.reshape(18 * Cin, 2 * Cout).T.astype(jnp.bfloat16)
    return waT, wbT


def res_context_block(x_ncdhw, params, *, num_groups):
    """Forward of ResContextBlock on a dense NCDHW tensor (returns NCDHW)."""
    B, Cin, D, H, W = x_ncdhw.shape
    Cout = params["w1b"].shape[-1]
    G = num_groups
    M = D * H * W
    assert Cin % G == 0 and Cout % G == 0 and Cin % 8 == 0

    # Lane padding on each side of the flattened voxel axis (covers max tap shift, 128-aligned).
    pad = max(128, -(-(H * W + W + 1) // 128) * 128)

    waT, wbT = _prep_weights(params, Cin, Cout)
    masks = _boundary_masks(D, H, W)
    ga = jnp.concatenate([params["g1a"], params["g2a"]]).reshape(2 * Cin, 1)
    ba = jnp.concatenate([params["b1a"], params["b2a"]]).reshape(2 * Cin, 1)
    gb = jnp.concatenate([params["g1b"], params["g2b"]]).reshape(2 * Cout, 1)
    bb = jnp.concatenate([params["b1b"], params["b2b"]]).reshape(2 * Cout, 1)

    kernel, K1, K2 = _make_fused_kernel(D, H, W, Cin, Cout, G, pad)

    args = [x_ncdhw.reshape(B, Cin, M), masks, waT, wbT, ga, ba, gb, bb]
    in_specs = [
        pl.BlockSpec((1, Cin, M), lambda b: (b, 0, 0)),
        pl.BlockSpec((32, M), lambda b: (0, 0)),
        pl.BlockSpec((2 * Cin, K1), lambda b: (0, 0)),
        pl.BlockSpec((2 * Cout, K2), lambda b: (0, 0)),
        pl.BlockSpec((2 * Cin, 1), lambda b: (0, 0)),
        pl.BlockSpec((2 * Cin, 1), lambda b: (0, 0)),
        pl.BlockSpec((2 * Cout, 1), lambda b: (0, 0)),
        pl.BlockSpec((2 * Cout, 1), lambda b: (0, 0)),
    ]
    if (Cin // G) > 1:
        args.append(_group_avg_matrix(Cin, G))
        in_specs.append(pl.BlockSpec((2 * Cin, 2 * Cin), lambda b: (0, 0)))
    if (Cout // G) > 1:
        args.append(_group_avg_matrix(Cout, G))
        in_specs.append(pl.BlockSpec((2 * Cout, 2 * Cout), lambda b: (0, 0)))

    flops = 2 * B * M * (K1 * 2 * Cin + K2 * 2 * Cout)
    bytes_accessed = 4 * (B * Cin * M + B * Cout * M) + 2 * (waT.size + wbT.size) + 4 * masks.size

    out = pl.pallas_call(
        kernel,
        grid=(B,),
        in_specs=in_specs,
        out_specs=pl.BlockSpec((1, Cout, M), lambda b: (b, 0, 0)),
        out_shape=jax.ShapeDtypeStruct((B, Cout, M), jnp.float32),
        scratch_shapes=[
            pltpu.VMEM((K2, M), jnp.bfloat16),                 # transposed bf16 im2col staging
            pltpu.VMEM((2 * Cin, M + 2 * pad), jnp.float32),   # lane-padded acts (x / a1 / a2)
        ],
        compiler_params=pltpu.CompilerParams(
            dimension_semantics=("parallel",)),
        cost_estimate=pl.CostEstimate(flops=int(flops),
                                      transcendentals=int(2 * B * (Cin + Cout)),
                                      bytes_accessed=int(bytes_accessed)),
    )(*args)

    return out.reshape(B, Cout, D, H, W)   # already channel-first: no wrapper transposes


def init_params(key, in_filters, out_filters):
    """kaiming_normal conv weights, GroupNorm weight=1 / bias=0 (PyTorch defaults)."""
    ks = jax.random.split(key, 4)

    def kaiming(k, nk, cin, cout):
        std = np.sqrt(2.0 / (cin * nk))
        return (std * jax.random.normal(k, (nk, cin, cout))).astype(jnp.float32)

    return {
        "w1a": kaiming(ks[0], 9, in_filters, in_filters),
        "w1b": kaiming(ks[1], 9, in_filters, out_filters),
        "w2a": kaiming(ks[2], 9, in_filters, in_filters),
        "w2b": kaiming(ks[3], 9, in_filters, out_filters),
        "g1a": jnp.ones((in_filters,), jnp.float32),
        "b1a": jnp.zeros((in_filters,), jnp.float32),
        "g1b": jnp.ones((out_filters,), jnp.float32),
        "b1b": jnp.zeros((out_filters,), jnp.float32),
        "g2a": jnp.ones((in_filters,), jnp.float32),
        "b2a": jnp.zeros((in_filters,), jnp.float32),
        "g2b": jnp.ones((out_filters,), jnp.float32),
        "b2b": jnp.zeros((out_filters,), jnp.float32),
    }


# ---------------- pure-JAX reference (for correctness check) ----------------
def _ref_conv(x, w_taps, taps):
    Cin = x.shape[-1]
    Cout = w_taps.shape[-1]
    wk = jnp.zeros((3, 3, 3, Cin, Cout), jnp.float32)
    for t, (td, th, tw) in enumerate(taps):
        wk = wk.at[td, th, tw].set(w_taps[t])
    return lax.conv_general_dilated(
        x, wk, window_strides=(1, 1, 1),
        padding=((1, 1), (1, 1), (1, 1)),
        dimension_numbers=("NDHWC", "DHWIO", "NDHWC"))


def _ref_gn(x, gamma, beta, G):
    B, D, H, W, C = x.shape
    xr = x.reshape(B, D * H * W, G, C // G)
    mean = xr.mean(axis=(1, 3), keepdims=True)
    var = ((xr - mean) ** 2).mean(axis=(1, 3), keepdims=True)
    y = ((xr - mean) / jnp.sqrt(var + GN_EPS)).reshape(B, D, H, W, C)
    return y * gamma.reshape(1, 1, 1, 1, C) + beta.reshape(1, 1, 1, 1, C)


def ref_forward(x_ncdhw, params, num_groups):
    x = jnp.transpose(x_ncdhw, (0, 2, 3, 4, 1))
    h = _ref_gn(_ref_conv(x, params["w1a"], TAPS_331),
                params["g1a"], params["b1a"], num_groups)
    h = jnp.where(h > 0, h, LRELU_SLOPE * h)
    shortcut = _ref_gn(_ref_conv(h, params["w1b"], TAPS_133),
                       params["g1b"], params["b1b"], num_groups)
    h = _ref_gn(_ref_conv(x, params["w2a"], TAPS_313),
                params["g2a"], params["b2a"], num_groups)
    h = jnp.where(h > 0, h, LRELU_SLOPE * h)
    resA = _ref_gn(_ref_conv(h, params["w2b"], TAPS_331),
                   params["g2b"], params["b2b"], num_groups)
    return jnp.transpose(resA + shortcut, (0, 4, 1, 2, 3))


if __name__ == "__main__":
    B = 2
    IN_FILTERS = 32
    OUT_FILTERS = 32
    NUM_GROUPS = 32          # norm_cfg default: GN(32 groups) => 1 channel/group here
    D = H = W = 8

    key = jax.random.PRNGKey(0)
    kx, kp = jax.random.split(key)
    x = jax.random.normal(kx, (B, IN_FILTERS, D, H, W), jnp.float32)   # NCDHW
    params = init_params(kp, IN_FILTERS, OUT_FILTERS)

    fwd = jax.jit(functools.partial(res_context_block, num_groups=NUM_GROUPS))
    out = jax.block_until_ready(fwd(x, params))
    assert out.shape == (B, OUT_FILTERS, D, H, W)

    ref = np.asarray(ref_forward(x, params, NUM_GROUPS))
    # bf16 MXU operands (with f32 accumulation) bound the kernel-vs-f32-reference mismatch.
    np.testing.assert_allclose(np.asarray(out), ref, rtol=2e-2, atol=3e-2)

    print("KERNEL_OK")
</pallas_src>

<mosaic_0001>
module attributes {stable_mosaic.version = 11 : i64} {
  func.func @kernel(%arg0: i32, %arg1: memref<1x32x512xf32, #tpu.memory_space<vmem>>, %arg2: memref<32x512xf32, #tpu.memory_space<vmem>>, %arg3: memref<64x480xbf16, #tpu.memory_space<vmem>>, %arg4: memref<64x576xbf16, #tpu.memory_space<vmem>>, %arg5: memref<64x1xf32, #tpu.memory_space<vmem>>, %arg6: memref<64x1xf32, #tpu.memory_space<vmem>>, %arg7: memref<64x1xf32, #tpu.memory_space<vmem>>, %arg8: memref<64x1xf32, #tpu.memory_space<vmem>>, %arg9: memref<1x32x512xf32, #tpu.memory_space<vmem>>, %arg10: memref<576x512xbf16, #tpu.memory_space<vmem>>, %arg11: memref<64x768xf32, #tpu.memory_space<vmem>>) attributes {dimension_semantics = [#tpu.dimension_semantics<parallel>], iteration_bounds = array<i64: 2>, scalar_prefetch = 0 : i64, scratch_operands = 2 : i64, tpu.core_type = #tpu.core_type<tc>, window_params = [{transform_indices = @transform_0, window_bounds = array<i64: 1, 32, 512>}, {pipeline_mode = #tpu.pipeline_mode<synchronous>, transform_indices = @transform_1, window_bounds = array<i64: 32, 512>}, {pipeline_mode = #tpu.pipeline_mode<synchronous>, transform_indices = @transform_2, window_bounds = array<i64: 64, 480>}, {pipeline_mode = #tpu.pipeline_mode<synchronous>, transform_indices = @transform_3, window_bounds = array<i64: 64, 576>}, {pipeline_mode = #tpu.pipeline_mode<synchronous>, transform_indices = @transform_4, window_bounds = array<i64: 64, 1>}, {pipeline_mode = #tpu.pipeline_mode<synchronous>, transform_indices = @transform_5, window_bounds = array<i64: 64, 1>}, {pipeline_mode = #tpu.pipeline_mode<synchronous>, transform_indices = @transform_6, window_bounds = array<i64: 64, 1>}, {pipeline_mode = #tpu.pipeline_mode<synchronous>, transform_indices = @transform_7, window_bounds = array<i64: 64, 1>}, {transform_indices = @transform_8, window_bounds = array<i64: 1, 32, 512>}]} {
    %cst = arith.constant 0.000000e+00 : f32
    %0 = vector.broadcast %cst : f32 to vector<64x128xf32>
    %c0 = arith.constant 0 : index
    %c0_0 = arith.constant 0 : index
    %1 = vector.load %arg11[%c0, %c0_0] : memref<64x768xf32, #tpu.memory_space<vmem>>, vector<64x128xf32>
    tpu.vector_store %arg11[%c0, %c0_0], %0 {strides = array<i32>} : memref<64x768xf32, #tpu.memory_space<vmem>>, vector<64x128xf32>,
    %c0_1 = arith.constant 0 : index
    %c640 = arith.constant 640 : index
    %2 = vector.load %arg11[%c0_1, %c640] : memref<64x768xf32, #tpu.memory_space<vmem>>, vector<64x128xf32>
    tpu.vector_store %arg11[%c0_1, %c640], %0 {strides = array<i32>} : memref<64x768xf32, #tpu.memory_space<vmem>>, vector<64x128xf32>,
    %c0_2 = arith.constant 0 : index
    %c0_3 = arith.constant 0 : index
    %c0_4 = arith.constant 0 : index
    %3 = vector.load %arg1[%c0_2, %c0_3, %c0_4] : memref<1x32x512xf32, #tpu.memory_space<vmem>>, vector<1x32x512xf32>
    %4 = vector.shape_cast %3 : vector<1x32x512xf32> to vector<32x512xf32>
    %c0_5 = arith.constant 0 : index
    %c128 = arith.constant 128 : index
    %5 = vector.load %arg11[%c0_5, %c128] : memref<64x768xf32, #tpu.memory_space<vmem>>, vector<32x512xf32>
    tpu.vector_store %arg11[%c0_5, %c128], %4 {strides = array<i32>} : memref<64x768xf32, #tpu.memory_space<vmem>>, vector<32x512xf32>,
    %c0_6 = arith.constant 0 : index
    %c56 = arith.constant 56 : index
    %6 = vector.load %arg11[%c0_6, %c56] : memref<64x768xf32, #tpu.memory_space<vmem>>, vector<32x512xf32>
    %c1 = arith.constant 1 : index
    %c0_7 = arith.constant 0 : index
    %7 = vector.load %arg2[%c1, %c0_7] : memref<32x512xf32, #tpu.memory_space<vmem>>, vector<1x512xf32>
    %8 = vector.broadcast %7 : vector<1x512xf32> to vector<32x512xf32>
    %9 = arith.mulf %6, %8 : vector<32x512xf32>
    %10 = arith.truncf %9 : vector<32x512xf32> to vector<32x512xbf16>
    %c0_8 = arith.constant 0 : index
    %c0_9 = arith.constant 0 : index
    %11 = vector.load %arg10[%c0_8, %c0_9] : memref<576x512xbf16, #tpu.memory_space<vmem>>, vector<32x512xbf16>
    tpu.vector_store %arg10[%c0_8, %c0_9], %10 {strides = array<i32>} : memref<576x512xbf16, #tpu.memory_space<vmem>>, vector<32x512xbf16>,
    %c0_10 = arith.constant 0 : index
    %c63 = arith.constant 63 : index
    %12 = vector.load %arg11[%c0_10, %c63] : memref<64x768xf32, #tpu.memory_space<vmem>>, vector<32x512xf32>
    %c3 = arith.constant 3 : index
    %c0_11 = arith.constant 0 : index
    %13 = vector.load %arg2[%c3, %c0_11] : memref<32x512xf32, #tpu.memory_space<vmem>>, vector<1x512xf32>
    %14 = vector.broadcast %13 : vector<1x512xf32> to vector<32x512xf32>
    %15 = arith.mulf %12, %14 : vector<32x512xf32>
    %16 = arith.truncf %15 : vector<32x512xf32> to vector<32x512xbf16>
    %c32 = arith.constant 32 : index
    %c0_12 = arith.constant 0 : index
    %17 = vector.load %arg10[%c32, %c0_12] : memref<576x512xbf16, #tpu.memory_space<vmem>>, vector<32x512xbf16>
    tpu.vector_store %arg10[%c32, %c0_12], %16 {strides = array<i32>} : memref<576x512xbf16, #tpu.memory_space<vmem>>, vector<32x512xbf16>,
    %c0_13 = arith.constant 0 : index
    %c64 = arith.constant 64 : index
    %18 = vector.load %arg11[%c0_13, %c64] : memref<64x768xf32, #tpu.memory_space<vmem>>, vector<32x512xf32>
    %c4 = arith.constant 4 : index
    %c0_14 = arith.constant 0 : index
    %19 = vector.load %arg2[%c4, %c0_14] : memref<32x512xf32, #tpu.memory_space<vmem>>, vector<1x512xf32>
    %20 = vector.broadcast %19 : vector<1x512xf32> to vector<32x512xf32>
    %21 = arith.mulf %18, %20 : vector<32x512xf32>
    %22 = arith.truncf %21 : vector<32x512xf32> to vector<32x512xbf16>
    %c64_15 = arith.constant 64 : index
    %c0_16 = arith.constant 0 : index
    %23 = vector.load %arg10[%c64_15, %c0_16] : memref<576x512xbf16, #tpu.memory_space<vmem>>, vector<32x512xbf16>
    tpu.vector_store %arg10[%c64_15, %c0_16], %22 {strides = array<i32>} : memref<576x512xbf16, #tpu.memory_space<vmem>>, vector<32x512xbf16>,
    %c0_17 = arith.constant 0 : index
    %c65 = arith.constant 65 : index
    %24 = vector.load %arg11[%c0_17, %c65] : memref<64x768xf32, #tpu.memory_space<vmem>>, vector<32x512xf32>
    %c5 = arith.constant 5 : index
    %c0_18 = arith.constant 0 : index
    %25 = vector.load %arg2[%c5, %c0_18] : memref<32x512xf32, #tpu.memory_space<vmem>>, vector<1x512xf32>
    %26 = vector.broadcast %25 : vector<1x512xf32> to vector<32x512xf32>
    %27 = arith.mulf %24, %26 : vector<32x512xf32>
    %28 = arith.truncf %27 : vector<32x512xf32> to vector<32x512xbf16>
    %c96 = arith.constant 96 : index
    %c0_19 = arith.constant 0 : index
    %29 = vector.load %arg10[%c96, %c0_19] : memref<576x512xbf16, #tpu.memory_space<vmem>>, vector<32x512xbf16>
    tpu.vector_store %arg10[%c96, %c0_19], %28 {strides = array<i32>} : memref<576x512xbf16, #tpu.memory_space<vmem>>, vector<32x512xbf16>,
    %c0_20 = arith.constant 0 : index
    %c72 = arith.constant 72 : index
    %30 = vector.load %arg11[%c0_20, %c72] : memref<64x768xf32, #tpu.memory_space<vmem>>, vector<32x512xf32>
    %c7 = arith.constant 7 : index
    %c0_21 = arith.constant 0 : index
    %31 = vector.load %arg2[%c7, %c0_21] : memref<32x512xf32, #tpu.memory_space<vmem>>, vector<1x512xf32>
    %32 = vector.broadcast %31 : vector<1x512xf32> to vector<32x512xf32>
    %33 = arith.mulf %30, %32 : vector<32x512xf32>
    %34 = arith.truncf %33 : vector<32x512xf32> to vector<32x512xbf16>
    %c128_22 = arith.constant 128 : index
    %c0_23 = arith.constant 0 : index
    %35 = vector.load %arg10[%c128_22, %c0_23] : memref<576x512xbf16, #tpu.memory_space<vmem>>, vector<32x512xbf16>
    tpu.vector_store %arg10[%c128_22, %c0_23], %34 {strides = array<i32>} : memref<576x512xbf16, #tpu.memory_space<vmem>>, vector<32x512xbf16>,
    %c0_24 = arith.constant 0 : index
    %c120 = arith.constant 120 : index
    %36 = vector.load %arg11[%c0_24, %c120] : memref<64x768xf32, #tpu.memory_space<vmem>>, vector<32x512xf32>
    %c10 = arith.constant 10 : index
    %c0_25 = arith.constant 0 : index
    %37 = vector.load %arg2[%c10, %c0_25] : memref<32x512xf32, #tpu.memory_space<vmem>>, vector<1x512xf32>
    %38 = vector.broadcast %37 : vector<1x512xf32> to vector<32x512xf32>
    %39 = arith.mulf %36, %38 : vector<32x512xf32>
    %40 = arith.truncf %39 : vector<32x512xf32> to vector<32x512xbf16>
    %c160 = arith.constant 160 : index
    %c0_26 = arith.constant 0 : index
    %41 = vector.load %arg10[%c160, %c0_26] : memref<576x512xbf16, #tpu.memory_space<vmem>>, vector<32x512xbf16>
    tpu.vector_store %arg10[%c160, %c0_26], %40 {strides = array<i32>} : memref<576x512xbf16, #tpu.memory_space<vmem>>, vector<32x512xbf16>,
    %c0_27 = arith.constant 0 : index
    %c127 = arith.constant 127 : index
    %42 = vector.load %arg11[%c0_27, %c127] : memref<64x768xf32, #tpu.memory_space<vmem>>, vector<32x512xf32>
    %c12 = arith.constant 12 : index
    %c0_28 = arith.constant 0 : index
    %43 = vector.load %arg2[%c12, %c0_28] : memref<32x512xf32, #tpu.memory_space<vmem>>, vector<1x512xf32>
    %44 = vector.broadcast %43 : vector<1x512xf32> to vector<32x512xf32>
    %45 = arith.mulf %42, %44 : vector<32x512xf32>
    %46 = arith.truncf %45 : vector<32x512xf32> to vector<32x512xbf16>
    %c192 = arith.constant 192 : index
    %c0_29 = arith.constant 0 : index
    %47 = vector.load %arg10[%c192, %c0_29] : memref<576x512xbf16, #tpu.memory_space<vmem>>, vector<32x512xbf16>
    tpu.vector_store %arg10[%c192, %c0_29], %46 {strides = array<i32>} : memref<576x512xbf16, #tpu.memory_space<vmem>>, vector<32x512xbf16>,
    %c0_30 = arith.constant 0 : index
    %c128_31 = arith.constant 128 : index
    %48 = vector.load %arg11[%c0_30, %c128_31] : memref<64x768xf32, #tpu.memory_space<vmem>>, vector<32x512xf32>
    %49 = arith.truncf %48 : vector<32x512xf32> to vector<32x512xbf16>
    %c224 = arith.constant 224 : index
    %c0_32 = arith.constant 0 : index
    %50 = vector.load %arg10[%c224, %c0_32] : memref<576x512xbf16, #tpu.memory_space<vmem>>, vector<32x512xbf16>
    tpu.vector_store %arg10[%c224, %c0_32], %49 {strides = array<i32>} : memref<576x512xbf16, #tpu.memory_space<vmem>>, vector<32x512xbf16>,
    %c0_33 = arith.constant 0 : index
    %c129 = arith.constant 129 : index
    %51 = vector.load %arg11[%c0_33, %c129] : memref<64x768xf32, #tpu.memory_space<vmem>>, vector<32x512xf32>
    %c14 = arith.constant 14 : index
    %c0_34 = arith.constant 0 : index
    %52 = vector.load %arg2[%c14, %c0_34] : memref<32x512xf32, #tpu.memory_space<vmem>>, vector<1x512xf32>
    %53 = vector.broadcast %52 : vector<1x512xf32> to vector<32x512xf32>
    %54 = arith.mulf %51, %53 : vector<32x512xf32>
    %55 = arith.truncf %54 : vector<32x512xf32> to vector<32x512xbf16>
    %c256 = arith.constant 256 : index
    %c0_35 = arith.constant 0 : index
    %56 = vector.load %arg10[%c256, %c0_35] : memref<576x512xbf16, #tpu.memory_space<vmem>>, vector<32x512xbf16>
    tpu.vector_store %arg10[%c256, %c0_35], %55 {strides = array<i32>} : memref<576x512xbf16, #tpu.memory_space<vmem>>, vector<32x512xbf16>,
    %c0_36 = arith.constant 0 : index
    %c136 = arith.constant 136 : index
    %57 = vector.load %arg11[%c0_36, %c136] : memref<64x768xf32, #tpu.memory_space<vmem>>, vector<32x512xf32>
    %c16 = arith.constant 16 : index
    %c0_37 = arith.constant 0 : index
    %58 = vector.load %arg2[%c16, %c0_37] : memref<32x512xf32, #tpu.memory_space<vmem>>, vector<1x512xf32>
    %59 = vector.broadcast %58 : vector<1x512xf32> to vector<32x512xf32>
    %60 = arith.mulf %57, %59 : vector<32x512xf32>
    %61 = arith.truncf %60 : vector<32x512xf32> to vector<32x512xbf16>
    %c288 = arith.constant 288 : index
    %c0_38 = arith.constant 0 : index
    %62 = vector.load %arg10[%c288, %c0_38] : memref<576x512xbf16, #tpu.memory_space<vmem>>, vector<32x512xbf16>
    tpu.vector_store %arg10[%c288, %c0_38], %61 {strides = array<i32>} : memref<576x512xbf16, #tpu.memory_space<vmem>>, vector<32x512xbf16>,
    %c0_39 = arith.constant 0 : index
    %c184 = arith.constant 184 : index
    %63 = vector.load %arg11[%c0_39, %c184] : memref<64x768xf32, #tpu.memory_space<vmem>>, vector<32x512xf32>
    %c19 = arith.constant 19 : index
    %c0_40 = arith.constant 0 : index
    %64 = vector.load %arg2[%c19, %c0_40] : memref<32x512xf32, #tpu.memory_space<vmem>>, vector<1x512xf32>
    %65 = vector.broadcast %64 : vector<1x512xf32> to vector<32x512xf32>
    %66 = arith.mulf %63, %65 : vector<32x512xf32>
    %67 = arith.truncf %66 : vector<32x512xf32> to vector<32x512xbf16>
    %c320 = arith.constant 320 : index
    %c0_41 = arith.constant 0 : index
    %68 = vector.load %arg10[%c320, %c0_41] : memref<576x512xbf16, #tpu.memory_space<vmem>>, vector<32x512xbf16>
    tpu.vector_store %arg10[%c320, %c0_41], %67 {strides = array<i32>} : memref<576x512xbf16, #tpu.memory_space<vmem>>, vector<32x512xbf16>,
    %c0_42 = arith.constant 0 : index
    %c191 = arith.constant 191 : index
    %69 = vector.load %arg11[%c0_42, %c191] : memref<64x768xf32, #tpu.memory_space<vmem>>, vector<32x512xf32>
    %c21 = arith.constant 21 : index
    %c0_43 = arith.constant 0 : index
    %70 = vector.load %arg2[%c21, %c0_43] : memref<32x512xf32, #tpu.memory_space<vmem>>, vector<1x512xf32>
    %71 = vector.broadcast %70 : vector<1x512xf32> to vector<32x512xf32>
    %72 = arith.mulf %69, %71 : vector<32x512xf32>
    %73 = arith.truncf %72 : vector<32x512xf32> to vector<32x512xbf16>
    %c352 = arith.constant 352 : index
    %c0_44 = arith.constant 0 : index
    %74 = vector.load %arg10[%c352, %c0_44] : memref<576x512xbf16, #tpu.memory_space<vmem>>, vector<32x512xbf16>
    tpu.vector_store %arg10[%c352, %c0_44], %73 {strides = array<i32>} : memref<576x512xbf16, #tpu.memory_space<vmem>>, vector<32x512xbf16>,
    %c0_45 = arith.constant 0 : index
    %c192_46 = arith.constant 192 : index
    %75 = vector.load %arg11[%c0_45, %c192_46] : memref<64x768xf32, #tpu.memory_space<vmem>>, vector<32x512xf32>
    %c22 = arith.constant 22 : index
    %c0_47 = arith.constant 0 : index
    %76 = vector.load %arg2[%c22, %c0_47] : memref<32x512xf32, #tpu.memory_space<vmem>>, vector<1x512xf32>
    %77 = vector.broadcast %76 : vector<1x512xf32> to vector<32x512xf32>
    %78 = arith.mulf %75, %77 : vector<32x512xf32>
    %79 = arith.truncf %78 : vector<32x512xf32> to vector<32x512xbf16>
    %c384 = arith.constant 384 : index
    %c0_48 = arith.constant 0 : index
    %80 = vector.load %arg10[%c384, %c0_48] : memref<576x512xbf16, #tpu.memory_space<vmem>>, vector<32x512xbf16>
    tpu.vector_store %arg10[%c384, %c0_48], %79 {strides = array<i32>} : memref<576x512xbf16, #tpu.memory_space<vmem>>, vector<32x512xbf16>,
    %c0_49 = arith.constant 0 : index
    %c193 = arith.constant 193 : index
    %81 = vector.load %arg11[%c0_49, %c193] : memref<64x768xf32, #tpu.memory_space<vmem>>, vector<32x512xf32>
    %c23 = arith.constant 23 : index
    %c0_50 = arith.constant 0 : index
    %82 = vector.load %arg2[%c23, %c0_50] : memref<32x512xf32, #tpu.memory_space<vmem>>, vector<1x512xf32>
    %83 = vector.broadcast %82 : vector<1x512xf32> to vector<32x512xf32>
    %84 = arith.mulf %81, %83 : vector<32x512xf32>
    %85 = arith.truncf %84 : vector<32x512xf32> to vector<32x512xbf16>
    %c416 = arith.constant 416 : index
    %c0_51 = arith.constant 0 : index
    %86 = vector.load %arg10[%c416, %c0_51] : memref<576x512xbf16, #tpu.memory_space<vmem>>, vector<32x512xbf16>
    tpu.vector_store %arg10[%c416, %c0_51], %85 {strides = array<i32>} : memref<576x512xbf16, #tpu.memory_space<vmem>>, vector<32x512xbf16>,
    %c0_52 = arith.constant 0 : index
    %c200 = arith.constant 200 : index
    %87 = vector.load %arg11[%c0_52, %c200] : memref<64x768xf32, #tpu.memory_space<vmem>>, vector<32x512xf32>
    %c25 = arith.constant 25 : index
    %c0_53 = arith.constant 0 : index
    %88 = vector.load %arg2[%c25, %c0_53] : memref<32x512xf32, #tpu.memory_space<vmem>>, vector<1x512xf32>
    %89 = vector.broadcast %88 : vector<1x512xf32> to vector<32x512xf32>
    %90 = arith.mulf %87, %89 : vector<32x512xf32>
    %91 = arith.truncf %90 : vector<32x512xf32> to vector<32x512xbf16>
    %c448 = arith.constant 448 : index
    %c0_54 = arith.constant 0 : index
    %92 = vector.load %arg10[%c448, %c0_54] : memref<576x512xbf16, #tpu.memory_space<vmem>>, vector<32x512xbf16>
    tpu.vector_store %arg10[%c448, %c0_54], %91 {strides = array<i32>} : memref<576x512xbf16, #tpu.memory_space<vmem>>, vector<32x512xbf16>,
    %c0_55 = arith.constant 0 : index
    %c0_56 = arith.constant 0 : index
    %93 = vector.load %arg3[%c0_55, %c0_56] : memref<64x480xbf16, #tpu.memory_space<vmem>>, vector<64x480xbf16>
    %c0_57 = arith.constant 0 : index
    %c0_58 = arith.constant 0 : index
    %94 = vector.load %arg10[%c0_57, %c0_58] : memref<576x512xbf16, #tpu.memory_space<vmem>>, vector<480x512xbf16>
    %cst_59 = arith.constant dense<0.000000e+00> : vector<64x512xf32>
    %95 = tpu.matmul %93, %94, %cst_59 {dimension_numbers = #tpu.dot_dimension_numbers<[1], [0], [0], [1], [0, 0, 1, 1], [], []>} : vector<64x480xbf16>, vector<480x512xbf16>, vector<64x512xf32> -> vector<64x512xf32>
    %cst_60 = arith.constant dense<0.000000e+00> : vector<64xf32>
    %96 = vector.multi_reduction <add>, %95, %cst_60 [1] : vector<64x512xf32> to vector<64xf32>
    %97 = vector.shape_cast %96 : vector<64xf32> to vector<64x1xf32>
    %cst_61 = arith.constant 0.001953125 : f32
    %98 = vector.broadcast %cst_61 : f32 to vector<64x1xf32>
    %99 = arith.mulf %97, %98 : vector<64x1xf32>
    %100 = arith.mulf %95, %95 : vector<64x512xf32>
    %cst_62 = arith.constant dense<0.000000e+00> : vector<64xf32>
    %101 = vector.multi_reduction <add>, %100, %cst_62 [1] : vector<64x512xf32> to vector<64xf32>
    %102 = vector.shape_cast %101 : vector<64xf32> to vector<64x1xf32>
    %cst_63 = arith.constant 0.001953125 : f32
    %103 = vector.broadcast %cst_63 : f32 to vector<64x1xf32>
    %104 = arith.mulf %102, %103 : vector<64x1xf32>
    %105 = arith.mulf %99, %99 : vector<64x1xf32>
    %106 = arith.subf %104, %105 : vector<64x1xf32>
    %cst_64 = arith.constant 0.000000e+00 : f32
    %107 = vector.broadcast %cst_64 : f32 to vector<64x1xf32>
    %108 = arith.maximumf %106, %107 : vector<64x1xf32>
    %109 = vector.broadcast %99 : vector<64x1xf32> to vector<64x512xf32>
    %110 = arith.subf %95, %109 : vector<64x512xf32>
    %cst_65 = arith.constant 9.99999974E-6 : f32
    %111 = vector.broadcast %cst_65 : f32 to vector<64x1xf32>
    %112 = arith.addf %108, %111 : vector<64x1xf32>
    %113 = math.rsqrt %112 : vector<64x1xf32>
    %114 = vector.broadcast %113 : vector<64x1xf32> to vector<64x512xf32>
    %115 = arith.mulf %110, %114 : vector<64x512xf32>
    %c0_66 = arith.constant 0 : index
    %c0_67 = arith.constant 0 : index
    %116 = vector.load %arg5[%c0_66, %c0_67] : memref<64x1xf32, #tpu.memory_space<vmem>>, vector<64x1xf32>
    %117 = vector.broadcast %116 : vector<64x1xf32> to vector<64x512xf32>
    %118 = arith.mulf %115, %117 : vector<64x512xf32>
    %c0_68 = arith.constant 0 : index
    %c0_69 = arith.constant 0 : index
    %119 = vector.load %arg6[%c0_68, %c0_69] : memref<64x1xf32, #tpu.memory_space<vmem>>, vector<64x1xf32>
    %120 = vector.broadcast %119 : vector<64x1xf32> to vector<64x512xf32>
    %121 = arith.addf %118, %120 : vector<64x512xf32>
    %cst_70 = arith.constant 0.000000e+00 : f32
    %122 = vector.broadcast %cst_70 : f32 to vector<64x512xf32>
    %123 = arith.cmpf ogt, %121, %122 : vector<64x512xf32>
    %cst_71 = arith.constant 0.00999999977 : f32
    %124 = vector.broadcast %cst_71 : f32 to vector<64x512xf32>
    %125 = arith.mulf %124, %121 : vector<64x512xf32>
    %126 = arith.select %123, %121, %125 : vector<64x512xi1>, vector<64x512xf32>
    %c0_72 = arith.constant 0 : index
    %c128_73 = arith.constant 128 : index
    %127 = vector.load %arg11[%c0_72, %c128_73] : memref<64x768xf32, #tpu.memory_space<vmem>>, vector<64x512xf32>
    tpu.vector_store %arg11[%c0_72, %c128_73], %126 {strides = array<i32>} : memref<64x768xf32, #tpu.memory_space<vmem>>, vector<64x512xf32>,
    %c0_74 = arith.constant 0 : index
    %c119 = arith.constant 119 : index
    %128 = vector.load %arg11[%c0_74, %c119] : memref<64x768xf32, #tpu.memory_space<vmem>>, vector<32x512xf32>
    %c9 = arith.constant 9 : index
    %c0_75 = arith.constant 0 : index
    %129 = vector.load %arg2[%c9, %c0_75] : memref<32x512xf32, #tpu.memory_space<vmem>>, vector<1x512xf32>
    %130 = vector.broadcast %129 : vector<1x512xf32> to vector<32x512xf32>
    %131 = arith.mulf %128, %130 : vector<32x512xf32>
    %132 = arith.truncf %131 : vector<32x512xf32> to vector<32x512xbf16>
    %c0_76 = arith.constant 0 : index
    %c0_77 = arith.constant 0 : index
    %133 = vector.load %arg10[%c0_76, %c0_77] : memref<576x512xbf16, #tpu.memory_space<vmem>>, vector<32x512xbf16>
    tpu.vector_store %arg10[%c0_76, %c0_77], %132 {strides = array<i32>} : memref<576x512xbf16, #tpu.memory_space<vmem>>, vector<32x512xbf16>,
    %c0_78 = arith.constant 0 : index
    %c120_79 = arith.constant 120 : index
    %134 = vector.load %arg11[%c0_78, %c120_79] : memref<64x768xf32, #tpu.memory_space<vmem>>, vector<32x512xf32>
    %c10_80 = arith.constant 10 : index
    %c0_81 = arith.constant 0 : index
    %135 = vector.load %arg2[%c10_80, %c0_81] : memref<32x512xf32, #tpu.memory_space<vmem>>, vector<1x512xf32>
    %136 = vector.broadcast %135 : vector<1x512xf32> to vector<32x512xf32>
    %137 = arith.mulf %134, %136 : vector<32x512xf32>
    %138 = arith.truncf %137 : vector<32x512xf32> to vector<32x512xbf16>
    %c32_82 = arith.constant 32 : index
    %c0_83 = arith.constant 0 : index
    %139 = vector.load %arg10[%c32_82, %c0_83] : memref<576x512xbf16, #tpu.memory_space<vmem>>, vector<32x512xbf16>
    tpu.vector_store %arg10[%c32_82, %c0_83], %138 {strides = array<i32>} : memref<576x512xbf16, #tpu.memory_space<vmem>>, vector<32x512xbf16>,
    %c0_84 = arith.constant 0 : index
    %c121 = arith.constant 121 : index
    %140 = vector.load %arg11[%c0_84, %c121] : memref<64x768xf32, #tpu.memory_space<vmem>>, vector<32x512xf32>
    %c11 = arith.constant 11 : index
    %c0_85 = arith.constant 0 : index
    %141 = vector.load %arg2[%c11, %c0_85] : memref<32x512xf32, #tpu.memory_space<vmem>>, vector<1x512xf32>
    %142 = vector.broadcast %141 : vector<1x512xf32> to vector<32x512xf32>
    %143 = arith.mulf %140, %142 : vector<32x512xf32>
    %144 = arith.truncf %143 : vector<32x512xf32> to vector<32x512xbf16>
    %c64_86 = arith.constant 64 : index
    %c0_87 = arith.constant 0 : index
    %145 = vector.load %arg10[%c64_86, %c0_87] : memref<576x512xbf16, #tpu.memory_space<vmem>>, vector<32x512xbf16>
    tpu.vector_store %arg10[%c64_86, %c0_87], %144 {strides = array<i32>} : memref<576x512xbf16, #tpu.memory_space<vmem>>, vector<32x512xbf16>,
    %c0_88 = arith.constant 0 : index
    %c127_89 = arith.constant 127 : index
    %146 = vector.load %arg11[%c0_88, %c127_89] : memref<64x768xf32, #tpu.memory_space<vmem>>, vector<32x512xf32>
    %c12_90 = arith.constant 12 : index
    %c0_91 = arith.constant 0 : index
    %147 = vector.load %arg2[%c12_90, %c0_91] : memref<32x512xf32, #tpu.memory_space<vmem>>, vector<1x512xf32>
    %148 = vector.broadcast %147 : vector<1x512xf32> to vector<32x512xf32>
    %149 = arith.mulf %146, %148 : vector<32x512xf32>
    %150 = arith.truncf %149 : vector<32x512xf32> to vector<32x512xbf16>
    %c96_92 = arith.constant 96 : index
    %c0_93 = arith.constant 0 : index
    %151 = vector.load %arg10[%c96_92, %c0_93] : memref<576x512xbf16, #tpu.memory_space<vmem>>, vector<32x512xbf16>
    tpu.vector_store %arg10[%c96_92, %c0_93], %150 {strides = array<i32>} : memref<576x512xbf16, #tpu.memory_space<vmem>>, vector<32x512xbf16>,
    %c0_94 = arith.constant 0 : index
    %c128_95 = arith.constant 128 : index
    %152 = vector.load %arg11[%c0_94, %c128_95] : memref<64x768xf32, #tpu.memory_space<vmem>>, vector<32x512xf32>
    %153 = arith.truncf %152 : vector<32x512xf32> to vector<32x512xbf16>
    %c128_96 = arith.constant 128 : index
    %c0_97 = arith.constant 0 : index
    %154 = vector.load %arg10[%c128_96, %c0_97] : memref<576x512xbf16, #tpu.memory_space<vmem>>, vector<32x512xbf16>
    tpu.vector_store %arg10[%c128_96, %c0_97], %153 {strides = array<i32>} : memref<576x512xbf16, #tpu.memory_space<vmem>>, vector<32x512xbf16>,
    %c0_98 = arith.constant 0 : index
    %c129_99 = arith.constant 129 : index
    %155 = vector.load %arg11[%c0_98, %c129_99] : memref<64x768xf32, #tpu.memory_space<vmem>>, vector<32x512xf32>
    %c14_100 = arith.constant 14 : index
    %c0_101 = arith.constant 0 : index
    %156 = vector.load %arg2[%c14_100, %c0_101] : memref<32x512xf32, #tpu.memory_space<vmem>>, vector<1x512xf32>
    %157 = vector.broadcast %156 : vector<1x512xf32> to vector<32x512xf32>
    %158 = arith.mulf %155, %157 : vector<32x512xf32>
    %159 = arith.truncf %158 : vector<32x512xf32> to vector<32x512xbf16>
    %c160_102 = arith.constant 160 : index
    %c0_103 = arith.constant 0 : index
    %160 = vector.load %arg10[%c160_102, %c0_103] : memref<576x512xbf16, #tpu.memory_space<vmem>>, vector<32x512xbf16>
    tpu.vector_store %arg10[%c160_102, %c0_103], %159 {strides = array<i32>} : memref<576x512xbf16, #tpu.memory_space<vmem>>, vector<32x512xbf16>,
    %c0_104 = arith.constant 0 : index
    %c135 = arith.constant 135 : index
    %161 = vector.load %arg11[%c0_104, %c135] : memref<64x768xf32, #tpu.memory_space<vmem>>, vector<32x512xf32>
    %c15 = arith.constant 15 : index
    %c0_105 = arith.constant 0 : index
    %162 = vector.load %arg2[%c15, %c0_105] : memref<32x512xf32, #tpu.memory_space<vmem>>, vector<1x512xf32>
    %163 = vector.broadcast %162 : vector<1x512xf32> to vector<32x512xf32>
    %164 = arith.mulf %161, %163 : vector<32x512xf32>
    %165 = arith.truncf %164 : vector<32x512xf32> to vector<32x512xbf16>
    %c192_106 = arith.constant 192 : index
    %c0_107 = arith.constant 0 : index
    %166 = vector.load %arg10[%c192_106, %c0_107] : memref<576x512xbf16, #tpu.memory_space<vmem>>, vector<32x512xbf16>
    tpu.vector_store %arg10[%c192_106, %c0_107], %165 {strides = array<i32>} : memref<576x512xbf16, #tpu.memory_space<vmem>>, vector<32x512xbf16>,
    %c0_108 = arith.constant 0 : index
    %c136_109 = arith.constant 136 : index
    %167 = vector.load %arg11[%c0_108, %c136_109] : memref<64x768xf32, #tpu.memory_space<vmem>>, vector<32x512xf32>
    %c16_110 = arith.constant 16 : index
    %c0_111 = arith.constant 0 : index
    %168 = vector.load %arg2[%c16_110, %c0_111] : memref<32x512xf32, #tpu.memory_space<vmem>>, vector<1x512xf32>
    %169 = vector.broadcast %168 : vector<1x512xf32> to vector<32x512xf32>
    %170 = arith.mulf %167, %169 : vector<32x512xf32>
    %171 = arith.truncf %170 : vector<32x512xf32> to vector<32x512xbf16>
    %c224_112 = arith.constant 224 : index
    %c0_113 = arith.constant 0 : index
    %172 = vector.load %arg10[%c224_112, %c0_113] : memref<576x512xbf16, #tpu.memory_space<vmem>>, vector<32x512xbf16>
    tpu.vector_store %arg10[%c224_112, %c0_113], %171 {strides = array<i32>} : memref<576x512xbf16, #tpu.memory_space<vmem>>, vector<32x512xbf16>,
    %c0_114 = arith.constant 0 : index
    %c137 = arith.constant 137 : index
    %173 = vector.load %arg11[%c0_114, %c137] : memref<64x768xf32, #tpu.memory_space<vmem>>, vector<32x512xf32>
    %c17 = arith.constant 17 : index
    %c0_115 = arith.constant 0 : index
    %174 = vector.load %arg2[%c17, %c0_115] : memref<32x512xf32, #tpu.memory_space<vmem>>, vector<1x512xf32>
    %175 = vector.broadcast %174 : vector<1x512xf32> to vector<32x512xf32>
    %176 = arith.mulf %173, %175 : vector<32x512xf32>
    %177 = arith.truncf %176 : vector<32x512xf32> to vector<32x512xbf16>
    %c256_116 = arith.constant 256 : index
    %c0_117 = arith.constant 0 : index
    %178 = vector.load %arg10[%c256_116, %c0_117] : memref<576x512xbf16, #tpu.memory_space<vmem>>, vector<32x512xbf16>
    tpu.vector_store %arg10[%c256_116, %c0_117], %177 {strides = array<i32>} : memref<576x512xbf16, #tpu.memory_space<vmem>>, vector<32x512xbf16>,
    %c32_118 = arith.constant 32 : index
    %c56_119 = arith.constant 56 : index
    %179 = vector.load %arg11[%c32_118, %c56_119] : memref<64x768xf32, #tpu.memory_space<vmem>>, vector<32x512xf32>
    %c1_120 = arith.constant 1 : index
    %c0_121 = arith.constant 0 : index
    %180 = vector.load %arg2[%c1_120, %c0_121] : memref<32x512xf32, #tpu.memory_space<vmem>>, vector<1x512xf32>
    %181 = vector.broadcast %180 : vector<1x512xf32> to vector<32x512xf32>
    %182 = arith.mulf %179, %181 : vector<32x512xf32>
    %183 = arith.truncf %182 : vector<32x512xf32> to vector<32x512xbf16>
    %c288_122 = arith.constant 288 : index
    %c0_123 = arith.constant 0 : index
    %184 = vector.load %arg10[%c288_122, %c0_123] : memref<576x512xbf16, #tpu.memory_space<vmem>>, vector<32x512xbf16>
    tpu.vector_store %arg10[%c288_122, %c0_123], %183 {strides = array<i32>} : memref<576x512xbf16, #tpu.memory_space<vmem>>, vector<32x512xbf16>,
    %c32_124 = arith.constant 32 : index
    %c64_125 = arith.constant 64 : index
    %185 = vector.load %arg11[%c32_124, %c64_125] : memref<64x768xf32, #tpu.memory_space<vmem>>, vector<32x512xf32>
    %c4_126 = arith.constant 4 : index
    %c0_127 = arith.constant 0 : index
    %186 = vector.load %arg2[%c4_126, %c0_127] : memref<32x512xf32, #tpu.memory_space<vmem>>, vector<1x512xf32>
    %187 = vector.broadcast %186 : vector<1x512xf32> to vector<32x512xf32>
    %188 = arith.mulf %185, %187 : vector<32x512xf32>
    %189 = arith.truncf %188 : vector<32x512xf32> to vector<32x512xbf16>
    %c320_128 = arith.constant 320 : index
    %c0_129 = arith.constant 0 : index
    %190 = vector.load %arg10[%c320_128, %c0_129] : memref<576x512xbf16, #tpu.memory_space<vmem>>, vector<32x512xbf16>
    tpu.vector_store %arg10[%c320_128, %c0_129], %189 {strides = array<i32>} : memref<576x512xbf16, #tpu.memory_space<vmem>>, vector<32x512xbf16>,
    %c32_130 = arith.constant 32 : index
    %c72_131 = arith.constant 72 : index
    %191 = vector.load %arg11[%c32_130, %c72_131] : memref<64x768xf32, #tpu.memory_space<vmem>>, vector<32x512xf32>
    %c7_132 = arith.constant 7 : index
    %c0_133 = arith.constant 0 : index
    %192 = vector.load %arg2[%c7_132, %c0_133] : memref<32x512xf32, #tpu.memory_space<vmem>>, vector<1x512xf32>
    %193 = vector.broadcast %192 : vector<1x512xf32> to vector<32x512xf32>
    %194 = arith.mulf %191, %193 : vector<32x512xf32>
    %195 = arith.truncf %194 : vector<32x512xf32> to vector<32x512xbf16>
    %c352_134 = arith.constant 352 : index
    %c0_135 = arith.constant 0 : index
    %196 = vector.load %arg10[%c352_134, %c0_135] : memref<576x512xbf16, #tpu.memory_space<vmem>>, vector<32x512xbf16>
    tpu.vector_store %arg10[%c352_134, %c0_135], %195 {strides = array<i32>} : memref<576x512xbf16, #tpu.memory_space<vmem>>, vector<32x512xbf16>,
    %c32_136 = arith.constant 32 : index
    %c120_137 = arith.constant 120 : index
    %197 = vector.load %arg11[%c32_136, %c120_137] : memref<64x768xf32, #tpu.memory_space<vmem>>, vector<32x512xf32>
    %c10_138 = arith.constant 10 : index
    %c0_139 = arith.constant 0 : index
    %198 = vector.load %arg2[%c10_138, %c0_139] : memref<32x512xf32, #tpu.memory_space<vmem>>, vector<1x512xf32>
    %199 = vector.broadcast %198 : vector<1x512xf32> to vector<32x512xf32>
    %200 = arith.mulf %197, %199 : vector<32x512xf32>
    %201 = arith.truncf %200 : vector<32x512xf32> to vector<32x512xbf16>
    %c384_140 = arith.constant 384 : index
    %c0_141 = arith.constant 0 : index
    %202 = vector.load %arg10[%c384_140, %c0_141] : memref<576x512xbf16, #tpu.memory_space<vmem>>, vector<32x512xbf16>
    tpu.vector_store %arg10[%c384_140, %c0_141], %201 {strides = array<i32>} : memref<576x512xbf16, #tpu.memory_space<vmem>>, vector<32x512xbf16>,
    %c32_142 = arith.constant 32 : index
    %c128_143 = arith.constant 128 : index
    %203 = vector.load %arg11[%c32_142, %c128_143] : memref<64x768xf32, #tpu.memory_space<vmem>>, vector<32x512xf32>
    %204 = arith.truncf %203 : vector<32x512xf32> to vector<32x512xbf16>
    %c416_144 = arith.constant 416 : index
    %c0_145 = arith.constant 0 : index
    %205 = vector.load %arg10[%c416_144, %c0_145] : memref<576x512xbf16, #tpu.memory_space<vmem>>, vector<32x512xbf16>
    tpu.vector_store %arg10[%c416_144, %c0_145], %204 {strides = array<i32>} : memref<576x512xbf16, #tpu.memory_space<vmem>>, vector<32x512xbf16>,
    %c32_146 = arith.constant 32 : index
    %c136_147 = arith.constant 136 : index
    %206 = vector.load %arg11[%c32_146, %c136_147] : memref<64x768xf32, #tpu.memory_space<vmem>>, vector<32x512xf32>
    %c16_148 = arith.constant 16 : index
    %c0_149 = arith.constant 0 : index
    %207 = vector.load %arg2[%c16_148, %c0_149] : memref<32x512xf32, #tpu.memory_space<vmem>>, vector<1x512xf32>
    %208 = vector.broadcast %207 : vector<1x512xf32> to vector<32x512xf32>
    %209 = arith.mulf %206, %208 : vector<32x512xf32>
    %210 = arith.truncf %209 : vector<32x512xf32> to vector<32x512xbf16>
    %c448_150 = arith.constant 448 : index
    %c0_151 = arith.constant 0 : index
    %211 = vector.load %arg10[%c448_150, %c0_151] : memref<576x512xbf16, #tpu.memory_space<vmem>>, vector<32x512xbf16>
    tpu.vector_store %arg10[%c448_150, %c0_151], %210 {strides = array<i32>} : memref<576x512xbf16, #tpu.memory_space<vmem>>, vector<32x512xbf16>,
    %c32_152 = arith.constant 32 : index
    %c184_153 = arith.constant 184 : index
    %212 = vector.load %arg11[%c32_152, %c184_153] : memref<64x768xf32, #tpu.memory_space<vmem>>, vector<32x512xf32>
    %c19_154 = arith.constant 19 : index
    %c0_155 = arith.constant 0 : index
    %213 = vector.load %arg2[%c19_154, %c0_155] : memref<32x512xf32, #tpu.memory_space<vmem>>, vector<1x512xf32>
    %214 = vector.broadcast %213 : vector<1x512xf32> to vector<32x512xf32>
    %215 = arith.mulf %212, %214 : vector<32x512xf32>
    %216 = arith.truncf %215 : vector<32x512xf32> to vector<32x512xbf16>
    %c480 = arith.constant 480 : index
    %c0_156 = arith.constant 0 : index
    %217 = vector.load %arg10[%c480, %c0_156] : memref<576x512xbf16, #tpu.memory_space<vmem>>, vector<32x512xbf16>
    tpu.vector_store %arg10[%c480, %c0_156], %216 {strides = array<i32>} : memref<576x512xbf16, #tpu.memory_space<vmem>>, vector<32x512xbf16>,
    %c32_157 = arith.constant 32 : index
    %c192_158 = arith.constant 192 : index
    %218 = vector.load %arg11[%c32_157, %c192_158] : memref<64x768xf32, #tpu.memory_space<vmem>>, vector<32x512xf32>
    %c22_159 = arith.constant 22 : index
    %c0_160 = arith.constant 0 : index
    %219 = vector.load %arg2[%c22_159, %c0_160] : memref<32x512xf32, #tpu.memory_space<vmem>>, vector<1x512xf32>
    %220 = vector.broadcast %219 : vector<1x512xf32> to vector<32x512xf32>
    %221 = arith.mulf %218, %220 : vector<32x512xf32>
    %222 = arith.truncf %221 : vector<32x512xf32> to vector<32x512xbf16>
    %c512 = arith.constant 512 : index
    %c0_161 = arith.constant 0 : index
    %223 = vector.load %arg10[%c512, %c0_161] : memref<576x512xbf16, #tpu.memory_space<vmem>>, vector<32x512xbf16>
    tpu.vector_store %arg10[%c512, %c0_161], %222 {strides = array<i32>} : memref<576x512xbf16, #tpu.memory_space<vmem>>, vector<32x512xbf16>,
    %c32_162 = arith.constant 32 : index
    %c200_163 = arith.constant 200 : index
    %224 = vector.load %arg11[%c32_162, %c200_163] : memref<64x768xf32, #tpu.memory_space<vmem>>, vector<32x512xf32>
    %c25_164 = arith.constant 25 : index
    %c0_165 = arith.constant 0 : index
    %225 = vector.load %arg2[%c25_164, %c0_165] : memref<32x512xf32, #tpu.memory_space<vmem>>, vector<1x512xf32>
    %226 = vector.broadcast %225 : vector<1x512xf32> to vector<32x512xf32>
    %227 = arith.mulf %224, %226 : vector<32x512xf32>
    %228 = arith.truncf %227 : vector<32x512xf32> to vector<32x512xbf16>
    %c544 = arith.constant 544 : index
    %c0_166 = arith.constant 0 : index
    %229 = vector.load %arg10[%c544, %c0_166] : memref<576x512xbf16, #tpu.memory_space<vmem>>, vector<32x512xbf16>
    tpu.vector_store %arg10[%c544, %c0_166], %228 {strides = array<i32>} : memref<576x512xbf16, #tpu.memory_space<vmem>>, vector<32x512xbf16>,
    %c0_167 = arith.constant 0 : index
    %c0_168 = arith.constant 0 : index
    %230 = vector.load %arg4[%c0_167, %c0_168] : memref<64x576xbf16, #tpu.memory_space<vmem>>, vector<64x576xbf16>
    %c0_169 = arith.constant 0 : index
    %c0_170 = arith.constant 0 : index
    %231 = vector.load %arg10[%c0_169, %c0_170] : memref<576x512xbf16, #tpu.memory_space<vmem>>, vector<576x512xbf16>
    %cst_171 = arith.constant dense<0.000000e+00> : vector<64x512xf32>
    %232 = tpu.matmul %230, %231, %cst_171 {dimension_numbers = #tpu.dot_dimension_numbers<[1], [0], [0], [1], [0, 0, 1, 1], [], []>} : vector<64x576xbf16>, vector<576x512xbf16>, vector<64x512xf32> -> vector<64x512xf32>
    %cst_172 = arith.constant dense<0.000000e+00> : vector<64xf32>
    %233 = vector.multi_reduction <add>, %232, %cst_172 [1] : vector<64x512xf32> to vector<64xf32>
    %234 = vector.shape_cast %233 : vector<64xf32> to vector<64x1xf32>
    %cst_173 = arith.constant 0.001953125 : f32
    %235 = vector.broadcast %cst_173 : f32 to vector<64x1xf32>
    %236 = arith.mulf %234, %235 : vector<64x1xf32>
    %237 = arith.mulf %232, %232 : vector<64x512xf32>
    %cst_174 = arith.constant dense<0.000000e+00> : vector<64xf32>
    %238 = vector.multi_reduction <add>, %237, %cst_174 [1] : vector<64x512xf32> to vector<64xf32>
    %239 = vector.shape_cast %238 : vector<64xf32> to vector<64x1xf32>
    %cst_175 = arith.constant 0.001953125 : f32
    %240 = vector.broadcast %cst_175 : f32 to vector<64x1xf32>
    %241 = arith.mulf %239, %240 : vector<64x1xf32>
    %242 = arith.mulf %236, %236 : vector<64x1xf32>
    %243 = arith.subf %241, %242 : vector<64x1xf32>
    %cst_176 = arith.constant 0.000000e+00 : f32
    %244 = vector.broadcast %cst_176 : f32 to vector<64x1xf32>
    %245 = arith.maximumf %243, %244 : vector<64x1xf32>
    %246 = vector.broadcast %236 : vector<64x1xf32> to vector<64x512xf32>
    %247 = arith.subf %232, %246 : vector<64x512xf32>
    %cst_177 = arith.constant 9.99999974E-6 : f32
    %248 = vector.broadcast %cst_177 : f32 to vector<64x1xf32>
    %249 = arith.addf %245, %248 : vector<64x1xf32>
    %250 = math.rsqrt %249 : vector<64x1xf32>
    %251 = vector.broadcast %250 : vector<64x1xf32> to vector<64x512xf32>
    %252 = arith.mulf %247, %251 : vector<64x512xf32>
    %c0_178 = arith.constant 0 : index
    %c0_179 = arith.constant 0 : index
    %253 = vector.load %arg7[%c0_178, %c0_179] : memref<64x1xf32, #tpu.memory_space<vmem>>, vector<64x1xf32>
    %254 = vector.broadcast %253 : vector<64x1xf32> to vector<64x512xf32>
    %255 = arith.mulf %252, %254 : vector<64x512xf32>
    %c0_180 = arith.constant 0 : index
    %c0_181 = arith.constant 0 : index
    %256 = vector.load %arg8[%c0_180, %c0_181] : memref<64x1xf32, #tpu.memory_space<vmem>>, vector<64x1xf32>
    %257 = vector.broadcast %256 : vector<64x1xf32> to vector<64x512xf32>
    %258 = arith.addf %255, %257 : vector<64x512xf32>
    %259 = vector.extract_strided_slice %258 {offsets = [0, 0], sizes = [32, 512], strides = [1, 1]} : vector<64x512xf32> to vector<32x512xf32>
    %260 = vector.extract_strided_slice %258 {offsets = [32, 0], sizes = [32, 512], strides = [1, 1]} : vector<64x512xf32> to vector<32x512xf32>
    %261 = arith.addf %259, %260 : vector<32x512xf32>
    %c0_182 = arith.constant 0 : index
    %c0_183 = arith.constant 0 : index
    %c0_184 = arith.constant 0 : index
    %262 = vector.load %arg9[%c0_182, %c0_183, %c0_184] : memref<1x32x512xf32, #tpu.memory_space<vmem>>, vector<1x32x512xf32>
    %263 = vector.shape_cast %262 : vector<1x32x512xf32> to vector<32x512xf32>
    %264 = vector.shape_cast %261 : vector<32x512xf32> to vector<1x32x512xf32>
    tpu.vector_store %arg9[%c0_182, %c0_183, %c0_184], %264 {strides = array<i32>} : memref<1x32x512xf32, #tpu.memory_space<vmem>>, vector<1x32x512xf32>,
    return
  }
  func.func @transform_0(%arg0: i32) -> (i32, i32, i32) {
    %c0_i32 = arith.constant 0 : i32
    %c0_i32_0 = arith.constant 0 : i32
    %c0_i32_1 = arith.constant 0 : i32
    return %arg0, %c0_i32, %c0_i32_0 : i32, i32, i32
  }
  func.func @transform_1(%arg0: i32) -> (i32, i32) {
    %c0_i32 = arith.constant 0 : i32
    %c0_i32_0 = arith.constant 0 : i32
    %c0_i32_1 = arith.constant 0 : i32
    return %c0_i32, %c0_i32_0 : i32, i32
  }
  func.func @transform_2(%arg0: i32) -> (i32, i32) {
    %c0_i32 = arith.constant 0 : i32
    %c0_i32_0 = arith.constant 0 : i32
    %c0_i32_1 = arith.constant 0 : i32
    return %c0_i32, %c0_i32_0 : i32, i32
  }
  func.func @transform_3(%arg0: i32) -> (i32, i32) {
    %c0_i32 = arith.constant 0 : i32
    %c0_i32_0 = arith.constant 0 : i32
    %c0_i32_1 = arith.constant 0 : i32
    return %c0_i32, %c0_i32_0 : i32, i32
  }
  func.func @transform_4(%arg0: i32) -> (i32, i32) {
    %c0_i32 = arith.constant 0 : i32
    %c0_i32_0 = arith.constant 0 : i32
    %c0_i32_1 = arith.constant 0 : i32
    return %c0_i32, %c0_i32_0 : i32, i32
  }
  func.func @transform_5(%arg0: i32) -> (i32, i32) {
    %c0_i32 = arith.constant 0 : i32
    %c0_i32_0 = arith.constant 0 : i32
    %c0_i32_1 = arith.constant 0 : i32
    return %c0_i32, %c0_i32_0 : i32, i32
  }
  func.func @transform_6(%arg0: i32) -> (i32, i32) {
    %c0_i32 = arith.constant 0 : i32
    %c0_i32_0 = arith.constant 0 : i32
    %c0_i32_1 = arith.constant 0 : i32
    return %c0_i32, %c0_i32_0 : i32, i32
  }
  func.func @transform_7(%arg0: i32) -> (i32, i32) {
    %c0_i32 = arith.constant 0 : i32
    %c0_i32_0 = arith.constant 0 : i32
    %c0_i32_1 = arith.constant 0 : i32
    return %c0_i32, %c0_i32_0 : i32, i32
  }
  func.func @transform_8(%arg0: i32) -> (i32, i32, i32) {
    %c0_i32 = arith.constant 0 : i32
    %c0_i32_0 = arith.constant 0 : i32
    %c0_i32_1 = arith.constant 0 : i32
    return %arg0, %c0_i32, %c0_i32_0 : i32, i32, i32
  }
}

</mosaic_0001>

<bundles_post_ra>
// kernel: res_context_block.1
= control target key start
LH: loop header
LB: loop body
LE: loop exit
PB: predicated region body
PF: predicated region fallthrough
CT: control target
= control target key end

     0   :  { %s10868_s27 = smov 0   ;;  %s15530_s0 = inlined_call_operand.vmem [shape: f32[2,32,512], index: 0, kind: input, shape index: {}]   ;;  %s15531_s1 = inlined_call_operand.vmem [shape: f32[32,512], index: 1, kind: input, shape index: {}]   ;;  %s15532_s2 = inlined_call_operand.vmem [shape: bf16[64,480], index: 2, kind: input, shape index: {}]   ;;  %s15533_s3 = inlined_call_operand.vmem [shape: bf16[64,576], index: 3, kind: input, shape index: {}]   ;;  %s15534_s4 = inlined_call_operand.vmem [shape: f32[64,1], index: 4, kind: input, shape index: {}]   ;;  %s15535_s5 = inlined_call_operand.vmem [shape: f32[64,1], index: 5, kind: input, shape index: {}]   ;;  %s15536_s6 = inlined_call_operand.vmem [shape: f32[64,1], index: 6, kind: input, shape index: {}]   ;;  %s15537_s7 = inlined_call_operand.vmem [shape: f32[64,1], index: 7, kind: input, shape index: {}]   ;;  %s15538_s8 = inlined_call_operand.vmem [shape: f32[2,32,512], index: 8, kind: output, shape index: {}]  }
   0x1 LB: > { %s9128_s28 = sadd.s32 4294967295, %s10807_s27   ;;  %p9132_p0 = scmp.ge.s32.totalorder %s10807_s27, 1  ;;  %s10807_s27 = sphi %s10868_s27, %s18_s27  }
   0x2   : > { %p262_p1 = scmp.lt.s32.totalorder %s10807_s27, 3 }
   0x4   : > { %p263_p2 = pnand %p9132_p0, %p262_p1 }
   0x6   : > { %266 = sbr.rel (%p263_p2) target bundleno = 4390 (0x1126), region = 52 }
   0xb   : > { %v9138_v0 = vld [vmem:[%s15531_s1 + $0x3] ss:$8 sm:$0xf]  ;;  %v9137_v2 = vld [vmem:[%s15531_s1 + $0x1] ss:$8 sm:$0xf] }
   0xc   : > { %v537_v1 = vperm.slane %v9138_v0, 1  ;;  %v380_v3 = vperm.slane %v9137_v2, 2  ;;  %v378_v4 = vperm.slane %v9137_v2, 0  ;;  %s10809_s11 = smov 63   ;;  %s10810_s12 = smov 56   ;;  %v381_v7 = vperm.slane %v9137_v2, 3 }
   0xd   : > { %v9139_v5 = vld [vmem:[%s15531_s1 + $0x4] ss:$8 sm:$0xf]  ;;  %v379_v8 = vperm.slane %v9137_v2, 1  ;;  %s10811_s15 = smov 64   ;;  %v536_v10 = vperm.slane %v9138_v0, 0 }
   0xe   : > { %542 = vrot.lane.b32.xlu2 %v537_v1, %s10809_s11  ;;  %386 = vrot.lane.b32.xlu1 %v380_v3, %s10810_s12  ;;  %v693_v6 = vperm.slane %v9139_v5, 0  ;;  %v696_v9 = vperm.slane %v9139_v5, 3  ;;  %v538_v11 = vperm.slane %v9138_v0, 2  ;;  %v539_v12 = vperm.slane %v9138_v0, 3  ;;  %p296_p3 = scmp.lt.s32.totalorder %s9128_s28, 1  ;;  %s10812_s20 = smov 72  }
   0xf   : > { %382 = vrot.lane.b32.xlu0 %v378_v4, %s10810_s12  ;;  %v694_v13 = vperm.slane %v9139_v5, 1  ;;  %v695_v14 = vperm.slane %v9139_v5, 2  ;;  %vm390_vm0 = vcmask 457728   ;;  %s10813_s21 = smov 65   ;;  %vm548_vm1 = vcmask 515072   ;;  %s10814_s30 = smov 120  }
  0x10   : > { %s15874_s28 = smov (!%p296_p3, %s9128_s28), 1  ;;  %vm15543_vm2 = vcmask 523264   ;;  %vm479_vm3 = vcmask 1043456   ;;  %vm15544_vm4 = vcmask 588800   ;;  %vm638_vm5 = vcmask 531456   ;;  %s10815_s9 = smov 8  }
  0x11   : > { %s10401_s16 = sshll.u32 %s15874_s28, 7  ;;  %vm1176_vm6 = vcmask 982016   ;;  %s10816_s14 = smov 127   ;;  %vm1266_vm7 = vcmask 64512   ;;  %vm1333_vm8 = vcmask 1039360   ;;  %vm1423_vm9 = vcmask 7168  }
  0x12   : > { %s10913_s19 = scalar_lea.vmem %s15530_s0, %s10401_s16  ;;  %s10817_s17 = smov 1   ;;  %vm3388_vm10 = vcmask 785408  }
  0x13   : > { %v10916_v17 = vld [vmem:[%s10913_s19 + $0x18] sm:$0xff]  ;;  %v10949_v40 = vld [vmem:[%s10913_s19] sm:$0xff]  ;;  %v10962_v50 = vld [vmem:[%s10913_s19 + $0x8] sm:$0xff]  ;;  %s10819_s13 = smov 119   ;;  %s10820_s10 = smov 9  }
  0x14   : > { %v10923_v20 = vld [vmem:[%s10913_s19 + $0x38] sm:$0xff]  ;;  %v10965_v51 = vld [vmem:[%s10913_s19 + $0x10] sm:$0xff]  ;;  %v10976_v61 = vld [vmem:[%s10913_s19 + $0x28] sm:$0xff]  ;;  %s10821_s23 = smov 121   ;;  %s10822_s24 = smov 7  }
  0x15   : > { %v10929_v25 = vld [vmem:[%s10913_s19 + $0x58] sm:$0xff]  ;;  %v10979_v62 = vld [vmem:[%s10913_s19 + $0x30] sm:$0xff] }
  0x16   : > { %697 = vrot.lane.b32.xlu2 %v693_v6, %s10811_s15  ;;  %388 = vrot.lane.b32.xlu1 %v381_v7, %s10810_s12  ;;  %v10936_v32 = vld [vmem:[%s10913_s19 + $0x78] sm:$0xff] }
  0x17   : > { %384 = vrot.lane.b32.xlu0 %v379_v8, %s10810_s12 }
  0x1e   : > { %703 = vrot.lane.b32.xlu2 %v696_v9, %s10811_s15  ;;  %540 = vrot.lane.b32.xlu1 %v536_v10, %s10809_s11  ;;  %v10993_v9 = vld [vmem:[%s10913_s19 + $0x48] sm:$0xff]  ;;  %v10996_v10 = vld [vmem:[%s10913_s19 + $0x50] sm:$0xff] }
  0x1f   : > { %544 = vrot.lane.b32.xlu0 %v538_v11, %s10809_s11 }
  0x26   : > { %546 = vrot.lane.b32.xlu1 %v539_v12, %s10809_s11 }
  0x27   : > { %699 = vrot.lane.b32.xlu0 %v694_v13, %s10811_s15 }
  0x2e   : > { %701 = vrot.lane.b32.xlu1 %v695_v14, %s10811_s15 }
  0x68   : > { %v10897_v15 = vpop.permute.xlu2 %542 }
  0x70   : > { %v10905_v16 = vpop.permute.xlu2 %697 }
  0x78   : > { %v10918_v18 = vpop.permute.xlu2 %703 }
  0x79   : > { %v718_v19 = vmul.f32 %v10918_v18, %v10916_v17  ;;  %v723_v22 = vmul.f32 %v10918_v18, %v10923_v20  ;;  %v728_v26 = vmul.f32 %v10918_v18, %v10929_v25  ;;  %v733_v33 = vmul.f32 %v10918_v18, %v10936_v32 }
  0x7b   : > { %v736_v21 = vpack.c.bf16 %v718_v19, %v718_v19  ;;  %v739_v24 = vpack.c.bf16 %v723_v22, %v723_v22  ;;  %v742_v29 = vpack.c.bf16 %v728_v26, %v728_v26  ;;  %v745_v37 = vpack.c.bf16 %v733_v33, %v733_v33  ;;  %v11010_v26 = vld [vmem:[%s10913_s19 + $0x70] sm:$0xff] }
  0x7d   : > { %762 = vrot.lane.b32.xlu2 %v736_v21, %s10811_s15 }
  0x80   : > { %v387_v23 = vpop.permute.xlu1 %386 }
  0x81   : > { %v383_v27 = vpop.permute.xlu0 %382 }
  0x82   : > { %v10951_v41 = vmul.f32 0.0, %v383_v27 }
  0x85   : > { %768 = vrot.lane.b32.xlu2 %v739_v24, %s10811_s15  ;;  %v11007_v24 = vld [vmem:[%s10913_s19 + $0x68] sm:$0xff] }
  0x88   : > { %v389_v28 = vpop.permute.xlu1 %388 }
  0x89   : > { %v403_v30 = vmul.f32 %v389_v28, %v10916_v17  ;;  %v408_v34 = vmul.f32 %v389_v28, %v10923_v20  ;;  %v385_v35 = vpop.permute.xlu0 %384  ;;  %v413_v43 = vmul.f32 %v389_v28, %v10929_v25  ;;  %v393_v52 = vsel %vm390_vm0, %v387_v23, %v389_v28 }
  0x8a   : > { %v10946_v38 = vsel %vm390_vm0, %v383_v27, %v385_v35  ;;  %v392_v47 = vsel %vm390_vm0, %v385_v35, %v387_v23  ;;  %v402_v54 = vmul.f32 %v393_v52, %v10965_v51  ;;  %v418_v56 = vmul.f32 %v389_v28, %v10936_v32  ;;  %v11016_v27 = vld [vmem:[%s10913_s19 + $0x20] sm:$0xff] }
  0x8b   : > { %v421_v31 = vpack.c.bf16 %v403_v30, %v403_v30  ;;  %v424_v39 = vpack.c.bf16 %v408_v34, %v408_v34  ;;  %v400_v42 = vmul.f32 %v10946_v38, %v10949_v40  ;;  %v427_v49 = vpack.c.bf16 %v413_v43, %v413_v43  ;;  %v11033_v43 = vld [vmem:[%s10913_s19 + $0x40] sm:$0xff] }
  0x8c   : > { %v401_v53 = vmul.f32 %v392_v47, %v10962_v50  ;;  %v430_v60 = vpack.c.bf16 %v418_v56, %v418_v56  ;;  %v406_v1 = vmul.f32 %v392_v47, %v10976_v61  ;;  %v407_v2 = vmul.f32 %v393_v52, %v10979_v62 }
  0x8d   : > { %774 = vrot.lane.b32.xlu2 %v742_v29, %s10811_s15  ;;  %447 = vrot.lane.b32.xlu0 %v421_v31, %s10812_s20  ;;  %v419_v45 = vpack.c.bf16 %v400_v42, %v10951_v41  ;;  %v411_v11 = vmul.f32 %v392_v47, %v10993_v9  ;;  %v412_v12 = vmul.f32 %v393_v52, %v10996_v10 }
  0x8e   : > { %v420_v58 = vpack.c.bf16 %v402_v54, %v401_v53  ;;  %v423_v6 = vpack.c.bf16 %v407_v2, %v406_v1  ;;  %v416_v28 = vmul.f32 %v392_v47, %v11007_v24  ;;  %v417_v29 = vmul.f32 %v393_v52, %v11010_v26  ;;  %v11047_v53 = vld [vmem:[%s10913_s19 + $0x60] sm:$0xff] }
  0x8f   : > { %v426_v21 = vpack.c.bf16 %v412_v12, %v411_v11  ;;  %v405_v30 = vmul.f32 %v10946_v38, %v11016_v27  ;;  %v415_v56 = vmul.f32 %v10946_v38, %v11047_v53 }
  0x90   : > { %v10943_v36 = vpop.permute.xlu1 %540  ;;  %v429_v34 = vpack.c.bf16 %v417_v29, %v416_v28 }
  0x91   : > { %v545_v57 = vpop.permute.xlu0 %544  ;;  %v549_v35 = vsel %vm548_vm1, %v10943_v36, %v10897_v15  ;;  %v557_v42 = vmul.f32 0.0, %v10943_v36 }
  0x92   : > { %v550_v63 = vsel %vm548_vm1, %v10897_v15, %v545_v57  ;;  %v563_v54 = vmul.f32 %v549_v35, %v11016_v27 }
  0x93   : > { %v559_v4 = vmul.f32 %v550_v63, %v10962_v50  ;;  %v564_v14 = vmul.f32 %v550_v63, %v10976_v61  ;;  %v569_v31 = vmul.f32 %v550_v63, %v10993_v9  ;;  %v574_v15 = vmul.f32 %v550_v63, %v11007_v24 }
  0x95   : > { %780 = vrot.lane.b32.xlu2 %v745_v37, %s10811_s15  ;;  %453 = vrot.lane.b32.xlu0 %v424_v39, %s10812_s20  ;;  %v422_v37 = vpack.c.bf16 %v405_v30, %v10951_v41 }
  0x98   : > { %v547_v44 = vpop.permute.xlu1 %546 }
  0x99   : > { %v561_v46 = vmul.f32 %v547_v44, %v10916_v17  ;;  %v566_v55 = vmul.f32 %v547_v44, %v10923_v20  ;;  %v551_v0 = vsel %vm548_vm1, %v545_v57, %v547_v44  ;;  %v571_v3 = vmul.f32 %v547_v44, %v10929_v25  ;;  %v700_v47 = vpop.permute.xlu0 %699 }
  0x9a   : > { %v560_v5 = vmul.f32 %v551_v0, %v10965_v51  ;;  %v576_v13 = vmul.f32 %v547_v44, %v10936_v32  ;;  %v565_v19 = vmul.f32 %v551_v0, %v10979_v62  ;;  %v570_v33 = vmul.f32 %v551_v0, %v10996_v10 }
  0x9b   : > { %v579_v48 = vpack.c.bf16 %v561_v46, %v561_v46  ;;  %v582_v59 = vpack.c.bf16 %v566_v55, %v566_v55  ;;  %v585_v7 = vpack.c.bf16 %v571_v3, %v571_v3  ;;  %v558_v44 = vmul.f32 %v549_v35, %v10949_v40 }
  0x9c   : > { %v578_v8 = vpack.c.bf16 %v560_v5, %v559_v4  ;;  %v588_v22 = vpack.c.bf16 %v576_v13, %v576_v13  ;;  %v581_v23 = vpack.c.bf16 %v565_v19, %v564_v14  ;;  %v584_v39 = vpack.c.bf16 %v570_v33, %v569_v31  ;;  %v9140_v31 = vld [vmem:[%s15531_s1 + $0x5] ss:$8 sm:$0xf] }
  0x9d   : > { %443 = vrot.lane.b32.xlu2 %v419_v45, %s10812_s20  ;;  %605 = vrot.lane.b32.xlu1 %v579_v48, %s10813_s21  ;;  %v410_v45 = vmul.f32 %v10946_v38, %v11033_v43  ;;  %v575_v46 = vmul.f32 %v551_v0, %v11010_v26  ;;  %v577_v48 = vpack.c.bf16 %v558_v44, %v557_v42  ;;  %v714_v55 = vmul.f32 0.0, %v10905_v16 }
  0x9e   : > { %459 = vrot.lane.b32.xlu0 %v427_v49, %s10812_s20  ;;  %v706_v36 = vsel %vm15543_vm2, %v10905_v16, %v700_v47  ;;  %v568_v16 = vmul.f32 %v549_v35, %v11033_v43  ;;  %v851_v44 = vperm.slane %v9140_v31, 1 }
  0x9f   : > { %v425_v49 = vpack.c.bf16 %v410_v45, %v10951_v41  ;;  %v587_v52 = vpack.c.bf16 %v575_v46, %v574_v15  ;;  %v715_v57 = vmul.f32 %v706_v36, %v10949_v40  ;;  %v725_v11 = vmul.f32 %v706_v36, %v11033_v43 }
  0xa0   : > { %v583_v3 = vpack.c.bf16 %v568_v16, %v557_v42  ;;  %v853_v45 = vperm.slane %v9140_v31, 3 }
  0xa1   : > { %v734_v63 = vpack.c.bf16 %v715_v57, %v714_v55  ;;  %v740_v14 = vpack.c.bf16 %v725_v11, %v714_v55 }
  0xa5   : > { %445 = vrot.lane.b32.xlu2 %v420_v58, %s10812_s20  ;;  %611 = vrot.lane.b32.xlu1 %v582_v59, %s10813_s21  ;;  %v702_v58 = vpop.permute.xlu1 %701  ;;  %v580_v59 = vpack.c.bf16 %v563_v54, %v557_v42 }
  0xa6   : > { %465 = vrot.lane.b32.xlu0 %v430_v60, %s10812_s20  ;;  %v428_v60 = vpack.c.bf16 %v415_v56, %v10951_v41  ;;  %v707_v0 = vsel %vm15543_vm2, %v700_v47, %v702_v58  ;;  %v708_v1 = vsel %vm15543_vm2, %v702_v58, %v10918_v18  ;;  %v720_v41 = vmul.f32 %v706_v36, %v11016_v27 }
  0xa7   : > { %v716_v38 = vmul.f32 %v707_v0, %v10962_v50  ;;  %v717_v2 = vmul.f32 %v708_v1, %v10965_v51  ;;  %v731_v33 = vmul.f32 %v707_v0, %v11007_v24 }
  0xa8   : > { %v737_v5 = vpack.c.bf16 %v720_v41, %v714_v55 }
  0xa9   : > { %v735_v4 = vpack.c.bf16 %v717_v2, %v716_v38 }
  0xad   : > { %451 = vrot.lane.b32.xlu2 %v423_v6, %s10812_s20  ;;  %617 = vrot.lane.b32.xlu1 %v585_v7, %s10813_s21  ;;  %v573_v6 = vmul.f32 %v549_v35, %v11047_v53  ;;  %v721_v7 = vmul.f32 %v707_v0, %v10976_v61  ;;  %v850_v35 = vperm.slane %v9140_v31, 0 }
  0xae   : > { %603 = vrot.lane.b32.xlu0 %v578_v8, %s10813_s21  ;;  %v722_v8 = vmul.f32 %v708_v1, %v10979_v62 }
  0xaf   : > { %v586_v12 = vpack.c.bf16 %v573_v6, %v557_v42 }
  0xb0   : > { %v738_v13 = vpack.c.bf16 %v722_v8, %v721_v7 }
  0xb5   : > { %457 = vrot.lane.b32.xlu2 %v426_v21, %s10812_s20  ;;  %623 = vrot.lane.b32.xlu1 %v588_v22, %s10813_s21  ;;  %v726_v21 = vmul.f32 %v707_v0, %v10993_v9  ;;  %v727_v22 = vmul.f32 %v708_v1, %v10996_v10 }
  0xb6   : > { %609 = vrot.lane.b32.xlu0 %v581_v23, %s10813_s21  ;;  %v730_v23 = vmul.f32 %v706_v36, %v11047_v53 }
  0xb7   : > { %v741_v28 = vpack.c.bf16 %v727_v22, %v726_v21 }
  0xb8   : > { %v743_v29 = vpack.c.bf16 %v730_v23, %v714_v55 }
  0xbd   : > { %463 = vrot.lane.b32.xlu2 %v429_v34, %s10812_s20  ;;  %449 = vrot.lane.b32.xlu1 %v422_v37, %s10812_s20  ;;  %v732_v34 = vmul.f32 %v708_v1, %v11010_v26 }
  0xbe   : > { %615 = vrot.lane.b32.xlu0 %v584_v39, %s10813_s21  ;;  %v852_v39 = vperm.slane %v9140_v31, 2 }
  0xbf   : > { %v744_v37 = vpack.c.bf16 %v732_v34, %v731_v33 }
  0xc5   : > { %601 = vrot.lane.b32.xlu2 %v577_v48, %s10813_s21  ;;  %455 = vrot.lane.b32.xlu1 %v425_v49, %s10812_s20 }
  0xc6   : > { %621 = vrot.lane.b32.xlu0 %v587_v52, %s10813_s21 }
  0xcd   : > { %607 = vrot.lane.b32.xlu2 %v580_v59, %s10813_s21  ;;  %461 = vrot.lane.b32.xlu1 %v428_v60, %s10812_s20 }
  0xce   : > { %758 = vrot.lane.b32.xlu0 %v734_v63, %s10811_s15 }
  0xd5   : > { %613 = vrot.lane.b32.xlu2 %v583_v3, %s10813_s21  ;;  %760 = vrot.lane.b32.xlu1 %v735_v4, %s10811_s15 }
  0xd6   : > { %764 = vrot.lane.b32.xlu0 %v737_v5, %s10811_s15 }
  0xd7   : > { %v11068_v18 = vpop.permute.xlu2 %762 }
  0xdd   : > { %619 = vrot.lane.b32.xlu2 %v586_v12, %s10813_s21  ;;  %766 = vrot.lane.b32.xlu1 %v738_v13, %s10811_s15 }
  0xde   : > { %770 = vrot.lane.b32.xlu0 %v740_v14, %s10811_s15 }
  0xdf   : > { %v11077_v19 = vpop.permute.xlu2 %768 }
  0xe5   : > { %772 = vrot.lane.b32.xlu1 %v741_v28, %s10811_s15  ;;  %858 = vrot.lane.b32.xlu2 %v852_v39, %s10813_s21 }
  0xe6   : > { %776 = vrot.lane.b32.xlu0 %v743_v29, %s10811_s15 }
  0xe7   : > { %v11084_v30 = vpop.permute.xlu2 %774 }
  0xed   : > { %778 = vrot.lane.b32.xlu1 %v744_v37, %s10811_s15 }
  0xee   : > { %854 = vrot.lane.b32.xlu0 %v850_v35, %s10813_s21 }
  0xef   : > { %v11093_v42 = vpop.permute.xlu2 %780 }
  0xf5   : > { %856 = vrot.lane.b32.xlu1 %v851_v44, %s10813_s21 }
  0xf6   : > { %860 = vrot.lane.b32.xlu0 %v853_v45, %s10813_s21 }
  0xf7   : > { %v444_v15 = vpop.permute.xlu2 %443 }
  0xf8   : > { %v467_v46 = vrot.slane %v444_v15, 4 }
  0xff   : > { %v446_v47 = vpop.permute.xlu2 %445  ;;  %v448_v48 = vpop.permute.xlu0 %447 }
 0x100   : > { %v468_v49 = vrot.slane %v446_v47, 4  ;;  %v469_v52 = vrot.slane %v448_v48, 4 }
 0x102   : > { %v480_v36 = vsel %vm479_vm3, %v467_v46, %v468_v49  ;;  %v483_v55 = vsel %vm479_vm3, %v468_v49, %v469_v52 }
 0x103   : > { %v482_v54 = vsel %vm15544_vm4, %v444_v15, %v480_v36  ;;  %v484_v56 = vsel %vm15544_vm4, %v446_v47, %v483_v55 }
 0x104   : > { %505 = vst [vmem:[#allocation2] sm:$0xff] %v482_v54 }
 0x105   : > { %506 = vst [vmem:[#allocation2 + $0x8] sm:$0xff] %v484_v56 }
 0x107   : > { %v452_v57 = vpop.permute.xlu2 %451  ;;  %v454_v58 = vpop.permute.xlu0 %453 }
 0x108   : > { %v471_v59 = vrot.slane %v452_v57, 4  ;;  %v472_v60 = vrot.slane %v454_v58, 4 }
 0x10a   : > { %v487_v63 = vsel %vm479_vm3, %v471_v59, %v472_v60 }
 0x10b   : > { %v488_v0 = vsel %vm15544_vm4, %v452_v57, %v487_v63 }
 0x10c   : > { %508 = vst [vmem:[#allocation2 + $0x18] sm:$0xff] %v488_v0 }
 0x10f   : > { %v11104_v1 = vpop.permute.xlu2 %457  ;;  %v606_v16 = vpop.permute.xlu1 %605 }
 0x110   : > { %v460_v38 = vpop.permute.xlu0 %459  ;;  %v474_v2 = vrot.slane %v11104_v1, 4  ;;  %v627_v28 = vrot.slane %v606_v16, 4 }
 0x111   : > { %v475_v41 = vrot.slane %v460_v38, 4 }
 0x113   : > { %v491_v3 = vsel %vm479_vm3, %v474_v2, %v475_v41 }
 0x114   : > { %v492_v4 = vsel %vm15544_vm4, %v11104_v1, %v491_v3 }
 0x115   : > { %510 = vst [vmem:[#allocation2 + $0x28] sm:$0xff] %v492_v4 }
 0x117   : > { %v11110_v5 = vpop.permute.xlu2 %463  ;;  %v612_v6 = vpop.permute.xlu1 %611 }
 0x118   : > { %v466_v7 = vpop.permute.xlu0 %465  ;;  %v477_v8 = vrot.slane %v11110_v5, 4  ;;  %v630_v15 = vrot.slane %v612_v6, 4 }
 0x119   : > { %v478_v11 = vrot.slane %v466_v7, 4 }
 0x11b   : > { %v495_v12 = vsel %vm479_vm3, %v477_v8, %v478_v11 }
 0x11c   : > { %v496_v13 = vsel %vm15544_vm4, %v11110_v5, %v495_v12 }
 0x11d   : > { %512 = vst [vmem:[#allocation2 + $0x38] sm:$0xff] %v496_v13 }
 0x11f   : > { %v602_v14 = vpop.permute.xlu2 %601  ;;  %v618_v21 = vpop.permute.xlu1 %617 }
 0x120   : > { %v604_v22 = vpop.permute.xlu0 %603  ;;  %v625_v23 = vrot.slane %v602_v14, 4  ;;  %v633_v57 = vrot.slane %v618_v21, 4 }
 0x121   : > { %v626_v29 = vrot.slane %v604_v22, 4 }
 0x123   : > { %v640_v31 = vsel %vm479_vm3, %v626_v29, %v627_v28  ;;  %v637_v33 = vsel %vm479_vm3, %v625_v23, %v626_v29 }
 0x124   : > { %v641_v34 = vsel %vm638_vm5, %v604_v22, %v640_v31  ;;  %v639_v35 = vsel %vm638_vm5, %v602_v14, %v637_v33 }
 0x125   : > { %663 = vst [vmem:[#allocation2 + $0x48] sm:$0xff] %v641_v34 }
 0x126   : > { %662 = vst [vmem:[#allocation2 + $0x40] sm:$0xff] %v639_v35 }
 0x127   : > { %v608_v37 = vpop.permute.xlu2 %607  ;;  %v624_v39 = vpop.permute.xlu1 %623 }
 0x128   : > { %v610_v44 = vpop.permute.xlu0 %609  ;;  %v628_v45 = vrot.slane %v608_v37, 4  ;;  %v636_v11 = vrot.slane %v624_v39, 4  ;;  %v784_v39 = vrot.slane %v11068_v18, 4 }
 0x129   : > { %v629_v46 = vrot.slane %v610_v44, 4 }
 0x12b   : > { %v644_v47 = vsel %vm479_vm3, %v629_v46, %v630_v15  ;;  %v642_v48 = vsel %vm479_vm3, %v628_v45, %v629_v46 }
 0x12c   : > { %v645_v49 = vsel %vm638_vm5, %v610_v44, %v644_v47  ;;  %v643_v52 = vsel %vm638_vm5, %v608_v37, %v642_v48 }
 0x12d   : > { %665 = vst [vmem:[#allocation2 + $0x58] sm:$0xff] %v645_v49  ;;  %v787_v49 = vrot.slane %v11077_v19, 4 }
 0x12e   : > { %664 = vst [vmem:[#allocation2 + $0x50] sm:$0xff] %v643_v52 }
 0x12f   : > { %v614_v36 = vpop.permute.xlu2 %613  ;;  %v450_v54 = vpop.permute.xlu1 %449 }
 0x130   : > { %v616_v55 = vpop.permute.xlu0 %615  ;;  %v631_v56 = vrot.slane %v614_v36, 4  ;;  %v470_v58 = vrot.slane %v450_v54, 4 }
 0x131   : > { %v632_v60 = vrot.slane %v616_v55, 4 }
 0x132   : > { %v485_v63 = vsel %vm479_vm3, %v470_v58, %v471_v59 }
 0x133   : > { %v648_v0 = vsel %vm479_vm3, %v632_v60, %v633_v57  ;;  %v646_v1 = vsel %vm479_vm3, %v631_v56, %v632_v60  ;;  %v486_v16 = vsel %vm15544_vm4, %v450_v54, %v485_v63  ;;  %v790_v60 = vrot.slane %v11084_v30, 4 }
 0x134   : > { %v649_v38 = vsel %vm638_vm5, %v616_v55, %v648_v0  ;;  %v647_v41 = vsel %vm638_vm5, %v614_v36, %v646_v1  ;;  %507 = vst [vmem:[#allocation2 + $0x10] sm:$0xff] %v486_v16 }
 0x135   : > { %667 = vst [vmem:[#allocation2 + $0x68] sm:$0xff] %v649_v38 }
 0x136   : > { %666 = vst [vmem:[#allocation2 + $0x60] sm:$0xff] %v647_v41 }
 0x137   : > { %v620_v3 = vpop.permute.xlu2 %619  ;;  %v456_v4 = vpop.permute.xlu1 %455 }
 0x138   : > { %v622_v6 = vpop.permute.xlu0 %621  ;;  %v634_v7 = vrot.slane %v620_v3, 4  ;;  %v473_v12 = vrot.slane %v456_v4, 4 }
 0x139   : > { %v635_v59 = vrot.slane %v622_v6, 4 }
 0x13a   : > { %v489_v13 = vsel %vm479_vm3, %v473_v12, %v474_v2 }
 0x13b   : > { %v652_v14 = vsel %vm479_vm3, %v635_v59, %v636_v11  ;;  %v650_v21 = vsel %vm479_vm3, %v634_v7, %v635_v59  ;;  %v490_v22 = vsel %vm15544_vm4, %v456_v4, %v489_v13  ;;  %v793_v4 = vrot.slane %v11093_v42, 4 }
 0x13c   : > { %v653_v23 = vsel %vm638_vm5, %v622_v6, %v652_v14  ;;  %v651_v28 = vsel %vm638_vm5, %v620_v3, %v650_v21  ;;  %509 = vst [vmem:[#allocation2 + $0x20] sm:$0xff] %v490_v22 }
 0x13d   : > { %669 = vst [vmem:[#allocation2 + $0x78] sm:$0xff] %v653_v23 }
 0x13e   : > { %668 = vst [vmem:[#allocation2 + $0x70] sm:$0xff] %v651_v28 }
 0x13f   : > { %v462_v29 = vpop.permute.xlu1 %461  ;;  %v859_v13 = vpop.permute.xlu2 %858 }
 0x140   : > { %v759_v31 = vpop.permute.xlu0 %758  ;;  %v476_v33 = vrot.slane %v462_v29, 4 }
 0x141   : > { %v782_v44 = vrot.slane %v759_v31, 4 }
 0x142   : > { %v493_v2 = vsel %vm479_vm3, %v476_v33, %v477_v8 }
 0x143   : > { %v494_v34 = vsel %vm15544_vm4, %v462_v29, %v493_v2 }
 0x144   : > { %511 = vst [vmem:[#allocation2 + $0x30] sm:$0xff] %v494_v34 }
 0x147   : > { %v761_v35 = vpop.permute.xlu1 %760 }
 0x148   : > { %v765_v37 = vpop.permute.xlu0 %764  ;;  %v783_v45 = vrot.slane %v761_v35, 4 }
 0x149   : > { %v785_v52 = vrot.slane %v765_v37, 4 }
 0x14a   : > { %v794_v15 = vsel %vm479_vm3, %v782_v44, %v783_v45  ;;  %v797_v46 = vsel %vm479_vm3, %v783_v45, %v784_v39 }
 0x14b   : > { %v796_v47 = vsel %vm15543_vm2, %v759_v31, %v794_v15  ;;  %v798_v48 = vsel %vm15543_vm2, %v761_v35, %v797_v46 }
 0x14c   : > { %819 = vst [vmem:[#allocation2 + $0x80] sm:$0xff] %v796_v47 }
 0x14d   : > { %820 = vst [vmem:[#allocation2 + $0x88] sm:$0xff] %v798_v48 }
 0x14f   : > { %v767_v5 = vpop.permute.xlu1 %766 }
 0x150   : > { %v771_v8 = vpop.permute.xlu0 %770  ;;  %v786_v36 = vrot.slane %v767_v5, 4 }
 0x151   : > { %v788_v63 = vrot.slane %v771_v8, 4 }
 0x152   : > { %v799_v18 = vsel %vm479_vm3, %v785_v52, %v786_v36  ;;  %v801_v54 = vsel %vm479_vm3, %v786_v36, %v787_v49 }
 0x153   : > { %v800_v55 = vsel %vm15543_vm2, %v765_v37, %v799_v18  ;;  %v802_v56 = vsel %vm15543_vm2, %v767_v5, %v801_v54 }
 0x154   : > { %821 = vst [vmem:[#allocation2 + $0x90] sm:$0xff] %v800_v55 }
 0x155   : > { %822 = vst [vmem:[#allocation2 + $0x98] sm:$0xff] %v802_v56 }
 0x157   : > { %v773_v57 = vpop.permute.xlu1 %772 }
 0x158   : > { %v777_v58 = vpop.permute.xlu0 %776  ;;  %v789_v0 = vrot.slane %v773_v57, 4 }
 0x159   : > { %v791_v6 = vrot.slane %v777_v58, 4 }
 0x15a   : > { %v803_v19 = vsel %vm479_vm3, %v788_v63, %v789_v0  ;;  %v805_v1 = vsel %vm479_vm3, %v789_v0, %v790_v60 }
 0x15b   : > { %v804_v16 = vsel %vm15543_vm2, %v771_v8, %v803_v19  ;;  %v806_v38 = vsel %vm15543_vm2, %v773_v57, %v805_v1  ;;  %v9141_v19 = vld [vmem:[%s15531_s1 + $0x7] ss:$8 sm:$0xf] }
 0x15c   : > { %823 = vst [vmem:[#allocation2 + $0xa0] sm:$0xff] %v804_v16  ;;  %v1009_v1 = vperm.slane %v9141_v19, 2  ;;  %v1007_v16 = vperm.slane %v9141_v19, 0 }
 0x15d   : > { %824 = vst [vmem:[#allocation2 + $0xa8] sm:$0xff] %v806_v38  ;;  %v1008_v38 = vperm.slane %v9141_v19, 1 }
 0x15f   : > { %v779_v41 = vpop.permute.xlu1 %778 }
 0x160   : > { %v855_v3 = vpop.permute.xlu0 %854  ;;  %v792_v7 = vrot.slane %v779_v41, 4 }
 0x161   : > { %v871_v14 = vmul.f32 0.0, %v855_v3 }
 0x162   : > { %v807_v30 = vsel %vm479_vm3, %v791_v6, %v792_v7  ;;  %v809_v11 = vsel %vm479_vm3, %v792_v7, %v793_v4 }
 0x163   : > { %v808_v12 = vsel %vm15543_vm2, %v777_v58, %v807_v30  ;;  %v810_v59 = vsel %vm15543_vm2, %v779_v41, %v809_v11  ;;  %v1010_v41 = vperm.slane %v9141_v19, 3 }
 0x164   : > { %825 = vst [vmem:[#allocation2 + $0xb0] sm:$0xff] %v808_v12 }
 0x165   : > { %826 = vst [vmem:[#allocation2 + $0xb8] sm:$0xff] %v810_v59 }
 0x167   : > { %v857_v21 = vpop.permute.xlu1 %856 }
 0x168   : > { %v861_v22 = vpop.permute.xlu0 %860  ;;  %v863_v23 = vsel %vm638_vm5, %v855_v3, %v857_v21  ;;  %v864_v42 = vsel %vm638_vm5, %v857_v21, %v859_v13 }
 0x169   : > { %v865_v28 = vsel %vm638_vm5, %v859_v13, %v861_v22  ;;  %v875_v29 = vmul.f32 %v861_v22, %v10916_v17  ;;  %v872_v31 = vmul.f32 %v863_v23, %v10949_v40  ;;  %v873_v33 = vmul.f32 %v864_v42, %v10962_v50 }
 0x16a   : > { %v874_v2 = vmul.f32 %v865_v28, %v10965_v51  ;;  %v880_v39 = vmul.f32 %v861_v22, %v10923_v20  ;;  %v877_v44 = vmul.f32 %v863_v23, %v11016_v27  ;;  %v878_v45 = vmul.f32 %v864_v42, %v10976_v61 }
 0x16b   : > { %v893_v34 = vpack.c.bf16 %v875_v29, %v875_v29  ;;  %v891_v35 = vpack.c.bf16 %v872_v31, %v871_v14  ;;  %v879_v15 = vmul.f32 %v865_v28, %v10979_v62  ;;  %v885_v5 = vmul.f32 %v861_v22, %v10929_v25 }
 0x16c   : > { %v892_v37 = vpack.c.bf16 %v874_v2, %v873_v33  ;;  %v896_v46 = vpack.c.bf16 %v880_v39, %v880_v39  ;;  %v894_v47 = vpack.c.bf16 %v877_v44, %v871_v14  ;;  %v882_v8 = vmul.f32 %v863_v23, %v11033_v43 }
 0x16d   : > { %919 = vrot.lane.b32.xlu0 %v893_v34, %s10809_s11  ;;  %915 = vrot.lane.b32.xlu1 %v891_v35, %s10809_s11  ;;  %v895_v48 = vpack.c.bf16 %v879_v15, %v878_v45  ;;  %v883_v49 = vmul.f32 %v864_v42, %v10993_v9  ;;  %v884_v52 = vmul.f32 %v865_v28, %v10996_v10 }
 0x16e   : > { %917 = vrot.lane.b32.xlu2 %v892_v37, %s10809_s11  ;;  %v899_v36 = vpack.c.bf16 %v885_v5, %v885_v5  ;;  %v897_v18 = vpack.c.bf16 %v882_v8, %v871_v14  ;;  %v890_v55 = vmul.f32 %v861_v22, %v10936_v32  ;;  %v887_v56 = vmul.f32 %v863_v23, %v11047_v53 }
 0x16f   : > { %v898_v54 = vpack.c.bf16 %v884_v52, %v883_v49  ;;  %v888_v57 = vmul.f32 %v864_v42, %v11007_v24  ;;  %v889_v58 = vmul.f32 %v865_v28, %v11010_v26 }
 0x170   : > { %v902_v60 = vpack.c.bf16 %v890_v55, %v890_v55  ;;  %v900_v63 = vpack.c.bf16 %v887_v56, %v871_v14 }
 0x171   : > { %v901_v0 = vpack.c.bf16 %v889_v58, %v888_v57 }
 0x175   : > { %925 = vrot.lane.b32.xlu0 %v896_v46, %s10809_s11  ;;  %921 = vrot.lane.b32.xlu1 %v894_v47, %s10809_s11 }
 0x176   : > { %923 = vrot.lane.b32.xlu2 %v895_v48, %s10809_s11 }
 0x17d   : > { %931 = vrot.lane.b32.xlu0 %v899_v36, %s10809_s11  ;;  %927 = vrot.lane.b32.xlu1 %v897_v18, %s10809_s11 }
 0x17e   : > { %929 = vrot.lane.b32.xlu2 %v898_v54, %s10809_s11 }
 0x185   : > { %937 = vrot.lane.b32.xlu0 %v902_v60, %s10809_s11  ;;  %933 = vrot.lane.b32.xlu1 %v900_v63, %s10809_s11 }
 0x186   : > { %935 = vrot.lane.b32.xlu2 %v901_v0, %s10809_s11 }
 0x18d   : > { %1015 = vrot.lane.b32.xlu0 %v1009_v1, %s10812_s20  ;;  %1011 = vrot.lane.b32.xlu1 %v1007_v16, %s10812_s20 }
 0x18e   : > { %1013 = vrot.lane.b32.xlu2 %v1008_v38, %s10812_s20 }
 0x195   : > { %1017 = vrot.lane.b32.xlu1 %v1010_v41, %s10812_s20 }
 0x1c8   : > { %v918_v3 = vpop.permute.xlu2 %917 }
 0x1c9   : > { %v940_v6 = vrot.slane %v918_v3, 4 }
 0x1d0   : > { %v924_v11 = vpop.permute.xlu2 %923 }
 0x1d1   : > { %v943_v23 = vrot.slane %v924_v11, 4 }
 0x1d8   : > { %v930_v33 = vpop.permute.xlu2 %929 }
 0x1d9   : > { %v946_v39 = vrot.slane %v930_v33, 4 }
 0x1df   : > { %v920_v4 = vpop.permute.xlu0 %919  ;;  %v916_v30 = vpop.permute.xlu1 %915 }
 0x1e0   : > { %v941_v7 = vrot.slane %v920_v4, 4  ;;  %v939_v12 = vrot.slane %v916_v30, 4  ;;  %v936_v8 = vpop.permute.xlu2 %935 }
 0x1e1   : > { %v949_v52 = vrot.slane %v936_v8, 4 }
 0x1e2   : > { %v954_v59 = vsel %vm479_vm3, %v940_v6, %v941_v7  ;;  %v951_v14 = vsel %vm479_vm3, %v939_v12, %v940_v6 }
 0x1e3   : > { %v955_v13 = vsel %vm548_vm1, %v918_v3, %v954_v59  ;;  %v953_v21 = vsel %vm548_vm1, %v916_v30, %v951_v14 }
 0x1e4   : > { %977 = vst [vmem:[#allocation2 + $0xc8] sm:$0xff] %v955_v13 }
 0x1e5   : > { %976 = vst [vmem:[#allocation2 + $0xc0] sm:$0xff] %v953_v21 }
 0x1e7   : > { %v926_v22 = vpop.permute.xlu0 %925  ;;  %v922_v28 = vpop.permute.xlu1 %921 }
 0x1e8   : > { %v944_v42 = vrot.slane %v926_v22, 4  ;;  %v942_v29 = vrot.slane %v922_v28, 4  ;;  %v1014_v60 = vpop.permute.xlu2 %1013  ;;  %v10441_v22 = vld [vmem:[#allocation2 + $0xac] sm:$0xf0] }
 0x1ea   : > { %v958_v31 = vsel %vm479_vm3, %v943_v23, %v944_v42  ;;  %v956_v34 = vsel %vm479_vm3, %v942_v29, %v943_v23  ;;  %v9297_v29 = vld [vmem:[#allocation2 + $0xa0] sm:$0xf] }
 0x1eb   : > { %v959_v2 = vsel %vm548_vm1, %v924_v11, %v958_v31  ;;  %v957_v35 = vsel %vm548_vm1, %v922_v28, %v956_v34  ;;  %v9298_v31 = vor.u32 %v10441_v22, %v9297_v29  ;;  %v11273_v29 = vld [vmem:[%s10913_s19 + $0x18] sm:$0xff] }
 0x1ec   : > { %979 = vst [vmem:[#allocation2 + $0xd8] sm:$0xff] %v959_v2  ;;  %v9313_v11 = vld [vmem:[#allocation2 + $0xc0] sm:$0xf] }
 0x1ed   : > { %978 = vst [vmem:[#allocation2 + $0xd0] sm:$0xff] %v957_v35 }
 0x1ef   : > { %v932_v37 = vpop.permute.xlu0 %931  ;;  %v928_v45 = vpop.permute.xlu1 %927 }
 0x1f0   : > { %v947_v44 = vrot.slane %v932_v37, 4  ;;  %v945_v15 = vrot.slane %v928_v45, 4  ;;  %v10433_v37 = vld [vmem:[#allocation2 + $0x6c] sm:$0xf0] }
 0x1f2   : > { %v962_v46 = vsel %vm479_vm3, %v946_v39, %v947_v44  ;;  %v960_v48 = vsel %vm479_vm3, %v945_v15, %v946_v39  ;;  %v9265_v15 = vld [vmem:[#allocation2 + $0x60] sm:$0xf] }
 0x1f3   : > { %v963_v47 = vsel %vm548_vm1, %v930_v33, %v962_v46  ;;  %v961_v5 = vsel %vm548_vm1, %v928_v45, %v960_v48  ;;  %v9281_v33 = vld [vmem:[#allocation2 + $0x80] sm:$0xf]  ;;  %v9266_v46 = vor.u32 %v10433_v37, %v9265_v15 }
 0x1f4   : > { %981 = vst [vmem:[#allocation2 + $0xe8] sm:$0xff] %v963_v47  ;;  %v10445_v7 = vld [vmem:[#allocation2 + $0xcc] sm:$0xf0] }
 0x1f5   : > { %980 = vst [vmem:[#allocation2 + $0xe0] sm:$0xff] %v961_v5  ;;  %v9314_v13 = vor.u32 %v10445_v7, %v9313_v11 }
 0x1f7   : > { %v938_v49 = vpop.permute.xlu0 %937  ;;  %v934_v18 = vpop.permute.xlu1 %933 }
 0x1f8   : > { %v950_v36 = vrot.slane %v938_v49, 4  ;;  %v948_v54 = vrot.slane %v934_v18, 4  ;;  %v10425_v49 = vld [vmem:[#allocation2 + $0x2c] sm:$0xf0] }
 0x1fa   : > { %v966_v55 = vsel %vm479_vm3, %v949_v52, %v950_v36  ;;  %v964_v57 = vsel %vm479_vm3, %v948_v54, %v949_v52  ;;  %v9233_v54 = vld [vmem:[#allocation2 + $0x20] sm:$0xf] }
 0x1fb   : > { %v967_v56 = vsel %vm548_vm1, %v936_v8, %v966_v55  ;;  %v965_v58 = vsel %vm548_vm1, %v934_v18, %v964_v57  ;;  %v9234_v55 = vor.u32 %v10425_v49, %v9233_v54 }
 0x1fc   : > { %983 = vst [vmem:[#allocation2 + $0xf8] sm:$0xff] %v967_v56  ;;  %v9329_v41 = vld [vmem:[#allocation2 + $0xe0] sm:$0xf] }
 0x1fd   : > { %982 = vst [vmem:[#allocation2 + $0xf0] sm:$0xff] %v965_v58  ;;  %v9217_v56 = vld [vmem:[#allocation2] sm:$0xf] }
 0x1ff   : > { %v1012_v63 = vpop.permute.xlu1 %1011  ;;  %v1016_v16 = vpop.permute.xlu0 %1015 }
 0x200   : > { %v11216_v0 = vmul.f32 0.0, %v1012_v63  ;;  %v1020_v19 = vsel %vm15544_vm4, %v1012_v63, %v1014_v60  ;;  %v11222_v6 = vsel %vm15544_vm4, %v1014_v60, %v1016_v16 }
 0x201   : > { %v1029_v1 = vmul.f32 %v1020_v19, %v10949_v40  ;;  %v1030_v12 = vmul.f32 %v11222_v6, %v10962_v50  ;;  %v1034_v40 = vmul.f32 %v1020_v19, %v11016_v27  ;;  %v10437_v50 = vld [vmem:[#allocation2 + $0x8c] sm:$0xf0]  ;;  %v1039_v34 = vmul.f32 %v1020_v19, %v11033_v43 }
 0x202   : > { %v9282_v35 = vor.u32 %v10437_v50, %v9281_v33  ;;  %v1040_v47 = vmul.f32 %v11222_v6, %v10993_v9  ;;  %v1044_v5 = vmul.f32 %v1020_v19, %v11047_v53  ;;  %v1045_v57 = vmul.f32 %v11222_v6, %v11007_v24 }
 0x203   : > { %v1048_v38 = vpack.c.bf16 %v1029_v1, %v11216_v0  ;;  %v1051_v28 = vpack.c.bf16 %v1034_v40, %v11216_v0  ;;  %v1054_v45 = vpack.c.bf16 %v1039_v34, %v11216_v0  ;;  %v11282_v34 = vld [vmem:[%s10913_s19 + $0x38] sm:$0xff] }
 0x204   : > { %v10449_v3 = vld [vmem:[#allocation2 + $0xec] sm:$0xf0]  ;;  %v1057_v18 = vpack.c.bf16 %v1044_v5, %v11216_v0 }
 0x205   : > { %v9330_v4 = vor.u32 %v10449_v3, %v9329_v41  ;;  %1072 = vrot.lane.b32.xlu2 %v1048_v38, %s10810_s12 }
 0x207   : > { %3401 = vmatpush.bf16.msra.mxu0 %v9330_v4  ;;  %v1018_v30 = vpop.permute.xlu1 %1017 }
 0x208   : > { %v1022_v59 = vsel %vm15544_vm4, %v1016_v16, %v1018_v30  ;;  %v1032_v14 = vmul.f32 %v1018_v30, %v10916_v17  ;;  %v1037_v17 = vmul.f32 %v1018_v30, %v10923_v20  ;;  %v10429_v20 = vld [vmem:[#allocation2 + $0x4c] sm:$0xf0]  ;;  %v1047_v9 = vmul.f32 %v1018_v30, %v10936_v32 }
 0x209   : > { %v1031_v21 = vmul.f32 %v1022_v59, %v10965_v51  ;;  %v1035_v51 = vmul.f32 %v11222_v6, %v10976_v61  ;;  %v1036_v2 = vmul.f32 %v1022_v59, %v10979_v62  ;;  %v1042_v61 = vmul.f32 %v1018_v30, %v10929_v25  ;;  %v9249_v62 = vld [vmem:[#allocation2 + $0x40] sm:$0xf]  ;;  %v10421_v25 = vld [vmem:[#allocation2 + $0xc] sm:$0xf0] }
 0x20a   : > { %v1050_v23 = vpack.c.bf16 %v1032_v14, %v1032_v14  ;;  %v1053_v39 = vpack.c.bf16 %v1037_v17, %v1037_v17  ;;  %v1041_v48 = vmul.f32 %v1022_v59, %v10996_v10  ;;  %v9250_v8 = vor.u32 %v10429_v20, %v9249_v62  ;;  %v9142_v10 = vld [vmem:[%s15531_s1 + $0x22] ss:$8 sm:$0xf] }
 0x20b   : > { %3402 = vmatpush.bf16.msra.mxu0 %v9314_v13  ;;  %v1049_v42 = vpack.c.bf16 %v1031_v21, %v1030_v12  ;;  %v1052_v44 = vpack.c.bf16 %v1036_v2, %v1035_v51  ;;  %v1056_v52 = vpack.c.bf16 %v1042_v61, %v1042_v61  ;;  %v1046_v58 = vmul.f32 %v1022_v59, %v11010_v26 }
 0x20c   : > { %1076 = vrot.lane.b32.xlu1 %v1050_v23, %s10810_s12  ;;  %v1055_v36 = vpack.c.bf16 %v1041_v48, %v1040_v47  ;;  %v9218_v60 = vor.u32 %v10421_v25, %v9217_v56  ;;  %v1164_v63 = vperm.slane %v9142_v10, 0  ;;  %v1059_v0 = vpack.c.bf16 %v1047_v9, %v1047_v9  ;;  %v11291_v48 = vld [vmem:[%s10913_s19 + $0x58] sm:$0xff] }
 0x20d   : > { %1074 = vrot.lane.b32.xlu0 %v1049_v42, %s10810_s12  ;;  %1078 = vrot.lane.b32.xlu2 %v1051_v28, %s10810_s12  ;;  %v1058_v19 = vpack.c.bf16 %v1046_v58, %v1045_v57  ;;  %v1166_v32 = vperm.slane %v9142_v10, 2  ;;  %v1165_v1 = vperm.slane %v9142_v10, 1  ;;  %v1167_v16 = vperm.slane %v9142_v10, 3  ;;  %v11300_v56 = vld [vmem:[%s10913_s19 + $0x78] sm:$0xff] }
 0x20f   : > { %3403 = vmatpush.bf16.msra.mxu0 %v9298_v31 }
 0x213   : > { %3404 = vmatpush.bf16.msra.mxu0 %v9282_v35 }
 0x214   : > { %1082 = vrot.lane.b32.xlu1 %v1053_v39, %s10810_s12 }
 0x215   : > { %1080 = vrot.lane.b32.xlu0 %v1052_v44, %s10810_s12  ;;  %1084 = vrot.lane.b32.xlu2 %v1054_v45, %s10810_s12 }
 0x217   : > { %3405 = vmatpush.bf16.msra.mxu0 %v9266_v46 }
 0x21b   : > { %3406 = vmatpush.bf16.msra.mxu0 %v9250_v8 }
 0x21c   : > { %1088 = vrot.lane.b32.xlu1 %v1056_v52, %s10810_s12 }
 0x21d   : > { %1086 = vrot.lane.b32.xlu0 %v1055_v36, %s10810_s12  ;;  %1090 = vrot.lane.b32.xlu2 %v1057_v18, %s10810_s12 }
 0x21f   : > { %3407 = vmatpush.bf16.msra.mxu0 %v9234_v55 }
 0x223   : > { %3408 = vmatpush.bf16.msra.mxu0 %v9218_v60 }
 0x224   : > { %1094 = vrot.lane.b32.xlu1 %v1059_v0, %s10810_s12 }
 0x225   : > { %1092 = vrot.lane.b32.xlu0 %v1058_v19, %s10810_s12  ;;  %1168 = vrot.lane.b32.xlu2 %v1164_v63, %s10814_s30 }
 0x22c   : > { %1172 = vrot.lane.b32.xlu1 %v1166_v32, %s10814_s30 }
 0x22d   : > { %1170 = vrot.lane.b32.xlu0 %v1165_v1, %s10814_s30  ;;  %1174 = vrot.lane.b32.xlu2 %v1167_v16, %s10814_s30  ;;  %v11308_v1 = vld [vmem:[%s10913_s19 + $0x10] sm:$0xff] }
 0x25f   : > { %v1073_v24 = vpop.permute.xlu2 %1072 }
 0x260   : > { %v1096_v30 = vrot.slane %v1073_v24, 4 }
 0x267   : > { %v1079_v26 = vpop.permute.xlu2 %1078 }
 0x268   : > { %v1099_v42 = vrot.slane %v1079_v26, 4 }
 0x26f   : > { %v1085_v38 = vpop.permute.xlu2 %1084 }
 0x270   : > { %v1102_v45 = vrot.slane %v1085_v38, 4 }
 0x277   : > { %v1091_v41 = vpop.permute.xlu2 %1090 }
 0x278   : > { %v1105_v36 = vrot.slane %v1091_v41, 4 }
 0x27e   : > { %v1077_v3 = vpop.permute.xlu1 %1076 }
 0x27f   : > { %v1098_v4 = vrot.slane %v1077_v3, 4  ;;  %v1075_v6 = vpop.permute.xlu0 %1074  ;;  %v11266_v7 = vpop.permute.xlu2 %1168 }
 0x280   : > { %v1097_v11 = vrot.slane %v1075_v6, 4 }
 0x282   : > { %v1108_v12 = vsel %vm479_vm3, %v1096_v30, %v1097_v11  ;;  %v1111_v40 = vsel %vm479_vm3, %v1097_v11, %v1098_v4  ;;  %v11325_v30 = vld [vmem:[%s10913_s19 + $0x28] sm:$0xff] }
 0x283   : > { %v1110_v59 = vsel %vm390_vm0, %v1073_v24, %v1108_v12  ;;  %v1112_v13 = vsel %vm390_vm0, %v1075_v6, %v1111_v40  ;;  %v1185_v24 = vmul.f32 0.0, %v11266_v7  ;;  %v11329_v12 = vld [vmem:[%s10913_s19 + $0x30] sm:$0xff] }
 0x284   : > { %1133 = vst [vmem:[#allocation2 + $0x100] sm:$0xff] %v1110_v59 }
 0x285   : > { %1134 = vst [vmem:[#allocation2 + $0x108] sm:$0xff] %v1112_v13 }
 0x286   : > { %v1083_v14 = vpop.permute.xlu1 %1082 }
 0x287   : > { %v1101_v21 = vrot.slane %v1083_v14, 4  ;;  %v1081_v22 = vpop.permute.xlu0 %1080  ;;  %v1175_v23 = vpop.permute.xlu2 %1174  ;;  %v9143_v14 = vld [vmem:[%s15531_s1 + $0x24] ss:$8 sm:$0xf] }
 0x288   : > { %v1100_v28 = vrot.slane %v1081_v22, 4  ;;  %v1189_v31 = vmul.f32 %v11273_v29, %v1175_v23  ;;  %v1194_v35 = vmul.f32 %v11282_v34, %v1175_v23  ;;  %v1199_v5 = vmul.f32 %v11291_v48, %v1175_v23 }
 0x289   : > { %v1204_v57 = vmul.f32 %v11300_v56, %v1175_v23 }
 0x28a   : > { %v1113_v50 = vsel %vm479_vm3, %v1099_v42, %v1100_v28  ;;  %v1115_v17 = vsel %vm479_vm3, %v1100_v28, %v1101_v21  ;;  %v1207_v33 = vpack.c.bf16 %v1189_v31, %v1189_v31  ;;  %v1210_v46 = vpack.c.bf16 %v1194_v35, %v1194_v35  ;;  %v11343_v42 = vld [vmem:[%s10913_s19 + $0x50] sm:$0xff] }
 0x28b   : > { %v1114_v51 = vsel %vm390_vm0, %v1079_v26, %v1113_v50  ;;  %v1116_v2 = vsel %vm390_vm0, %v1081_v22, %v1115_v17  ;;  %v1213_v54 = vpack.c.bf16 %v1199_v5, %v1199_v5  ;;  %v1216_v32 = vpack.c.bf16 %v1204_v57, %v1204_v57  ;;  %v11313_v26 = vld [vmem:[%s10913_s19] sm:$0xff]  ;;  %v11339_v22 = vld [vmem:[%s10913_s19 + $0x48] sm:$0xff] }
 0x28c   : > { %1135 = vst [vmem:[#allocation2 + $0x110] sm:$0xff] %v1114_v51  ;;  %1233 = vrot.lane.b32.xlu2 %v1207_v33, %s10815_s9  ;;  %v11355_v51 = vld [vmem:[%s10913_s19 + $0x70] sm:$0xff] }
 0x28d   : > { %1136 = vst [vmem:[#allocation2 + $0x118] sm:$0xff] %v1116_v2 }
 0x28e   : > { %v1089_v37 = vpop.permute.xlu1 %1088 }
 0x28f   : > { %v1104_v39 = vrot.slane %v1089_v37, 4  ;;  %v1087_v44 = vpop.permute.xlu0 %1086 }
 0x290   : > { %v1103_v15 = vrot.slane %v1087_v44, 4 }
 0x292   : > { %v1117_v20 = vsel %vm479_vm3, %v1102_v45, %v1103_v15  ;;  %v1119_v61 = vsel %vm479_vm3, %v1103_v15, %v1104_v39  ;;  %v1321_v39 = vperm.slane %v9143_v14, 0 }
 0x293   : > { %v1118_v62 = vsel %vm390_vm0, %v1085_v38, %v1117_v20  ;;  %v1120_v47 = vsel %vm390_vm0, %v1087_v44, %v1119_v61  ;;  %v1322_v44 = vperm.slane %v9143_v14, 1 }
 0x294   : > { %1137 = vst [vmem:[#allocation2 + $0x120] sm:$0xff] %v1118_v62  ;;  %1239 = vrot.lane.b32.xlu2 %v1210_v46, %s10815_s9 }
 0x295   : > { %1138 = vst [vmem:[#allocation2 + $0x128] sm:$0xff] %v1120_v47 }
 0x296   : > { %v1095_v8 = vpop.permute.xlu1 %1094 }
 0x297   : > { %v1107_v49 = vrot.slane %v1095_v8, 4  ;;  %v1093_v52 = vpop.permute.xlu0 %1092 }
 0x298   : > { %v1106_v18 = vrot.slane %v1093_v52, 4 }
 0x29a   : > { %v1121_v55 = vsel %vm479_vm3, %v1105_v36, %v1106_v18  ;;  %v1123_v25 = vsel %vm479_vm3, %v1106_v18, %v1107_v49 }
 0x29b   : > { %v1122_v9 = vsel %vm390_vm0, %v1091_v41, %v1121_v55  ;;  %v1124_v10 = vsel %vm390_vm0, %v1093_v52, %v1123_v25  ;;  %v11317_v41 = vld [vmem:[%s10913_s19 + $0x8] sm:$0xff] }
 0x29c   : > { %1139 = vst [vmem:[#allocation2 + $0x130] sm:$0xff] %v1122_v9  ;;  %1245 = vrot.lane.b32.xlu2 %v1213_v54, %s10815_s9 }
 0x29d   : > { %1140 = vst [vmem:[#allocation2 + $0x138] sm:$0xff] %v1124_v10 }
 0x29e   : > { %v1173_v58 = vpop.permute.xlu1 %1172 }
 0x29f   : > { %v1179_v60 = vsel %vm1176_vm6, %v1173_v58, %v1175_v23  ;;  %v1171_v63 = vpop.permute.xlu0 %1170 }
 0x2a0   : > { %v1177_v0 = vsel %vm1176_vm6, %v11266_v7, %v1171_v63  ;;  %v1178_v19 = vsel %vm1176_vm6, %v1171_v63, %v1173_v58  ;;  %v1188_v16 = vmul.f32 %v11308_v1, %v1179_v60  ;;  %v1193_v40 = vmul.f32 %v11329_v12, %v1179_v60 }
 0x2a1   : > { %v1186_v38 = vmul.f32 %v11313_v26, %v1177_v0  ;;  %v1187_v3 = vmul.f32 %v11317_v41, %v1178_v19  ;;  %v1191_v7 = vmul.f32 %v1177_v0, %v11016_v27  ;;  %v1192_v11 = vmul.f32 %v11325_v30, %v1178_v19 }
 0x2a2   : > { %v1323_v27 = vperm.slane %v9143_v14, 2  ;;  %v1196_v21 = vmul.f32 %v1177_v0, %v11033_v43  ;;  %v1197_v23 = vmul.f32 %v11339_v22, %v1178_v19  ;;  %v1198_v28 = vmul.f32 %v11343_v42, %v1179_v60  ;;  %v11351_v43 = vld [vmem:[%s10913_s19 + $0x68] sm:$0xff] }
 0x2a3   : > { %v1205_v4 = vpack.c.bf16 %v1186_v38, %v1185_v24  ;;  %v1206_v6 = vpack.c.bf16 %v1188_v16, %v1187_v3  ;;  %v1208_v59 = vpack.c.bf16 %v1191_v7, %v1185_v24  ;;  %v1209_v13 = vpack.c.bf16 %v1193_v40, %v1192_v11 }
 0x2a4   : > { %1251 = vrot.lane.b32.xlu2 %v1216_v32, %s10815_s9  ;;  %v1211_v31 = vpack.c.bf16 %v1196_v21, %v1185_v24  ;;  %v1212_v50 = vpack.c.bf16 %v1198_v28, %v1197_v23  ;;  %v1201_v17 = vmul.f32 %v1177_v0, %v11047_v53  ;;  %v1202_v33 = vmul.f32 %v11351_v43, %v1178_v19 }
 0x2a5   : > { %1229 = vrot.lane.b32.xlu0 %v1205_v4, %s10815_s9  ;;  %1231 = vrot.lane.b32.xlu1 %v1206_v6, %s10815_s9  ;;  %v1203_v2 = vmul.f32 %v11355_v51, %v1179_v60  ;;  %v1324_v53 = vperm.slane %v9143_v14, 3 }
 0x2a6   : > { %v1214_v35 = vpack.c.bf16 %v1201_v17, %v1185_v24 }
 0x2a7   : > { %v1215_v37 = vpack.c.bf16 %v1203_v2, %v1202_v33 }
 0x2ac   : > { %1329 = vrot.lane.b32.xlu2 %v1323_v27, %s10816_s14 }
 0x2ad   : > { %1235 = vrot.lane.b32.xlu0 %v1208_v59, %s10815_s9  ;;  %1237 = vrot.lane.b32.xlu1 %v1209_v13, %s10815_s9 }
 0x2b5   : > { %1241 = vrot.lane.b32.xlu0 %v1211_v31, %s10815_s9  ;;  %1243 = vrot.lane.b32.xlu1 %v1212_v50, %s10815_s9 }
 0x2bd   : > { %1247 = vrot.lane.b32.xlu0 %v1214_v35, %s10815_s9  ;;  %1249 = vrot.lane.b32.xlu1 %v1215_v37, %s10815_s9 }
 0x2c5   : > { %1325 = vrot.lane.b32.xlu0 %v1321_v39, %s10816_s14  ;;  %1327 = vrot.lane.b32.xlu1 %v1322_v44, %s10816_s14  ;;  %v11384_v44 = vld [vmem:[%s10913_s19 + $0x20] sm:$0xff] }
 0x2cd   : > { %1331 = vrot.lane.b32.xlu0 %v1324_v53, %s10816_s14 }
 0x2e6   : > { %v1234_v45 = vpop.permute.xlu2 %1233 }
 0x2e7   : > { %v1255_v20 = vrot.slane %v1234_v45, 4 }
 0x2ee   : > { %v1240_v47 = vpop.permute.xlu2 %1239 }
 0x2ef   : > { %v1258_v54 = vrot.slane %v1240_v47, 4 }
 0x2f6   : > { %v1246_v57 = vpop.permute.xlu2 %1245 }
 0x2f7   : > { %v1261_v19 = vrot.slane %v1246_v57, 4 }
 0x2fe   : > { %v1252_v6 = vpop.permute.xlu2 %1251 }
 0x2ff   : > { %v1264_v40 = vrot.slane %v1252_v6, 4 }
 0x306   : > { %v1330_v2 = vpop.permute.xlu2 %1329 }
 0x317   : > { %v1230_v15 = vpop.permute.xlu0 %1229  ;;  %v1232_v46 = vpop.permute.xlu1 %1231 }
 0x318   : > { %v1253_v61 = vrot.slane %v1230_v15, 4  ;;  %v1254_v62 = vrot.slane %v1232_v46, 4 }
 0x31a   : > { %v1265_v5 = vsel %vm479_vm3, %v1253_v61, %v1254_v62  ;;  %v1268_v8 = vsel %vm479_vm3, %v1254_v62, %v1255_v20 }
 0x31b   : > { %v1267_v49 = vsel %vm1266_vm7, %v1230_v15, %v1265_v5  ;;  %v1269_v52 = vsel %vm1266_vm7, %v1232_v46, %v1268_v8 }
 0x31c   : > { %1290 = vst [vmem:[#allocation2 + $0x140] sm:$0xff] %v1267_v49  ;;  %v11397_v49 = vld [vmem:[%s10913_s19 + $0x40] sm:$0xff] }
 0x31d   : > { %1291 = vst [vmem:[#allocation2 + $0x148] sm:$0xff] %v1269_v52 }
 0x31f   : > { %v1236_v36 = vpop.permute.xlu0 %1235  ;;  %v1238_v18 = vpop.permute.xlu1 %1237 }
 0x320   : > { %v1256_v55 = vrot.slane %v1236_v36, 4  ;;  %v1257_v25 = vrot.slane %v1238_v18, 4 }
 0x322   : > { %v1270_v9 = vsel %vm479_vm3, %v1256_v55, %v1257_v25  ;;  %v1272_v10 = vsel %vm479_vm3, %v1257_v25, %v1258_v54 }
 0x323   : > { %v1271_v58 = vsel %vm1266_vm7, %v1236_v36, %v1270_v9  ;;  %v1273_v60 = vsel %vm1266_vm7, %v1238_v18, %v1272_v10  ;;  %v11407_v10 = vld [vmem:[%s10913_s19 + $0x60] sm:$0xff] }
 0x324   : > { %1292 = vst [vmem:[#allocation2 + $0x150] sm:$0xff] %v1271_v58 }
 0x325   : > { %1293 = vst [vmem:[#allocation2 + $0x158] sm:$0xff] %v1273_v60 }
 0x327   : > { %v1242_v63 = vpop.permute.xlu0 %1241  ;;  %v1244_v0 = vpop.permute.xlu1 %1243 }
 0x328   : > { %v1259_v32 = vrot.slane %v1242_v63, 4  ;;  %v1260_v16 = vrot.slane %v1244_v0, 4 }
 0x32a   : > { %v1274_v24 = vsel %vm479_vm3, %v1259_v32, %v1260_v16  ;;  %v1276_v38 = vsel %vm479_vm3, %v1260_v16, %v1261_v19  ;;  %v9144_v32 = vld [vmem:[%s15531_s1 + $0x26] ss:$8 sm:$0xf] }
 0x32b   : > { %v1275_v3 = vsel %vm1266_vm7, %v1242_v63, %v1274_v24  ;;  %v1277_v4 = vsel %vm1266_vm7, %v1244_v0, %v1276_v38  ;;  %v1510_v38 = vperm.slane %v9144_v32, 0  ;;  %v1512_v6 = vperm.slane %v9144_v32, 2 }
 0x32c   : > { %1294 = vst [vmem:[#allocation2 + $0x160] sm:$0xff] %v1275_v3 }
 0x32d   : > { %1295 = vst [vmem:[#allocation2 + $0x168] sm:$0xff] %v1277_v4 }
 0x32f   : > { %v1248_v7 = vpop.permute.xlu0 %1247  ;;  %v1250_v11 = vpop.permute.xlu1 %1249 }
 0x330   : > { %v1262_v59 = vrot.slane %v1248_v7, 4  ;;  %v1263_v13 = vrot.slane %v1250_v11, 4 }
 0x332   : > { %v1278_v14 = vsel %vm479_vm3, %v1262_v59, %v1263_v13  ;;  %v1280_v27 = vsel %vm479_vm3, %v1263_v13, %v1264_v40  ;;  %v1475_v59 = vpack.c.bf16 %v11339_v22, %v11397_v49  ;;  %v1477_v13 = vpack.c.bf16 %v11351_v43, %v11407_v10 }
 0x333   : > { %v1279_v21 = vsel %vm1266_vm7, %v1248_v7, %v1278_v14  ;;  %v1281_v23 = vsel %vm1266_vm7, %v1250_v11, %v1280_v27  ;;  %v1513_v7 = vperm.slane %v9144_v32, 3  ;;  %v1511_v11 = vperm.slane %v9144_v32, 1  ;;  %v9153_v14 = vld [vmem:[%s15532_s2] sm:$0xf]  ;;  %v10405_v27 = vld [vmem:[%s15532_s2 + $0xc] sm:$0xf0] }
 0x334   : > { %1296 = vst [vmem:[#allocation2 + $0x170] sm:$0xff] %v1279_v21  ;;  %v11436_v21 = vor.u32 %v10405_v27, %v9153_v14  ;;  %v9185_v27 = vld [vmem:[%s15532_s2 + $0x40] sm:$0xf] }
 0x335   : > { %1297 = vst [vmem:[#allocation2 + $0x178] sm:$0xff] %v1281_v23  ;;  %v1471_v23 = vpack.c.bf16 %v11317_v41, %v11313_v26 }
 0x336   : > { %1483 = vst [vmem:[#allocation2 + $0x1e0] sm:$0xff] %v1475_v59  ;;  %3409 = vmatmul.bf16.vlgmr.msra.gmra.mxu0 %v11436_v21  ;;  %v1478_v59 = vpack.c.bf16 %v11300_v56, %v11355_v51 }
 0x337   : > { %v1326_v28 = vpop.permute.xlu0 %1325  ;;  %v1328_v31 = vpop.permute.xlu1 %1327  ;;  %1485 = vst [vmem:[#allocation2 + $0x1f0] sm:$0xff] %v1477_v13 }
 0x338   : > { %v1342_v50 = vmul.f32 0.0, %v1326_v28  ;;  %v1334_v17 = vsel %vm1333_vm8, %v1326_v28, %v1328_v31  ;;  %v1335_v37 = vsel %vm1333_vm8, %v1328_v31, %v1330_v2  ;;  %v1473_v28 = vpack.c.bf16 %v11325_v30, %v11384_v44  ;;  %1479 = vst [vmem:[#allocation2 + $0x1c0] sm:$0xff] %v1471_v23  ;;  %v10413_v23 = vld [vmem:[%s15532_s2 + $0x4c] sm:$0xf0] }
 0x339   : > { %v1343_v33 = vmul.f32 %v11313_v26, %v1334_v17  ;;  %v1348_v53 = vmul.f32 %v11384_v44, %v1334_v17  ;;  %v1344_v46 = vmul.f32 %v11317_v41, %v1335_v37  ;;  %v1353_v52 = vmul.f32 %v11397_v49, %v1334_v17  ;;  %1486 = vst [vmem:[#allocation2 + $0x1f8] sm:$0xff] %v1478_v59 }
 0x33a   : > { %v1349_v36 = vmul.f32 %v11325_v30, %v1335_v37  ;;  %v1358_v57 = vmul.f32 %v11407_v10, %v1334_v17  ;;  %v1354_v58 = vmul.f32 %v11339_v22, %v1335_v37  ;;  %v1359_v24 = vmul.f32 %v11351_v43, %v1335_v37  ;;  %1481 = vst [vmem:[#allocation2 + $0x1d0] sm:$0xff] %v1473_v28 }
 0x33b   : > { %v1362_v35 = vpack.c.bf16 %v1343_v33, %v1342_v50  ;;  %v1365_v47 = vpack.c.bf16 %v1348_v53, %v1342_v50  ;;  %v1368_v55 = vpack.c.bf16 %v1353_v52, %v1342_v50  ;;  %v10465_v59 = vld [vmem:[#allocation2 + $0x16c] sm:$0xf0] }
 0x33c   : > { %v1371_v0 = vpack.c.bf16 %v1358_v57, %v1342_v50 }
 0x33d   : > { %1386 = vrot.lane.b32.xlu1 %v1362_v35, %s10817_s17  ;;  %v9457_v33 = vld [vmem:[#allocation2 + $0x1e0] sm:$0xf] }
 0x33e   : > { %v10481_v37 = vld [vmem:[#allocation2 + $0x1ec] sm:$0xf0] }
 0x33f   : > { %v1332_v39 = vpop.permute.xlu0 %1331 }
 0x340   : > { %v1346_v45 = vmul.f32 %v11273_v29, %v1332_v39  ;;  %v1336_v15 = vsel %vm1333_vm8, %v1330_v2, %v1332_v39  ;;  %v1351_v5 = vmul.f32 %v11282_v34, %v1332_v39  ;;  %v1356_v25 = vmul.f32 %v11291_v48, %v1332_v39  ;;  %v10479_v2 = vld [vmem:[#allocation2 + $0x1e4] sm:$0xf] }
 0x341   : > { %v1345_v20 = vmul.f32 %v11308_v1, %v1336_v15  ;;  %v1350_v8 = vmul.f32 %v11329_v12, %v1336_v15  ;;  %v1355_v9 = vmul.f32 %v11343_v42, %v1336_v15  ;;  %v1361_v19 = vmul.f32 %v11300_v56, %v1332_v39  ;;  %v9459_v39 = vld [vmem:[#allocation2 + $0x1f0] sm:$0xf0] }
 0x342   : > { %v1364_v61 = vpack.c.bf16 %v1346_v45, %v1346_v45  ;;  %v1367_v18 = vpack.c.bf16 %v1351_v5, %v1351_v5  ;;  %v1370_v60 = vpack.c.bf16 %v1356_v25, %v1356_v25  ;;  %v1360_v16 = vmul.f32 %v11355_v51, %v1336_v15 }
 0x343   : > { %v1363_v62 = vpack.c.bf16 %v1345_v20, %v1344_v46  ;;  %v1366_v54 = vpack.c.bf16 %v1350_v8, %v1349_v36  ;;  %v1369_v63 = vpack.c.bf16 %v1355_v9, %v1354_v58  ;;  %v1373_v3 = vpack.c.bf16 %v1361_v19, %v1361_v19  ;;  %v9441_v20 = vld [vmem:[#allocation2 + $0x1c0] sm:$0xf] }
 0x344   : > { %1390 = vrot.lane.b32.xlu0 %v1364_v61, %s10817_s17  ;;  %v1372_v4 = vpack.c.bf16 %v1360_v16, %v1359_v24  ;;  %v9458_v45 = vor.u32 %v10481_v37, %v9457_v33  ;;  %v9462_v15 = vor.u32 %v10479_v2, %v9459_v39  ;;  %v10475_v61 = vld [vmem:[#allocation2 + $0x1c4] sm:$0xf]  ;;  %v9169_v58 = vld [vmem:[%s15532_s2 + $0x20] sm:$0xf]  ;;  %v1472_v33 = vpack.c.bf16 %v11273_v29, %v11308_v1 }
 0x345   : > { %1388 = vrot.lane.b32.xlu2 %v1363_v62, %s10817_s17  ;;  %1392 = vrot.lane.b32.xlu1 %v1365_v47, %s10817_s17  ;;  %v10477_v62 = vld [vmem:[#allocation2 + $0x1cc] sm:$0xf0]  ;;  %v9443_v47 = vld [vmem:[#allocation2 + $0x1d0] sm:$0xf0]  ;;  %v1474_v37 = vpack.c.bf16 %v11282_v34, %v11329_v12 }
 0x346   : > { %3430 = vmatpush.bf16.msra.mxu1 %v9458_v45  ;;  %3546 = vmatpush.bf16.msrb.mxu0 %v9462_v15  ;;  %v9442_v8 = vor.u32 %v10477_v62, %v9441_v20  ;;  %v9446_v52 = vor.u32 %v10475_v61, %v9443_v47  ;;  %1480 = vst [vmem:[#allocation2 + $0x1c8] sm:$0xff] %v1472_v33  ;;  %v10463_v33 = vld [vmem:[#allocation2 + $0x164] sm:$0xf] }
 0x347   : > { %1482 = vst [vmem:[#allocation2 + $0x1d8] sm:$0xff] %v1474_v37 }
 0x34a   : > { %3431 = vmatpush.bf16.msra.mxu1 %v9442_v8  ;;  %3547 = vmatpush.bf16.msrb.mxu0 %v9446_v52 }
 0x34c   : > { %1396 = vrot.lane.b32.xlu0 %v1367_v18, %s10817_s17 }
 0x34d   : > { %1394 = vrot.lane.b32.xlu2 %v1366_v54, %s10817_s17  ;;  %1398 = vrot.lane.b32.xlu1 %v1368_v55, %s10817_s17 }
 0x354   : > { %1402 = vrot.lane.b32.xlu0 %v1370_v60, %s10817_s17  ;;  %v10409_v60 = vld [vmem:[%s15532_s2 + $0x2c] sm:$0xf0] }
 0x355   : > { %1400 = vrot.lane.b32.xlu2 %v1369_v63, %s10817_s17  ;;  %1404 = vrot.lane.b32.xlu1 %v1371_v0, %s10817_s17  ;;  %v11455_v19 = vor.u32 %v10409_v60, %v9169_v58 }
 0x357   : > { %3414 = vmatmul.bf16.gmra.mxu0 %v11455_v19 }
 0x35c   : > { %1408 = vrot.lane.b32.xlu0 %v1373_v3, %s10817_s17 }
 0x35d   : > { %1406 = vrot.lane.b32.xlu2 %v1372_v4, %s10817_s17  ;;  %1514 = vrot.lane.b32.xlu1 %v1510_v38, %s10817_s17 }
 0x364   : > { %1518 = vrot.lane.b32.xlu0 %v1512_v6, %s10817_s17 }
 0x365   : > { %1520 = vrot.lane.b32.xlu1 %v1513_v7, %s10817_s17  ;;  %1516 = vrot.lane.b32.xlu2 %v1511_v11, %s10817_s17 }
 0x39f   : > { %v1389_v40 = vpop.permute.xlu2 %1388 }
 0x3a0   : > { %v1411_v50 = vrot.slane %v1389_v40, 4 }
 0x3a7   : > { %v1395_v35 = vpop.permute.xlu2 %1394 }
 0x3a8   : > { %v1414_v54 = vrot.slane %v1395_v35, 4 }
 0x3af   : > { %v1387_v31 = vpop.permute.xlu1 %1386  ;;  %v1401_v63 = vpop.permute.xlu2 %1400 }
 0x3b0   : > { %v1410_v17 = vrot.slane %v1387_v31, 4  ;;  %v1417_v38 = vrot.slane %v1401_v63, 4 }
 0x3b2   : > { %v1422_v53 = vsel %vm479_vm3, %v1410_v17, %v1411_v50 }
 0x3b3   : > { %v1424_v46 = vsel %vm1423_vm9, %v1387_v31, %v1422_v53 }
 0x3b4   : > { %1447 = vst [vmem:[#allocation2 + $0x180] sm:$0xff] %v1424_v46 }
 0x3b6   : > { %v1391_v5 = vpop.permute.xlu0 %1390 }
 0x3b7   : > { %v1412_v36 = vrot.slane %v1391_v5, 4  ;;  %v1393_v18 = vpop.permute.xlu1 %1392  ;;  %v1407_v13 = vpop.permute.xlu2 %1406 }
 0x3b8   : > { %v1413_v55 = vrot.slane %v1393_v18, 4 }
 0x3b9   : > { %v1425_v25 = vsel %vm479_vm3, %v1411_v50, %v1412_v36  ;;  %v1420_v50 = vrot.slane %v1407_v13, 4 }
 0x3ba   : > { %v1426_v9 = vsel %vm1423_vm9, %v1389_v40, %v1425_v25  ;;  %v1427_v57 = vsel %vm479_vm3, %v1413_v55, %v1414_v54  ;;  %v1476_v40 = vpack.c.bf16 %v11291_v48, %v11343_v42 }
 0x3bb   : > { %1448 = vst [vmem:[#allocation2 + $0x188] sm:$0xff] %v1426_v9  ;;  %v1428_v0 = vsel %vm1423_vm9, %v1393_v18, %v1427_v57 }
 0x3bc   : > { %1449 = vst [vmem:[#allocation2 + $0x190] sm:$0xff] %v1428_v0  ;;  %v9409_v0 = vld [vmem:[#allocation2 + $0x180] sm:$0xf] }
 0x3bd   : > { %1484 = vst [vmem:[#allocation2 + $0x1e8] sm:$0xff] %v1476_v40 }
 0x3be   : > { %v1397_v32 = vpop.permute.xlu0 %1396 }
 0x3bf   : > { %v1415_v16 = vrot.slane %v1397_v32, 4  ;;  %v1399_v24 = vpop.permute.xlu1 %1398  ;;  %v1517_v15 = vpop.permute.xlu2 %1516 }
 0x3c0   : > { %v1416_v3 = vrot.slane %v1399_v24, 4 }
 0x3c1   : > { %v1429_v4 = vsel %vm479_vm3, %v1414_v54, %v1415_v16 }
 0x3c2   : > { %v1430_v6 = vsel %vm1423_vm9, %v1395_v35, %v1429_v4  ;;  %v1431_v7 = vsel %vm479_vm3, %v1416_v3, %v1417_v38  ;;  %v11475_v35 = vor.u32 %v10413_v23, %v9185_v27  ;;  %v9201_v27 = vld [vmem:[%s15532_s2 + $0x60] sm:$0xf]  ;;  %v10417_v23 = vld [vmem:[%s15532_s2 + $0x6c] sm:$0xf0] }
 0x3c3   : > { %1450 = vst [vmem:[#allocation2 + $0x198] sm:$0xff] %v1430_v6  ;;  %v1432_v11 = vsel %vm1423_vm9, %v1399_v24, %v1431_v7  ;;  %v10469_v58 = vld [vmem:[#allocation2 + $0x18c] sm:$0xf0]  ;;  %v9411_v60 = vld [vmem:[#allocation2 + $0x190] sm:$0xf0]  ;;  %v11520_v37 = vor.u32 %v10417_v23, %v9201_v27 }
 0x3c4   : > { %1451 = vst [vmem:[#allocation2 + $0x1a0] sm:$0xff] %v1432_v11  ;;  %3419 = vmatmul.bf16.gmra.mxu0 %v11475_v35  ;;  %v9410_v24 = vor.u32 %v10469_v58, %v9409_v0  ;;  %v10482_v58 = vld [vmem:[#allocation2 + $0x1f4] sm:$0xf0]  ;;  %v9347_v0 = vld [vmem:[#allocation2 + $0x110] sm:$0xf0] }
 0x3c5   : > { %v10403_v27 = vld [vmem:[%s15532_s2 + $0x4] sm:$0xf] }
 0x3c6   : > { %v1403_v14 = vpop.permute.xlu0 %1402 }
 0x3c7   : > { %v1418_v28 = vrot.slane %v1403_v14, 4  ;;  %v1405_v31 = vpop.permute.xlu1 %1404  ;;  %v9395_v14 = vld [vmem:[#allocation2 + $0x170] sm:$0xf0] }
 0x3c8   : > { %v1419_v17 = vrot.slane %v1405_v31, 4 }
 0x3c9   : > { %v1433_v2 = vsel %vm479_vm3, %v1417_v38, %v1418_v28  ;;  %v10467_v38 = vld [vmem:[#allocation2 + $0x184] sm:$0xf] }
 0x3ca   : > { %v1434_v39 = vsel %vm1423_vm9, %v1401_v63, %v1433_v2  ;;  %v1435_v53 = vsel %vm479_vm3, %v1419_v17, %v1420_v50  ;;  %v9414_v11 = vor.u32 %v10467_v38, %v9411_v60  ;;  %v9393_v17 = vld [vmem:[#allocation2 + $0x160] sm:$0xf]  ;;  %v9398_v2 = vor.u32 %v10463_v33, %v9395_v14  ;;  %v10451_v38 = vld [vmem:[#allocation2 + $0x104] sm:$0xf]  ;;  %v10478_v14 = vld [vmem:[#allocation2 + $0x1d4] sm:$0xf0] }
 0x3cb   : > { %1452 = vst [vmem:[#allocation2 + $0x1a8] sm:$0xff] %v1434_v39  ;;  %v1436_v45 = vsel %vm1423_vm9, %v1405_v31, %v1435_v53  ;;  %v9425_v36 = vld [vmem:[#allocation2 + $0x1a0] sm:$0xf]  ;;  %v10471_v18 = vld [vmem:[#allocation2 + $0x1a4] sm:$0xf] }
 0x3cc   : > { %1453 = vst [vmem:[#allocation2 + $0x1b0] sm:$0xff] %v1436_v45  ;;  %v10461_v39 = vld [vmem:[#allocation2 + $0x14c] sm:$0xf0]  ;;  %v9379_v53 = vld [vmem:[#allocation2 + $0x150] sm:$0xf0] }
 0x3cd   : > { %v9377_v45 = vld [vmem:[#allocation2 + $0x140] sm:$0xf] }
 0x3ce   : > { %v1409_v46 = vpop.permute.xlu0 %1408 }
 0x3cf   : > { %v1421_v20 = vrot.slane %v1409_v46, 4  ;;  %v11483_v61 = vpop.permute.xlu1 %1514 }
 0x3d0   : > { %v11487_v62 = vsel %vm1423_vm9, %v11483_v61, %v1517_v15  ;;  %v1531_v47 = vmul.f32 %v11313_v26, %v11483_v61  ;;  %v1536_v3 = vmul.f32 %v11384_v44, %v11483_v61  ;;  %v1541_v46 = vmul.f32 %v11397_v49, %v11483_v61 }
 0x3d1   : > { %v1437_v5 = vsel %vm479_vm3, %v1420_v50, %v1421_v20  ;;  %v1532_v8 = vmul.f32 %v11317_v41, %v11487_v62  ;;  %v1537_v4 = vmul.f32 %v11325_v30, %v11487_v62  ;;  %v1542_v20 = vmul.f32 %v11339_v22, %v11487_v62 }
 0x3d2   : > { %v1438_v52 = vsel %vm1423_vm9, %v1407_v13, %v1437_v5 }
 0x3d3   : > { %1454 = vst [vmem:[#allocation2 + $0x1b8] sm:$0xff] %v1438_v52  ;;  %v1551_v54 = vpack.c.bf16 %v1532_v8, %v1531_v47  ;;  %v10473_v55 = vld [vmem:[#allocation2 + $0x1ac] sm:$0xf0]  ;;  %v9427_v25 = vld [vmem:[#allocation2 + $0x1b0] sm:$0xf0]  ;;  %v1554_v31 = vpack.c.bf16 %v1537_v4, %v1536_v3  ;;  %v9378_v8 = vor.u32 %v10461_v39, %v9377_v45  ;;  %v1546_v3 = vmul.f32 %v11407_v10, %v11483_v61 }
 0x3d4   : > { %v9426_v9 = vor.u32 %v10473_v55, %v9425_v36  ;;  %v9430_v57 = vor.u32 %v10471_v18, %v9427_v25  ;;  %3424 = vmatmul.bf16.gmra.mxu0 %v11520_v37  ;;  %v10457_v36 = vld [vmem:[#allocation2 + $0x12c] sm:$0xf0]  ;;  %v9363_v18 = vld [vmem:[#allocation2 + $0x130] sm:$0xf0]  ;;  %v1557_v55 = vpack.c.bf16 %v1542_v20, %v1541_v46  ;;  %v1547_v4 = vmul.f32 %v11351_v43, %v11487_v62  ;;  %v10470_v45 = vld [vmem:[#allocation2 + $0x194] sm:$0xf0] }
 0x3d5   : > { %1575 = vrot.lane.b32.xlu2 %v1551_v54, %s10816_s14  ;;  %v9361_v54 = vld [vmem:[#allocation2 + $0x120] sm:$0xf]  ;;  %v9155_v61 = vld [vmem:[%s15532_s2 + $0x10] sm:$0xf0]  ;;  %v9417_v46 = vld [vmem:[#allocation2 + $0x188] sm:$0xf] }
 0x3d6   : > { %3432 = vmatpush.bf16.msra.mxu1 %v9426_v9  ;;  %3548 = vmatpush.bf16.msrb.mxu0 %v9430_v57  ;;  %v1519_v63 = vpop.permute.xlu0 %1518  ;;  %v10455_v9 = vld [vmem:[#allocation2 + $0x124] sm:$0xf]  ;;  %v9465_v57 = vld [vmem:[#allocation2 + $0x1e8] sm:$0xf]  ;;  %v9362_v60 = vor.u32 %v10457_v36, %v9361_v54  ;;  %v1560_v62 = vpack.c.bf16 %v1547_v4, %v1546_v3  ;;  %v10466_v20 = vld [vmem:[#allocation2 + $0x174] sm:$0xf0] }
 0x3d7   : > { %v11497_v32 = vsel %vm1423_vm9, %v1517_v15, %v1519_v63  ;;  %v1521_v16 = vpop.permute.xlu1 %1520  ;;  %v10459_v15 = vld [vmem:[#allocation2 + $0x144] sm:$0xf]  ;;  %v9385_v36 = vld [vmem:[#allocation2 + $0x148] sm:$0xf]  ;;  %v9419_v4 = vld [vmem:[#allocation2 + $0x198] sm:$0xf0] }
 0x3d8   : > { %v11504_v6 = vsel %vm1423_vm9, %v1519_v63, %v1521_v16  ;;  %v1535_v7 = vmul.f32 0.0, %v1521_v16  ;;  %v1533_v40 = vmul.f32 %v11308_v1, %v11497_v32  ;;  %v1538_v47 = vmul.f32 %v11329_v12, %v11497_v32  ;;  %v9369_v54 = vld [vmem:[#allocation2 + $0x128] sm:$0xf] }
 0x3d9   : > { %v1534_v13 = vmul.f32 %v11273_v29, %v11504_v6  ;;  %v9394_v29 = vor.u32 %v10465_v59, %v9393_v17  ;;  %v1539_v5 = vmul.f32 %v11282_v34, %v11504_v6  ;;  %v9382_v52 = vor.u32 %v10459_v15, %v9379_v53  ;;  %v10453_v34 = vld [vmem:[#allocation2 + $0x10c] sm:$0xf0] }
 0x3da   : > { %v11516_v28 = vpack.c.bf16 %v1535_v7, %v1535_v7  ;;  %3433 = vmatpush.bf16.msra.mxu1 %v9410_v24  ;;  %3549 = vmatpush.bf16.msrb.mxu0 %v9414_v11  ;;  %v9366_v63 = vor.u32 %v10455_v9, %v9363_v18  ;;  %v9466_v16 = vor.u32 %v10482_v58, %v9465_v57  ;;  %v9345_v24 = vld [vmem:[#allocation2 + $0x100] sm:$0xf]  ;;  %v10458_v18 = vld [vmem:[#allocation2 + $0x134] sm:$0xf0]  ;;  %v9467_v9 = vld [vmem:[#allocation2 + $0x1f8] sm:$0xf0] }
 0x3db   : > { %v1552_v50 = vpack.c.bf16 %v1534_v13, %v1533_v40  ;;  %v1555_v25 = vpack.c.bf16 %v1539_v5, %v1538_v47  ;;  %v1543_v7 = vmul.f32 %v11343_v42, %v11497_v32  ;;  %v1544_v11 = vmul.f32 %v11291_v48, %v11504_v6  ;;  %v9449_v13 = vld [vmem:[#allocation2 + $0x1c8] sm:$0xf]  ;;  %v10454_v57 = vld [vmem:[#allocation2 + $0x114] sm:$0xf0] }
 0x3dc   : > { %1579 = vrot.lane.b32.xlu1 %v11516_v28, %s10816_s14  ;;  %v9346_v40 = vor.u32 %v10453_v34, %v9345_v24  ;;  %v9350_v59 = vor.u32 %v10451_v38, %v9347_v0  ;;  %v11553_v48 = vor.u32 %v10403_v27, %v9155_v61  ;;  %v9145_v17 = vld [vmem:[%s15531_s1 + $0x40] ss:$8 sm:$0xf]  ;;  %v1548_v33 = vmul.f32 %v11355_v51, %v11497_v32  ;;  %v10476_v34 = vld [vmem:[#allocation2 + $0x1cc] sm:$0xf] }
 0x3dd   : > { %1581 = vrot.lane.b32.xlu2 %v1554_v31, %s10816_s14  ;;  %1577 = vrot.lane.b32.xlu0 %v1552_v50, %s10816_s14  ;;  %v1558_v23 = vpack.c.bf16 %v1544_v11, %v1543_v7  ;;  %v9450_v31 = vor.u32 %v10478_v14, %v9449_v13  ;;  %v10474_v50 = vld [vmem:[#allocation2 + $0x1b4] sm:$0xf0]  ;;  %v1667_v53 = vperm.slane %v9145_v17, 0  ;;  %v9418_v32 = vor.u32 %v10470_v45, %v9417_v46  ;;  %v9353_v58 = vld [vmem:[#allocation2 + $0x108] sm:$0xf] }
 0x3de   : > { %3434 = vmatpush.bf16.msra.mxu1 %v9394_v29  ;;  %3550 = vmatpush.bf16.msrb.mxu0 %v9398_v2  ;;  %v1549_v29 = vmul.f32 %v11300_v56, %v11504_v6  ;;  %v9433_v2 = vld [vmem:[#allocation2 + $0x1a8] sm:$0xf]  ;;  %v1669_v6 = vperm.slane %v9145_v17, 2  ;;  %v1670_v5 = vperm.slane %v9145_v17, 3  ;;  %v9451_v0 = vld [vmem:[#allocation2 + $0x1d8] sm:$0xf0] }
 0x3df   : > { %v9434_v39 = vor.u32 %v10474_v50, %v9433_v2  ;;  %v9401_v56 = vld [vmem:[#allocation2 + $0x168] sm:$0xf]  ;;  %v9435_v24 = vld [vmem:[#allocation2 + $0x1b8] sm:$0xf0]  ;;  %v10472_v38 = vld [vmem:[#allocation2 + $0x1ac] sm:$0xf] }
 0x3e0   : > { %v1561_v15 = vpack.c.bf16 %v1549_v29, %v1548_v33  ;;  %v9402_v47 = vor.u32 %v10466_v20, %v9401_v56  ;;  %v9438_v3 = vor.u32 %v10472_v38, %v9435_v24  ;;  %v10468_v7 = vld [vmem:[#allocation2 + $0x18c] sm:$0xf]  ;;  %v9387_v14 = vld [vmem:[#allocation2 + $0x158] sm:$0xf0] }
 0x3e1   : > { %v9422_v11 = vor.u32 %v10468_v7, %v9419_v4  ;;  %v10460_v27 = vld [vmem:[#allocation2 + $0x14c] sm:$0xf]  ;;  %v9355_v50 = vld [vmem:[#allocation2 + $0x118] sm:$0xf0] }
 0x3e2   : > { %3435 = vmatpush.bf16.msra.mxu1 %v9378_v8  ;;  %3551 = vmatpush.bf16.msrb.mxu0 %v9382_v52  ;;  %v1668_v8 = vperm.slane %v9145_v17, 1  ;;  %v10462_v52 = vld [vmem:[#allocation2 + $0x154] sm:$0xf0]  ;;  %v9390_v61 = vor.u32 %v10460_v27, %v9387_v14  ;;  %v10452_v17 = vld [vmem:[#allocation2 + $0x10c] sm:$0xf] }
 0x3e3   : > { %v9358_v33 = vor.u32 %v10452_v17, %v9355_v50 }
 0x3e4   : > { %1585 = vrot.lane.b32.xlu1 %v11516_v28, %s10816_s14 }
 0x3e5   : > { %1587 = vrot.lane.b32.xlu2 %v1557_v55, %s10816_s14  ;;  %1583 = vrot.lane.b32.xlu0 %v1555_v25, %s10816_s14  ;;  %v9370_v55 = vor.u32 %v10458_v18, %v9369_v54  ;;  %v10480_v25 = vld [vmem:[#allocation2 + $0x1ec] sm:$0xf] }
 0x3e6   : > { %3436 = vmatpush.bf16.msra.mxu1 %v9362_v60  ;;  %3552 = vmatpush.bf16.msrb.mxu0 %v9366_v63  ;;  %v9470_v60 = vor.u32 %v10480_v25, %v9467_v9  ;;  %v9354_v63 = vor.u32 %v10454_v57, %v9353_v58 }
 0x3ea   : > { %3437 = vmatpush.bf16.msra.mxu1 %v9346_v40  ;;  %3553 = vmatpush.bf16.msrb.mxu0 %v9350_v59  ;;  %v9403_v40 = vld [vmem:[#allocation2 + $0x178] sm:$0xf0]  ;;  %v10464_v59 = vld [vmem:[#allocation2 + $0x16c] sm:$0xf] }
 0x3eb   : > { %v9406_v13 = vor.u32 %v10464_v59, %v9403_v40 }
 0x3ec   : > { %1591 = vrot.lane.b32.xlu1 %v11516_v28, %s10816_s14 }
 0x3ed   : > { %1593 = vrot.lane.b32.xlu2 %v1560_v62, %s10816_s14  ;;  %1589 = vrot.lane.b32.xlu0 %v1558_v23, %s10816_s14  ;;  %v9371_v62 = vld [vmem:[#allocation2 + $0x138] sm:$0xf0]  ;;  %v10456_v23 = vld [vmem:[#allocation2 + $0x12c] sm:$0xf] }
 0x3ee   : > { %3662 = vmatpush.bf16.msra.mxu0 %v9466_v16  ;;  %3438 = vmatmul.bf16.vlgmr.msra.gmra.mxu1 %v11553_v48  ;;  %v9454_v16 = vor.u32 %v10476_v34, %v9451_v0 }
 0x3ef   : > { %3554 = vmatmul.bf16.vlgmr.msrb.gmra.mxu0 %v11553_v48 }
 0x3f2   : > { %3663 = vmatpush.bf16.msra.mxu0 %v9450_v31  ;;  %v9374_v31 = vor.u32 %v10456_v23, %v9371_v62 }
 0x3f4   : > { %1597 = vrot.lane.b32.xlu1 %v11516_v28, %s10816_s14  ;;  %v9386_v28 = vor.u32 %v10462_v52, %v9385_v36 }
 0x3f5   : > { %1671 = vrot.lane.b32.xlu2 %v1667_v53, %s10815_s9  ;;  %1595 = vrot.lane.b32.xlu0 %v1561_v15, %s10816_s14 }
 0x3f6   : > { %3664 = vmatpush.bf16.msra.mxu0 %v9434_v39 }
 0x3fa   : > { %3665 = vmatpush.bf16.msra.mxu0 %v9418_v32 }
 0x3fc   : > { %1675 = vrot.lane.b32.xlu1 %v1669_v6, %s10815_s9 }
 0x3fd   : > { %1677 = vrot.lane.b32.xlu2 %v1670_v5, %s10815_s9  ;;  %1673 = vrot.lane.b32.xlu0 %v1668_v8, %s10815_s9 }
 0x3fe   : > { %3666 = vmatpush.bf16.msra.mxu0 %v9402_v47 }
 0x402   : > { %3667 = vmatpush.bf16.msra.mxu0 %v9386_v28 }
 0x406   : > { %3668 = vmatpush.bf16.msra.mxu0 %v9370_v55 }
 0x40a   : > { %3669 = vmatpush.bf16.msra.mxu0 %v9354_v63 }
 0x40e   : > { %3778 = vmatpush.bf16.msrb.mxu0 %v9470_v60 }
 0x412   : > { %3779 = vmatpush.bf16.msrb.mxu0 %v9454_v16 }
 0x416   : > { %3780 = vmatpush.bf16.msrb.mxu0 %v9438_v3 }
 0x41a   : > { %3781 = vmatpush.bf16.msrb.mxu0 %v9422_v11 }
 0x41e   : > { %3782 = vmatpush.bf16.msrb.mxu0 %v9406_v13 }
 0x422   : > { %3783 = vmatpush.bf16.msrb.mxu0 %v9390_v61 }
 0x426   : > { %3784 = vmatpush.bf16.msrb.mxu0 %v9374_v31 }
 0x42a   : > { %3785 = vmatpush.bf16.msrb.mxu0 %v9358_v33 }
 0x42f   : > { %v1576_v29 = vpop.permute.xlu2 %1575 }
 0x430   : > { %v1599_v20 = vrot.slane %v1576_v29, 4 }
 0x437   : > { %v1582_v2 = vpop.permute.xlu2 %1581 }
 0x438   : > { %v1602_v54 = vrot.slane %v1582_v2, 4 }
 0x43f   : > { %v1588_v39 = vpop.permute.xlu2 %1587 }
 0x440   : > { %v1605_v24 = vrot.slane %v1588_v39, 4 }
 0x447   : > { %v1594_v53 = vpop.permute.xlu2 %1593 }
 0x448   : > { %v1608_v14 = vrot.slane %v1594_v53, 4 }
 0x44e   : > { %v1580_v45 = vpop.permute.xlu1 %1579 }
 0x44f   : > { %v1601_v15 = vrot.slane %v1580_v45, 4  ;;  %v11573_v46 = vpop.permute.xlu2 %1671  ;;  %v1578_v32 = vpop.permute.xlu0 %1577 }
 0x450   : > { %v1600_v56 = vrot.slane %v1578_v32, 4 }
 0x452   : > { %v1611_v6 = vsel %vm479_vm3, %v1599_v20, %v1600_v56  ;;  %v1614_v47 = vsel %vm479_vm3, %v1600_v56, %v1601_v15  ;;  %v1688_v15 = vmul.f32 %v11313_v26, %v11573_v46  ;;  %v1693_v26 = vmul.f32 %v11384_v44, %v11573_v46 }
 0x453   : > { %v1613_v5 = vsel %vm1333_vm8, %v1576_v29, %v1611_v6  ;;  %v1615_v8 = vsel %vm1333_vm8, %v1578_v32, %v1614_v47  ;;  %v11611_v47 = vld [vmem:[%s10913_s19 + $0x38] sm:$0xff] }
 0x454   : > { %1636 = vst [vmem:[#allocation2 + $0x200] sm:$0xff] %v1613_v5 }
 0x455   : > { %1637 = vst [vmem:[#allocation2 + $0x208] sm:$0xff] %v1615_v8 }
 0x456   : > { %v1586_v52 = vpop.permute.xlu1 %1585 }
 0x457   : > { %v1604_v36 = vrot.slane %v1586_v52, 4  ;;  %v1678_v28 = vpop.permute.xlu2 %1677  ;;  %v1584_v18 = vpop.permute.xlu0 %1583  ;;  %v9146_v52 = vld [vmem:[%s15531_s1 + $0x43] ss:$8 sm:$0xf] }
 0x458   : > { %v1692_v55 = vmul.f32 0.0, %v1678_v28  ;;  %v1603_v25 = vrot.slane %v1584_v18, 4 }
 0x45a   : > { %v1710_v9 = vpack.c.bf16 %v1692_v55, %v1692_v55  ;;  %v1616_v57 = vsel %vm479_vm3, %v1602_v54, %v1603_v25  ;;  %v1618_v58 = vsel %vm479_vm3, %v1603_v25, %v1604_v36  ;;  %v1698_v54 = vmul.f32 %v11397_v49, %v11573_v46 }
 0x45b   : > { %v1617_v60 = vsel %vm1333_vm8, %v1582_v2, %v1616_v57  ;;  %v1619_v63 = vsel %vm1333_vm8, %v1584_v18, %v1618_v58 }
 0x45c   : > { %1638 = vst [vmem:[#allocation2 + $0x210] sm:$0xff] %v1617_v60  ;;  %1736 = vrot.lane.b32.xlu2 %v1710_v9, %s10814_s30 }
 0x45d   : > { %1639 = vst [vmem:[#allocation2 + $0x218] sm:$0xff] %v1619_v63 }
 0x45e   : > { %v1592_v34 = vpop.permute.xlu1 %1591 }
 0x45f   : > { %v1607_v0 = vrot.slane %v1592_v34, 4  ;;  %v1590_v16 = vpop.permute.xlu0 %1589  ;;  %v1825_v34 = vperm.slane %v9146_v52, 1 }
 0x460   : > { %v1606_v38 = vrot.slane %v1590_v16, 4 }
 0x462   : > { %v1620_v3 = vsel %vm479_vm3, %v1605_v24, %v1606_v38  ;;  %v1622_v4 = vsel %vm479_vm3, %v1606_v38, %v1607_v0  ;;  %v1824_v0 = vperm.slane %v9146_v52, 0 }
 0x463   : > { %v1621_v7 = vsel %vm1333_vm8, %v1588_v39, %v1620_v3  ;;  %v1623_v11 = vsel %vm1333_vm8, %v1590_v16, %v1622_v4  ;;  %v11599_v39 = vld [vmem:[%s10913_s19 + $0x18] sm:$0xff] }
 0x464   : > { %1640 = vst [vmem:[#allocation2 + $0x220] sm:$0xff] %v1621_v7  ;;  %1742 = vrot.lane.b32.xlu2 %v1710_v9, %s10814_s30 }
 0x465   : > { %1641 = vst [vmem:[#allocation2 + $0x228] sm:$0xff] %v1623_v11 }
 0x466   : > { %v1598_v40 = vpop.permute.xlu1 %1597 }
 0x467   : > { %v1610_v59 = vrot.slane %v1598_v40, 4  ;;  %v1596_v13 = vpop.permute.xlu0 %1595 }
 0x468   : > { %v1609_v27 = vrot.slane %v1596_v13, 4 }
 0x46a   : > { %v1624_v61 = vsel %vm479_vm3, %v1608_v14, %v1609_v27  ;;  %v1626_v62 = vsel %vm479_vm3, %v1609_v27, %v1610_v59 }
 0x46b   : > { %v1625_v23 = vsel %vm1333_vm8, %v1594_v53, %v1624_v61  ;;  %v1627_v31 = vsel %vm1333_vm8, %v1596_v13, %v1626_v62 }
 0x46c   : > { %1642 = vst [vmem:[#allocation2 + $0x230] sm:$0xff] %v1625_v23  ;;  %1748 = vrot.lane.b32.xlu2 %v1710_v9, %s10814_s30 }
 0x46d   : > { %1643 = vst [vmem:[#allocation2 + $0x238] sm:$0xff] %v1627_v31 }
 0x46e   : > { %v1676_v50 = vpop.permute.xlu1 %1675 }
 0x46f   : > { %v1682_v17 = vsel %vm1266_vm7, %v1676_v50, %v1678_v28  ;;  %v1674_v33 = vpop.permute.xlu0 %1673  ;;  %v11624_v28 = vld [vmem:[%s10913_s19 + $0x58] sm:$0xff] }
 0x470   : > { %v1680_v29 = vsel %vm1266_vm7, %v11573_v46, %v1674_v33  ;;  %v1681_v2 = vsel %vm1266_vm7, %v1674_v33, %v1676_v50  ;;  %v1691_v53 = vmul.f32 %v11599_v39, %v1682_v17 }
 0x471   : > { %v1690_v45 = vmul.f32 %v11308_v1, %v1681_v2  ;;  %v1689_v32 = vmul.f32 %v11317_v41, %v1680_v29  ;;  %v1695_v6 = vmul.f32 %v11329_v12, %v1681_v2  ;;  %v1696_v1 = vmul.f32 %v11611_v47, %v1682_v17 }
 0x472   : > { %v1694_v5 = vmul.f32 %v11325_v30, %v1680_v29  ;;  %v1826_v12 = vperm.slane %v9146_v52, 2  ;;  %v1700_v36 = vmul.f32 %v11343_v42, %v1681_v2  ;;  %v1701_v30 = vmul.f32 %v11624_v28, %v1682_v17  ;;  %v11635_v42 = vld [vmem:[%s10913_s19 + $0x78] sm:$0xff] }
 0x473   : > { %v1709_v20 = vpack.c.bf16 %v1691_v53, %v1690_v45  ;;  %v1708_v56 = vpack.c.bf16 %v1689_v32, %v1688_v15  ;;  %v1712_v41 = vpack.c.bf16 %v1696_v1, %v1695_v6  ;;  %v1699_v18 = vmul.f32 %v11339_v22, %v1680_v29 }
 0x474   : > { %1754 = vrot.lane.b32.xlu2 %v1710_v9, %s10814_s30  ;;  %v1711_v8 = vpack.c.bf16 %v1694_v5, %v1693_v26  ;;  %v1715_v55 = vpack.c.bf16 %v1701_v30, %v1700_v36  ;;  %v1705_v9 = vmul.f32 %v11355_v51, %v1681_v2  ;;  %v1706_v57 = vmul.f32 %v11635_v42, %v1682_v17 }
 0x475   : > { %1734 = vrot.lane.b32.xlu1 %v1709_v20, %s10814_s30  ;;  %1732 = vrot.lane.b32.xlu0 %v1708_v56, %s10814_s30  ;;  %v1714_v25 = vpack.c.bf16 %v1699_v18, %v1698_v54  ;;  %v1704_v58 = vmul.f32 %v11351_v43, %v1680_v29  ;;  %v1703_v22 = vmul.f32 %v11407_v10, %v11573_v46  ;;  %v1827_v51 = vperm.slane %v9146_v52, 3 }
 0x476   : > { %v1718_v60 = vpack.c.bf16 %v1706_v57, %v1705_v9  ;;  %v11664_v9 = vld [vmem:[%s10913_s19] sm:$0xff] }
 0x477   : > { %v1717_v63 = vpack.c.bf16 %v1704_v58, %v1703_v22  ;;  %v11668_v58 = vld [vmem:[%s10913_s19 + $0x8] sm:$0xff] }
 0x47c   : > { %1832 = vrot.lane.b32.xlu2 %v1826_v12, %s10810_s12 }
 0x47d   : > { %1740 = vrot.lane.b32.xlu1 %v1712_v41, %s10814_s30  ;;  %1738 = vrot.lane.b32.xlu0 %v1711_v8, %s10814_s30 }
 0x485   : > { %1746 = vrot.lane.b32.xlu1 %v1715_v55, %s10814_s30  ;;  %1744 = vrot.lane.b32.xlu0 %v1714_v25, %s10814_s30 }
 0x48d   : > { %1752 = vrot.lane.b32.xlu1 %v1718_v60, %s10814_s30  ;;  %1750 = vrot.lane.b32.xlu0 %v1717_v63, %s10814_s30 }
 0x495   : > { %1830 = vrot.lane.b32.xlu1 %v1825_v34, %s10810_s12  ;;  %1828 = vrot.lane.b32.xlu0 %v1824_v0, %s10810_s12 }
 0x49d   : > { %1834 = vrot.lane.b32.xlu0 %v1827_v51, %s10810_s12 }
 0x4b6   : > { %v1737_v16 = vpop.permute.xlu2 %1736 }
 0x4b7   : > { %v1758_v38 = vrot.slane %v1737_v16, 4 }
 0x4be   : > { %v1743_v4 = vpop.permute.xlu2 %1742 }
 0x4bf   : > { %v1761_v27 = vrot.slane %v1743_v4, 4 }
 0x4c6   : > { %v1749_v50 = vpop.permute.xlu2 %1748 }
 0x4c7   : > { %v1764_v53 = vrot.slane %v1749_v50, 4  ;;  %v11703_v50 = vld [vmem:[%s10913_s19 + $0x68] sm:$0xff] }
 0x4ce   : > { %v1755_v1 = vpop.permute.xlu2 %1754 }
 0x4cf   : > { %v1767_v41 = vrot.slane %v1755_v1, 4 }
 0x4d6   : > { %v1833_v60 = vpop.permute.xlu2 %1832 }
 0x4e7   : > { %v1735_v43 = vpop.permute.xlu1 %1734  ;;  %v1733_v24 = vpop.permute.xlu0 %1732 }
 0x4e8   : > { %v1757_v46 = vrot.slane %v1735_v43, 4  ;;  %v1756_v3 = vrot.slane %v1733_v24, 4 }
 0x4ea   : > { %v1771_v7 = vsel %vm479_vm3, %v1757_v46, %v1758_v38  ;;  %v1768_v11 = vsel %vm479_vm3, %v1756_v3, %v1757_v46  ;;  %v11680_v46 = vld [vmem:[%s10913_s19 + $0x10] sm:$0xff] }
 0x4eb   : > { %v1772_v40 = vsel %vm1176_vm6, %v1735_v43, %v1771_v7  ;;  %v1770_v59 = vsel %vm1176_vm6, %v1733_v24, %v1768_v11  ;;  %v11676_v24 = vld [vmem:[%s10913_s19 + $0x28] sm:$0xff] }
 0x4ec   : > { %1794 = vst [vmem:[#allocation2 + $0x248] sm:$0xff] %v1772_v40 }
 0x4ed   : > { %1793 = vst [vmem:[#allocation2 + $0x240] sm:$0xff] %v1770_v59 }
 0x4ef   : > { %v1741_v13 = vpop.permute.xlu1 %1740  ;;  %v1739_v14 = vpop.permute.xlu0 %1738 }
 0x4f0   : > { %v1760_v61 = vrot.slane %v1741_v13, 4  ;;  %v1759_v62 = vrot.slane %v1739_v14, 4 }
 0x4f2   : > { %v1775_v23 = vsel %vm479_vm3, %v1760_v61, %v1761_v27  ;;  %v1773_v31 = vsel %vm479_vm3, %v1759_v62, %v1760_v61  ;;  %v11694_v27 = vld [vmem:[%s10913_s19 + $0x30] sm:$0xff] }
 0x4f3   : > { %v1776_v17 = vsel %vm1176_vm6, %v1741_v13, %v1775_v23  ;;  %v1774_v33 = vsel %vm1176_vm6, %v1739_v14, %v1773_v31  ;;  %v11690_v13 = vld [vmem:[%s10913_s19 + $0x48] sm:$0xff] }
 0x4f4   : > { %1796 = vst [vmem:[#allocation2 + $0x258] sm:$0xff] %v1776_v17 }
 0x4f5   : > { %1795 = vst [vmem:[#allocation2 + $0x250] sm:$0xff] %v1774_v33  ;;  %v11707_v33 = vld [vmem:[%s10913_s19 + $0x50] sm:$0xff] }
 0x4f7   : > { %v1747_v29 = vpop.permute.xlu1 %1746  ;;  %v1745_v2 = vpop.permute.xlu0 %1744 }
 0x4f8   : > { %v1763_v45 = vrot.slane %v1747_v29, 4  ;;  %v1762_v15 = vrot.slane %v1745_v2, 4 }
 0x4fa   : > { %v1779_v32 = vsel %vm479_vm3, %v1763_v45, %v1764_v53  ;;  %v1777_v20 = vsel %vm479_vm3, %v1762_v15, %v1763_v45  ;;  %v11718_v15 = vld [vmem:[%s10913_s19 + $0x70] sm:$0xff] }
 0x4fb   : > { %v1780_v56 = vsel %vm1176_vm6, %v1747_v29, %v1779_v32  ;;  %v1778_v6 = vsel %vm1176_vm6, %v1745_v2, %v1777_v20 }
 0x4fc   : > { %1798 = vst [vmem:[#allocation2 + $0x268] sm:$0xff] %v1780_v56 }
 0x4fd   : > { %1797 = vst [vmem:[#allocation2 + $0x260] sm:$0xff] %v1778_v6 }
 0x4ff   : > { %v1753_v5 = vpop.permute.xlu1 %1752  ;;  %v1751_v26 = vpop.permute.xlu0 %1750 }
 0x500   : > { %v1766_v8 = vrot.slane %v1753_v5, 4  ;;  %v1765_v52 = vrot.slane %v1751_v26, 4 }
 0x502   : > { %v1783_v12 = vsel %vm479_vm3, %v1766_v8, %v1767_v41  ;;  %v1781_v36 = vsel %vm479_vm3, %v1765_v52, %v1766_v8 }
 0x503   : > { %v1784_v30 = vsel %vm1176_vm6, %v1753_v5, %v1783_v12  ;;  %v1782_v18 = vsel %vm1176_vm6, %v1751_v26, %v1781_v36 }
 0x504   : > { %1800 = vst [vmem:[#allocation2 + $0x278] sm:$0xff] %v1784_v30 }
 0x505   : > { %1799 = vst [vmem:[#allocation2 + $0x270] sm:$0xff] %v1782_v18 }
 0x507   : > { %v1831_v54 = vpop.permute.xlu1 %1830  ;;  %v1829_v55 = vpop.permute.xlu0 %1828 }
 0x508   : > { %v1836_v25 = vsel %vm390_vm0, %v1829_v55, %v1831_v54  ;;  %v1844_v57 = vmul.f32 %v11664_v9, %v1829_v55  ;;  %v1837_v34 = vsel %vm390_vm0, %v1831_v54, %v1833_v60  ;;  %v1849_v43 = vmul.f32 %v11384_v44, %v1829_v55 }
 0x509   : > { %v1845_v22 = vmul.f32 %v11668_v58, %v1836_v25  ;;  %v1850_v38 = vmul.f32 %v11676_v24, %v1836_v25  ;;  %v1846_v3 = vmul.f32 %v11680_v46, %v1837_v34  ;;  %v1854_v59 = vmul.f32 %v11397_v49, %v1829_v55 }
 0x50a   : > { %v1855_v14 = vmul.f32 %v11690_v13, %v1836_v25  ;;  %v1851_v61 = vmul.f32 %v11694_v27, %v1837_v34  ;;  %v1859_v49 = vmul.f32 %v11407_v10, %v1829_v55  ;;  %v1860_v17 = vmul.f32 %v11703_v50, %v1836_v25  ;;  %v9147_v10 = vld [vmem:[%s15531_s1 + $0x45] ss:$8 sm:$0xf] }
 0x50b   : > { %v1864_v63 = vpack.c.bf16 %v1845_v22, %v1844_v57  ;;  %v1867_v40 = vpack.c.bf16 %v1850_v38, %v1849_v43  ;;  %v1856_v29 = vmul.f32 %v11707_v33, %v1837_v34  ;;  %v1861_v32 = vmul.f32 %v11718_v15, %v1837_v34 }
 0x50c   : > { %v1870_v23 = vpack.c.bf16 %v1855_v14, %v1854_v59  ;;  %v1873_v53 = vpack.c.bf16 %v1860_v17, %v1859_v49  ;;  %v1979_v20 = vperm.slane %v9147_v10, 0  ;;  %v1981_v6 = vperm.slane %v9147_v10, 2 }
 0x50d   : > { %1888 = vrot.lane.b32.xlu1 %v1864_v63, %s10812_s20  ;;  %v1980_v1 = vperm.slane %v9147_v10, 1  ;;  %v1982_v5 = vperm.slane %v9147_v10, 3 }
 0x50f   : > { %v1835_v0 = vpop.permute.xlu0 %1834 }
 0x510   : > { %v1838_v51 = vsel %vm390_vm0, %v1833_v60, %v1835_v0  ;;  %v1848_v16 = vmul.f32 0.0, %v1835_v0 }
 0x511   : > { %v1847_v4 = vmul.f32 %v11599_v39, %v1838_v51  ;;  %v1852_v44 = vmul.f32 %v11611_v47, %v1838_v51  ;;  %v1857_v31 = vmul.f32 %v11624_v28, %v1838_v51  ;;  %v1862_v45 = vmul.f32 %v11635_v42, %v1838_v51 }
 0x512   : > { %v1866_v7 = vpack.c.bf16 %v1848_v16, %v1848_v16 }
 0x513   : > { %v1865_v11 = vpack.c.bf16 %v1847_v4, %v1846_v3  ;;  %v1868_v62 = vpack.c.bf16 %v1852_v44, %v1851_v61  ;;  %v1871_v2 = vpack.c.bf16 %v1857_v31, %v1856_v29  ;;  %v1874_v56 = vpack.c.bf16 %v1862_v45, %v1861_v32 }
 0x514   : > { %1892 = vrot.lane.b32.xlu0 %v1866_v7, %s10812_s20 }
 0x515   : > { %1890 = vrot.lane.b32.xlu2 %v1865_v11, %s10812_s20  ;;  %1894 = vrot.lane.b32.xlu1 %v1867_v40, %s10812_s20 }
 0x51c   : > { %1898 = vrot.lane.b32.xlu0 %v1866_v7, %s10812_s20 }
 0x51d   : > { %1896 = vrot.lane.b32.xlu2 %v1868_v62, %s10812_s20  ;;  %1900 = vrot.lane.b32.xlu1 %v1870_v23, %s10812_s20 }
 0x524   : > { %1904 = vrot.lane.b32.xlu0 %v1866_v7, %s10812_s20 }
 0x525   : > { %1902 = vrot.lane.b32.xlu2 %v1871_v2, %s10812_s20  ;;  %1906 = vrot.lane.b32.xlu1 %v1873_v53, %s10812_s20 }
 0x52c   : > { %1910 = vrot.lane.b32.xlu0 %v1866_v7, %s10812_s20 }
 0x52d   : > { %1908 = vrot.lane.b32.xlu2 %v1874_v56, %s10812_s20  ;;  %1983 = vrot.lane.b32.xlu1 %v1979_v20, %s10809_s11 }
 0x534   : > { %1987 = vrot.lane.b32.xlu0 %v1981_v6, %s10809_s11 }
 0x535   : > { %1985 = vrot.lane.b32.xlu2 %v1980_v1, %s10809_s11  ;;  %1989 = vrot.lane.b32.xlu1 %v1982_v5, %s10809_s11 }
 0x56f   : > { %v1891_v26 = vpop.permute.xlu2 %1890 }
 0x570   : > { %v1913_v8 = vrot.slane %v1891_v26, 4 }
 0x577   : > { %v1897_v12 = vpop.permute.xlu2 %1896 }
 0x578   : > { %v1916_v25 = vrot.slane %v1897_v12, 4 }
 0x57f   : > { %v1889_v41 = vpop.permute.xlu1 %1888  ;;  %v1903_v34 = vpop.permute.xlu2 %1902 }
 0x580   : > { %v1912_v52 = vrot.slane %v1889_v41, 4  ;;  %v1919_v38 = vrot.slane %v1903_v34, 4 }
 0x582   : > { %v1924_v36 = vsel %vm479_vm3, %v1912_v52, %v1913_v8 }
 0x583   : > { %v1925_v30 = vsel %vm15544_vm4, %v1889_v41, %v1924_v36  ;;  %v11751_v36 = vld [vmem:[%s10913_s19 + $0x20] sm:$0xff] }
 0x584   : > { %1948 = vst [vmem:[#allocation2 + $0x280] sm:$0xff] %v1925_v30 }
 0x586   : > { %v1893_v18 = vpop.permute.xlu0 %1892 }
 0x587   : > { %v1914_v54 = vrot.slane %v1893_v18, 4  ;;  %v1895_v55 = vpop.permute.xlu1 %1894  ;;  %v1909_v44 = vpop.permute.xlu2 %1908 }
 0x588   : > { %v1915_v22 = vrot.slane %v1895_v55, 4  ;;  %v1922_v62 = vrot.slane %v1909_v44, 4 }
 0x589   : > { %v1926_v57 = vsel %vm479_vm3, %v1913_v8, %v1914_v54 }
 0x58a   : > { %v1927_v60 = vsel %vm15544_vm4, %v1891_v26, %v1926_v57  ;;  %v1928_v63 = vsel %vm479_vm3, %v1915_v22, %v1916_v25 }
 0x58b   : > { %1949 = vst [vmem:[#allocation2 + $0x288] sm:$0xff] %v1927_v60  ;;  %v1929_v0 = vsel %vm15544_vm4, %v1895_v55, %v1928_v63 }
 0x58c   : > { %1950 = vst [vmem:[#allocation2 + $0x290] sm:$0xff] %v1929_v0  ;;  %v11763_v0 = vld [vmem:[%s10913_s19 + $0x40] sm:$0xff] }
 0x58e   : > { %v1899_v51 = vpop.permute.xlu0 %1898 }
 0x58f   : > { %v1917_v16 = vrot.slane %v1899_v51, 4  ;;  %v1901_v43 = vpop.permute.xlu1 %1900  ;;  %v1986_v53 = vpop.permute.xlu2 %1985 }
 0x590   : > { %v1918_v4 = vrot.slane %v1901_v43, 4 }
 0x591   : > { %v1930_v3 = vsel %vm479_vm3, %v1916_v25, %v1917_v16 }
 0x592   : > { %v1931_v7 = vsel %vm15544_vm4, %v1897_v12, %v1930_v3  ;;  %v1932_v11 = vsel %vm479_vm3, %v1918_v4, %v1919_v38 }
 0x593   : > { %1951 = vst [vmem:[#allocation2 + $0x298] sm:$0xff] %v1931_v7  ;;  %v1933_v40 = vsel %vm15544_vm4, %v1901_v43, %v1932_v11  ;;  %v11773_v7 = vld [vmem:[%s10913_s19 + $0x60] sm:$0xff] }
 0x594   : > { %1952 = vst [vmem:[#allocation2 + $0x2a0] sm:$0xff] %v1933_v40 }
 0x596   : > { %v1905_v59 = vpop.permute.xlu0 %1904 }
 0x597   : > { %v1920_v14 = vrot.slane %v1905_v59, 4  ;;  %v1907_v61 = vpop.permute.xlu1 %1906  ;;  %v9148_v59 = vld [vmem:[%s15531_s1 + $0x46] ss:$8 sm:$0xf] }
 0x598   : > { %v1921_v31 = vrot.slane %v1907_v61, 4 }
 0x599   : > { %v1934_v23 = vsel %vm479_vm3, %v1919_v38, %v1920_v14 }
 0x59a   : > { %v1935_v49 = vsel %vm15544_vm4, %v1903_v34, %v1934_v23  ;;  %v1936_v17 = vsel %vm479_vm3, %v1921_v31, %v1922_v62  ;;  %v2136_v31 = vperm.slane %v9148_v59, 2 }
 0x59b   : > { %1953 = vst [vmem:[#allocation2 + $0x2a8] sm:$0xff] %v1935_v49  ;;  %v1937_v29 = vsel %vm15544_vm4, %v1907_v61, %v1936_v17  ;;  %v2135_v49 = vperm.slane %v9148_v59, 1  ;;  %v2137_v17 = vperm.slane %v9148_v59, 3 }
 0x59c   : > { %1954 = vst [vmem:[#allocation2 + $0x2b0] sm:$0xff] %v1937_v29 }
 0x59e   : > { %v1911_v2 = vpop.permute.xlu0 %1910 }
 0x59f   : > { %v1923_v45 = vrot.slane %v1911_v2, 4  ;;  %v1984_v10 = vpop.permute.xlu1 %1983 }
 0x5a0   : > { %v1991_v20 = vsel %vm548_vm1, %v1984_v10, %v1986_v53  ;;  %v1999_v56 = vmul.f32 %v11664_v9, %v1984_v10  ;;  %v2004_v30 = vmul.f32 %v11751_v36, %v1984_v10  ;;  %v2009_v51 = vmul.f32 %v11763_v0, %v1984_v10 }
 0x5a1   : > { %v1938_v32 = vsel %vm479_vm3, %v1922_v62, %v1923_v45  ;;  %v2000_v1 = vmul.f32 %v11668_v58, %v1991_v20  ;;  %v2005_v8 = vmul.f32 %v11676_v24, %v1991_v20  ;;  %v2010_v60 = vmul.f32 %v11690_v13, %v1991_v20 }
 0x5a2   : > { %v1939_v6 = vsel %vm15544_vm4, %v1909_v44, %v1938_v32  ;;  %v2015_v38 = vmul.f32 %v11703_v50, %v1991_v20  ;;  %v2014_v11 = vmul.f32 %v11773_v7, %v1984_v10  ;;  %v2134_v62 = vperm.slane %v9148_v59, 0 }
 0x5a3   : > { %1955 = vst [vmem:[#allocation2 + $0x2b8] sm:$0xff] %v1939_v6  ;;  %v2019_v5 = vpack.c.bf16 %v2000_v1, %v1999_v56  ;;  %v2022_v22 = vpack.c.bf16 %v2005_v8, %v2004_v30  ;;  %v2025_v43 = vpack.c.bf16 %v2010_v60, %v2009_v51 }
 0x5a4   : > { %v2028_v44 = vpack.c.bf16 %v2015_v38, %v2014_v11  ;;  %v10407_v38 = vld [vmem:[%s15532_s2 + $0x24] sm:$0xf] }
 0x5a5   : > { %2043 = vrot.lane.b32.xlu2 %v2019_v5, %s10813_s21 }
 0x5a6   : > { %v1988_v26 = vpop.permute.xlu0 %1987 }
 0x5a7   : > { %v1992_v41 = vsel %vm548_vm1, %v1986_v53, %v1988_v26  ;;  %v1990_v52 = vpop.permute.xlu1 %1989 }
 0x5a8   : > { %v2001_v12 = vmul.f32 %v11680_v46, %v1992_v41  ;;  %v2003_v18 = vmul.f32 0.0, %v1990_v52  ;;  %v1993_v54 = vsel %vm548_vm1, %v1988_v26, %v1990_v52  ;;  %v2006_v63 = vmul.f32 %v11694_v27, %v1992_v41 }
 0x5a9   : > { %v2002_v55 = vmul.f32 %v11599_v39, %v1993_v54  ;;  %v2007_v34 = vmul.f32 %v11611_v47, %v1993_v54  ;;  %v2011_v3 = vmul.f32 %v11707_v33, %v1992_v41  ;;  %v2012_v4 = vmul.f32 %v11624_v28, %v1993_v54 }
 0x5aa   : > { %v2021_v25 = vpack.c.bf16 %v2003_v18, %v2003_v18  ;;  %v2016_v14 = vmul.f32 %v11718_v15, %v1992_v41  ;;  %v2017_v61 = vmul.f32 %v11635_v42, %v1993_v54 }
 0x5ab   : > { %v2020_v57 = vpack.c.bf16 %v2002_v55, %v2001_v12  ;;  %v2023_v16 = vpack.c.bf16 %v2007_v34, %v2006_v63  ;;  %v2026_v40 = vpack.c.bf16 %v2012_v4, %v2011_v3  ;;  %v9171_v3 = vld [vmem:[%s15532_s2 + $0x30] sm:$0xf0] }
 0x5ac   : > { %2047 = vrot.lane.b32.xlu1 %v2021_v25, %s10813_s21  ;;  %v2029_v23 = vpack.c.bf16 %v2017_v61, %v2016_v14 }
 0x5ad   : > { %2045 = vrot.lane.b32.xlu0 %v2020_v57, %s10813_s21  ;;  %2049 = vrot.lane.b32.xlu2 %v2022_v22, %s10813_s21 }
 0x5b4   : > { %2053 = vrot.lane.b32.xlu1 %v2021_v25, %s10813_s21 }
 0x5b5   : > { %2051 = vrot.lane.b32.xlu0 %v2023_v16, %s10813_s21  ;;  %2055 = vrot.lane.b32.xlu2 %v2025_v43, %s10813_s21 }
 0x5bc   : > { %2059 = vrot.lane.b32.xlu1 %v2021_v25, %s10813_s21 }
 0x5bd   : > { %2057 = vrot.lane.b32.xlu0 %v2026_v40, %s10813_s21  ;;  %2061 = vrot.lane.b32.xlu2 %v2028_v44, %s10813_s21  ;;  %v11810_v40 = vor.u32 %v10407_v38, %v9171_v3  ;;  %v11866_v38 = vld [vmem:[%s15531_s1 + $0x47] ss:$8 sm:$0xf] }
 0x5bf   : > { %3443 = vmatmul.bf16.gmra.mxu1 %v11810_v40  ;;  %3559 = vmatmul.bf16.gmra.mxu0 %v11810_v40 }
 0x5c4   : > { %2065 = vrot.lane.b32.xlu1 %v2021_v25, %s10813_s21 }
 0x5c5   : > { %2063 = vrot.lane.b32.xlu0 %v2029_v23, %s10813_s21  ;;  %2138 = vrot.lane.b32.xlu2 %v2134_v62, %s10811_s15 }
 0x5cc   : > { %2142 = vrot.lane.b32.xlu1 %v2136_v31, %s10811_s15 }
 0x5cd   : > { %2140 = vrot.lane.b32.xlu0 %v2135_v49, %s10811_s15  ;;  %2144 = vrot.lane.b32.xlu2 %v2137_v17, %s10811_s15 }
 0x5ff   : > { %v2044_v29 = vpop.permute.xlu2 %2043 }
 0x600   : > { %v2067_v6 = vrot.slane %v2044_v29, 4 }
 0x607   : > { %v2050_v2 = vpop.permute.xlu2 %2049 }
 0x608   : > { %v2070_v54 = vrot.slane %v2050_v2, 4 }
 0x60f   : > { %v2056_v53 = vpop.permute.xlu2 %2055 }
 0x610   : > { %v2073_v4 = vrot.slane %v2056_v53, 4 }
 0x617   : > { %v2062_v45 = vpop.permute.xlu2 %2061 }
 0x618   : > { %v2076_v49 = vrot.slane %v2062_v45, 4 }
 0x61e   : > { %v2048_v10 = vpop.permute.xlu1 %2047 }
 0x61f   : > { %v2069_v32 = vrot.slane %v2048_v10, 4  ;;  %v2046_v20 = vpop.permute.xlu0 %2045  ;;  %v11790_v56 = vpop.permute.xlu2 %2138 }
 0x620   : > { %v2068_v1 = vrot.slane %v2046_v20, 4 }
 0x622   : > { %v2079_v5 = vsel %vm479_vm3, %v2067_v6, %v2068_v1  ;;  %v2081_v26 = vsel %vm479_vm3, %v2068_v1, %v2069_v32 }
 0x623   : > { %v2080_v41 = vsel %vm638_vm5, %v2044_v29, %v2079_v5  ;;  %v2082_v8 = vsel %vm638_vm5, %v2046_v20, %v2081_v26  ;;  %v11829_v20 = vld [vmem:[%s15531_s1 + $0x61] ss:$8 sm:$0xf]  ;;  %v9187_v5 = vld [vmem:[%s15532_s2 + $0x50] sm:$0xf0] }
 0x624   : > { %2103 = vst [vmem:[#allocation2 + $0x2c0] sm:$0xff] %v2080_v41  ;;  %v2445_v41 = vperm.slane %v11829_v20, 1 }
 0x625   : > { %2104 = vst [vmem:[#allocation2 + $0x2c8] sm:$0xff] %v2082_v8 }
 0x626   : > { %v2054_v52 = vpop.permute.xlu1 %2053 }
 0x627   : > { %v2072_v12 = vrot.slane %v2054_v52, 4  ;;  %v2052_v30 = vpop.permute.xlu0 %2051  ;;  %v2145_v18 = vpop.permute.xlu2 %2144 }
 0x628   : > { %v2071_v55 = vrot.slane %v2052_v30, 4  ;;  %v2158_v25 = vmul.f32 0.0, %v2145_v18 }
 0x62a   : > { %v2083_v57 = vsel %vm479_vm3, %v2070_v54, %v2071_v55  ;;  %v2085_v22 = vsel %vm479_vm3, %v2071_v55, %v2072_v12  ;;  %v11798_v60 = vpack.c.bf16 %v2158_v25, %v2158_v25 }
 0x62b   : > { %v2084_v63 = vsel %vm638_vm5, %v2050_v2, %v2083_v57  ;;  %v2086_v34 = vsel %vm638_vm5, %v2052_v30, %v2085_v22 }
 0x62c   : > { %2105 = vst [vmem:[#allocation2 + $0x2d0] sm:$0xff] %v2084_v63  ;;  %2202 = vrot.lane.b32.xlu2 %v11798_v60, %s10811_s15 }
 0x62d   : > { %2106 = vst [vmem:[#allocation2 + $0x2d8] sm:$0xff] %v2086_v34 }
 0x62e   : > { %v2060_v51 = vpop.permute.xlu1 %2059 }
 0x62f   : > { %v2075_v16 = vrot.slane %v2060_v51, 4  ;;  %v2058_v43 = vpop.permute.xlu0 %2057 }
 0x630   : > { %v2074_v11 = vrot.slane %v2058_v43, 4 }
 0x632   : > { %v2087_v44 = vsel %vm479_vm3, %v2073_v4, %v2074_v11  ;;  %v2089_v59 = vsel %vm479_vm3, %v2074_v11, %v2075_v16 }
 0x633   : > { %v2088_v14 = vsel %vm638_vm5, %v2056_v53, %v2087_v44  ;;  %v2090_v61 = vsel %vm638_vm5, %v2058_v43, %v2089_v59  ;;  %v10509_v16 = vld [vmem:[#allocation2 + $0x2cc] sm:$0xf0]  ;;  %v9571_v43 = vld [vmem:[#allocation2 + $0x2d0] sm:$0xf0]  ;;  %v9569_v44 = vld [vmem:[#allocation2 + $0x2c0] sm:$0xf] }
 0x634   : > { %2107 = vst [vmem:[#allocation2 + $0x2e0] sm:$0xff] %v2088_v14  ;;  %2208 = vrot.lane.b32.xlu2 %v11798_v60, %s10811_s15  ;;  %v10507_v59 = vld [vmem:[#allocation2 + $0x2c4] sm:$0xf]  ;;  %v2289_v14 = vperm.slane %v11866_v38, 0 }
 0x635   : > { %2108 = vst [vmem:[#allocation2 + $0x2e8] sm:$0xff] %v2090_v61  ;;  %v9570_v61 = vor.u32 %v10509_v16, %v9569_v44  ;;  %v9521_v16 = vld [vmem:[#allocation2 + $0x260] sm:$0xf]  ;;  %v9507_v44 = vld [vmem:[#allocation2 + $0x250] sm:$0xf0] }
 0x636   : > { %v2066_v62 = vpop.permute.xlu1 %2065 }
 0x637   : > { %v2078_v23 = vrot.slane %v2066_v62, 4  ;;  %v2064_v31 = vpop.permute.xlu0 %2063  ;;  %v9574_v62 = vor.u32 %v10507_v59, %v9571_v43  ;;  %v10495_v43 = vld [vmem:[#allocation2 + $0x264] sm:$0xf] }
 0x638   : > { %v2077_v17 = vrot.slane %v2064_v31, 4 }
 0x63a   : > { %v2091_v29 = vsel %vm479_vm3, %v2076_v49, %v2077_v17  ;;  %v2093_v2 = vsel %vm479_vm3, %v2077_v17, %v2078_v23  ;;  %v2159_v23 = vmul.f32 %v11751_v36, %v11790_v56  ;;  %v9555_v49 = vld [vmem:[#allocation2 + $0x2b0] sm:$0xf0] }
 0x63b   : > { %v2092_v10 = vsel %vm638_vm5, %v2062_v45, %v2091_v29  ;;  %v2094_v53 = vsel %vm638_vm5, %v2064_v31, %v2093_v2  ;;  %v10411_v45 = vld [vmem:[%s15532_s2 + $0x44] sm:$0xf]  ;;  %v9585_v54 = vld [vmem:[#allocation2 + $0x2e0] sm:$0xf]  ;;  %v10505_v31 = vld [vmem:[#allocation2 + $0x2ac] sm:$0xf0] }
 0x63c   : > { %2109 = vst [vmem:[#allocation2 + $0x2f0] sm:$0xff] %v2092_v10  ;;  %2214 = vrot.lane.b32.xlu2 %v11798_v60, %s10811_s15  ;;  %v11850_v12 = vor.u32 %v10411_v45, %v9187_v5  ;;  %v10511_v25 = vld [vmem:[#allocation2 + $0x2e4] sm:$0xf]  ;;  %v9553_v29 = vld [vmem:[#allocation2 + $0x2a0] sm:$0xf] }
 0x63d   : > { %2110 = vst [vmem:[#allocation2 + $0x2f8] sm:$0xff] %v2094_v53  ;;  %v10503_v2 = vld [vmem:[#allocation2 + $0x2a4] sm:$0xf]  ;;  %v9554_v10 = vor.u32 %v10505_v31, %v9553_v29  ;;  %v9537_v45 = vld [vmem:[#allocation2 + $0x280] sm:$0xf]  ;;  %v2169_v31 = vmul.f32 %v11773_v7, %v11790_v56 }
 0x63e   : > { %v2143_v32 = vpop.permute.xlu1 %2142  ;;  %3448 = vmatmul.bf16.gmra.mxu1 %v11850_v12  ;;  %3564 = vmatmul.bf16.gmra.mxu0 %v11850_v12  ;;  %v9558_v53 = vor.u32 %v10503_v2, %v9555_v49  ;;  %v10499_v5 = vld [vmem:[#allocation2 + $0x284] sm:$0xf]  ;;  %v2444_v49 = vperm.slane %v11829_v20, 0  ;;  %v9489_v2 = vld [vmem:[#allocation2 + $0x220] sm:$0xf] }
 0x63f   : > { %v11832_v6 = vsel %vm15543_vm2, %v2143_v32, %v2145_v18  ;;  %v2141_v1 = vpop.permute.xlu0 %2140 }
 0x640   : > { %v2157_v26 = vmul.f32 %v11599_v39, %v11832_v6  ;;  %v11845_v8 = vsel %vm15543_vm2, %v11790_v56, %v2141_v1  ;;  %v11848_v52 = vsel %vm15543_vm2, %v2141_v1, %v2143_v32  ;;  %v2154_v39 = vmul.f32 %v11664_v9, %v11790_v56  ;;  %v10501_v32 = vld [vmem:[#allocation2 + $0x28c] sm:$0xf0]  ;;  %v9539_v1 = vld [vmem:[#allocation2 + $0x290] sm:$0xf0] }
 0x641   : > { %v2155_v30 = vmul.f32 %v11668_v58, %v11845_v8  ;;  %v2156_v18 = vmul.f32 %v11680_v46, %v11848_v52  ;;  %v2162_v3 = vmul.f32 %v11611_v47, %v11832_v6  ;;  %v2160_v4 = vmul.f32 %v11676_v24, %v11845_v8 }
 0x642   : > { %v2161_v11 = vmul.f32 %v11694_v27, %v11848_v52  ;;  %v2170_v59 = vmul.f32 %v11703_v50, %v11845_v8 }
 0x643   : > { %v10513_v55 = vld [vmem:[#allocation2 + $0x2ec] sm:$0xf0]  ;;  %v9587_v57 = vld [vmem:[#allocation2 + $0x2f0] sm:$0xf0]  ;;  %v2174_v22 = vpack.c.bf16 %v2155_v30, %v2154_v39  ;;  %v2175_v63 = vpack.c.bf16 %v2157_v26, %v2156_v18  ;;  %v2177_v47 = vpack.c.bf16 %v2160_v4, %v2159_v23  ;;  %v2167_v26 = vmul.f32 %v11624_v28, %v11832_v6  ;;  %v10415_v39 = vld [vmem:[%s15532_s2 + $0x64] sm:$0xf] }
 0x644   : > { %v9586_v34 = vor.u32 %v10513_v55, %v9585_v54  ;;  %v9590_v51 = vor.u32 %v10511_v25, %v9587_v57  ;;  %2450 = vrot.lane.b32.xlu2 %v2445_v41, %s10812_s20  ;;  %v2178_v17 = vpack.c.bf16 %v2162_v3, %v2161_v11  ;;  %v2165_v41 = vmul.f32 %v11690_v13, %v11845_v8  ;;  %v9203_v54 = vld [vmem:[%s15532_s2 + $0x70] sm:$0xf0]  ;;  %v10493_v11 = vld [vmem:[#allocation2 + $0x24c] sm:$0xf0] }
 0x645   : > { %2198 = vrot.lane.b32.xlu0 %v2174_v22, %s10811_s15  ;;  %2200 = vrot.lane.b32.xlu1 %v2175_v63, %s10811_s15  ;;  %v2166_v30 = vmul.f32 %v11707_v33, %v11848_v52  ;;  %v2292_v18 = vperm.slane %v11866_v38, 3  ;;  %v9538_v55 = vor.u32 %v10501_v32, %v9537_v45  ;;  %v9542_v25 = vor.u32 %v10499_v5, %v9539_v1  ;;  %v10497_v22 = vld [vmem:[#allocation2 + $0x26c] sm:$0xf0]  ;;  %v9523_v63 = vld [vmem:[#allocation2 + $0x270] sm:$0xf0] }
 0x646   : > { %3459 = vmatpush.bf16.msra.mxu2 %v9586_v34  ;;  %3575 = vmatpush.bf16.msrb.mxu1 %v9590_v51  ;;  %v11893_v57 = vor.u32 %v10415_v39, %v9203_v54  ;;  %v2164_v28 = vmul.f32 %v11763_v0, %v11790_v56  ;;  %v9522_v3 = vor.u32 %v10497_v22, %v9521_v16  ;;  %v10485_v8 = vld [vmem:[#allocation2 + $0x20c] sm:$0xf0]  ;;  %v9475_v1 = vld [vmem:[#allocation2 + $0x210] sm:$0xf0]  ;;  %v9473_v56 = vld [vmem:[#allocation2 + $0x200] sm:$0xf] }
 0x647   : > { %v2181_v51 = vpack.c.bf16 %v2167_v26, %v2166_v30  ;;  %v9526_v4 = vor.u32 %v10495_v43, %v9523_v63  ;;  %v2183_v29 = vpack.c.bf16 %v2170_v59, %v2169_v31  ;;  %v10514_v45 = vld [vmem:[#allocation2 + $0x2f4] sm:$0xf0]  ;;  %v10483_v5 = vld [vmem:[#allocation2 + $0x204] sm:$0xf]  ;;  %v9161_v26 = vld [vmem:[%s15532_s2 + $0x8] sm:$0xf]  ;;  %v9474_v30 = vor.u32 %v10485_v8, %v9473_v56 }
 0x648   : > { %v2180_v34 = vpack.c.bf16 %v2165_v41, %v2164_v28  ;;  %v10406_v41 = vld [vmem:[%s15532_s2 + $0x14] sm:$0xf0]  ;;  %v9593_v39 = vld [vmem:[#allocation2 + $0x2e8] sm:$0xf]  ;;  %v2290_v43 = vperm.slane %v11866_v38, 1 }
 0x649   : > { %v9594_v54 = vor.u32 %v10514_v45, %v9593_v39  ;;  %v10510_v28 = vld [vmem:[#allocation2 + $0x2d4] sm:$0xf0]  ;;  %v11917_v22 = vor.u32 %v10406_v41, %v9161_v26  ;;  %v9577_v63 = vld [vmem:[#allocation2 + $0x2c8] sm:$0xf]  ;;  %v9579_v8 = vld [vmem:[#allocation2 + $0x2d8] sm:$0xf0] }
 0x64a   : > { %3460 = vmatpush.bf16.msra.mxu2 %v9570_v61  ;;  %3576 = vmatpush.bf16.msrb.mxu1 %v9574_v62  ;;  %v10491_v61 = vld [vmem:[#allocation2 + $0x244] sm:$0xf]  ;;  %v10498_v59 = vld [vmem:[#allocation2 + $0x274] sm:$0xf0]  ;;  %v9563_v45 = vld [vmem:[#allocation2 + $0x2b8] sm:$0xf0] }
 0x64b   : > { %v9510_v23 = vor.u32 %v10491_v61, %v9507_v44  ;;  %v2171_v61 = vmul.f32 %v11718_v15, %v11848_v52  ;;  %v10494_v31 = vld [vmem:[#allocation2 + $0x254] sm:$0xf0]  ;;  %v9547_v41 = vld [vmem:[#allocation2 + $0x298] sm:$0xf0] }
 0x64c   : > { %2293 = vrot.lane.b32.xlu2 %v2289_v14, %s10813_s21  ;;  %v9505_v14 = vld [vmem:[#allocation2 + $0x240] sm:$0xf]  ;;  %v10486_v52 = vld [vmem:[#allocation2 + $0x214] sm:$0xf0]  ;;  %v9531_v39 = vld [vmem:[#allocation2 + $0x278] sm:$0xf0] }
 0x64d   : > { %2204 = vrot.lane.b32.xlu0 %v2177_v47, %s10811_s15  ;;  %2206 = vrot.lane.b32.xlu1 %v2178_v17, %s10811_s15  ;;  %v9506_v62 = vor.u32 %v10493_v11, %v9505_v14  ;;  %v10489_v47 = vld [vmem:[#allocation2 + $0x22c] sm:$0xf0]  ;;  %v9491_v17 = vld [vmem:[#allocation2 + $0x230] sm:$0xf0]  ;;  %v9545_v11 = vld [vmem:[#allocation2 + $0x288] sm:$0xf]  ;;  %v2172_v14 = vmul.f32 %v11635_v42, %v11832_v6 }
 0x64e   : > { %3461 = vmatpush.bf16.msra.mxu2 %v9554_v10  ;;  %3577 = vmatpush.bf16.msrb.mxu1 %v9558_v53  ;;  %v10487_v10 = vld [vmem:[#allocation2 + $0x224] sm:$0xf]  ;;  %v9490_v53 = vor.u32 %v10489_v47, %v9489_v2  ;;  %v9497_v42 = vld [vmem:[#allocation2 + $0x228] sm:$0xf] }
 0x64f   : > { %3453 = vmatmul.bf16.gmra.mxu1 %v11893_v57  ;;  %3569 = vmatmul.bf16.gmra.mxu0 %v11893_v57  ;;  %v9494_v32 = vor.u32 %v10487_v10, %v9491_v17  ;;  %v10490_v17 = vld [vmem:[#allocation2 + $0x234] sm:$0xf0]  ;;  %v9481_v2 = vld [vmem:[#allocation2 + $0x208] sm:$0xf] }
 0x650   : > { %v9498_v6 = vor.u32 %v10490_v17, %v9497_v42  ;;  %v9482_v10 = vor.u32 %v10486_v52, %v9481_v2 }
 0x652   : > { %3462 = vmatpush.bf16.msra.mxu2 %v9538_v55  ;;  %3578 = vmatpush.bf16.msrb.mxu1 %v9542_v25  ;;  %v2446_v55 = vperm.slane %v11829_v20, 2  ;;  %v2447_v25 = vperm.slane %v11829_v20, 3  ;;  %v9561_v20 = vld [vmem:[#allocation2 + $0x2a8] sm:$0xf] }
 0x654   : > { %2299 = vrot.lane.b32.xlu2 %v2292_v18, %s10813_s21  ;;  %v9478_v18 = vor.u32 %v10483_v5, %v9475_v1  ;;  %v10508_v1 = vld [vmem:[#allocation2 + $0x2cc] sm:$0xf] }
 0x655   : > { %2210 = vrot.lane.b32.xlu0 %v2180_v34, %s10811_s15  ;;  %2212 = vrot.lane.b32.xlu1 %v2181_v51, %s10811_s15  ;;  %v9578_v34 = vor.u32 %v10510_v28, %v9577_v63  ;;  %v10506_v51 = vld [vmem:[#allocation2 + $0x2b4] sm:$0xf0]  ;;  %v9582_v56 = vor.u32 %v10508_v1, %v9579_v8  ;;  %v9515_v28 = vld [vmem:[#allocation2 + $0x258] sm:$0xf0]  ;;  %v10492_v63 = vld [vmem:[#allocation2 + $0x24c] sm:$0xf] }
 0x656   : > { %3463 = vmatpush.bf16.msra.mxu2 %v9522_v3  ;;  %3579 = vmatpush.bf16.msrb.mxu1 %v9526_v4  ;;  %v9562_v16 = vor.u32 %v10506_v51, %v9561_v20  ;;  %v2291_v3 = vperm.slane %v11866_v38, 2  ;;  %v10502_v4 = vld [vmem:[#allocation2 + $0x294] sm:$0xf0]  ;;  %v2184_v38 = vpack.c.bf16 %v2172_v14, %v2171_v61  ;;  %v9499_v51 = vld [vmem:[#allocation2 + $0x238] sm:$0xf0] }
 0x657   : > { %v9546_v44 = vor.u32 %v10502_v4, %v9545_v11  ;;  %v10488_v20 = vld [vmem:[#allocation2 + $0x22c] sm:$0xf] }
 0x658   : > { %v10484_v4 = vld [vmem:[#allocation2 + $0x20c] sm:$0xf] }
 0x65a   : > { %3464 = vmatpush.bf16.msra.mxu2 %v9506_v62  ;;  %3580 = vmatpush.bf16.msrb.mxu1 %v9510_v23  ;;  %v9529_v62 = vld [vmem:[#allocation2 + $0x268] sm:$0xf] }
 0x65b   : > { %v9530_v23 = vor.u32 %v10498_v59, %v9529_v62 }
 0x65d   : > { %2216 = vrot.lane.b32.xlu0 %v2183_v29, %s10811_s15  ;;  %2448 = vrot.lane.b32.xlu1 %v2444_v49, %s10812_s20  ;;  %v9513_v49 = vld [vmem:[#allocation2 + $0x248] sm:$0xf]  ;;  %v9595_v29 = vld [vmem:[#allocation2 + $0x2f8] sm:$0xf0] }
 0x65e   : > { %3465 = vmatpush.bf16.msra.mxu2 %v9490_v53  ;;  %3581 = vmatpush.bf16.msrb.mxu1 %v9494_v32  ;;  %v9514_v47 = vor.u32 %v10494_v31, %v9513_v49  ;;  %v10512_v53 = vld [vmem:[#allocation2 + $0x2ec] sm:$0xf] }
 0x65f   : > { %3670 = vmatmul.bf16.vlgmr.msra.gmra.mxu0 %v11553_v48  ;;  %v9598_v32 = vor.u32 %v10512_v53, %v9595_v29 }
 0x662   : > { %3466 = vmatpush.bf16.msra.mxu2 %v9474_v30  ;;  %3582 = vmatpush.bf16.msrb.mxu1 %v9478_v18  ;;  %v10500_v30 = vld [vmem:[#allocation2 + $0x28c] sm:$0xf] }
 0x663   : > { %v9550_v18 = vor.u32 %v10500_v30, %v9547_v41 }
 0x665   : > { %2452 = vrot.lane.b32.xlu0 %v2446_v55, %s10812_s20  ;;  %2454 = vrot.lane.b32.xlu1 %v2447_v25, %s10812_s20 }
 0x666   : > { %3691 = vmatpush.bf16.msra.mxu1 %v9594_v54  ;;  %3467 = vmatmul.bf16.vlgmr.msra.gmra.mxu2 %v11917_v22  ;;  %v10496_v54 = vld [vmem:[#allocation2 + $0x26c] sm:$0xf] }
 0x667   : > { %3583 = vmatmul.bf16.vlgmr.msrb.gmra.mxu1 %v11917_v22  ;;  %v9534_v25 = vor.u32 %v10496_v54, %v9531_v39 }
 0x66a   : > { %3692 = vmatpush.bf16.msra.mxu1 %v9578_v34  ;;  %v9518_v34 = vor.u32 %v10492_v63, %v9515_v28 }
 0x66d   : > { %2295 = vrot.lane.b32.xlu0 %v2290_v43, %s10813_s21  ;;  %2297 = vrot.lane.b32.xlu1 %v2291_v3, %s10813_s21  ;;  %v9502_v43 = vor.u32 %v10488_v20, %v9499_v51  ;;  %v9483_v3 = vld [vmem:[#allocation2 + $0x218] sm:$0xf0] }
 0x66e   : > { %3693 = vmatpush.bf16.msra.mxu1 %v9562_v16  ;;  %v9486_v11 = vor.u32 %v10484_v4, %v9483_v3 }
 0x66f   : > { %3675 = vmatmul.bf16.gmra.mxu0 %v11810_v40 }
 0x672   : > { %3694 = vmatpush.bf16.msra.mxu1 %v9546_v44 }
 0x675   : > { %2218 = vrot.lane.b32.xlu0 %v2184_v38, %s10811_s15  ;;  %2220 = vrot.lane.b32.xlu1 %v11798_v60, %s10811_s15  ;;  %v10504_v60 = vld [vmem:[#allocation2 + $0x2ac] sm:$0xf] }
 0x676   : > { %3695 = vmatpush.bf16.msra.mxu1 %v9530_v23  ;;  %v9566_v26 = vor.u32 %v10504_v60, %v9563_v45 }
 0x67a   : > { %3696 = vmatpush.bf16.msra.mxu1 %v9514_v47 }
 0x67e   : > { %3697 = vmatpush.bf16.msra.mxu1 %v9498_v6 }
 0x67f   : > { %3680 = vmatmul.bf16.gmra.mxu0 %v11850_v12 }
 0x682   : > { %3698 = vmatpush.bf16.msra.mxu1 %v9482_v10 }
 0x686   : > { %3807 = vmatpush.bf16.msrb.mxu1 %v9598_v32  ;;  %v2203_v5 = vpop.permute.xlu2 %2202 }
 0x687   : > { %v2224_v38 = vrot.slane %v2203_v5, 4 }
 0x68a   : > { %3808 = vmatpush.bf16.msrb.mxu1 %v9582_v56 }
 0x68e   : > { %3809 = vmatpush.bf16.msrb.mxu1 %v9566_v26  ;;  %v2209_v55 = vpop.permute.xlu2 %2208 }
 0x68f   : > { %3685 = vmatmul.bf16.gmra.mxu0 %v11893_v57  ;;  %v2227_v10 = vrot.slane %v2209_v55, 4 }
 0x692   : > { %3810 = vmatpush.bf16.msrb.mxu1 %v9550_v18 }
 0x696   : > { %3811 = vmatpush.bf16.msrb.mxu1 %v9534_v25  ;;  %v2215_v16 = vpop.permute.xlu2 %2214 }
 0x697   : > { %v2230_v26 = vrot.slane %v2215_v16, 4 }
 0x69a   : > { %3812 = vmatpush.bf16.msrb.mxu1 %v9518_v34 }
 0x69e   : > { %3813 = vmatpush.bf16.msrb.mxu1 %v9502_v43  ;;  %v2451_v44 = vpop.permute.xlu2 %2450 }
 0x6a2   : > { %3814 = vmatpush.bf16.msrb.mxu1 %v9486_v11 }
 0x6a6   : > { %v11938_v59 = vpop.permute.xlu2 %2293 }
 0x6ae   : > { %v2300_v14 = vpop.permute.xlu2 %2299 }
 0x6af   : > { %v2313_v61 = vmul.f32 0.0, %v2300_v14 }
 0x6b1   : > { %v11940_v62 = vpack.c.bf16 %v2313_v61, %v2313_v61  ;;  %v11976_v61 = vld [vmem:[%s10913_s19 + $0x78] sm:$0xff] }
 0x6b3   : > { %2357 = vrot.lane.b32.xlu1 %v11940_v62, %s10809_s11 }
 0x6b7   : > { %v2199_v23 = vpop.permute.xlu0 %2198  ;;  %v2201_v31 = vpop.permute.xlu1 %2200 }
 0x6b8   : > { %v2222_v49 = vrot.slane %v2199_v23, 4  ;;  %v2223_v47 = vrot.slane %v2201_v31, 4 }
 0x6ba   : > { %v2234_v17 = vsel %vm479_vm3, %v2222_v49, %v2223_v47  ;;  %v2236_v42 = vsel %vm479_vm3, %v2223_v47, %v2224_v38 }
 0x6bb   : > { %v2235_v6 = vsel %vm15543_vm2, %v2199_v23, %v2234_v17  ;;  %v2237_v52 = vsel %vm15543_vm2, %v2201_v31, %v2236_v42 }
 0x6bc   : > { %2258 = vst [vmem:[#allocation2 + $0x300] sm:$0xff] %v2235_v6 }
 0x6bd   : > { %2259 = vst [vmem:[#allocation2 + $0x308] sm:$0xff] %v2237_v52 }
 0x6bf   : > { %v2205_v29 = vpop.permute.xlu0 %2204  ;;  %v2207_v2 = vpop.permute.xlu1 %2206 }
 0x6c0   : > { %v2225_v53 = vrot.slane %v2205_v29, 4  ;;  %v2226_v32 = vrot.slane %v2207_v2, 4 }
 0x6c2   : > { %v2238_v8 = vsel %vm479_vm3, %v2225_v53, %v2226_v32  ;;  %v2240_v1 = vsel %vm479_vm3, %v2226_v32, %v2227_v10  ;;  %v2309_v10 = vmul.f32 %v11664_v9, %v11938_v59  ;;  %v10794_v9 = vld [vmem:[%s10913_s19 + $0x58] sm:$0xff] }
 0x6c3   : > { %v2239_v56 = vsel %vm15543_vm2, %v2205_v29, %v2238_v8  ;;  %v2241_v45 = vsel %vm15543_vm2, %v2207_v2, %v2240_v1  ;;  %v10793_v29 = vld [vmem:[%s10913_s19 + $0x18] sm:$0xff] }
 0x6c4   : > { %2260 = vst [vmem:[#allocation2 + $0x310] sm:$0xff] %v2239_v56 }
 0x6c5   : > { %2261 = vst [vmem:[#allocation2 + $0x318] sm:$0xff] %v2241_v45 }
 0x6c7   : > { %v2211_v60 = vpop.permute.xlu0 %2210  ;;  %v2213_v5 = vpop.permute.xlu1 %2212 }
 0x6c8   : > { %v2228_v41 = vrot.slane %v2211_v60, 4  ;;  %v2229_v30 = vrot.slane %v2213_v5, 4 }
 0x6ca   : > { %v2242_v18 = vsel %vm479_vm3, %v2228_v41, %v2229_v30  ;;  %v2244_v39 = vsel %vm479_vm3, %v2229_v30, %v2230_v26  ;;  %v10795_v41 = vld [vmem:[%s10913_s19 + $0x38] sm:$0xff] }
 0x6cb   : > { %v2243_v54 = vsel %vm15543_vm2, %v2211_v60, %v2242_v18  ;;  %v2245_v55 = vsel %vm15543_vm2, %v2213_v5, %v2244_v39  ;;  %v2314_v39 = vmul.f32 %v11751_v36, %v11938_v59 }
 0x6cc   : > { %2262 = vst [vmem:[#allocation2 + $0x320] sm:$0xff] %v2243_v54 }
 0x6cd   : > { %2263 = vst [vmem:[#allocation2 + $0x328] sm:$0xff] %v2245_v55 }
 0x6cf   : > { %v2217_v25 = vpop.permute.xlu0 %2216  ;;  %v11956_v28 = vpop.permute.xlu1 %2448 }
 0x6d0   : > { %v11960_v63 = vsel %vm15544_vm4, %v11956_v28, %v2451_v44  ;;  %v2474_v34 = vmul.f32 %v11763_v0, %v11956_v28  ;;  %v2231_v8 = vrot.slane %v2217_v25, 4 }
 0x6d1   : > { %v2475_v51 = vmul.f32 %v11690_v13, %v11960_v63  ;;  %v2470_v42 = vmul.f32 %v11676_v24, %v11960_v63 }
 0x6d3   : > { %v2490_v20 = vpack.c.bf16 %v2475_v51, %v2474_v34 }
 0x6d5   : > { %2520 = vrot.lane.b32.xlu1 %v2490_v20, %s10810_s12 }
 0x6d7   : > { %v2453_v16 = vpop.permute.xlu0 %2452  ;;  %v2455_v43 = vpop.permute.xlu1 %2454 }
 0x6d8   : > { %v11968_v3 = vsel %vm15544_vm4, %v2451_v44, %v2453_v16  ;;  %v11971_v4 = vsel %vm15544_vm4, %v2453_v16, %v2455_v43  ;;  %v2469_v44 = vmul.f32 %v11751_v36, %v11956_v28  ;;  %v2479_v16 = vmul.f32 %v11773_v7, %v11956_v28 }
 0x6d9   : > { %v2481_v11 = vmul.f32 %v11718_v15, %v11968_v3  ;;  %v2482_v13 = vmul.f32 %v11976_v61, %v11971_v4  ;;  %v2476_v36 = vmul.f32 %v11707_v33, %v11968_v3 }
 0x6db   : > { %v2494_v23 = vpack.c.bf16 %v2482_v13, %v2481_v11  ;;  %v2480_v11 = vmul.f32 %v11703_v50, %v11960_v63 }
 0x6dd   : > { %2528 = vrot.lane.b32.xlu1 %v2494_v23, %s10810_s12  ;;  %v2493_v23 = vpack.c.bf16 %v2480_v11, %v2479_v16 }
 0x6df   : > { %v2296_v31 = vpop.permute.xlu0 %2295  ;;  %v2298_v38 = vpop.permute.xlu1 %2297 }
 0x6e0   : > { %v11985_v49 = vsel %vm638_vm5, %v11938_v59, %v2296_v31  ;;  %v11988_v47 = vsel %vm638_vm5, %v2296_v31, %v2298_v38  ;;  %v11991_v17 = vsel %vm638_vm5, %v2298_v38, %v2300_v14  ;;  %v2487_v14 = vpack.c.bf16 %v2470_v42, %v2469_v44  ;;  %v10797_v44 = vld [vmem:[%s10913_s19 + $0x8] sm:$0xff] }
 0x6e1   : > { %v2310_v6 = vmul.f32 %v11668_v58, %v11985_v49  ;;  %v2311_v52 = vmul.f32 %v11680_v46, %v11988_v47  ;;  %v2312_v2 = vmul.f32 %v10793_v29, %v11991_v17  ;;  %v2315_v58 = vmul.f32 %v11676_v24, %v11985_v49 }
 0x6e2   : > { %v2321_v56 = vmul.f32 %v11707_v33, %v11988_v47  ;;  %v2322_v45 = vmul.f32 %v10794_v9, %v11991_v17  ;;  %v2316_v26 = vmul.f32 %v11694_v27, %v11988_v47  ;;  %v2317_v30 = vmul.f32 %v10795_v41, %v11991_v17  ;;  %v10796_v33 = vld [vmem:[%s10913_s19] sm:$0xff] }
 0x6e3   : > { %v2329_v53 = vpack.c.bf16 %v2310_v6, %v2309_v10  ;;  %v2330_v32 = vpack.c.bf16 %v2312_v2, %v2311_v52  ;;  %v2332_v34 = vpack.c.bf16 %v2315_v58, %v2314_v39  ;;  %v2468_v31 = vmul.f32 0.0, %v2455_v43  ;;  %v10798_v6 = vld [vmem:[%s10913_s19 + $0x10] sm:$0xff]  ;;  %v10799_v43 = vld [vmem:[%s10913_s19 + $0x48] sm:$0xff] }
 0x6e4   : > { %v2336_v51 = vpack.c.bf16 %v2322_v45, %v2321_v56  ;;  %v2333_v20 = vpack.c.bf16 %v2317_v30, %v2316_v26  ;;  %v2464_v38 = vmul.f32 %v10796_v33, %v11956_v28  ;;  %v2465_v42 = vmul.f32 %v10797_v44, %v11960_v63  ;;  %v10800_v58 = vld [vmem:[%s10913_s19 + $0x68] sm:$0xff]  ;;  %s15417_s19 = scalar_lea.vmem %s15538_s8, %s10401_s16 }
 0x6e5   : > { %2353 = vrot.lane.b32.xlu2 %v2329_v53, %s10809_s11  ;;  %2514 = vrot.lane.b32.xlu1 %v2487_v14, %s10810_s12  ;;  %v2466_v50 = vmul.f32 %v10798_v6, %v11968_v3  ;;  %v2467_v52 = vmul.f32 %v10793_v29, %v11971_v4  ;;  %v2486_v2 = vpack.c.bf16 %v2468_v31, %v2468_v31 }
 0x6e6   : > { %2355 = vrot.lane.b32.xlu0 %v2330_v32, %s10809_s11  ;;  %v2484_v10 = vpack.c.bf16 %v2465_v42, %v2464_v38  ;;  %v2471_v28 = vmul.f32 %v11694_v27, %v11968_v3  ;;  %v2472_v63 = vmul.f32 %v10795_v41, %v11971_v4  ;;  %v2320_v14 = vmul.f32 %v10799_v43, %v11985_v49 }
 0x6e7   : > { %v2219_v46 = vpop.permute.xlu0 %2218  ;;  %v2221_v1 = vpop.permute.xlu1 %2220  ;;  %v2485_v53 = vpack.c.bf16 %v2467_v52, %v2466_v50  ;;  %v2319_v29 = vmul.f32 %v11763_v0, %v11938_v59  ;;  %v2326_v27 = vmul.f32 %v11718_v15, %v11988_v47  ;;  %v2327_v3 = vmul.f32 %v11976_v61, %v11991_v17 }
 0x6e8   : > { %v2232_v60 = vrot.slane %v2219_v46, 4  ;;  %v2233_v5 = vrot.slane %v2221_v1, 4  ;;  %v2488_v32 = vpack.c.bf16 %v2472_v63, %v2471_v28  ;;  %v2324_v0 = vmul.f32 %v11773_v7, %v11938_v59 }
 0x6e9   : > { %v2339_v1 = vpack.c.bf16 %v2327_v3, %v2326_v27 }
 0x6ea   : > { %v2246_v24 = vsel %vm479_vm3, %v2231_v8, %v2232_v60  ;;  %v2248_v18 = vsel %vm479_vm3, %v2232_v60, %v2233_v5  ;;  %v2335_v8 = vpack.c.bf16 %v2320_v14, %v2319_v29 }
 0x6eb   : > { %v2247_v54 = vsel %vm15543_vm2, %v2217_v25, %v2246_v24  ;;  %v2249_v55 = vsel %vm15543_vm2, %v2219_v46, %v2248_v18  ;;  %v2477_v25 = vmul.f32 %v10794_v9, %v11971_v4  ;;  %v2325_v46 = vmul.f32 %v10800_v58, %v11985_v49 }
 0x6ec   : > { %2264 = vst [vmem:[#allocation2 + $0x330] sm:$0xff] %v2247_v54 }
 0x6ed   : > { %2265 = vst [vmem:[#allocation2 + $0x338] sm:$0xff] %v2249_v55  ;;  %2359 = vrot.lane.b32.xlu2 %v2332_v34, %s10809_s11  ;;  %2367 = vrot.lane.b32.xlu1 %v2336_v51, %s10809_s11  ;;  %v2491_v13 = vpack.c.bf16 %v2477_v25, %v2476_v36  ;;  %v2338_v4 = vpack.c.bf16 %v2325_v46, %v2324_v0 }
 0x6ee   : > { %2361 = vrot.lane.b32.xlu0 %v2333_v20, %s10809_s11 }
 0x6f5   : > { %2522 = vrot.lane.b32.xlu2 %v2491_v13, %s10810_s12  ;;  %2363 = vrot.lane.b32.xlu1 %v11940_v62, %s10809_s11  ;;  %v9177_v13 = vld [vmem:[%s15532_s2 + $0x28] sm:$0xf] }
 0x6f6   : > { %2526 = vrot.lane.b32.xlu0 %v2493_v23, %s10810_s12  ;;  %v10410_v23 = vld [vmem:[%s15532_s2 + $0x34] sm:$0xf0] }
 0x6f7   : > { %v12101_v38 = vor.u32 %v10410_v23, %v9177_v13 }
 0x6f9   : > { %3472 = vmatmul.bf16.gmra.mxu2 %v12101_v38  ;;  %3588 = vmatmul.bf16.gmra.mxu1 %v12101_v38 }
 0x6fd   : > { %2508 = vrot.lane.b32.xlu2 %v2484_v10, %s10810_s12  ;;  %2512 = vrot.lane.b32.xlu1 %v2486_v2, %s10810_s12 }
 0x6fe   : > { %2510 = vrot.lane.b32.xlu0 %v2485_v53, %s10810_s12 }
 0x705   : > { %2516 = vrot.lane.b32.xlu2 %v2488_v32, %s10810_s12  ;;  %2530 = vrot.lane.b32.xlu1 %v2486_v2, %s10810_s12 }
 0x706   : > { %2365 = vrot.lane.b32.xlu0 %v2335_v8, %s10809_s11 }
 0x70d   : > { %2371 = vrot.lane.b32.xlu2 %v2338_v4, %s10809_s11  ;;  %v9193_v4 = vld [vmem:[%s15532_s2 + $0x48] sm:$0xf] }
 0x70e   : > { %2373 = vrot.lane.b32.xlu0 %v2339_v1, %s10809_s11  ;;  %v10414_v1 = vld [vmem:[%s15532_s2 + $0x54] sm:$0xf0] }
 0x715   : > { %2369 = vrot.lane.b32.xlu2 %v11940_v62, %s10809_s11 }
 0x716   : > { %2375 = vrot.lane.b32.xlu0 %v11940_v62, %s10809_s11 }
 0x71d   : > { %2518 = vrot.lane.b32.xlu2 %v2486_v2, %s10810_s12 }
 0x71e   : > { %2524 = vrot.lane.b32.xlu0 %v2486_v2, %s10810_s12 }
 0x725   : > { %v2358_v15 = vpop.permute.xlu1 %2357 }
 0x726   : > { %v2379_v45 = vrot.slane %v2358_v15, 4 }
 0x73f   : > { %v2354_v61 = vpop.permute.xlu2 %2353 }
 0x740   : > { %v2377_v41 = vrot.slane %v2354_v61, 4 }
 0x747   : > { %v2521_v49 = vpop.permute.xlu1 %2520  ;;  %v2360_v7 = vpop.permute.xlu2 %2359 }
 0x748   : > { %v2538_v17 = vrot.slane %v2521_v49, 4  ;;  %v2380_v25 = vrot.slane %v2360_v7, 4 }
 0x74f   : > { %v12072_v59 = vpop.permute.xlu2 %2522  ;;  %v12074_v47 = vpop.permute.xlu1 %2528 }
 0x750   : > { %v2539_v56 = vrot.slane %v12072_v59, 4  ;;  %v2542_v2 = vrot.slane %v12074_v47, 4 }
 0x752   : > { %v2552_v9 = vsel %vm479_vm3, %v2538_v17, %v2539_v56 }
 0x753   : > { %v2553_v62 = vsel %vm390_vm0, %v2521_v49, %v2552_v9  ;;  %v12125_v9 = vor.u32 %v10414_v1, %v9193_v4 }
 0x754   : > { %2572 = vst [vmem:[#allocation2 + $0x3a0] sm:$0xff] %v2553_v62 }
 0x755   : > { %3477 = vmatmul.bf16.gmra.mxu2 %v12125_v9  ;;  %3593 = vmatmul.bf16.gmra.mxu1 %v12125_v9 }
 0x757   : > { %v2509_v60 = vpop.permute.xlu2 %2508  ;;  %v2515_v5 = vpop.permute.xlu1 %2514 }
 0x758   : > { %v2356_v26 = vpop.permute.xlu0 %2355  ;;  %v2535_v51 = vrot.slane %v2515_v5, 4  ;;  %v2532_v27 = vrot.slane %v2509_v60, 4 }
 0x759   : > { %v2378_v30 = vrot.slane %v2356_v26, 4 }
 0x75b   : > { %v2389_v24 = vsel %vm479_vm3, %v2377_v41, %v2378_v30  ;;  %v2391_v18 = vsel %vm479_vm3, %v2378_v30, %v2379_v45  ;;  %v10535_v17 = vld [vmem:[#allocation2 + $0x3a4] sm:$0xf] }
 0x75c   : > { %v2390_v39 = vsel %vm548_vm1, %v2354_v61, %v2389_v24  ;;  %v2392_v54 = vsel %vm548_vm1, %v2356_v26, %v2391_v18 }
 0x75d   : > { %2413 = vst [vmem:[#allocation2 + $0x340] sm:$0xff] %v2390_v39 }
 0x75e   : > { %2414 = vst [vmem:[#allocation2 + $0x348] sm:$0xff] %v2392_v54 }
 0x75f   : > { %v12085_v55 = vpop.permute.xlu2 %2516  ;;  %v12087_v34 = vpop.permute.xlu1 %2367 }
 0x760   : > { %v2536_v20 = vrot.slane %v12085_v55, 4  ;;  %v2362_v36 = vpop.permute.xlu0 %2361  ;;  %v2384_v32 = vrot.slane %v12087_v34, 4 }
 0x761   : > { %v2381_v16 = vrot.slane %v2362_v36, 4 }
 0x762   : > { %v2548_v11 = vsel %vm479_vm3, %v2535_v51, %v2536_v20 }
 0x763   : > { %v2549_v31 = vsel %vm390_vm0, %v2515_v5, %v2548_v11  ;;  %v2393_v33 = vsel %vm479_vm3, %v2380_v25, %v2381_v16 }
 0x764   : > { %2570 = vst [vmem:[#allocation2 + $0x390] sm:$0xff] %v2549_v31  ;;  %v2394_v44 = vsel %vm548_vm1, %v2360_v7, %v2393_v33  ;;  %v9681_v7 = vld [vmem:[#allocation2 + $0x3a0] sm:$0xf] }
 0x765   : > { %2415 = vst [vmem:[#allocation2 + $0x350] sm:$0xff] %v2394_v44  ;;  %v9633_v1 = vld [vmem:[#allocation2 + $0x340] sm:$0xf] }
 0x767   : > { %v12106_v42 = vpop.permute.xlu2 %2371  ;;  %v2364_v6 = vpop.permute.xlu1 %2363 }
 0x768   : > { %v2527_v50 = vpop.permute.xlu0 %2526  ;;  %v2382_v52 = vrot.slane %v2364_v6, 4 }
 0x769   : > { %v2541_v10 = vrot.slane %v2527_v50, 4 }
 0x76a   : > { %v2395_v53 = vsel %vm479_vm3, %v2381_v16, %v2382_v52 }
 0x76b   : > { %v2556_v28 = vsel %vm479_vm3, %v2541_v10, %v2542_v2  ;;  %v2396_v63 = vsel %vm548_vm1, %v2362_v36, %v2395_v53  ;;  %v10533_v13 = vld [vmem:[#allocation2 + $0x38c] sm:$0xf0]  ;;  %v9667_v23 = vld [vmem:[#allocation2 + $0x390] sm:$0xf0]  ;;  %v10418_v10 = vld [vmem:[%s15532_s2 + $0x74] sm:$0xf0] }
 0x76c   : > { %v2557_v43 = vsel %vm390_vm0, %v2527_v50, %v2556_v28  ;;  %2416 = vst [vmem:[#allocation2 + $0x358] sm:$0xff] %v2396_v63 }
 0x76d   : > { %2574 = vst [vmem:[#allocation2 + $0x3b0] sm:$0xff] %v2557_v43 }
 0x76f   : > { %v2370_v14 = vpop.permute.xlu2 %2369  ;;  %v2513_v29 = vpop.permute.xlu1 %2512 }
 0x770   : > { %v2385_v8 = vrot.slane %v2370_v14, 4  ;;  %v2511_v58 = vpop.permute.xlu0 %2510  ;;  %v2534_v46 = vrot.slane %v2513_v29, 4 }
 0x771   : > { %v2533_v3 = vrot.slane %v2511_v58, 4 }
 0x772   : > { %v2399_v0 = vsel %vm479_vm3, %v2384_v32, %v2385_v8 }
 0x773   : > { %v2400_v15 = vsel %vm548_vm1, %v12087_v34, %v2399_v0  ;;  %v2544_v61 = vsel %vm479_vm3, %v2532_v27, %v2533_v3  ;;  %v2546_v49 = vsel %vm479_vm3, %v2533_v3, %v2534_v46  ;;  %v10525_v3 = vld [vmem:[#allocation2 + $0x34c] sm:$0xf0]  ;;  %v9635_v0 = vld [vmem:[#allocation2 + $0x350] sm:$0xf0] }
 0x774   : > { %2418 = vst [vmem:[#allocation2 + $0x368] sm:$0xff] %v2400_v15  ;;  %v2545_v62 = vsel %vm390_vm0, %v2509_v60, %v2544_v61  ;;  %v2547_v45 = vsel %vm390_vm0, %v2511_v58, %v2546_v49  ;;  %v10537_v5 = vld [vmem:[#allocation2 + $0x3ac] sm:$0xf0]  ;;  %v9683_v26 = vld [vmem:[#allocation2 + $0x3b0] sm:$0xf0]  ;;  %v9634_v49 = vor.u32 %v10525_v3, %v9633_v1 }
 0x775   : > { %2568 = vst [vmem:[#allocation2 + $0x380] sm:$0xff] %v2545_v62  ;;  %v9682_v41 = vor.u32 %v10537_v5, %v9681_v7  ;;  %v9686_v30 = vor.u32 %v10535_v17, %v9683_v26  ;;  %v10523_v15 = vld [vmem:[#allocation2 + $0x344] sm:$0xf]  ;;  %v10521_v17 = vld [vmem:[#allocation2 + $0x32c] sm:$0xf0] }
 0x776   : > { %2569 = vst [vmem:[#allocation2 + $0x388] sm:$0xff] %v2547_v45  ;;  %v9638_v7 = vor.u32 %v10523_v15, %v9635_v0  ;;  %v9619_v62 = vld [vmem:[#allocation2 + $0x330] sm:$0xf0]  ;;  %v9617_v26 = vld [vmem:[#allocation2 + $0x320] sm:$0xf] }
 0x777   : > { %3490 = vmatpush.bf16.msra.mxu3 %v9682_v41  ;;  %3606 = vmatpush.bf16.msrb.mxu2 %v9686_v30  ;;  %v2519_v24 = vpop.permute.xlu2 %2518  ;;  %v2531_v18 = vpop.permute.xlu1 %2530  ;;  %v10519_v41 = vld [vmem:[#allocation2 + $0x324] sm:$0xf]  ;;  %v9618_v30 = vor.u32 %v10521_v17, %v9617_v26  ;;  %v10522_v1 = vld [vmem:[#allocation2 + $0x334] sm:$0xf0]  ;;  %v9251_v15 = vld [vmem:[#allocation2 + $0x50] sm:$0xf0] }
 0x778   : > { %v2537_v39 = vrot.slane %v2519_v24, 4  ;;  %v2366_v54 = vpop.permute.xlu0 %2365  ;;  %v2543_v34 = vrot.slane %v2531_v18, 4  ;;  %v9622_v24 = vor.u32 %v10519_v41, %v9619_v62  ;;  %v10517_v18 = vld [vmem:[#allocation2 + $0x30c] sm:$0xf0]  ;;  %v10431_v3 = vld [vmem:[#allocation2 + $0x64] sm:$0xf] }
 0x779   : > { %v2383_v60 = vrot.slane %v2366_v54, 4  ;;  %v10518_v62 = vld [vmem:[#allocation2 + $0x314] sm:$0xf0]  ;;  %v9609_v26 = vld [vmem:[#allocation2 + $0x308] sm:$0xf] }
 0x77a   : > { %v2550_v51 = vsel %vm479_vm3, %v2536_v20, %v2537_v39  ;;  %v2558_v36 = vsel %vm479_vm3, %v2542_v2, %v2543_v34  ;;  %v9603_v39 = vld [vmem:[#allocation2 + $0x310] sm:$0xf0]  ;;  %v9601_v34 = vld [vmem:[#allocation2 + $0x300] sm:$0xf]  ;;  %v9610_v41 = vor.u32 %v10518_v62, %v9609_v26 }
 0x77b   : > { %v2551_v25 = vsel %vm390_vm0, %v12085_v55, %v2550_v51  ;;  %v2397_v16 = vsel %vm479_vm3, %v2383_v60, %v2384_v32  ;;  %v2559_v11 = vsel %vm390_vm0, %v12074_v47, %v2558_v36  ;;  %v2386_v55 = vrot.slane %v12106_v42, 4  ;;  %v9209_v47 = vld [vmem:[%s15532_s2 + $0x68] sm:$0xf]  ;;  %v10515_v60 = vld [vmem:[#allocation2 + $0x304] sm:$0xf] }
 0x77c   : > { %2571 = vst [vmem:[#allocation2 + $0x398] sm:$0xff] %v2551_v25  ;;  %v2398_v31 = vsel %vm548_vm1, %v2366_v54, %v2397_v16  ;;  %v9665_v33 = vld [vmem:[#allocation2 + $0x380] sm:$0xf]  ;;  %v10531_v44 = vld [vmem:[#allocation2 + $0x384] sm:$0xf]  ;;  %v12151_v28 = vor.u32 %v10418_v10, %v9209_v47  ;;  %v9602_v51 = vor.u32 %v10517_v18, %v9601_v34  ;;  %v9606_v36 = vor.u32 %v10515_v60, %v9603_v39 }
 0x77d   : > { %2417 = vst [vmem:[#allocation2 + $0x360] sm:$0xff] %v2398_v31  ;;  %v9666_v6 = vor.u32 %v10533_v13, %v9665_v33  ;;  %v9670_v20 = vor.u32 %v10531_v44, %v9667_v23  ;;  %v9331_v54 = vld [vmem:[#allocation2 + $0xf0] sm:$0xf0]  ;;  %v10447_v25 = vld [vmem:[#allocation2 + $0xe4] sm:$0xf] }
 0x77e   : > { %2575 = vst [vmem:[#allocation2 + $0x3b8] sm:$0xff] %v2559_v11  ;;  %3482 = vmatmul.bf16.gmra.mxu2 %v12151_v28  ;;  %3598 = vmatmul.bf16.gmra.mxu1 %v12151_v28  ;;  %v9334_v16 = vor.u32 %v10447_v25, %v9331_v54  ;;  %v9315_v13 = vld [vmem:[#allocation2 + $0xd0] sm:$0xf0]  ;;  %v10443_v44 = vld [vmem:[#allocation2 + $0xc4] sm:$0xf] }
 0x77f   : > { %3491 = vmatpush.bf16.msra.mxu3 %v9666_v6  ;;  %3607 = vmatpush.bf16.msrb.mxu2 %v9670_v20  ;;  %v9318_v6 = vor.u32 %v10443_v44, %v9315_v13  ;;  %v9219_v54 = vld [vmem:[#allocation2 + $0x10] sm:$0xf0]  ;;  %v10419_v34 = vld [vmem:[#allocation2 + $0x4] sm:$0xf]  ;;  %v10532_v60 = vld [vmem:[#allocation2 + $0x38c] sm:$0xf] }
 0x780   : > { %v2374_v50 = vpop.permute.xlu0 %2373  ;;  %v9337_v25 = vld [vmem:[#allocation2 + $0xe8] sm:$0xf]  ;;  %v10528_v44 = vld [vmem:[#allocation2 + $0x36c] sm:$0xf] }
 0x781   : > { %v2387_v52 = vrot.slane %v2374_v50, 4 }
 0x783   : > { %v2401_v2 = vsel %vm479_vm3, %v2386_v55, %v2387_v52  ;;  %v10534_v20 = vld [vmem:[#allocation2 + $0x394] sm:$0xf0]  ;;  %v9673_v55 = vld [vmem:[#allocation2 + $0x388] sm:$0xf] }
 0x784   : > { %v2402_v53 = vsel %vm548_vm1, %v12106_v42, %v2401_v2  ;;  %v9649_v29 = vld [vmem:[#allocation2 + $0x360] sm:$0xf]  ;;  %v10527_v58 = vld [vmem:[#allocation2 + $0x364] sm:$0xf] }
 0x785   : > { %2419 = vst [vmem:[#allocation2 + $0x370] sm:$0xff] %v2402_v53  ;;  %v10538_v31 = vld [vmem:[#allocation2 + $0x3b4] sm:$0xf0]  ;;  %v10439_v2 = vld [vmem:[#allocation2 + $0xa4] sm:$0xf] }
 0x786   : > { %v9283_v53 = vld [vmem:[#allocation2 + $0x90] sm:$0xf0] }
 0x788   : > { %v2376_v63 = vpop.permute.xlu0 %2375 }
 0x789   : > { %v2388_v43 = vrot.slane %v2376_v63, 4  ;;  %v9657_v63 = vld [vmem:[#allocation2 + $0x368] sm:$0xf] }
 0x78b   : > { %v2403_v14 = vsel %vm479_vm3, %v2387_v52, %v2388_v43  ;;  %v9674_v52 = vor.u32 %v10534_v20, %v9673_v55  ;;  %v9321_v20 = vld [vmem:[#allocation2 + $0xc8] sm:$0xf] }
 0x78c   : > { %v2404_v32 = vsel %vm548_vm1, %v2374_v50, %v2403_v14  ;;  %v10529_v8 = vld [vmem:[#allocation2 + $0x36c] sm:$0xf0]  ;;  %v9651_v46 = vld [vmem:[#allocation2 + $0x370] sm:$0xf0]  ;;  %v10435_v14 = vld [vmem:[#allocation2 + $0x84] sm:$0xf] }
 0x78d   : > { %2420 = vst [vmem:[#allocation2 + $0x378] sm:$0xff] %v2404_v32  ;;  %v9650_v27 = vor.u32 %v10529_v8, %v9649_v29  ;;  %v9654_v42 = vor.u32 %v10527_v58, %v9651_v46  ;;  %v9299_v50 = vld [vmem:[#allocation2 + $0xb0] sm:$0xf0]  ;;  %v9286_v29 = vor.u32 %v10435_v14, %v9283_v53  ;;  %v10526_v32 = vld [vmem:[#allocation2 + $0x354] sm:$0xf0] }
 0x78e   : > { %3699 = vmatmul.bf16.vlgmr.msra.gmra.mxu1 %v11917_v22  ;;  %v9302_v47 = vor.u32 %v10439_v2, %v9299_v50  ;;  %v9267_v8 = vld [vmem:[#allocation2 + $0x70] sm:$0xf0]  ;;  %v10408_v58 = vld [vmem:[%s15532_s2 + $0x2c] sm:$0xf]  ;;  %v9179_v46 = vld [vmem:[%s15532_s2 + $0x38] sm:$0xf0] }
 0x78f   : > { %3492 = vmatpush.bf16.msra.mxu3 %v9650_v27  ;;  %3608 = vmatpush.bf16.msrb.mxu2 %v9654_v42  ;;  %v9641_v27 = vld [vmem:[#allocation2 + $0x348] sm:$0xf]  ;;  %v9270_v0 = vor.u32 %v10431_v3, %v9267_v8  ;;  %v10442_v2 = vld [vmem:[#allocation2 + $0xb4] sm:$0xf0] }
 0x790   : > { %v2525_v4 = vpop.permute.xlu0 %2524  ;;  %v9642_v42 = vor.u32 %v10526_v32, %v9641_v27  ;;  %v9305_v53 = vld [vmem:[#allocation2 + $0xa8] sm:$0xf]  ;;  %v10438_v14 = vld [vmem:[#allocation2 + $0x94] sm:$0xf0] }
 0x791   : > { %v2540_v61 = vrot.slane %v2525_v4, 4  ;;  %v12182_v4 = vor.u32 %v10408_v58, %v9179_v46  ;;  %v9289_v8 = vld [vmem:[#allocation2 + $0x88] sm:$0xf]  ;;  %v9611_v46 = vld [vmem:[#allocation2 + $0x318] sm:$0xf0] }
 0x792   : > { %v9290_v58 = vor.u32 %v10438_v14, %v9289_v8  ;;  %v10434_v27 = vld [vmem:[#allocation2 + $0x74] sm:$0xf0]  ;;  %v9227_v14 = vld [vmem:[#allocation2 + $0x18] sm:$0xf0] }
 0x793   : > { %v2554_v45 = vsel %vm479_vm3, %v2539_v56, %v2540_v61  ;;  %3493 = vmatpush.bf16.msra.mxu3 %v9634_v49  ;;  %3609 = vmatpush.bf16.msrb.mxu2 %v9638_v7  ;;  %v10404_v56 = vld [vmem:[%s15532_s2 + $0xc] sm:$0xf]  ;;  %v9625_v61 = vld [vmem:[#allocation2 + $0x328] sm:$0xf]  ;;  %v10427_v7 = vld [vmem:[#allocation2 + $0x44] sm:$0xf] }
 0x794   : > { %v2555_v5 = vsel %vm390_vm0, %v12072_v59, %v2554_v45  ;;  %v9163_v59 = vld [vmem:[%s15532_s2 + $0x18] sm:$0xf0]  ;;  %v10530_v10 = vld [vmem:[#allocation2 + $0x374] sm:$0xf0]  ;;  %v9626_v49 = vor.u32 %v10522_v1, %v9625_v61  ;;  %v9254_v17 = vor.u32 %v10427_v7, %v9251_v15  ;;  %v9235_v45 = vld [vmem:[#allocation2 + $0x30] sm:$0xf0] }
 0x795   : > { %2573 = vst [vmem:[#allocation2 + $0x3a8] sm:$0xff] %v2555_v5  ;;  %v12169_v11 = vor.u32 %v10404_v56, %v9163_v59  ;;  %v9658_v43 = vor.u32 %v10530_v10, %v9657_v63  ;;  %v9675_v56 = vld [vmem:[#allocation2 + $0x398] sm:$0xf0]  ;;  %v10450_v59 = vld [vmem:[#allocation2 + $0xf4] sm:$0xf0]  ;;  %v9306_v63 = vor.u32 %v10442_v2, %v9305_v53  ;;  %v3468_v2 = vpop.f32.mrf.mxu2 }
 0x796   : > { %v9659_v13 = vld [vmem:[#allocation2 + $0x378] sm:$0xf0]  ;;  %v10416_v15 = vld [vmem:[%s15532_s2 + $0x6c] sm:$0xf]  ;;  %v9257_v7 = vld [vmem:[#allocation2 + $0x48] sm:$0xf] }
 0x797   : > { %3494 = vmatpush.bf16.msra.mxu3 %v9618_v30  ;;  %3610 = vmatpush.bf16.msrb.mxu2 %v9622_v24  ;;  %v10423_v30 = vld [vmem:[#allocation2 + $0x24] sm:$0xf]  ;;  %v9691_v24 = vld [vmem:[#allocation2 + $0x3b8] sm:$0xf0] }
 0x798   : > { %v9238_v18 = vor.u32 %v10423_v30, %v9235_v45  ;;  %v9211_v61 = vld [vmem:[%s15532_s2 + $0x78] sm:$0xf0]  ;;  %v10426_v45 = vld [vmem:[#allocation2 + $0x34] sm:$0xf0]  ;;  %v9225_v30 = vld [vmem:[#allocation2 + $0x8] sm:$0xf] }
 0x799   : > { %v9243_v53 = vld [vmem:[#allocation2 + $0x38] sm:$0xf0] }
 0x79b   : > { %3495 = vmatpush.bf16.msra.mxu3 %v9602_v51  ;;  %3611 = vmatpush.bf16.msrb.mxu2 %v9606_v36  ;;  %v9222_v51 = vor.u32 %v10419_v34, %v9219_v54  ;;  %v9678_v36 = vor.u32 %v10532_v60, %v9675_v56  ;;  %v9323_v56 = vld [vmem:[#allocation2 + $0xd8] sm:$0xf0] }
 0x79c   : > { %v9689_v23 = vld [vmem:[#allocation2 + $0x3a8] sm:$0xf]  ;;  %v10536_v5 = vld [vmem:[#allocation2 + $0x3ac] sm:$0xf]  ;;  %v9307_v60 = vld [vmem:[#allocation2 + $0xb8] sm:$0xf0] }
 0x79d   : > { %v9690_v33 = vor.u32 %v10538_v31, %v9689_v23  ;;  %v9694_v39 = vor.u32 %v10536_v5, %v9691_v24  ;;  %v10412_v23 = vld [vmem:[%s15532_s2 + $0x4c] sm:$0xf]  ;;  %v9195_v31 = vld [vmem:[%s15532_s2 + $0x58] sm:$0xf0]  ;;  %v9241_v5 = vld [vmem:[#allocation2 + $0x28] sm:$0xf] }
 0x79e   : > { %9695 = vmatmul.msk.bf16.vlgmr.msra.gmra.mxu3 %vm3388_vm10, %v12169_v11  ;;  %9699 = vmatmul.msk.bf16.vlgmr.msrb.gmra.mxu2 %vm3388_vm10, %v12169_v11  ;;  %v12195_v50 = vor.u32 %v10412_v23, %v9195_v31  ;;  %v9242_v26 = vor.u32 %v10426_v45, %v9241_v5  ;;  %v9275_v23 = vld [vmem:[#allocation2 + $0x78] sm:$0xf0]  ;;  %v10432_v31 = vld [vmem:[#allocation2 + $0x6c] sm:$0xf] }
 0x79f   : > { %3517 = vmatpush.bf16.msrb.mxu3 %v9334_v16  ;;  %3722 = vmatpush.bf16.msra.mxu2 %v9690_v33  ;;  %v9338_v16 = vor.u32 %v10450_v59, %v9337_v25  ;;  %v10446_v33 = vld [vmem:[#allocation2 + $0xd4] sm:$0xf0]  ;;  %v10444_v59 = vld [vmem:[#allocation2 + $0xcc] sm:$0xf]  ;;  %v9291_v25 = vld [vmem:[#allocation2 + $0x98] sm:$0xf0] }
 0x7a0   : > { %3704 = vmatmul.bf16.gmra.mxu1 %v12101_v38  ;;  %v9322_v55 = vor.u32 %v10446_v33, %v9321_v20  ;;  %v9326_v34 = vor.u32 %v10444_v59, %v9323_v56  ;;  %v9278_v33 = vor.u32 %v10432_v31, %v9275_v23  ;;  %v3439_v20 = vpop.f32.mrf.mxu1 }
 0x7a3   : > { %3518 = vmatpush.bf16.msrb.mxu3 %v9318_v6  ;;  %3723 = vmatpush.bf16.msra.mxu2 %v9674_v52  ;;  %v9662_v6 = vor.u32 %v10528_v44, %v9659_v13  ;;  %v9643_v52 = vld [vmem:[#allocation2 + $0x358] sm:$0xf0] }
 0x7a4   : > { %v9259_v44 = vld [vmem:[#allocation2 + $0x58] sm:$0xf0] }
 0x7a7   : > { %3519 = vmatpush.bf16.msrb.mxu3 %v9302_v47  ;;  %3724 = vmatpush.bf16.msra.mxu2 %v9658_v43  ;;  %v10524_v47 = vld [vmem:[#allocation2 + $0x34c] sm:$0xf]  ;;  %v9627_v43 = vld [vmem:[#allocation2 + $0x338] sm:$0xf0] }
 0x7a8   : > { %v9646_v10 = vor.u32 %v10524_v47, %v9643_v52  ;;  %v10428_v52 = vld [vmem:[#allocation2 + $0x4c] sm:$0xf] }
 0x7a9   : > { %v9262_v47 = vor.u32 %v10428_v52, %v9259_v44 }
 0x7ab   : > { %3520 = vmatpush.bf16.msrb.mxu3 %v9286_v29  ;;  %3725 = vmatpush.bf16.msra.mxu2 %v9642_v42  ;;  %v10520_v29 = vld [vmem:[#allocation2 + $0x32c] sm:$0xf] }
 0x7ac   : > { %v9630_v32 = vor.u32 %v10520_v29, %v9627_v43  ;;  %v10516_v42 = vld [vmem:[#allocation2 + $0x30c] sm:$0xf] }
 0x7ad   : > { %v9614_v3 = vor.u32 %v10516_v42, %v9611_v46  ;;  %v10420_v29 = vld [vmem:[#allocation2 + $0xc] sm:$0xf] }
 0x7ae   : > { %9696 = vmatmul.msk.bf16.gmra.mxu3 %vm3388_vm10, %v12182_v4  ;;  %9700 = vmatmul.msk.bf16.gmra.mxu2 %vm3388_vm10, %v12182_v4 }
 0x7af   : > { %3521 = vmatpush.bf16.msrb.mxu3 %v9270_v0  ;;  %3726 = vmatpush.bf16.msra.mxu2 %v9626_v49  ;;  %v9273_v0 = vld [vmem:[#allocation2 + $0x68] sm:$0xf]  ;;  %v10430_v49 = vld [vmem:[#allocation2 + $0x54] sm:$0xf0] }
 0x7b0   : > { %3709 = vmatmul.bf16.gmra.mxu1 %v12125_v9  ;;  %v9274_v1 = vor.u32 %v10434_v27, %v9273_v0  ;;  %v9258_v62 = vor.u32 %v10430_v49, %v9257_v7  ;;  %v3470_v27 = vpop.f32.mrf.mxu2 }
 0x7b3   : > { %3522 = vmatpush.bf16.msrb.mxu3 %v9254_v17  ;;  %3727 = vmatpush.bf16.msra.mxu2 %v9610_v41  ;;  %v12208_v17 = vor.u32 %v10416_v15, %v9211_v61  ;;  %v10422_v41 = vld [vmem:[#allocation2 + $0x14] sm:$0xf0] }
 0x7b4   : > { %v9226_v24 = vor.u32 %v10422_v41, %v9225_v30 }
 0x7b7   : > { %3523 = vmatpush.bf16.msrb.mxu3 %v9238_v18  ;;  %3838 = vmatpush.bf16.msrb.mxu2 %v9694_v39  ;;  %v9339_v18 = vld [vmem:[#allocation2 + $0xf8] sm:$0xf0]  ;;  %v10448_v39 = vld [vmem:[#allocation2 + $0xec] sm:$0xf] }
 0x7b8   : > { %v9342_v54 = vor.u32 %v10448_v39, %v9339_v18  ;;  %v3473_v15 = vpop.f32.mrf.mxu2 }
 0x7bb   : > { %3524 = vmatpush.bf16.msrb.mxu3 %v9222_v51  ;;  %3839 = vmatpush.bf16.msrb.mxu2 %v9678_v36  ;;  %v10440_v51 = vld [vmem:[#allocation2 + $0xac] sm:$0xf] }
 0x7bc   : > { %v9310_v36 = vor.u32 %v10440_v51, %v9307_v60 }
 0x7be   : > { %9697 = vmatmul.msk.bf16.gmra.mxu3 %vm3388_vm10, %v12195_v50  ;;  %9701 = vmatmul.msk.bf16.gmra.mxu2 %vm3388_vm10, %v12195_v50 }
 0x7bf   : > { %3633 = vmatpush.bf16.msra.mxu3 %v9338_v16  ;;  %3840 = vmatpush.bf16.msrb.mxu2 %v9662_v6  ;;  %v10436_v16 = vld [vmem:[#allocation2 + $0x8c] sm:$0xf]  ;;  %v3410_v6 = vpop.f32.mrf.mxu0 }
 0x7c0   : > { %3714 = vmatmul.bf16.gmra.mxu1 %v12151_v28  ;;  %v9294_v13 = vor.u32 %v10436_v16, %v9291_v25 }
 0x7c3   : > { %3634 = vmatpush.bf16.msra.mxu3 %v9322_v55  ;;  %3841 = vmatpush.bf16.msrb.mxu2 %v9646_v10  ;;  %v3440_v55 = vadd.f32 %v3439_v20, %v3410_v6 }
 0x7c5   : > { %v3469_v10 = vadd.f32 %v3468_v2, %v3440_v55 }
 0x7c7   : > { %3635 = vmatpush.bf16.msra.mxu3 %v9306_v63  ;;  %3842 = vmatpush.bf16.msrb.mxu2 %v9630_v32  ;;  %v10424_v63 = vld [vmem:[#allocation2 + $0x2c] sm:$0xf]  ;;  %v9230_v32 = vor.u32 %v10420_v29, %v9227_v14  ;;  %v3412_v8 = vpop.f32.mrf.mxu0 }
 0x7c8   : > { %v9246_v43 = vor.u32 %v10424_v63, %v9243_v53  ;;  %3786 = vmatmul.bf16.vlgmr.msrb.gmra.mxu0 %v11553_v48  ;;  %v3475_v48 = vpop.f32.mrf.mxu2 }
 0x7cb   : > { %3636 = vmatpush.bf16.msra.mxu3 %v9290_v58  ;;  %3843 = vmatpush.bf16.msrb.mxu2 %v9614_v3  ;;  %v3441_v58 = vpop.f32.mrf.mxu1 }
 0x7cc   : > { %v3442_v46 = vadd.f32 %v3441_v58, %v3412_v8 }
 0x7ce   : > { %9698 = vmatmul.msk.bf16.gmra.mxu3 %vm3388_vm10, %v12208_v17  ;;  %9702 = vmatmul.msk.bf16.gmra.mxu2 %vm3388_vm10, %v12208_v17  ;;  %v3471_v42 = vadd.f32 %v3470_v27, %v3442_v46 }
 0x7cf   : > { %3637 = vmatpush.bf16.msra.mxu3 %v9274_v1  ;;  %v3415_v3 = vpop.f32.mrf.mxu0 }
 0x7d0   : > { %3815 = vmatmul.bf16.vlgmr.msrb.gmra.mxu1 %v11917_v22 }
 0x7d3   : > { %3638 = vmatpush.bf16.msra.mxu3 %v9258_v62  ;;  %v3444_v0 = vpop.f32.mrf.mxu1 }
 0x7d4   : > { %v3445_v1 = vadd.f32 %v3444_v0, %v3415_v3 }
 0x7d6   : > { %v3474_v61 = vadd.f32 %v3473_v15, %v3445_v1 }
 0x7d7   : > { %3639 = vmatpush.bf16.msra.mxu3 %v9242_v26  ;;  %v3417_v49 = vpop.f32.mrf.mxu0 }
 0x7d8   : > { %3791 = vmatmul.bf16.gmra.mxu0 %v11810_v40  ;;  %v3478_v41 = vpop.f32.mrf.mxu2 }
 0x7db   : > { %3640 = vmatpush.bf16.msra.mxu3 %v9226_v24  ;;  %v3446_v7 = vpop.f32.mrf.mxu1 }
 0x7dc   : > { %v3447_v62 = vadd.f32 %v3446_v7, %v3417_v49 }
 0x7de   : > { %3525 = vmatmul.bf16.vlgmr.msrb.gmra.mxu3 %v11436_v21  ;;  %9703 = vmatmul.msk.bf16.vlgmr.msra.gmra.mxu2 %vm3388_vm10, %v12169_v11  ;;  %v3476_v22 = vadd.f32 %v3475_v48, %v3447_v62 }
 0x7df   : > { %3749 = vmatpush.bf16.msrb.mxu3 %v9342_v54  ;;  %v3420_v45 = vpop.f32.mrf.mxu0 }
 0x7e0   : > { %3820 = vmatmul.bf16.gmra.mxu1 %v12101_v38  ;;  %v3480_v54 = vpop.f32.mrf.mxu2 }
 0x7e3   : > { %3750 = vmatpush.bf16.msrb.mxu3 %v9326_v34  ;;  %v3449_v5 = vpop.f32.mrf.mxu1 }
 0x7e4   : > { %v3450_v26 = vadd.f32 %v3449_v5, %v3420_v45 }
 0x7e6   : > { %v3479_v30 = vadd.f32 %v3478_v41, %v3450_v26 }
 0x7e7   : > { %3751 = vmatpush.bf16.msrb.mxu3 %v9310_v36  ;;  %v3422_v24 = vpop.f32.mrf.mxu0 }
 0x7e8   : > { %3796 = vmatmul.bf16.gmra.mxu0 %v11850_v12 }
 0x7eb   : > { %3752 = vmatpush.bf16.msrb.mxu3 %v9294_v13  ;;  %v3451_v18 = vpop.f32.mrf.mxu1 }
 0x7ec   : > { %v3452_v39 = vadd.f32 %v3451_v18, %v3422_v24 }
 0x7ee   : > { %3530 = vmatmul.bf16.gmra.mxu3 %v11455_v19  ;;  %9704 = vmatmul.msk.bf16.gmra.mxu2 %vm3388_vm10, %v12182_v4  ;;  %v3481_v56 = vadd.f32 %v3480_v54, %v3452_v39 }
 0x7ef   : > { %3753 = vmatpush.bf16.msrb.mxu3 %v9278_v33  ;;  %v3425_v59 = vpop.f32.mrf.mxu0 }
 0x7f0   : > { %3825 = vmatmul.bf16.gmra.mxu1 %v12125_v9 }
 0x7f3   : > { %3754 = vmatpush.bf16.msrb.mxu3 %v9262_v47  ;;  %v3454_v34 = vpop.f32.mrf.mxu1 }
 0x7f4   : > { %v3455_v60 = vadd.f32 %v3454_v34, %v3425_v59 }
 0x7f7   : > { %3755 = vmatpush.bf16.msrb.mxu3 %v9246_v43 }
 0x7fb   : > { %3756 = vmatpush.bf16.msrb.mxu3 %v9230_v32  ;;  %v3456_v13 = vpop.f32.mrf.mxu1 }
 0x7fe   : > { %3535 = vmatmul.bf16.gmra.mxu3 %v11475_v35  ;;  %9705 = vmatmul.msk.bf16.gmra.mxu2 %vm3388_vm10, %v12195_v50 }
 0x800   : > { %3830 = vmatmul.bf16.gmra.mxu1 %v12151_v28 }
 0x801   : > { %v3483_v25 = vpop.f32.mrf.mxu2 }
 0x802   : > { %v3484_v16 = vadd.f32 %v3483_v25, %v3455_v60 }
 0x803   : > { %v3584_v55 = vpop.f32.mrf.mxu1 }
 0x809   : > { %v3485_v31 = vpop.f32.mrf.mxu2 }
 0x80b   : > { %v12255_v2 = vpop.f32.mrf.mxu1 }
 0x80e   : > { %3540 = vmatmul.bf16.gmra.mxu3 %v11520_v37  ;;  %9706 = vmatmul.msk.bf16.gmra.mxu2 %vm3388_vm10, %v12208_v17 }
 0x813   : > { %v3589_v43 = vpop.f32.mrf.mxu1 }
 0x81b   : > { %v12268_v8 = vpop.f32.mrf.mxu1 }
 0x81e   : > { %3641 = vmatmul.bf16.vlgmr.msra.gmra.mxu3 %v11436_v21  ;;  %9707 = vmatmul.msk.bf16.vlgmr.msrb.gmra.mxu2 %vm3388_vm10, %v12169_v11  ;;  %v3427_v11 = vpop.f32.mrf.mxu0 }
 0x81f   : > { %v3457_v12 = vadd.f32 %v3456_v13, %v3427_v11  ;;  %3801 = vmatmul.bf16.gmra.mxu0 %v11893_v57 }
 0x821   : > { %v3497_v40 = vpop.f32.mrf.mxu3  ;;  %v3486_v33 = vadd.f32 %v3485_v31, %v3457_v12  ;;  %v3613_v52 = vpop.f32.mrf.mxu2 }
 0x822   : > { %v12235_v38 = vadd.f32 %v3497_v40, %v3469_v10 }
 0x823   : > { %v3594_v3 = vpop.f32.mrf.mxu1 }
 0x826   : > { %v3555_v20 = vpop.f32.mrf.mxu0 }
 0x829   : > { %v3499_v51 = vpop.f32.mrf.mxu3  ;;  %v12257_v47 = vpop.f32.mrf.mxu2 }
 0x82a   : > { %v12237_v36 = vadd.f32 %v3499_v51, %v3471_v42 }
 0x82b   : > { %v12279_v7 = vpop.f32.mrf.mxu1 }
 0x82e   : > { %3646 = vmatmul.bf16.gmra.mxu3 %v11455_v19  ;;  %9708 = vmatmul.msk.bf16.gmra.mxu2 %vm3388_vm10, %v12182_v4  ;;  %v12253_v28 = vpop.f32.mrf.mxu0 }
 0x831   : > { %v3502_v9 = vpop.f32.mrf.mxu3 }
 0x832   : > { %v12244_v23 = vadd.f32 %v3502_v9, %v3474_v61 }
 0x833   : > { %v3599_v5 = vpop.f32.mrf.mxu1 }
 0x836   : > { %v3560_v63 = vpop.f32.mrf.mxu0 }
 0x839   : > { %v3504_v44 = vpop.f32.mrf.mxu3 }
 0x83a   : > { %v12246_v6 = vadd.f32 %v3504_v44, %v3476_v22 }
 0x83b   : > { %v12292_v39 = vpop.f32.mrf.mxu1 }
 0x83c   : > { %15633 = vst [vmem:[#allocation7_spill] sm:$0xff] %v12292_v39 }
 0x83e   : > { %3651 = vmatmul.bf16.gmra.mxu3 %v11475_v35  ;;  %9709 = vmatmul.msk.bf16.gmra.mxu2 %vm3388_vm10, %v12195_v50  ;;  %v3618_v50 = vpop.f32.mrf.mxu2  ;;  %v12266_v32 = vpop.f32.mrf.mxu0 }
 0x841   : > { %v3507_v4 = vpop.f32.mrf.mxu3 }
 0x842   : > { %v12251_v57 = vadd.f32 %v3507_v4, %v3479_v30 }
 0x843   : > { %v3700_v34 = vpop.f32.mrf.mxu1 }
 0x846   : > { %v12270_v58 = vpop.f32.mrf.mxu2  ;;  %v3565_v42 = vpop.f32.mrf.mxu0 }
 0x849   : > { %v3509_v10 = vpop.f32.mrf.mxu3 }
 0x84a   : > { %v12259_v53 = vadd.f32 %v3509_v10, %v3481_v56 }
 0x84b   : > { %v3702_v11 = vpop.f32.mrf.mxu1 }
 0x84e   : > { %3656 = vmatmul.bf16.gmra.mxu3 %v11520_v37  ;;  %9710 = vmatmul.msk.bf16.gmra.mxu2 %vm3388_vm10, %v12208_v17  ;;  %v3623_v0 = vpop.f32.mrf.mxu2  ;;  %v12275_v61 = vpop.f32.mrf.mxu0 }
 0x851   : > { %v3512_v14 = vpop.f32.mrf.mxu3 }
 0x852   : > { %v12264_v29 = vadd.f32 %v3512_v14, %v3484_v16 }
 0x854   : > { %15630 = vst [vmem:[#allocation4_spill] sm:$0xff] %v12264_v29 }
 0x856   : > { %v12283_v48 = vpop.f32.mrf.mxu2  ;;  %v3570_v22 = vpop.f32.mrf.mxu0 }
 0x859   : > { %v3514_v46 = vpop.f32.mrf.mxu3 }
 0x85a   : > { %v12272_v27 = vadd.f32 %v3514_v46, %v3486_v33 }
 0x85c   : > { %15631 = vst [vmem:[#allocation5_spill] sm:$0xff] %v12272_v27 }
 0x85e   : > { %3757 = vmatmul.bf16.vlgmr.msrb.gmra.mxu3 %v11436_v21  ;;  %v3628_v26 = vpop.f32.mrf.mxu2  ;;  %v12290_v18 = vpop.f32.mrf.mxu0 }
 0x85f   : > { %15632 = vst [vmem:[#allocation6_spill] sm:$0xff] %v12290_v18 }
 0x861   : > { %v3526_v1 = vpop.f32.mrf.mxu3 }
 0x862   : > { %v3556_v17 = vadd.f32 %v3555_v20, %v3526_v1  ;;  %v3705_v20 = vpop.f32.mrf.mxu1 }
 0x864   : > { %v3585_v15 = vadd.f32 %v3584_v55, %v3556_v17 }
 0x866   : > { %v12277_v49 = vadd.f32 %v3613_v52, %v3585_v15  ;;  %v12294_v40 = vpop.f32.mrf.mxu2  ;;  %v3671_v56 = vpop.f32.mrf.mxu0 }
 0x867   : > { %15634 = vst [vmem:[#allocation8_spill] sm:$0xff] %v12294_v40 }
 0x869   : > { %v12281_v62 = vpop.f32.mrf.mxu3 }
 0x86a   : > { %v12310_v10 = vpop.f32.mrf.mxu1  ;;  %v3558_v29 = vadd.f32 %v12253_v28, %v12281_v62 }
 0x86e   : > { %3762 = vmatmul.bf16.gmra.mxu3 %v11455_v19  ;;  %v3729_v51 = vpop.f32.mrf.mxu2  ;;  %v3673_v16 = vpop.f32.mrf.mxu0 }
 0x871   : > { %v3531_v45 = vpop.f32.mrf.mxu3 }
 0x872   : > { %v3561_v21 = vadd.f32 %v3560_v63, %v3531_v45 }
 0x874   : > { %v3590_v41 = vadd.f32 %v3589_v43, %v3561_v21 }
 0x876   : > { %v12286_v30 = vadd.f32 %v3618_v50, %v3590_v41  ;;  %v3731_v12 = vpop.f32.mrf.mxu2  ;;  %v12316_v50 = vpop.f32.mrf.mxu1 }
 0x879   : > { %v12288_v24 = vpop.f32.mrf.mxu3 }
 0x87e   : > { %3767 = vmatmul.bf16.gmra.mxu3 %v11475_v35  ;;  %v3676_v35 = vpop.f32.mrf.mxu0  ;;  %v12306_v55 = vpop.f32.mrf.mxu2 }
 0x881   : > { %v3536_v54 = vpop.f32.mrf.mxu3 }
 0x882   : > { %v3566_v19 = vadd.f32 %v3565_v42, %v3536_v54 }
 0x884   : > { %v3595_v59 = vadd.f32 %v3594_v3, %v3566_v19  ;;  %v12322_v3 = vpop.f32.mrf.mxu1 }
 0x886   : > { %v12297_v60 = vadd.f32 %v3623_v0, %v3595_v59  ;;  %v12308_v4 = vpop.f32.mrf.mxu0  ;;  %v12312_v63 = vpop.f32.mrf.mxu2 }
 0x889   : > { %v12299_v25 = vpop.f32.mrf.mxu3 }
 0x88e   : > { %3772 = vmatmul.bf16.gmra.mxu3 %v11520_v37  ;;  %v12314_v43 = vpop.f32.mrf.mxu0  ;;  %v12318_v14 = vpop.f32.mrf.mxu2 }
 0x891   : > { %v3541_v13 = vpop.f32.mrf.mxu3 }
 0x892   : > { %v3571_v9 = vadd.f32 %v3570_v22, %v3541_v13  ;;  %v12330_v22 = vpop.f32.mrf.mxu1 }
 0x893   : > { %15637 = vst [vmem:[#allocation11_spill] sm:$0xff] %v12330_v22  ;;  %v3587_v22 = vadd.f32 %v12255_v2, %v3558_v29 }
 0x894   : > { %v3600_v31 = vadd.f32 %v3599_v5, %v3571_v9 }
 0x895   : > { %v12357_v28 = vadd.f32 %v12257_v47, %v3587_v22  ;;  %v3914_v22 = vmul.f32 %v12277_v49, %v12277_v49 }
 0x896   : > { %v12302_v33 = vadd.f32 %v3628_v26, %v3600_v31  ;;  %v12320_v42 = vpop.f32.mrf.mxu0  ;;  %v12324_v1 = vpop.f32.mrf.mxu2 }
 0x898   : > { %15635 = vst [vmem:[#allocation9_spill] sm:$0xff] %v12302_v33 }
 0x899   : > { %v12304_v44 = vpop.f32.mrf.mxu3 }
 0x89a   : > { %15636 = vst [vmem:[#allocation10_spill] sm:$0xff] %v12304_v44  ;;  %v12338_v26 = vpop.f32.mrf.mxu1  ;;  %v3865_v44 = vadd.f32 %v12277_v49, %v12235_v38 }
 0x89b   : > { %15640 = vst [vmem:[#allocation14_spill] sm:$0xff] %v12338_v26 }
 0x89e   : > { %v12326_v17 = vpop.f32.mrf.mxu0  ;;  %v12332_v45 = vpop.f32.mrf.mxu2 }
 0x89f   : > { %15638 = vst [vmem:[#allocation12_spill] sm:$0xff] %v12332_v45 }
 0x8a1   : > { %v3642_v52 = vpop.f32.mrf.mxu3 }
 0x8a2   : > { %v3816_v59 = vpop.f32.mrf.mxu1  ;;  %v3672_v31 = vadd.f32 %v3671_v56, %v3642_v52 }
 0x8a4   : > { %v3701_v40 = vadd.f32 %v3700_v34, %v3672_v31 }
 0x8a6   : > { %v12336_v21 = vpop.f32.mrf.mxu0  ;;  %v12340_v41 = vpop.f32.mrf.mxu2 }
 0x8a7   : > { %15639 = vst [vmem:[#allocation13_spill] sm:$0xff] %v12336_v21  ;;  %v12348_v21 = vadd.f32 %v3729_v51, %v3701_v40 }
 0x8a8   : > { %15641 = vst [vmem:[#allocation15_spill] sm:$0xff] %v12340_v41 }
 0x8a9   : > { %v3644_v37 = vpop.f32.mrf.mxu3  ;;  %v3866_v34 = vadd.f32 %v3865_v44, %v12348_v21 }
 0x8aa   : > { %v3818_v33 = vpop.f32.mrf.mxu1  ;;  %v3674_v26 = vadd.f32 %v3673_v16, %v3644_v37 }
 0x8ae   : > { %v3787_v19 = vpop.f32.mrf.mxu0  ;;  %v3845_v13 = vpop.f32.mrf.mxu2 }
 0x8b1   : > { %v3647_v46 = vpop.f32.mrf.mxu3 }
 0x8b2   : > { %v3821_v51 = vpop.f32.mrf.mxu1  ;;  %v3677_v2 = vadd.f32 %v3676_v35, %v3647_v46 }
 0x8b6   : > { %v3789_v27 = vpop.f32.mrf.mxu0  ;;  %v3847_v39 = vpop.f32.mrf.mxu2 }
 0x8b9   : > { %v3649_v0 = vpop.f32.mrf.mxu3 }
 0x8be   : > { %v3792_v52 = vpop.f32.mrf.mxu0  ;;  %v3850_v37 = vpop.f32.mrf.mxu2 }
 0x8c1   : > { %v12328_v15 = vpop.f32.mrf.mxu3 }
 0x8c6   : > { %v3794_v46 = vpop.f32.mrf.mxu0 }
 0x8c9   : > { %v12334_v5 = vpop.f32.mrf.mxu3 }
 0x8d1   : > { %v12342_v54 = vpop.f32.mrf.mxu3 }
 0x8d9   : > { %v12344_v9 = vpop.f32.mrf.mxu3 }
 0x8da   : > { %15642 = vst [vmem:[#allocation16_spill] sm:$0xff] %v12344_v9  ;;  %v3703_v9 = vadd.f32 %v3702_v11, %v3674_v26  ;;  %v3706_v11 = vadd.f32 %v3705_v20, %v3677_v2 }
 0x8dc   : > { %v12360_v16 = vadd.f32 %v3731_v12, %v3703_v9  ;;  %v3563_v12 = vadd.f32 %v12266_v32, %v12288_v24  ;;  %v12375_v26 = vadd.f32 %v12306_v55, %v3706_v11  ;;  %v3852_v55 = vpop.f32.mrf.mxu2 }
 0x8de   : > { %v3592_v32 = vadd.f32 %v12268_v8, %v3563_v12 }
 0x8e0   : > { %v12392_v8 = vadd.f32 %v12270_v58, %v3592_v32  ;;  %v3919_v58 = vmul.f32 %v12360_v16, %v12360_v16  ;;  %v3929_v32 = vmul.f32 %v12251_v57, %v12251_v57 }
 0x8e1   : > { %v3758_v45 = vpop.f32.mrf.mxu3 }
 0x8e2   : > { %v3788_v41 = vadd.f32 %v3787_v19, %v3758_v45  ;;  %v3823_v19 = vpop.f32.mrf.mxu1 }
 0x8e4   : > { %v3817_v18 = vadd.f32 %v3816_v59, %v3788_v41  ;;  %v3915_v41 = vmul.f32 %v12348_v21, %v12348_v21 }
 0x8e6   : > { %v12353_v56 = vadd.f32 %v3845_v13, %v3817_v18  ;;  %v3870_v18 = vadd.f32 %v12357_v28, %v12237_v36  ;;  %v3875_v13 = vadd.f32 %v12286_v30, %v12244_v23 }
 0x8e8   : > { %v3867_v62 = vadd.f32 %v3866_v34, %v12353_v56  ;;  %v3871_v47 = vadd.f32 %v3870_v18, %v12360_v16  ;;  %v3916_v9 = vmul.f32 %v12353_v56, %v12353_v56 }
 0x8e9   : > { %v3760_v40 = vpop.f32.mrf.mxu3 }
 0x8ea   : > { %v3790_v29 = vadd.f32 %v3789_v27, %v3760_v40  ;;  %3868 = vadd.xlane.f32.xlu2 %v3867_v62  ;;  %v3913_v27 = vmul.f32 %v12235_v38, %v12235_v38  ;;  %v3682_v62 = vadd.f32 %v12314_v43, %v12328_v15 }
 0x8ec   : > { %v3819_v45 = vadd.f32 %v3818_v33, %v3790_v29  ;;  %v3945_v59 = vadd.f32 %v3914_v22, %v3913_v27  ;;  %v3711_v43 = vadd.f32 %v12316_v50, %v3682_v62  ;;  %v3826_v22 = vpop.f32.mrf.mxu1  ;;  %v3855_v27 = vpop.f32.mrf.mxu2 }
 0x8ee   : > { %v12364_v44 = vadd.f32 %v3847_v39, %v3819_v45  ;;  %v3679_v39 = vadd.f32 %v12308_v4, %v3649_v0  ;;  %v3876_v0 = vadd.f32 %v3875_v13, %v12375_v26  ;;  %v3946_v34 = vadd.f32 %v3945_v59, %v3915_v41  ;;  %v3797_v45 = vpop.f32.mrf.mxu0 }
 0x8ef   : > { %v3930_v41 = vmul.f32 %v12297_v60, %v12297_v60 }
 0x8f0   : > { %v3872_v35 = vadd.f32 %v3871_v47, %v12364_v44  ;;  %v3708_v31 = vadd.f32 %v12310_v10, %v3679_v39  ;;  %v3917_v10 = vmul.f32 %v12237_v36, %v12237_v36  ;;  %v3920_v11 = vmul.f32 %v12364_v44, %v12364_v44 }
 0x8f1   : > { %v3763_v33 = vpop.f32.mrf.mxu3  ;;  %v3880_v47 = vadd.f32 %v12392_v8, %v12246_v6 }
 0x8f2   : > { %v3793_v20 = vadd.f32 %v3792_v52, %v3763_v33  ;;  %3873 = vadd.xlane.f32.xlu0 %v3872_v35  ;;  %v3918_v52 = vmul.f32 %v12357_v28, %v12357_v28  ;;  %v12400_v29 = vadd.f32 %v12312_v63, %v3708_v31  ;;  %v3568_v33 = vadd.f32 %v12275_v61, %v12299_v25 }
 0x8f3   : > { %v3885_v61 = vadd.f32 %v12297_v60, %v12251_v57  ;;  %v3965_v31 = vadd.f32 %v3930_v41, %v3929_v32  ;;  %v3925_v32 = vmul.f32 %v12246_v6, %v12246_v6 }
 0x8f4   : > { %v3822_v24 = vadd.f32 %v3821_v51, %v3793_v20  ;;  %v3947_v51 = vadd.f32 %v3946_v34, %v3916_v9  ;;  %v3950_v18 = vadd.f32 %v3918_v52, %v3917_v10  ;;  %v3881_v35 = vadd.f32 %v3880_v47, %v12400_v29  ;;  %v15644_v47 = vld [vmem:[#allocation10_spill] sm:$0xff] }
 0x8f5   : > { %v3597_v25 = vadd.f32 %v12279_v7, %v3568_v33  ;;  %v10818_v9 = vmov 0   ;;  %v3828_v7 = vpop.f32.mrf.mxu1 }
 0x8f6   : > { %v12386_v4 = vadd.f32 %v3850_v37, %v3822_v24  ;;  %v3951_v12 = vadd.f32 %v3950_v18, %v3919_v58  ;;  %v3799_v13 = vpop.f32.mrf.mxu0  ;;  %10726 = vset.pattern.permute.xlu0 %v10818_v9  ;;  %10725 = vset.pattern.permute.xlu2 %v10818_v9 }
 0x8f7   : > { %10727 = vset.pattern.permute.xlu1 %v10818_v9  ;;  %v12436_v34 = vadd.f32 %v12283_v48, %v3597_v25  ;;  %v3687_v48 = vadd.f32 %v12326_v17, %v12342_v54  ;;  %v15650_v9 = vld [vmem:[#allocation12_spill] sm:$0xff] }
 0x8f8   : > { %15643 = vst [vmem:[#allocation17_spill] sm:$0xff] %v12386_v4  ;;  %v3877_v40 = vadd.f32 %v3876_v0, %v12386_v4  ;;  %v3952_v50 = vadd.f32 %v3951_v12, %v3920_v11  ;;  %v3922_v0 = vmul.f32 %v12286_v30, %v12286_v30 }
 0x8f9   : > { %v3765_v2 = vpop.f32.mrf.mxu3 }
 0x8fa   : > { %v3795_v37 = vadd.f32 %v3794_v46, %v3765_v2  ;;  %3878 = vadd.xlane.f32.xlu1 %v3877_v40  ;;  %3948 = vadd.xlane.f32.xlu0 %v3947_v51  ;;  %v12415_v46 = vadd.f32 %v12318_v14, %v3711_v43  ;;  %v3857_v51 = vpop.f32.mrf.mxu2  ;;  %v3923_v2 = vmul.f32 %v12375_v26, %v12375_v26 }
 0x8fb   : > { %v3890_v43 = vadd.f32 %v12436_v34, %v12259_v53 }
 0x8fc   : > { %v3824_v15 = vadd.f32 %v3823_v19, %v3795_v37  ;;  %v3684_v19 = vadd.f32 %v12320_v42, %v12334_v5  ;;  %v3931_v24 = vmul.f32 %v12415_v46, %v12415_v46 }
 0x8fe   : > { %v12409_v63 = vadd.f32 %v3852_v55, %v3824_v15  ;;  %v3713_v42 = vadd.f32 %v12322_v3, %v3684_v19  ;;  %v3886_v55 = vadd.f32 %v3885_v61, %v12415_v46  ;;  %v3966_v40 = vadd.f32 %v3965_v31, %v3931_v24  ;;  %v3802_v33 = vpop.f32.mrf.mxu0  ;;  %v15649_v61 = vld [vmem:[#allocation7_spill] sm:$0xff] }
 0x8ff   : > { %v3921_v3 = vmul.f32 %v12244_v23, %v12244_v23  ;;  %v3924_v15 = vmul.f32 %v12386_v4, %v12386_v4  ;;  %v3927_v31 = vmul.f32 %v12400_v29, %v12400_v29 }
 0x900   : > { %v3882_v39 = vadd.f32 %v3881_v35, %v12409_v63  ;;  %v12446_v37 = vadd.f32 %v12324_v1, %v3713_v42  ;;  %v15646_v1 = vld [vmem:[#allocation11_spill] sm:$0xff] }
 0x901   : > { %v3768_v20 = vpop.f32.mrf.mxu3  ;;  %v3955_v11 = vadd.f32 %v3922_v0, %v3921_v3  ;;  %v3716_v35 = vadd.f32 %v15646_v1, %v3687_v48  ;;  %v3933_v0 = vmul.f32 %v12259_v53, %v12259_v53 }
 0x902   : > { %v3798_v59 = vadd.f32 %v3797_v45, %v3768_v20  ;;  %3953 = vadd.xlane.f32.xlu1 %v3952_v50  ;;  %3883 = vadd.xlane.f32.xlu2 %v3882_v39  ;;  %v3891_v17 = vadd.f32 %v3890_v43, %v12446_v37  ;;  %v3926_v50 = vmul.f32 %v12392_v8, %v12392_v8  ;;  %v15647_v39 = vld [vmem:[#allocation16_spill] sm:$0xff]  ;;  %v15648_v20 = vld [vmem:[#allocation13_spill] sm:$0xff] }
 0x903   : > { %v3956_v54 = vadd.f32 %v3955_v11, %v3923_v2  ;;  %v3689_v41 = vadd.f32 %v15648_v20, %v15647_v39  ;;  %v12471_v42 = vadd.f32 %v15650_v9, %v3716_v35  ;;  %v15653_v2 = vld [vmem:[#allocation9_spill] sm:$0xff]  ;;  %v15654_v43 = vld [vmem:[#allocation8_spill] sm:$0xff]  ;;  %v15655_v35 = vld [vmem:[#allocation15_spill] sm:$0xff] }
 0x904   : > { %v3827_v14 = vadd.f32 %v3826_v22, %v3798_v59  ;;  %v15645_v22 = vld [vmem:[#allocation6_spill] sm:$0xff] }
 0x905   : > { %v3573_v12 = vadd.f32 %v15645_v22, %v15644_v47  ;;  %v3957_v59 = vadd.f32 %v3956_v54, %v3924_v15 }
 0x906   : > { %v12430_v5 = vadd.f32 %v3855_v27, %v3827_v14  ;;  %v3831_v14 = vpop.f32.mrf.mxu1  ;;  %v3804_v39 = vpop.f32.mrf.mxu0 }
 0x907   : > { %v3602_v25 = vadd.f32 %v15649_v61, %v3573_v12  ;;  %v3938_v12 = vmul.f32 %v15653_v2, %v15653_v2  ;;  %v15656_v61 = vld [vmem:[#allocation5_spill] sm:$0xff] }
 0x908   : > { %v3887_v52 = vadd.f32 %v3886_v55, %v12430_v5  ;;  %v3932_v62 = vmul.f32 %v12430_v5, %v12430_v5 }
 0x909   : > { %v3770_v10 = vpop.f32.mrf.mxu3  ;;  %v12487_v15 = vadd.f32 %v15654_v43, %v3602_v25  ;;  %v3941_v25 = vmul.f32 %v15656_v61, %v15656_v61  ;;  %v4169_v43 = vld [vmem:[%s15534_s4] sm:$0xff] }
 0x90a   : > { %v3800_v58 = vadd.f32 %v3799_v13, %v3770_v10  ;;  %3888 = vadd.xlane.f32.xlu2 %v3887_v52  ;;  %v3967_v45 = vadd.f32 %v3966_v40, %v3932_v62  ;;  %v3934_v13 = vmul.f32 %v12436_v34, %v12436_v34  ;;  %v3960_v52 = vadd.f32 %v3926_v50, %v3925_v32  ;;  %v15651_v40 = vld [vmem:[#allocation14_spill] sm:$0xff]  ;;  %v15652_v10 = vld [vmem:[#allocation4_spill] sm:$0xff] }
 0x90b   : > { %v3935_v62 = vmul.f32 %v12446_v37, %v12446_v37  ;;  %v3718_v3 = vadd.f32 %v15651_v40, %v3689_v41  ;;  %v3895_v48 = vadd.f32 %v15653_v2, %v15652_v10  ;;  %v3937_v50 = vmul.f32 %v15652_v10, %v15652_v10 }
 0x90c   : > { %v3829_v18 = vadd.f32 %v3828_v7, %v3800_v58  ;;  %3968 = vadd.xlane.f32.xlu1 %v3967_v45  ;;  %v3860_v7 = vpop.f32.mrf.mxu2  ;;  %v3928_v58 = vmul.f32 %v12409_v63, %v12409_v63  ;;  %v3961_v22 = vadd.f32 %v3960_v52, %v3927_v31  ;;  %v3942_v32 = vmul.f32 %v12487_v15, %v12487_v15 }
 0x90d   : > { %v3896_v47 = vadd.f32 %v3895_v48, %v12471_v42 }
 0x90e   : > { %v12457_v27 = vadd.f32 %v3857_v51, %v3829_v18  ;;  %v3970_v18 = vadd.f32 %v3934_v13, %v3933_v0  ;;  %v3980_v40 = vadd.f32 %v3942_v32, %v3941_v25  ;;  %v4251_v32 = vld [vmem:[%s15535_s5 + $0x10] sm:$0xff]  ;;  %v4253_v25 = vld [vmem:[%s15535_s5 + $0x20] sm:$0xff] }
 0x910   : > { %v3892_v19 = vadd.f32 %v3891_v17, %v12457_v27  ;;  %v3936_v45 = vmul.f32 %v12457_v27, %v12457_v27  ;;  %v3971_v1 = vadd.f32 %v3970_v18, %v3935_v62  ;;  %v12495_v17 = vadd.f32 %v15655_v35, %v3718_v3  ;;  %v4170_v18 = vld [vmem:[%s15534_s4 + $0x8] sm:$0xff]  ;;  %v4252_v35 = vld [vmem:[%s15535_s5 + $0x18] sm:$0xff] }
 0x911   : > { %v3773_v24 = vpop.f32.mrf.mxu3 }
 0x912   : > { %v3803_v55 = vadd.f32 %v3802_v33, %v3773_v24  ;;  %3893 = vadd.xlane.f32.xlu0 %v3892_v19  ;;  %3958 = vadd.xlane.f32.xlu2 %v3957_v59  ;;  %v3962_v33 = vadd.f32 %v3961_v22, %v3928_v58  ;;  %v3972_v41 = vadd.f32 %v3971_v1, %v3936_v45  ;;  %v4249_v22 = vld [vmem:[%s15535_s5] sm:$0xff] }
 0x913   : > { %v3939_v59 = vmul.f32 %v12471_v42, %v12471_v42  ;;  %v3975_v24 = vadd.f32 %v3938_v12, %v3937_v50  ;;  %v3943_v31 = vmul.f32 %v12495_v17, %v12495_v17  ;;  %v4172_v12 = vld [vmem:[%s15534_s4 + $0x18] sm:$0xff]  ;;  %v4173_v1 = vld [vmem:[%s15534_s4 + $0x20] sm:$0xff]  ;;  %v4255_v50 = vld [vmem:[%s15535_s5 + $0x30] sm:$0xff] }
 0x914   : > { %v3832_v51 = vadd.f32 %v3831_v14, %v3803_v55  ;;  %v3833_v14 = vpop.f32.mrf.mxu1  ;;  %v3900_v55 = vadd.f32 %v12487_v15, %v15656_v61  ;;  %v3862_v0 = vpop.f32.mrf.mxu2 }
 0x915   : > { %v3976_v52 = vadd.f32 %v3975_v24, %v3939_v59  ;;  %v3981_v58 = vadd.f32 %v3980_v40, %v3943_v31  ;;  %v9712_v59 = vld [vmem:[%s15531_s1 + $0x22] ss:$8 sm:$0xf] }
 0x916   : > { %v12489_v11 = vadd.f32 %v3860_v7, %v3832_v51  ;;  %v3901_v62 = vadd.f32 %v3900_v55, %v12495_v17  ;;  %v4254_v24 = vld [vmem:[%s15535_s5 + $0x28] sm:$0xff] }
 0x918   : > { %v3897_v54 = vadd.f32 %v3896_v47, %v12489_v11  ;;  %v3940_v9 = vmul.f32 %v12489_v11, %v12489_v11  ;;  %v4171_v47 = vld [vmem:[%s15534_s4 + $0x10] sm:$0xff] }
 0x919   : > { %v3775_v20 = vpop.f32.mrf.mxu3 }
 0x91a   : > { %v3805_v19 = vadd.f32 %v3804_v39, %v3775_v20  ;;  %3898 = vadd.xlane.f32.xlu1 %v3897_v54  ;;  %3963 = vadd.xlane.f32.xlu0 %v3962_v33  ;;  %v3977_v3 = vadd.f32 %v3976_v52, %v3940_v9  ;;  %v4174_v54 = vld [vmem:[%s15534_s4 + $0x28] sm:$0xff]  ;;  %v4175_v33 = vld [vmem:[%s15534_s4 + $0x30] sm:$0xff]  ;;  %v4176_v20 = vld [vmem:[%s15534_s4 + $0x38] sm:$0xff]  ;;  %v4639_v9 = vperm.slane %v9712_v59, 3 }
 0x91b   : > { %3973 = vadd.xlane.f32.xlu2 %v3972_v41  ;;  %v9711_v39 = vld [vmem:[%s15531_s1 + $0x21] ss:$8 sm:$0xf] }
 0x91c   : > { %v3834_v13 = vadd.f32 %v3833_v14, %v3805_v19  ;;  %v4250_v41 = vld [vmem:[%s15535_s5 + $0x8] sm:$0xff]  ;;  %v4481_v19 = vperm.slane %v9711_v39, 1  ;;  %v4636_v14 = vperm.slane %v9712_v59, 0  ;;  %v4482_v52 = vperm.slane %v9711_v39, 2 }
 0x91e   : > { %v12512_v7 = vadd.f32 %v3862_v0, %v3834_v13  ;;  %v4256_v13 = vld [vmem:[%s15535_s5 + $0x38] sm:$0xff]  ;;  %v4480_v0 = vperm.slane %v9711_v39, 0 }
 0x920   : > { %v3902_v51 = vadd.f32 %v3901_v62, %v12512_v7  ;;  %v3944_v48 = vmul.f32 %v12512_v7, %v12512_v7 }
 0x922   : > { %3978 = vadd.xlane.f32.xlu0 %v3977_v3  ;;  %v3982_v45 = vadd.f32 %v3981_v58, %v3944_v48  ;;  %v4483_v58 = vperm.slane %v9711_v39, 3 }
 0x923   : > { %3903 = vadd.xlane.f32.xlu2 %v3902_v51 }
 0x924   : > { %3983 = vadd.xlane.f32.xlu1 %v3982_v45 }
 0x936   : > { %4184 = vperm.xlu0 %10726, %v4170_v18   ;;  %v4637_v18 = vperm.slane %v9712_v59, 1 }
 0x93b   : > { %4179 = vperm.xlu2 %10725, %v4169_v43  }
 0x93d   : > { %4189 = vperm.xlu1 %10727, %v4171_v47  }
 0x93e   : > { %4259 = vperm.xlu0 %10726, %v4249_v22  }
 0x943   : > { %4194 = vperm.xlu2 %10725, %v4172_v12  }
 0x945   : > { %4199 = vperm.xlu1 %10727, %v4173_v1  }
 0x946   : > { %4274 = vperm.xlu0 %10726, %v4252_v35  }
 0x94b   : > { %4204 = vperm.xlu2 %10725, %v4174_v54  }
 0x94d   : > { %4209 = vperm.xlu1 %10727, %v4175_v33   ;;  %v4638_v33 = vperm.slane %v9712_v59, 2 }
 0x94e   : > { %4289 = vperm.xlu0 %10726, %v4255_v50  }
 0x953   : > { %4214 = vperm.xlu2 %10725, %v4176_v20  }
 0x955   : > { %4264 = vperm.xlu1 %10727, %v4250_v41  }
 0x956   : > { %4486 = vrot.lane.b32.xlu0 %v4481_v19, %s10819_s13 }
 0x95b   : > { %4269 = vperm.xlu2 %10725, %v4251_v32  }
 0x95d   : > { %4279 = vperm.xlu1 %10727, %v4253_v25   ;;  %v3869_v31 = vpop.xlane.xlu2 %3868 }
 0x95e   : > { %4640 = vrot.lane.b32.xlu0 %v4636_v14, %s10814_s30  ;;  %v12575_v62 = vmul.f32 0.001953125, %v3869_v31 }
 0x960   : > { %v3993_v48 = vmul.f32 %v12575_v62, %v12575_v62 }
 0x963   : > { %4284 = vperm.xlu2 %10725, %v4254_v24  }
 0x965   : > { %4294 = vperm.xlu1 %10727, %v4256_v13   ;;  %v3874_v55 = vpop.xlane.xlu0 %3873 }
 0x966   : > { %4646 = vrot.lane.b32.xlu0 %v4639_v9, %s10814_s30  ;;  %v12581_v43 = vmul.f32 0.001953125, %v3874_v55 }
 0x968   : > { %v3994_v54 = vmul.f32 %v12581_v43, %v12581_v43 }
 0x96b   : > { %4484 = vrot.lane.b32.xlu2 %v4480_v0, %s10819_s13 }
 0x96d   : > { %v3879_v40 = vpop.xlane.xlu1 %3878  ;;  %4488 = vrot.lane.b32.xlu1 %v4482_v52, %s10819_s13  ;;  %v3949_v3 = vpop.xlane.xlu0 %3948 }
 0x96e   : > { %v3985_v51 = vmul.f32 0.001953125, %v3949_v3  ;;  %v12600_v24 = vmul.f32 0.001953125, %v3879_v40 }
 0x970   : > { %v4001_v45 = vsub.f32 %v3985_v51, %v3993_v48  ;;  %v3995_v51 = vmul.f32 %v12600_v24, %v12600_v24 }
 0x972   : > { %v4009_v47 = vmax.f32 %v4001_v45, 0.0 }
 0x973   : > { %4490 = vrot.lane.b32.xlu2 %v4483_v58, %s10819_s13 }
 0x974   : > { %v12585_v1 = vadd.f32 1e-05, %v4009_v47 }
 0x975   : > { %4642 = vrot.lane.b32.xlu1 %v4637_v18, %s10814_s30  ;;  %v3954_v22 = vpop.xlane.xlu1 %3953  ;;  %v3884_v12 = vpop.xlane.xlu2 %3883 }
 0x976   : > { %v3986_v35 = vmul.f32 0.001953125, %v3954_v22  ;;  %10728 = vrsqrt.f32 %v12585_v1  ;;  %v12614_v18 = vmul.f32 0.001953125, %v3884_v12  ;;  %vm4063_vm11 = vweird.f32 %v12585_v1 }
 0x978   : > { %v4002_v50 = vsub.f32 %v3986_v35, %v3994_v54 }
 0x97a   : > { %v4010_v39 = vmax.f32 %v4002_v50, 0.0 }
 0x97b   : > { %4644 = vrot.lane.b32.xlu2 %v4638_v33, %s10814_s30 }
 0x97c   : > { %v12591_v20 = vadd.f32 1e-05, %v4010_v39  ;;  %v12595_v25 = vpop.eup %10728 }
 0x97d   : > { %v3889_v41 = vpop.xlane.xlu2 %3888  ;;  %v4058_v9 = vmul.f32 %v12595_v25, %v12585_v1  ;;  %vm4064_vm12 = vweird.f32 %v12595_v25 }
 0x97e   : > { %v12593_v19 = vmul.f32 0.001953125, %v3889_v41  ;;  %10730 = vrsqrt.f32 %v12591_v20  ;;  %vm4073_vm13 = vweird.f32 %v12591_v20  ;;  %vm4065_vm14 = vmor %vm4063_vm11, %vm4064_vm12 }
 0x97f   : > { %v3969_v32 = vpop.xlane.xlu1 %3968  ;;  %v4059_v58 = vmul.f32 %v12595_v25, %v4058_v9 }
 0x980   : > { %v3989_v14 = vmul.f32 0.001953125, %v3969_v32  ;;  %v3997_v59 = vmul.f32 %v12593_v19, %v12593_v19 }
 0x981   : > { %v4060_v22 = vmul.f32 0.5, %v4059_v58 }
 0x982   : > { %v4005_v13 = vsub.f32 %v3989_v14, %v3997_v59 }
 0x984   : > { %v4013_v55 = vmax.f32 %v4005_v13, 0.0  ;;  %v12604_v52 = vpop.eup %10730 }
 0x985   : > { %v3894_v31 = vpop.xlane.xlu0 %3893  ;;  %v3959_v0 = vpop.xlane.xlu2 %3958  ;;  %v4068_v45 = vmul.f32 %v12604_v52, %v12591_v20  ;;  %vm4074_vm15 = vweird.f32 %v12604_v52 }
 0x986   : > { %v12606_v3 = vadd.f32 1e-05, %v4013_v55  ;;  %v3987_v48 = vmul.f32 0.001953125, %v3959_v0  ;;  %v12616_v35 = vmul.f32 0.001953125, %v3894_v31  ;;  %v3996_v31 = vmul.f32 %v12614_v18, %v12614_v18  ;;  %vm4075_vm5 = vmor %vm4073_vm13, %vm4074_vm15 }
 0x987   : > { %v4069_v12 = vmul.f32 %v12604_v52, %v4068_v45 }
 0x988   : > { %10732 = vrsqrt.f32 %v12606_v3  ;;  %v4003_v40 = vsub.f32 %v3987_v48, %v3995_v51  ;;  %v4061_v48 = vsub.f32 1.5, %v4060_v22  ;;  %v3998_v45 = vmul.f32 %v12616_v35, %v12616_v35 }
 0x989   : > { %v4070_v22 = vmul.f32 0.5, %v4069_v12  ;;  %vm4103_vm1 = vweird.f32 %v12606_v3  ;;  %v15659_v12 = vsub.f32 %v12348_v21, %v12575_v62  ;;  %v15663_v21 = vsub.f32 %v12360_v16, %v12581_v43 }
 0x98a   : > { %v4011_v47 = vmax.f32 %v4003_v40, 0.0  ;;  %v4062_v59 = vmul.f32 %v12595_v25, %v4061_v48 }
 0x98c   : > { %v12620_v33 = vadd.f32 1e-05, %v4011_v47 }
 0x98d   : > { %v3964_v32 = vpop.xlane.xlu0 %3963  ;;  %v3899_v40 = vpop.xlane.xlu1 %3898 }
 0x98e   : > { %v12635_v9 = vpop.eup %10732  ;;  %10734 = vrsqrt.f32 %v12620_v33  ;;  %v3988_v55 = vmul.f32 0.001953125, %v3964_v32  ;;  %v3974_v0 = vpop.xlane.xlu2 %3973  ;;  %v4066_v32 = vsel %vm4065_vm14, %v12595_v25, %v4062_v59  ;;  %vm4083_vm11 = vweird.f32 %v12620_v33 }
 0x98f   : > { %v4098_v58 = vmul.f32 %v12635_v9, %v12606_v3  ;;  %v3990_v47 = vmul.f32 0.001953125, %v3974_v0  ;;  %v12656_v0 = vmul.f32 0.001953125, %v3899_v40  ;;  %v4071_v40 = vsub.f32 1.5, %v4070_v22 }
 0x990   : > { %v4004_v13 = vsub.f32 %v3988_v55, %v3996_v31  ;;  %v12713_v25 = vmul.f32 %v4066_v32, %v15659_v12  ;;  %vm4104_vm10 = vweird.f32 %v12635_v9 }
 0x991   : > { %v4006_v51 = vsub.f32 %v3990_v47, %v3998_v45  ;;  %v4099_v39 = vmul.f32 %v12635_v9, %v4098_v58  ;;  %vm4105_vm12 = vmor %vm4103_vm1, %vm4104_vm10 }
 0x992   : > { %v4012_v55 = vmax.f32 %v4004_v13, 0.0  ;;  %v3999_v13 = vmul.f32 %v12656_v0, %v12656_v0 }
 0x993   : > { %v4014_v14 = vmax.f32 %v4006_v51, 0.0 }
 0x994   : > { %v12664_v45 = vpop.eup %10734  ;;  %v12667_v47 = vadd.f32 1e-05, %v4012_v55  ;;  %v4100_v55 = vmul.f32 0.5, %v4099_v39 }
 0x995   : > { %v4078_v48 = vmul.f32 %v12664_v45, %v12620_v33  ;;  %v12675_v51 = vadd.f32 1e-05, %v4014_v14  ;;  %v3979_v41 = vpop.xlane.xlu0 %3978  ;;  %vm4084_vm13 = vweird.f32 %v12664_v45 }
 0x996   : > { %10736 = vrsqrt.f32 %v12667_v47  ;;  %v3991_v58 = vmul.f32 0.001953125, %v3979_v41  ;;  %v3904_v22 = vpop.xlane.xlu2 %3903  ;;  %v4072_v41 = vmul.f32 %v12604_v52, %v4071_v40  ;;  %v4101_v59 = vsub.f32 1.5, %v4100_v55 }
 0x997   : > { %v4079_v14 = vmul.f32 %v12664_v45, %v4078_v48  ;;  %10738 = vrsqrt.f32 %v12675_v51  ;;  %v3984_v31 = vpop.xlane.xlu1 %3983  ;;  %v12689_v50 = vmul.f32 0.001953125, %v3904_v22  ;;  %v15658_v40 = vsub.f32 %v12277_v49, %v12575_v62 }
 0x998   : > { %v4007_v1 = vsub.f32 %v3991_v58, %v3999_v13  ;;  %v3992_v39 = vmul.f32 0.001953125, %v3984_v31  ;;  %v15657_v31 = vsub.f32 %v12235_v38, %v12575_v62  ;;  %v15660_v55 = vsub.f32 %v12353_v56, %v12575_v62 }
 0x999   : > { %v4000_v13 = vmul.f32 %v12689_v50, %v12689_v50  ;;  %v4080_v22 = vmul.f32 0.5, %v4079_v14  ;;  %v12708_v54 = vmul.f32 %v4066_v32, %v15658_v40  ;;  %v4037_v49 = vsub.f32 %v12259_v53, %v12616_v35 }
 0x99a   : > { %v4015_v48 = vmax.f32 %v4007_v1, 0.0  ;;  %v12703_v58 = vmul.f32 %v4066_v32, %v15657_v31  ;;  %v12718_v1 = vmul.f32 %v4066_v32, %v15660_v55  ;;  %v4076_v31 = vsel %vm4075_vm5, %v12604_v52, %v4072_v41  ;;  %vm4085_vm5 = vmor %vm4083_vm11, %vm4084_vm13 }
 0x99b   : > { %v4008_v14 = vsub.f32 %v3992_v39, %v4000_v13  ;;  %v4102_v32 = vmul.f32 %v12635_v9, %v4101_v59  ;;  %v4081_v13 = vsub.f32 1.5, %v4080_v22  ;;  %v15661_v55 = vsub.f32 %v12237_v36, %v12581_v43 }
 0x99c   : > { %v10737_v4 = vpop.eup %10736  ;;  %v12722_v38 = vadd.f32 1e-05, %v4015_v48  ;;  %v15662_v59 = vsub.f32 %v12357_v28, %v12581_v43  ;;  %v12756_v22 = vmul.f32 %v4076_v31, %v15663_v21  ;;  %v15664_v36 = vsub.f32 %v12364_v44, %v12581_v43 }
 0x99d   : > { %v12728_v12 = vpop.eup %10738  ;;  %v4088_v56 = vmul.f32 %v10737_v4, %v12667_v47  ;;  %v4016_v41 = vmax.f32 %v4008_v14, 0.0  ;;  %v12746_v20 = vmul.f32 %v4076_v31, %v15661_v55  ;;  %v4106_v55 = vsel %vm4105_vm12, %v12635_v9, %v4102_v32 }
 0x99e   : > { %v4108_v39 = vmul.f32 %v12728_v12, %v12675_v51  ;;  %10740 = vrsqrt.f32 %v12722_v38  ;;  %v4180_v48 = vpop.permute.xlu2 %4179  ;;  %v12751_v62 = vmul.f32 %v4076_v31, %v15662_v59  ;;  %v4082_v21 = vmul.f32 %v12664_v45, %v4081_v13 }
 0x99f   : > { %v4089_v52 = vmul.f32 %v10737_v4, %v4088_v56  ;;  %v12760_v56 = vadd.f32 1e-05, %v4016_v41  ;;  %vm4094_vm14 = vweird.f32 %v10737_v4  ;;  %vm4093_vm15 = vweird.f32 %v12667_v47 }
 0x9a0   : > { %v4109_v40 = vmul.f32 %v12728_v12, %v4108_v39  ;;  %v12765_v39 = vmul.f32 %v4076_v31, %v15664_v36  ;;  %vm4113_vm1 = vweird.f32 %v12675_v51  ;;  %v4045_v41 = vsub.f32 %v15656_v61, %v12689_v50  ;;  %vm4095_vm10 = vmor %vm4093_vm15, %vm4094_vm14 }
 0x9a1   : > { %v4090_v14 = vmul.f32 0.5, %v4089_v52  ;;  %10742 = vrsqrt.f32 %v12760_v56  ;;  %v4047_v59 = vsub.f32 %v12495_v17, %v12689_v50  ;;  %v15666_v43 = vsub.f32 %v12297_v60, %v12593_v19 }
 0x9a2   : > { %v4110_v16 = vmul.f32 0.5, %v4109_v40  ;;  %v4046_v40 = vsub.f32 %v12487_v15, %v12689_v50  ;;  %vm4114_vm11 = vweird.f32 %v12728_v12  ;;  %v4217_v28 = vmul.f32 %v4180_v48, %v12703_v58 }
 0x9a3   : > { %v4091_v52 = vsub.f32 1.5, %v4090_v14  ;;  %v15665_v14 = vsub.f32 %v12251_v57, %v12593_v19  ;;  %v12805_v3 = vmul.f32 %v4106_v55, %v15666_v43  ;;  %v15667_v57 = vsub.f32 %v12415_v46, %v12593_v19  ;;  %vm4115_vm13 = vmor %vm4113_vm1, %vm4114_vm11 }
 0x9a4   : > { %v12775_v44 = vpop.eup %10740  ;;  %v4111_v32 = vsub.f32 1.5, %v4110_v16  ;;  %v4086_v16 = vsel %vm4085_vm5, %v12664_v45, %v4082_v21  ;;  %vm4123_vm12 = vweird.f32 %v12722_v38  ;;  %v4220_v46 = vmul.f32 %v4180_v48, %v12718_v1 }
 0x9a5   : > { %v4092_v31 = vmul.f32 %v10737_v4, %v4091_v52  ;;  %v4118_v13 = vmul.f32 %v12775_v44, %v12722_v38  ;;  %v12798_v36 = vmul.f32 %v4106_v55, %v15665_v14  ;;  %v12812_v14 = vmul.f32 %v4106_v55, %v15667_v57 }
 0x9a6   : > { %v4195_v47 = vpop.permute.xlu2 %4194  ;;  %v4112_v60 = vmul.f32 %v12728_v12, %v4111_v32  ;;  %v15669_v57 = vsub.f32 %v12246_v6, %v12614_v18  ;;  %v15674_v6 = vsub.f32 %v12286_v30, %v12600_v24  ;;  %vm4124_vm14 = vweird.f32 %v12775_v44 }
 0x9a7   : > { %v4096_v52 = vsel %vm4095_vm10, %v10737_v4, %v4092_v31  ;;  %v4119_v9 = vmul.f32 %v12775_v44, %v4118_v13  ;;  %v15668_v4 = vsub.f32 %v12430_v5, %v12593_v19  ;;  %v10743_v21 = vpop.eup %10742  ;;  %v4218_v31 = vmul.f32 %v4180_v48, %v12708_v54  ;;  %vm4125_vm5 = vmor %vm4123_vm12, %vm4124_vm14 }
 0x9a8   : > { %v4185_v33 = vpop.permute.xlu0 %4184  ;;  %v4219_v13 = vmul.f32 %v4180_v48, %v12713_v25  ;;  %v4128_v58 = vmul.f32 %v10743_v21, %v12760_v56  ;;  %v4149_v5 = vmul.f32 %v4096_v52, %v15669_v57  ;;  %v15670_v19 = vsub.f32 %v12244_v23, %v12600_v24 }
 0x9a9   : > { %v12817_v45 = vmul.f32 %v4106_v55, %v15668_v4  ;;  %v4120_v43 = vmul.f32 0.5, %v4119_v9  ;;  %v15671_v9 = vsub.f32 %v12392_v8, %v12614_v18  ;;  %v15672_v25 = vsub.f32 %v12400_v29, %v12614_v18 }
 0x9aa   : > { %v4145_v55 = vmul.f32 %v4086_v16, %v15670_v19  ;;  %v15673_v4 = vsub.f32 %v12409_v63, %v12614_v18  ;;  %v4146_v48 = vmul.f32 %v4086_v16, %v15674_v6  ;;  %v4129_v8 = vmul.f32 %v10743_v21, %v4128_v58  ;;  %v15676_v19 = vld [vmem:[#allocation17_spill] sm:$0xff] }
 0x9ab   : > { %v4150_v54 = vmul.f32 %v4096_v52, %v15671_v9  ;;  %v4151_v32 = vmul.f32 %v4096_v52, %v15672_v25  ;;  %v4121_v23 = vsub.f32 1.5, %v4120_v43  ;;  %v15675_v57 = vsub.f32 %v12375_v26, %v12600_v24 }
 0x9ac   : > { %v4152_v1 = vmul.f32 %v4096_v52, %v15673_v4  ;;  %v15677_v9 = vsub.f32 %v15676_v19, %v12600_v24  ;;  %v4116_v18 = vsel %vm4115_vm13, %v12728_v12, %v4112_v60  ;;  %vm4133_vm15 = vweird.f32 %v12760_v56 }
 0x9ad   : > { %v4147_v29 = vmul.f32 %v4086_v16, %v15675_v57  ;;  %v12857_v30 = vmul.f32 %v4185_v33, %v12746_v20  ;;  %v4130_v51 = vmul.f32 0.5, %v4129_v8  ;;  %vm4134_vm1 = vweird.f32 %v10743_v21 }
 0x9ae   : > { %v4148_v63 = vmul.f32 %v4086_v16, %v15677_v9  ;;  %v4229_v52 = vmul.f32 %v4195_v47, %v4149_v5  ;;  %v12860_v43 = vmul.f32 %v4185_v33, %v12751_v62  ;;  %v4205_v26 = vpop.permute.xlu2 %4204  ;;  %v4230_v58 = vmul.f32 %v4195_v47, %v4150_v54  ;;  %vm4135_vm4 = vmor %vm4133_vm15, %vm4134_vm1 }
 0x9af   : > { %v4231_v25 = vmul.f32 %v4195_v47, %v4151_v32  ;;  %v4232_v24 = vmul.f32 %v4195_v47, %v4152_v1  ;;  %v12863_v16 = vmul.f32 %v4185_v33, %v12756_v22  ;;  %v4190_v12 = vpop.permute.xlu1 %4189  ;;  %v4122_v60 = vmul.f32 %v12775_v44, %v4121_v23 }
 0x9b0   : > { %v4131_v4 = vsub.f32 1.5, %v4130_v51  ;;  %v12867_v20 = vmul.f32 %v4185_v33, %v12765_v39  ;;  %v4157_v5 = vmul.f32 %v4116_v18, %v4037_v49  ;;  %v4260_v62 = vpop.permute.xlu0 %4259  ;;  %v15678_v54 = vsub.f32 %v12436_v34, %v12616_v35 }
 0x9b1   : > { %v15679_v22 = vsub.f32 %v12446_v37, %v12616_v35  ;;  %v4297_v1 = vadd.f32 %v4260_v62, %v4217_v28  ;;  %v4298_v6 = vadd.f32 %v4260_v62, %v4218_v31  ;;  %v15680_v39 = vsub.f32 %v12457_v27, %v12616_v35 }
 0x9b2   : > { %v4158_v32 = vmul.f32 %v4116_v18, %v15678_v54  ;;  %v4132_v23 = vmul.f32 %v10743_v21, %v4131_v4  ;;  %v4299_v8 = vadd.f32 %v4260_v62, %v4219_v13  ;;  %v4300_v57 = vadd.f32 %v4260_v62, %v4220_v46 }
 0x9b3   : > { %v4159_v47 = vmul.f32 %v4116_v18, %v15679_v22  ;;  %v4160_v33 = vmul.f32 %v4116_v18, %v15680_v39  ;;  %vm4329_vm10 = vcmp.gt.f32.partialorder %v4297_v1, 0.0  ;;  %vm4330_vm11 = vcmp.gt.f32.partialorder %v4298_v6, 0.0 }
 0x9b4   : > { %v4361_v53 = vmul.f32 0.01, %v4297_v1  ;;  %v4362_v34 = vmul.f32 0.01, %v4298_v6  ;;  %v4126_v37 = vsel %vm4125_vm5, %v12775_v44, %v4122_v60  ;;  %vm4331_vm13 = vcmp.gt.f32.partialorder %v4299_v8, 0.0 }
 0x9b5   : > { %vm4332_vm2 = vcmp.gt.f32.partialorder %v4300_v57, 0.0  ;;  %v4363_v49 = vmul.f32 0.01, %v4299_v8  ;;  %v12889_v27 = vmul.f32 %v4205_v26, %v4157_v5  ;;  %v4364_v35 = vmul.f32 0.01, %v4300_v57 }
 0x9b6   : > { %v12891_v28 = vsel %vm4329_vm10, %v4297_v1, %v4361_v53  ;;  %v12893_v38 = vsel %vm4330_vm11, %v4298_v6, %v4362_v34  ;;  %v4136_v31 = vsel %vm4135_vm4, %v10743_v21, %v4132_v23  ;;  %v12895_v13 = vmul.f32 %v4205_v26, %v4158_v32  ;;  %v12901_v19 = vpop.permute.xlu2 %4214 }
 0x9b7   : > { %v12897_v46 = vsel %vm4331_vm13, %v4299_v8, %v4363_v49  ;;  %v5095_v44 = vpack.c.bf16 %v12893_v38, %v12891_v28  ;;  %v12903_v9 = vmul.f32 %v4205_v26, %v4159_v47  ;;  %v12905_v56 = vmul.f32 %v4205_v26, %v4160_v33  ;;  %v12909_v60 = vpop.permute.xlu1 %4199 }
 0x9b8   : > { %v4225_v18 = vmul.f32 %v4190_v12, %v4145_v55  ;;  %v12907_v51 = vsel %vm4332_vm2, %v4300_v57, %v4364_v35  ;;  %v4226_v4 = vmul.f32 %v4190_v12, %v4146_v48  ;;  %v4227_v21 = vmul.f32 %v4190_v12, %v4147_v29  ;;  %v4275_v54 = vpop.permute.xlu0 %4274 }
 0x9b9   : > { %v4228_v5 = vmul.f32 %v4190_v12, %v4148_v63  ;;  %v5096_v62 = vpack.c.bf16 %v12907_v51, %v12897_v46  ;;  %5103 = vst [vmem:[#allocation2 + $0x100] sm:$0xff] %v5095_v44  ;;  %v4165_v32 = vmul.f32 %v4136_v31, %v4045_v41  ;;  %v4166_v55 = vmul.f32 %v4136_v31, %v4046_v40 }
 0x9ba   : > { %v12922_v26 = vmul.f32 %v4136_v31, %v4047_v59  ;;  %v15681_v48 = vsub.f32 %v15652_v10, %v12656_v0  ;;  %v4309_v63 = vadd.f32 %v4275_v54, %v4229_v52  ;;  %v4310_v12 = vadd.f32 %v4275_v54, %v4230_v58 }
 0x9bb   : > { %5104 = vst [vmem:[#allocation2 + $0x108] sm:$0xff] %v5096_v62  ;;  %v4311_v22 = vadd.f32 %v4275_v54, %v4231_v25  ;;  %v4312_v47 = vadd.f32 %v4275_v54, %v4232_v24  ;;  %v15682_v61 = vsub.f32 %v12512_v7, %v12689_v50  ;;  %v12933_v15 = vmul.f32 %v12901_v19, %v4165_v32 }
 0x9bc   : > { %v4161_v29 = vmul.f32 %v4126_v37, %v15681_v48  ;;  %v12936_v17 = vmul.f32 %v12901_v19, %v4166_v55  ;;  %v15683_v10 = vsub.f32 %v15653_v2, %v12656_v0  ;;  %vm4341_vm2 = vcmp.gt.f32.partialorder %v4309_v63, 0.0 }
 0x9bd   : > { %v12930_v41 = vmul.f32 %v4136_v31, %v15682_v61  ;;  %vm4342_vm4 = vcmp.gt.f32.partialorder %v4310_v12, 0.0  ;;  %vm4343_vm12 = vcmp.gt.f32.partialorder %v4311_v22, 0.0  ;;  %vm4344_vm14 = vcmp.gt.f32.partialorder %v4312_v47, 0.0 }
 0x9be   : > { %v4162_v40 = vmul.f32 %v4126_v37, %v15683_v10  ;;  %v12943_v59 = vmul.f32 %v12909_v60, %v12798_v36  ;;  %v4373_v7 = vmul.f32 0.01, %v4309_v63  ;;  %v4374_v50 = vmul.f32 0.01, %v4310_v12  ;;  %v4270_v24 = vpop.permute.xlu2 %4269 }
 0x9bf   : > { %v4375_v52 = vmul.f32 0.01, %v4311_v22  ;;  %v12947_v58 = vmul.f32 %v12909_v60, %v12805_v3  ;;  %v4376_v25 = vmul.f32 0.01, %v4312_v47  ;;  %v15684_v2 = vsub.f32 %v12471_v42, %v12656_v0  ;;  %v4210_v57 = vpop.permute.xlu1 %4209 }
 0x9c0   : > { %v15685_v6 = vsub.f32 %v12489_v11, %v12656_v0  ;;  %v12955_v39 = vsel %vm4341_vm2, %v4309_v63, %v4373_v7  ;;  %v12957_v36 = vsel %vm4342_vm4, %v4310_v12, %v4374_v50  ;;  %v4305_v8 = vadd.f32 %v4270_v24, %v4225_v18  ;;  %v4290_v31 = vpop.permute.xlu0 %4289 }
 0x9c1   : > { %v4163_v1 = vmul.f32 %v4126_v37, %v15684_v2  ;;  %v12959_v33 = vsel %vm4343_vm12, %v4311_v22, %v4375_v52  ;;  %v12961_v3 = vsel %vm4344_vm14, %v4312_v47, %v4376_v25  ;;  %v5101_v53 = vpack.c.bf16 %v12957_v36, %v12955_v39 }
 0x9c2   : > { %v4164_v23 = vmul.f32 %v4126_v37, %v15685_v6  ;;  %v4306_v34 = vadd.f32 %v4270_v24, %v4226_v4  ;;  %v4307_v42 = vadd.f32 %v4270_v24, %v4227_v21  ;;  %v5102_v49 = vpack.c.bf16 %v12961_v3, %v12959_v33 }
 0x9c3   : > { %v4308_v11 = vadd.f32 %v4270_v24, %v4228_v5  ;;  %vm4337_vm15 = vcmp.gt.f32.partialorder %v4305_v8, 0.0  ;;  %v4369_v0 = vmul.f32 0.01, %v4305_v8  ;;  %5109 = vst [vmem:[#allocation2 + $0x130] sm:$0xff] %v5101_v53  ;;  %v4241_v35 = vmul.f32 %v4210_v57, %v4161_v29 }
 0x9c4   : > { %vm4338_vm1 = vcmp.gt.f32.partialorder %v4306_v34, 0.0  ;;  %vm4339_vm5 = vcmp.gt.f32.partialorder %v4307_v42, 0.0  ;;  %v4370_v37 = vmul.f32 0.01, %v4306_v34  ;;  %5110 = vst [vmem:[#allocation2 + $0x138] sm:$0xff] %v5102_v49  ;;  %v4242_v21 = vmul.f32 %v4210_v57, %v4162_v40 }
 0x9c5   : > { %vm4340_vm10 = vcmp.gt.f32.partialorder %v4308_v11, 0.0  ;;  %v4371_v44 = vmul.f32 0.01, %v4307_v42  ;;  %v4372_v18 = vmul.f32 0.01, %v4308_v11  ;;  %v12967_v62 = vsel %vm4337_vm15, %v4305_v8, %v4369_v0 }
 0x9c6   : > { %v12969_v4 = vsel %vm4338_vm1, %v4306_v34, %v4370_v37  ;;  %v4243_v54 = vmul.f32 %v4210_v57, %v4163_v1  ;;  %v4244_v32 = vmul.f32 %v4210_v57, %v4164_v23  ;;  %v4321_v29 = vadd.f32 %v4290_v31, %v4241_v35  ;;  %v4285_v61 = vpop.permute.xlu2 %4284 }
 0x9c7   : > { %v12971_v5 = vsel %vm4339_vm5, %v4307_v42, %v4371_v44  ;;  %v12973_v55 = vsel %vm4340_vm10, %v4308_v11, %v4372_v18  ;;  %v5099_v48 = vpack.c.bf16 %v12969_v4, %v12967_v62  ;;  %v4322_v12 = vadd.f32 %v4290_v31, %v4242_v21  ;;  %v4265_v50 = vpop.permute.xlu1 %4264 }
 0x9c8   : > { %v5100_v63 = vpack.c.bf16 %v12973_v55, %v12971_v5  ;;  %v4323_v22 = vadd.f32 %v4290_v31, %v4243_v54  ;;  %v4324_v47 = vadd.f32 %v4290_v31, %v4244_v32  ;;  %vm4492_vm11 = vcmask 973824  }
 0x9c9   : > { %5107 = vst [vmem:[#allocation2 + $0x120] sm:$0xff] %v5099_v48  ;;  %vm4353_vm13 = vcmp.gt.f32.partialorder %v4321_v29, 0.0  ;;  %v4385_v10 = vmul.f32 0.01, %v4321_v29  ;;  %v4317_v40 = vadd.f32 %v4285_v61, %v12889_v27  ;;  %v4318_v7 = vadd.f32 %v4285_v61, %v12895_v13 }
 0x9ca   : > { %5108 = vst [vmem:[#allocation2 + $0x128] sm:$0xff] %v5100_v63  ;;  %vm4354_vm2 = vcmp.gt.f32.partialorder %v4322_v12, 0.0  ;;  %vm4355_vm4 = vcmp.gt.f32.partialorder %v4323_v22, 0.0  ;;  %vm4356_vm12 = vcmp.gt.f32.partialorder %v4324_v47, 0.0  ;;  %v4386_v52 = vmul.f32 0.01, %v4322_v12 }
 0x9cb   : > { %v4387_v25 = vmul.f32 0.01, %v4323_v22  ;;  %v4388_v24 = vmul.f32 0.01, %v4324_v47  ;;  %v12981_v2 = vsel %vm4353_vm13, %v4321_v29, %v4385_v10  ;;  %v4319_v1 = vadd.f32 %v4285_v61, %v12903_v9 }
 0x9cc   : > { %v12984_v6 = vsel %vm4354_vm2, %v4322_v12, %v4386_v52  ;;  %v4320_v23 = vadd.f32 %v4285_v61, %v12905_v56  ;;  %vm4349_vm14 = vcmp.gt.f32.partialorder %v4317_v40, 0.0  ;;  %vm4350_vm15 = vcmp.gt.f32.partialorder %v4318_v7, 0.0 }
 0x9cd   : > { %v12987_v27 = vsel %vm4355_vm4, %v4323_v22, %v4387_v25  ;;  %v12989_v13 = vsel %vm4356_vm12, %v4324_v47, %v4388_v24  ;;  %v6369_v8 = vpack.c.bf16 %v12984_v6, %v12981_v2  ;;  %vm4351_vm1 = vcmp.gt.f32.partialorder %v4319_v1, 0.0 }
 0x9ce   : > { %v6370_v57 = vpack.c.bf16 %v12989_v13, %v12987_v27  ;;  %vm4352_vm5 = vcmp.gt.f32.partialorder %v4320_v23, 0.0  ;;  %v4381_v53 = vmul.f32 0.01, %v4317_v40  ;;  %v4382_v9 = vmul.f32 0.01, %v4318_v7  ;;  %v4485_v31 = vpop.permute.xlu2 %4484 }
 0x9cf   : > { %6377 = vst [vmem:[#allocation2 + $0x360] sm:$0xff] %v6369_v8  ;;  %v4383_v34 = vmul.f32 0.01, %v4319_v1  ;;  %v4384_v42 = vmul.f32 0.01, %v4320_v23  ;;  %v4301_v56 = vadd.f32 %v4265_v50, %v12857_v30  ;;  %v4302_v49 = vadd.f32 %v4265_v50, %v12860_v43  ;;  %v4280_v21 = vpop.permute.xlu1 %4279 }
 0x9d0   : > { %6378 = vst [vmem:[#allocation2 + $0x368] sm:$0xff] %v6370_v57  ;;  %v12998_v11 = vsel %vm4349_vm14, %v4317_v40, %v4381_v53  ;;  %v13001_v0 = vsel %vm4350_vm15, %v4318_v7, %v4382_v9  ;;  %v4303_v37 = vadd.f32 %v4265_v50, %v12863_v16  ;;  %v4304_v35 = vadd.f32 %v4265_v50, %v12867_v20  ;;  %v13017_v16 = vpop.permute.xlu0 %4486 }
 0x9d1   : > { %v4235_v44 = vmul.f32 %v12909_v60, %v12812_v14  ;;  %v13008_v18 = vsel %vm4351_vm1, %v4319_v1, %v4383_v34  ;;  %v13011_v30 = vsel %vm4352_vm5, %v4320_v23, %v4384_v42  ;;  %v6367_v43 = vpack.c.bf16 %v13001_v0, %v12998_v11 }
 0x9d2   : > { %v6368_v54 = vpack.c.bf16 %v13011_v30, %v13008_v18  ;;  %vm4333_vm10 = vcmp.gt.f32.partialorder %v4301_v56, 0.0  ;;  %vm4334_vm13 = vcmp.gt.f32.partialorder %v4302_v49, 0.0  ;;  %vm4335_vm2 = vcmp.gt.f32.partialorder %v4303_v37, 0.0 }
 0x9d3   : > { %6375 = vst [vmem:[#allocation2 + $0x350] sm:$0xff] %v6367_v43  ;;  %vm4336_vm4 = vcmp.gt.f32.partialorder %v4304_v35, 0.0  ;;  %v4365_v14 = vmul.f32 0.01, %v4301_v56  ;;  %v4366_v20 = vmul.f32 0.01, %v4302_v49  ;;  %v13021_v32 = vsel %vm4492_vm11, %v4485_v31, %v13017_v16 }
 0x9d4   : > { %6376 = vst [vmem:[#allocation2 + $0x358] sm:$0xff] %v6368_v54  ;;  %v4367_v48 = vmul.f32 0.01, %v4303_v37  ;;  %v4368_v29 = vmul.f32 0.01, %v4304_v35  ;;  %v13023_v63 = vmul.f32 0.0, %v4485_v31  ;;  %v4502_v12 = vmul.f32 %v13021_v32, %v12891_v28 }
 0x9d5   : > { %v4236_v22 = vmul.f32 %v12909_v60, %v12817_v45  ;;  %v13029_v47 = vsel %vm4333_vm10, %v4301_v56, %v4365_v14  ;;  %v13031_v61 = vsel %vm4334_vm13, %v4302_v49, %v4366_v20  ;;  %v4313_v10 = vadd.f32 %v4280_v21, %v12943_v59 }
 0x9d6   : > { %v4247_v40 = vmul.f32 %v12901_v19, %v12922_v26  ;;  %v13037_v7 = vsel %vm4335_vm2, %v4303_v37, %v4367_v48  ;;  %v13039_v50 = vsel %vm4336_vm4, %v4304_v35, %v4368_v29  ;;  %v5097_v52 = vpack.c.bf16 %v13031_v61, %v13029_v47 }
 0x9d7   : > { %v5098_v45 = vpack.c.bf16 %v13039_v50, %v13037_v7  ;;  %v4314_v60 = vadd.f32 %v4280_v21, %v12947_v58  ;;  %v4315_v25 = vadd.f32 %v4280_v21, %v4235_v44  ;;  %v4316_v24 = vadd.f32 %v4280_v21, %v4236_v22  ;;  %v4295_v8 = vpop.permute.xlu1 %4294  ;;  %v4491_v58 = vpop.permute.xlu2 %4490 }
 0x9d8   : > { %v4248_v59 = vmul.f32 %v12901_v19, %v12930_v41  ;;  %5105 = vst [vmem:[#allocation2 + $0x110] sm:$0xff] %v5097_v52  ;;  %vm4345_vm12 = vcmp.gt.f32.partialorder %v4313_v10, 0.0  ;;  %v4377_v26 = vmul.f32 0.01, %v4313_v10  ;;  %v4521_v1 = vpack.c.bf16 %v4502_v12, %v13023_v63 }
 0x9d9   : > { %5106 = vst [vmem:[#allocation2 + $0x118] sm:$0xff] %v5098_v45  ;;  %vm4346_vm14 = vcmp.gt.f32.partialorder %v4314_v60, 0.0  ;;  %vm4347_vm15 = vcmp.gt.f32.partialorder %v4315_v25, 0.0  ;;  %vm4348_vm1 = vcmp.gt.f32.partialorder %v4316_v24, 0.0  ;;  %v4378_v23 = vmul.f32 0.01, %v4314_v60 }
 0x9da   : > { %v4379_v57 = vmul.f32 0.01, %v4315_v25  ;;  %v4380_v53 = vmul.f32 0.01, %v4316_v24  ;;  %v13049_v9 = vsel %vm4345_vm12, %v4313_v10, %v4377_v26  ;;  %4545 = vrot.lane.b32.xlu0 %v4521_v1, %s10820_s10  ;;  %v4325_v19 = vadd.f32 %v4295_v8, %v12933_v15 }
 0x9db   : > { %v13053_v41 = vsel %vm4346_vm14, %v4314_v60, %v4378_v23  ;;  %v4326_v34 = vadd.f32 %v4295_v8, %v12936_v17  ;;  %v4327_v42 = vadd.f32 %v4295_v8, %v4247_v40  ;;  %v4328_v56 = vadd.f32 %v4295_v8, %v4248_v59  ;;  %v4641_v23 = vpop.permute.xlu0 %4640 }
 0x9dc   : > { %v4507_v49 = vmul.f32 %v13021_v32, %v13029_v47  ;;  %v13059_v37 = vsel %vm4347_vm15, %v4315_v25, %v4379_v57  ;;  %v13062_v35 = vsel %vm4348_vm1, %v4316_v24, %v4380_v53  ;;  %v6365_v31 = vpack.c.bf16 %v13053_v41, %v13049_v9 }
 0x9dd   : > { %v6366_v15 = vpack.c.bf16 %v13062_v35, %v13059_v37  ;;  %vm4357_vm5 = vcmp.gt.f32.partialorder %v4325_v19, 0.0  ;;  %vm4358_vm10 = vcmp.gt.f32.partialorder %v4326_v34, 0.0  ;;  %vm4359_vm13 = vcmp.gt.f32.partialorder %v4327_v42, 0.0 }
 0x9de   : > { %6373 = vst [vmem:[#allocation2 + $0x340] sm:$0xff] %v6365_v31  ;;  %vm4360_vm2 = vcmp.gt.f32.partialorder %v4328_v56, 0.0  ;;  %v4389_v17 = vmul.f32 0.01, %v4325_v19  ;;  %v4390_v44 = vmul.f32 0.01, %v4326_v34  ;;  %v4505_v43 = vmul.f32 %v4491_v58, %v12907_v51 }
 0x9df   : > { %6374 = vst [vmem:[#allocation2 + $0x348] sm:$0xff] %v6366_v15  ;;  %v4391_v21 = vmul.f32 0.01, %v4327_v42  ;;  %v4392_v54 = vmul.f32 0.01, %v4328_v56  ;;  %v4524_v29 = vpack.c.bf16 %v4507_v49, %v13023_v63  ;;  %v4489_v40 = vpop.permute.xlu1 %4488  ;;  %v4512_v25 = vmul.f32 %v13021_v32, %v12967_v62 }
 0x9e0   : > { %v13069_v14 = vsel %vm4357_vm5, %v4325_v19, %v4389_v17  ;;  %v13071_v20 = vsel %vm4358_vm10, %v4326_v34, %v4390_v44  ;;  %v4523_v48 = vpack.c.bf16 %v4505_v43, %v4505_v43  ;;  %v4494_v45 = vsel %vm4492_vm11, %v13017_v16, %v4489_v40 }
 0x9e1   : > { %v13074_v12 = vsel %vm4359_vm13, %v4327_v42, %v4391_v21  ;;  %v13076_v22 = vsel %vm4360_vm2, %v4328_v56, %v4392_v54  ;;  %v6371_v10 = vpack.c.bf16 %v13071_v20, %v13069_v14  ;;  %v4495_v60 = vsel %vm4492_vm11, %v4489_v40, %v4491_v58 }
 0x9e2   : > { %v6372_v52 = vpack.c.bf16 %v13076_v22, %v13074_v12  ;;  %4549 = vrot.lane.b32.xlu2 %v4523_v48, %s10820_s10  ;;  %4551 = vrot.lane.b32.xlu0 %v4524_v29, %s10820_s10  ;;  %v4503_v24 = vmul.f32 %v4494_v45, %v12893_v38  ;;  %v4504_v59 = vmul.f32 %v4495_v60, %v12897_v46  ;;  %v13094_v16 = vmul.f32 0.0, %v4641_v23  ;;  %v4645_v48 = vpop.permute.xlu2 %4644 }
 0x9e3   : > { %6379 = vst [vmem:[#allocation2 + $0x370] sm:$0xff] %v6371_v10  ;;  %v4510_v26 = vmul.f32 %v4491_v58, %v13039_v50  ;;  %v4527_v57 = vpack.c.bf16 %v4512_v25, %v13023_v63  ;;  %v4517_v42 = vmul.f32 %v13021_v32, %v12955_v39  ;;  %v4515_v56 = vmul.f32 %v4491_v58, %v12973_v55  ;;  %v4647_v17 = vpop.permute.xlu0 %4646 }
 0x9e4   : > { %6380 = vst [vmem:[#allocation2 + $0x378] sm:$0xff] %v6372_v52  ;;  %v4522_v1 = vpack.c.bf16 %v4504_v59, %v4503_v24  ;;  %v4508_v44 = vmul.f32 %v4494_v45, %v13031_v61  ;;  %v4509_v43 = vmul.f32 %v4495_v60, %v13037_v7  ;;  %v4520_v32 = vmul.f32 %v4491_v58, %v12961_v3 }
 0x9e5   : > { %v4526_v8 = vpack.c.bf16 %v4510_v26, %v4510_v26  ;;  %v4529_v31 = vpack.c.bf16 %v4515_v56, %v4515_v56  ;;  %v4530_v15 = vpack.c.bf16 %v4517_v42, %v13023_v63  ;;  %v4660_v21 = vmul.f32 %v4647_v17, %v12907_v51 }
 0x9e6   : > { %4547 = vrot.lane.b32.xlu1 %v4522_v1, %s10820_s10  ;;  %v4525_v54 = vpack.c.bf16 %v4509_v43, %v4508_v44  ;;  %v4532_v29 = vpack.c.bf16 %v4520_v32, %v4520_v32  ;;  %v4513_v40 = vmul.f32 %v4494_v45, %v12969_v4  ;;  %v4514_v52 = vmul.f32 %v4495_v60, %v12971_v5 }
 0x9e7   : > { %v4643_v53 = vpop.permute.xlu1 %4642  ;;  %v4678_v10 = vpack.c.bf16 %v4660_v21, %v4660_v21  ;;  %v4650_v58 = vsel %vm1176_vm6, %v4645_v48, %v4647_v17  ;;  %v4665_v24 = vmul.f32 %v4647_v17, %v13039_v50  ;;  %vm4582_vm4 = vcmask 72704  }
 0x9e8   : > { %v13099_v19 = vsel %vm1176_vm6, %v4641_v23, %v4643_v53  ;;  %v4649_v63 = vsel %vm1176_vm6, %v4643_v53, %v4645_v48  ;;  %v4659_v59 = vmul.f32 %v4650_v58, %v12897_v46  ;;  %v4528_v26 = vpack.c.bf16 %v4514_v52, %v4513_v40  ;;  %v9713_v48 = vld [vmem:[%s15531_s1 + $0x23] ss:$8 sm:$0xf] }
 0x9e9   : > { %v4657_v34 = vmul.f32 %v13099_v19, %v12891_v28  ;;  %v4658_v25 = vmul.f32 %v4649_v63, %v12893_v38  ;;  %v4681_v23 = vpack.c.bf16 %v4665_v24, %v4665_v24  ;;  %v4663_v53 = vmul.f32 %v4649_v63, %v13031_v61 }
 0x9ea   : > { %4555 = vrot.lane.b32.xlu2 %v4526_v8, %s10820_s10  ;;  %4557 = vrot.lane.b32.xlu0 %v4527_v57, %s10820_s10  ;;  %v4518_v8 = vmul.f32 %v4494_v45, %v12957_v36  ;;  %v4519_v57 = vmul.f32 %v4495_v60, %v12959_v33  ;;  %v4664_v42 = vmul.f32 %v4650_v58, %v13037_v7  ;;  %vm4803_vm12 = vcmask 990208  }
 0x9eb   : > { %v4676_v49 = vpack.c.bf16 %v4657_v34, %v13094_v16  ;;  %v4677_v1 = vpack.c.bf16 %v4659_v59, %v4658_v25  ;;  %v4670_v34 = vmul.f32 %v4647_v17, %v12973_v55  ;;  %v4662_v45 = vmul.f32 %v13099_v19, %v13029_v47 }
 0x9ec   : > { %v4531_v56 = vpack.c.bf16 %v4519_v57, %v4518_v8  ;;  %v4668_v60 = vmul.f32 %v4649_v63, %v12969_v4  ;;  %v4669_v44 = vmul.f32 %v4650_v58, %v12971_v5  ;;  %v4672_v25 = vmul.f32 %v13099_v19, %v12955_v39 }
 0x9ed   : > { %v4679_v43 = vpack.c.bf16 %v4662_v45, %v13094_v16  ;;  %v4792_v59 = vperm.slane %v9713_v48, 1  ;;  %vm4893_vm14 = vcmask 56320   ;;  %vm15694_vm1 = vcmask 523264  }
 0x9ee   : > { %4700 = vrot.lane.b32.xlu1 %v4676_v49, %s10815_s9  ;;  %v4680_v49 = vpack.c.bf16 %v4664_v42, %v4663_v53  ;;  %v4683_v32 = vpack.c.bf16 %v4669_v44, %v4668_v60  ;;  %v4685_v24 = vpack.c.bf16 %v4672_v25, %v13094_v16  ;;  %vm15695_vm5 = vmmov %vm15694_vm1 }
 0x9ef   : > { %vm15696_vm10 = vmmov %vm15694_vm1 }
 0x9f2   : > { %4561 = vrot.lane.b32.xlu2 %v4529_v31, %s10820_s10  ;;  %4563 = vrot.lane.b32.xlu0 %v4530_v15, %s10820_s10  ;;  %v4684_v31 = vpack.c.bf16 %v4670_v34, %v4670_v34  ;;  %v4675_v15 = vmul.f32 %v4647_v17, %v12961_v3  ;;  %v4673_v17 = vmul.f32 %v4649_v63, %v12957_v36  ;;  %v4791_v63 = vperm.slane %v9713_v48, 0 }
 0x9f4   : > { %v4687_v21 = vpack.c.bf16 %v4675_v15, %v4675_v15 }
 0x9f6   : > { %4553 = vrot.lane.b32.xlu1 %v4525_v54, %s10820_s10  ;;  %v4667_v54 = vmul.f32 %v13099_v19, %v12967_v62 }
 0x9f8   : > { %v4682_v40 = vpack.c.bf16 %v4667_v54, %v13094_v16 }
 0x9fa   : > { %4567 = vrot.lane.b32.xlu2 %v4532_v29, %s10820_s10  ;;  %4704 = vrot.lane.b32.xlu0 %v4678_v10, %s10815_s9  ;;  %v4674_v29 = vmul.f32 %v4650_v58, %v12959_v33  ;;  %v4793_v10 = vperm.slane %v9713_v48, 2  ;;  %v4794_v58 = vperm.slane %v9713_v48, 3 }
 0x9fc   : > { %v4686_v52 = vpack.c.bf16 %v4674_v29, %v4673_v17 }
 0x9fe   : > { %4559 = vrot.lane.b32.xlu1 %v4528_v26, %s10820_s10 }
 0xa02   : > { %4702 = vrot.lane.b32.xlu2 %v4677_v1, %s10815_s9  ;;  %4710 = vrot.lane.b32.xlu0 %v4681_v23, %s10815_s9 }
 0xa06   : > { %4565 = vrot.lane.b32.xlu1 %v4531_v56, %s10820_s10 }
 0xa0a   : > { %4708 = vrot.lane.b32.xlu2 %v4680_v49, %s10815_s9  ;;  %4716 = vrot.lane.b32.xlu0 %v4684_v31, %s10815_s9 }
 0xa0e   : > { %4706 = vrot.lane.b32.xlu1 %v4679_v43, %s10815_s9 }
 0xa12   : > { %4714 = vrot.lane.b32.xlu2 %v4683_v32, %s10815_s9  ;;  %4722 = vrot.lane.b32.xlu0 %v4687_v21, %s10815_s9 }
 0xa16   : > { %4712 = vrot.lane.b32.xlu1 %v4682_v40, %s10815_s9 }
 0xa1a   : > { %4720 = vrot.lane.b32.xlu2 %v4686_v52, %s10815_s9  ;;  %4799 = vrot.lane.b32.xlu0 %v4793_v10, %s10821_s23 }
 0xa1e   : > { %4718 = vrot.lane.b32.xlu1 %v4685_v24, %s10815_s9 }
 0xa22   : > { %4797 = vrot.lane.b32.xlu2 %v4792_v59, %s10821_s23 }
 0xa26   : > { %4795 = vrot.lane.b32.xlu1 %v4791_v63, %s10821_s23 }
 0xa2e   : > { %4801 = vrot.lane.b32.xlu1 %v4794_v58, %s10821_s23 }
 0xa3c   : > { %v4550_v26 = vpop.permute.xlu2 %4549 }
 0xa3d   : > { %v4571_v16 = vrot.slane %v4550_v26, 4 }
 0xa44   : > { %v4556_v19 = vpop.permute.xlu2 %4555 }
 0xa45   : > { %v4574_v29 = vrot.slane %v4556_v19, 4 }
 0xa4c   : > { %v4562_v1 = vpop.permute.xlu2 %4561  ;;  %v4546_v23 = vpop.permute.xlu0 %4545 }
 0xa4d   : > { %v4569_v34 = vrot.slane %v4546_v23, 4 }
 0xa54   : > { %v4552_v8 = vpop.permute.xlu0 %4551  ;;  %v13163_v57 = vpop.permute.xlu2 %4567 }
 0xa55   : > { %v4572_v10 = vrot.slane %v4552_v8, 4 }
 0xa58   : > { %v4548_v53 = vpop.permute.xlu1 %4547 }
 0xa59   : > { %v4570_v42 = vrot.slane %v4548_v53, 4 }
 0xa5b   : > { %v4581_v49 = vsel %vm479_vm3, %v4569_v34, %v4570_v42  ;;  %v4584_v31 = vsel %vm479_vm3, %v4570_v42, %v4571_v16  ;;  %v4577_v16 = vrot.slane %v4562_v1, 4 }
 0xa5c   : > { %v4558_v56 = vpop.permute.xlu0 %4557  ;;  %v4583_v45 = vsel %vm4582_vm4, %v4546_v23, %v4581_v49  ;;  %v4585_v60 = vsel %vm4582_vm4, %v4548_v53, %v4584_v31  ;;  %v4703_v15 = vpop.permute.xlu2 %4702 }
 0xa5d   : > { %4606 = vst [vmem:[#allocation2] sm:$0xff] %v4583_v45  ;;  %v4725_v43 = vrot.slane %v4703_v15, 4  ;;  %v4575_v34 = vrot.slane %v4558_v56, 4 }
 0xa5e   : > { %4607 = vst [vmem:[#allocation2 + $0x8] sm:$0xff] %v4585_v60 }
 0xa60   : > { %v4701_v44 = vpop.permute.xlu1 %4700 }
 0xa61   : > { %v4724_v32 = vrot.slane %v4701_v44, 4 }
 0xa63   : > { %v4736_v54 = vsel %vm479_vm3, %v4724_v32, %v4725_v43 }
 0xa64   : > { %v4564_v21 = vpop.permute.xlu0 %4563  ;;  %v4737_v48 = vsel %vm1266_vm7, %v4701_v44, %v4736_v54  ;;  %v4709_v63 = vpop.permute.xlu2 %4708 }
 0xa65   : > { %4760 = vst [vmem:[#allocation2 + $0x40] sm:$0xff] %v4737_v48  ;;  %v4728_v31 = vrot.slane %v4709_v63, 4  ;;  %v4580_v48 = vrot.slane %v13163_v57, 4 }
 0xa68   : > { %v4554_v17 = vpop.permute.xlu1 %4553 }
 0xa69   : > { %v4573_v40 = vrot.slane %v4554_v17, 4 }
 0xa6b   : > { %v4586_v24 = vsel %vm479_vm3, %v4572_v10, %v4573_v40  ;;  %v4588_v59 = vsel %vm479_vm3, %v4573_v40, %v4574_v29 }
 0xa6c   : > { %v4705_v52 = vpop.permute.xlu0 %4704  ;;  %v4587_v58 = vsel %vm4582_vm4, %v4552_v8, %v4586_v24  ;;  %v4589_v26 = vsel %vm4582_vm4, %v4554_v17, %v4588_v59  ;;  %v4578_v17 = vrot.slane %v4564_v21, 4 }
 0xa6d   : > { %v4726_v25 = vrot.slane %v4705_v52, 4  ;;  %4608 = vst [vmem:[#allocation2 + $0x10] sm:$0xff] %v4587_v58 }
 0xa6e   : > { %4609 = vst [vmem:[#allocation2 + $0x18] sm:$0xff] %v4589_v26 }
 0xa6f   : > { %v4738_v23 = vsel %vm479_vm3, %v4725_v43, %v4726_v25 }
 0xa70   : > { %v4739_v53 = vsel %vm1266_vm7, %v4703_v15, %v4738_v23  ;;  %v4560_v19 = vpop.permute.xlu1 %4559  ;;  %v4715_v15 = vpop.permute.xlu2 %4714 }
 0xa71   : > { %4761 = vst [vmem:[#allocation2 + $0x48] sm:$0xff] %v4739_v53  ;;  %v4576_v42 = vrot.slane %v4560_v19, 4  ;;  %v4731_v40 = vrot.slane %v4715_v15, 4 }
 0xa73   : > { %v4590_v60 = vsel %vm479_vm3, %v4575_v34, %v4576_v42  ;;  %v4592_v8 = vsel %vm479_vm3, %v4576_v42, %v4577_v16 }
 0xa74   : > { %v4711_v49 = vpop.permute.xlu0 %4710  ;;  %v4591_v44 = vsel %vm4582_vm4, %v4558_v56, %v4590_v60  ;;  %v4593_v43 = vsel %vm4582_vm4, %v4560_v19, %v4592_v8 }
 0xa75   : > { %v4729_v45 = vrot.slane %v4711_v49, 4  ;;  %4610 = vst [vmem:[#allocation2 + $0x20] sm:$0xff] %v4591_v44 }
 0xa76   : > { %4611 = vst [vmem:[#allocation2 + $0x28] sm:$0xff] %v4593_v43 }
 0xa77   : > { %v4742_v32 = vsel %vm479_vm3, %v4728_v31, %v4729_v45 }
 0xa78   : > { %v4743_v54 = vsel %vm1266_vm7, %v4709_v63, %v4742_v32  ;;  %v4566_v1 = vpop.permute.xlu1 %4565  ;;  %v4721_v57 = vpop.permute.xlu2 %4720 }
 0xa79   : > { %4763 = vst [vmem:[#allocation2 + $0x58] sm:$0xff] %v4743_v54  ;;  %v4579_v29 = vrot.slane %v4566_v1, 4  ;;  %v4734_v19 = vrot.slane %v4721_v57, 4 }
 0xa7b   : > { %v4594_v56 = vsel %vm479_vm3, %v4578_v17, %v4579_v29  ;;  %v4596_v25 = vsel %vm479_vm3, %v4579_v29, %v4580_v48 }
 0xa7c   : > { %v4717_v10 = vpop.permute.xlu0 %4716  ;;  %v4595_v24 = vsel %vm4582_vm4, %v4564_v21, %v4594_v56  ;;  %v4597_v59 = vsel %vm4582_vm4, %v4566_v1, %v4596_v25 }
 0xa7d   : > { %v4732_v52 = vrot.slane %v4717_v10, 4  ;;  %4612 = vst [vmem:[#allocation2 + $0x30] sm:$0xff] %v4595_v24 }
 0xa7e   : > { %4613 = vst [vmem:[#allocation2 + $0x38] sm:$0xff] %v4597_v59 }
 0xa7f   : > { %v4746_v63 = vsel %vm479_vm3, %v4731_v40, %v4732_v52 }
 0xa80   : > { %v4747_v58 = vsel %vm1266_vm7, %v4715_v15, %v4746_v63  ;;  %v4707_v26 = vpop.permute.xlu1 %4706  ;;  %v4798_v54 = vpop.permute.xlu2 %4797 }
 0xa81   : > { %4765 = vst [vmem:[#allocation2 + $0x68] sm:$0xff] %v4747_v58  ;;  %v4727_v23 = vrot.slane %v4707_v26, 4 }
 0xa83   : > { %v4740_v34 = vsel %vm479_vm3, %v4727_v23, %v4728_v31 }
 0xa84   : > { %v4723_v53 = vpop.permute.xlu0 %4722  ;;  %v4741_v42 = vsel %vm1266_vm7, %v4707_v26, %v4740_v34 }
 0xa85   : > { %v4735_v16 = vrot.slane %v4723_v53, 4  ;;  %4762 = vst [vmem:[#allocation2 + $0x50] sm:$0xff] %v4741_v42 }
 0xa87   : > { %v4750_v21 = vsel %vm479_vm3, %v4734_v19, %v4735_v16 }
 0xa88   : > { %v4751_v49 = vsel %vm1266_vm7, %v4721_v57, %v4750_v21  ;;  %v4713_v45 = vpop.permute.xlu1 %4712 }
 0xa89   : > { %4767 = vst [vmem:[#allocation2 + $0x78] sm:$0xff] %v4751_v49  ;;  %v4730_v60 = vrot.slane %v4713_v45, 4 }
 0xa8b   : > { %v4744_v8 = vsel %vm479_vm3, %v4730_v60, %v4731_v40 }
 0xa8c   : > { %v4745_v44 = vsel %vm1266_vm7, %v4713_v45, %v4744_v8  ;;  %v4800_v10 = vpop.permute.xlu0 %4799 }
 0xa8d   : > { %4764 = vst [vmem:[#allocation2 + $0x60] sm:$0xff] %v4745_v44  ;;  %v4805_v52 = vsel %vm4803_vm12, %v4798_v54, %v4800_v10 }
 0xa8e   : > { %v4814_v63 = vmul.f32 %v4805_v52, %v12893_v38  ;;  %v4819_v34 = vmul.f32 %v4805_v52, %v13031_v61  ;;  %v4824_v44 = vmul.f32 %v4805_v52, %v12969_v4 }
 0xa90   : > { %v4719_v43 = vpop.permute.xlu1 %4718 }
 0xa91   : > { %v4733_v32 = vrot.slane %v4719_v43, 4 }
 0xa93   : > { %v4748_v15 = vsel %vm479_vm3, %v4733_v32, %v4734_v19 }
 0xa94   : > { %v4749_v31 = vsel %vm1266_vm7, %v4719_v43, %v4748_v15 }
 0xa95   : > { %4766 = vst [vmem:[#allocation2 + $0x70] sm:$0xff] %v4749_v31 }
 0xa98   : > { %v4796_v1 = vpop.permute.xlu1 %4795 }
 0xa99   : > { %v4804_v48 = vsel %vm4803_vm12, %v4796_v1, %v4798_v54  ;;  %v4812_v17 = vmul.f32 0.0, %v4796_v1  ;;  %v9714_v54 = vld [vmem:[%s15531_s1 + $0x24] ss:$8 sm:$0xf] }
 0xa9a   : > { %v4813_v29 = vmul.f32 %v4804_v48, %v12891_v28  ;;  %v4818_v56 = vmul.f32 %v4804_v48, %v13029_v47  ;;  %v4823_v19 = vmul.f32 %v4804_v48, %v12967_v62  ;;  %v4828_v60 = vmul.f32 %v4804_v48, %v12955_v39 }
 0xa9b   : > { %v4829_v48 = vmul.f32 %v4805_v52, %v12957_v36 }
 0xa9c   : > { %v4832_v40 = vpack.c.bf16 %v4813_v29, %v4812_v17  ;;  %v4835_v23 = vpack.c.bf16 %v4818_v56, %v4812_v17  ;;  %v4838_v49 = vpack.c.bf16 %v4823_v19, %v4812_v17  ;;  %v4841_v15 = vpack.c.bf16 %v4828_v60, %v4812_v17 }
 0xa9d   : > { %v4947_v29 = vperm.slane %v9714_v54, 0  ;;  %v4949_v17 = vperm.slane %v9714_v54, 2  ;;  %v4948_v56 = vperm.slane %v9714_v54, 1 }
 0xa9e   : > { %4856 = vrot.lane.b32.xlu2 %v4832_v40, %s10822_s24 }
 0xaa0   : > { %v4802_v25 = vpop.permute.xlu1 %4801 }
 0xaa1   : > { %v4806_v24 = vsel %vm4803_vm12, %v4800_v10, %v4802_v25  ;;  %v4816_v59 = vmul.f32 %v4802_v25, %v12907_v51  ;;  %v4821_v53 = vmul.f32 %v4802_v25, %v13039_v50  ;;  %v4826_v45 = vmul.f32 %v4802_v25, %v12973_v55 }
 0xaa2   : > { %v4815_v58 = vmul.f32 %v4806_v24, %v12897_v46  ;;  %v4820_v16 = vmul.f32 %v4806_v24, %v13037_v7  ;;  %v4825_v8 = vmul.f32 %v4806_v24, %v12971_v5  ;;  %v4831_v31 = vmul.f32 %v4802_v25, %v12961_v3 }
 0xaa3   : > { %v4834_v57 = vpack.c.bf16 %v4816_v59, %v4816_v59  ;;  %v4837_v42 = vpack.c.bf16 %v4821_v53, %v4821_v53  ;;  %v4840_v43 = vpack.c.bf16 %v4826_v45, %v4826_v45  ;;  %v4830_v1 = vmul.f32 %v4806_v24, %v12959_v33 }
 0xaa4   : > { %v4833_v26 = vpack.c.bf16 %v4815_v58, %v4814_v63  ;;  %v4836_v21 = vpack.c.bf16 %v4820_v16, %v4819_v34  ;;  %v4839_v32 = vpack.c.bf16 %v4825_v8, %v4824_v44  ;;  %v4843_v10 = vpack.c.bf16 %v4831_v31, %v4831_v31 }
 0xaa5   : > { %4860 = vrot.lane.b32.xlu1 %v4834_v57, %s10822_s24  ;;  %v4842_v40 = vpack.c.bf16 %v4830_v1, %v4829_v48  ;;  %v4950_v25 = vperm.slane %v9714_v54, 3 }
 0xaa6   : > { %4858 = vrot.lane.b32.xlu0 %v4833_v26, %s10822_s24  ;;  %4862 = vrot.lane.b32.xlu2 %v4835_v23, %s10822_s24 }
 0xaad   : > { %4866 = vrot.lane.b32.xlu1 %v4837_v42, %s10822_s24 }
 0xaae   : > { %4864 = vrot.lane.b32.xlu0 %v4836_v21, %s10822_s24  ;;  %4868 = vrot.lane.b32.xlu2 %v4838_v49, %s10822_s24 }
 0xab5   : > { %4872 = vrot.lane.b32.xlu1 %v4840_v43, %s10822_s24 }
 0xab6   : > { %4870 = vrot.lane.b32.xlu0 %v4839_v32, %s10822_s24  ;;  %4874 = vrot.lane.b32.xlu2 %v4841_v15, %s10822_s24 }
 0xabd   : > { %4878 = vrot.lane.b32.xlu1 %v4843_v10, %s10822_s24 }
 0xabe   : > { %4876 = vrot.lane.b32.xlu0 %v4842_v40, %s10822_s24  ;;  %4951 = vrot.lane.b32.xlu2 %v4947_v29, %s10816_s14 }
 0xac5   : > { %4955 = vrot.lane.b32.xlu1 %v4949_v17, %s10816_s14 }
 0xac6   : > { %4953 = vrot.lane.b32.xlu0 %v4948_v56, %s10816_s14  ;;  %4957 = vrot.lane.b32.xlu2 %v4950_v25, %s10816_s14 }
 0xaf8   : > { %v4857_v24 = vpop.permute.xlu2 %4856 }
 0xaf9   : > { %v4880_v53 = vrot.slane %v4857_v24, 4 }
 0xb00   : > { %v4863_v52 = vpop.permute.xlu2 %4862 }
 0xb01   : > { %v4883_v44 = vrot.slane %v4863_v52, 4 }
 0xb08   : > { %v4869_v59 = vpop.permute.xlu2 %4868 }
 0xb09   : > { %v4886_v56 = vrot.slane %v4869_v59, 4 }
 0xb10   : > { %v4875_v63 = vpop.permute.xlu2 %4874 }
 0xb17   : > { %v4861_v58 = vpop.permute.xlu1 %4860 }
 0xb18   : > { %v4882_v57 = vrot.slane %v4861_v58, 4  ;;  %v4859_v26 = vpop.permute.xlu0 %4858  ;;  %v4952_v23 = vpop.permute.xlu2 %4951 }
 0xb19   : > { %v4881_v19 = vrot.slane %v4859_v26, 4 }
 0xb1b   : > { %v4892_v16 = vsel %vm479_vm3, %v4880_v53, %v4881_v19  ;;  %v4895_v34 = vsel %vm479_vm3, %v4881_v19, %v4882_v57 }
 0xb1c   : > { %v4894_v42 = vsel %vm4893_vm14, %v4857_v24, %v4892_v16  ;;  %v4896_v21 = vsel %vm4893_vm14, %v4859_v26, %v4895_v34 }
 0xb1d   : > { %4917 = vst [vmem:[#allocation2 + $0x80] sm:$0xff] %v4894_v42  ;;  %v4889_v42 = vrot.slane %v4875_v63, 4 }
 0xb1e   : > { %4918 = vst [vmem:[#allocation2 + $0x88] sm:$0xff] %v4896_v21 }
 0xb1f   : > { %v4867_v49 = vpop.permute.xlu1 %4866 }
 0xb20   : > { %v4885_v45 = vrot.slane %v4867_v49, 4  ;;  %v4865_v60 = vpop.permute.xlu0 %4864  ;;  %v4958_v8 = vpop.permute.xlu2 %4957 }
 0xb21   : > { %v4884_v43 = vrot.slane %v4865_v60, 4  ;;  %v4971_v32 = vmul.f32 %v4958_v8, %v12907_v51  ;;  %v4976_v10 = vmul.f32 %v4958_v8, %v13039_v50  ;;  %v4981_v19 = vmul.f32 %v4958_v8, %v12973_v55 }
 0xb23   : > { %v4897_v15 = vsel %vm479_vm3, %v4883_v44, %v4884_v43  ;;  %v4899_v31 = vsel %vm479_vm3, %v4884_v43, %v4885_v45  ;;  %v4989_v54 = vpack.c.bf16 %v4971_v32, %v4971_v32  ;;  %v4992_v57 = vpack.c.bf16 %v4976_v10, %v4976_v10 }
 0xb24   : > { %v4898_v1 = vsel %vm4893_vm14, %v4863_v52, %v4897_v15  ;;  %v4900_v48 = vsel %vm4893_vm14, %v4865_v60, %v4899_v31  ;;  %v4995_v60 = vpack.c.bf16 %v4981_v19, %v4981_v19  ;;  %v4986_v32 = vmul.f32 %v4958_v8, %v12961_v3 }
 0xb25   : > { %4919 = vst [vmem:[#allocation2 + $0x90] sm:$0xff] %v4898_v1  ;;  %5015 = vrot.lane.b32.xlu2 %v4989_v54, %s10817_s17 }
 0xb26   : > { %4920 = vst [vmem:[#allocation2 + $0x98] sm:$0xff] %v4900_v48 }
 0xb27   : > { %v4873_v29 = vpop.permute.xlu1 %4872 }
 0xb28   : > { %v4888_v40 = vrot.slane %v4873_v29, 4  ;;  %v4871_v17 = vpop.permute.xlu0 %4870  ;;  %v4967_v29 = vmul.f32 0.0, %v4952_v23 }
 0xb29   : > { %v4887_v25 = vrot.slane %v4871_v17, 4 }
 0xb2b   : > { %v4901_v24 = vsel %vm479_vm3, %v4886_v56, %v4887_v25  ;;  %v4903_v58 = vsel %vm479_vm3, %v4887_v25, %v4888_v40  ;;  %v4998_v40 = vpack.c.bf16 %v4986_v32, %v4986_v32 }
 0xb2c   : > { %v4902_v52 = vsel %vm4893_vm14, %v4869_v59, %v4901_v24  ;;  %v4904_v26 = vsel %vm4893_vm14, %v4871_v17, %v4903_v58 }
 0xb2d   : > { %4921 = vst [vmem:[#allocation2 + $0xa0] sm:$0xff] %v4902_v52  ;;  %5021 = vrot.lane.b32.xlu2 %v4992_v57, %s10817_s17  ;;  %v9715_v57 = vld [vmem:[%s15531_s1 + $0x26] ss:$8 sm:$0xf] }
 0xb2e   : > { %4922 = vst [vmem:[#allocation2 + $0xa8] sm:$0xff] %v4904_v26  ;;  %v5135_v52 = vperm.slane %v9715_v57, 2 }
 0xb2f   : > { %v4879_v53 = vpop.permute.xlu1 %4878 }
 0xb30   : > { %v4891_v16 = vrot.slane %v4879_v53, 4  ;;  %v4877_v34 = vpop.permute.xlu0 %4876 }
 0xb31   : > { %v4890_v21 = vrot.slane %v4877_v34, 4 }
 0xb33   : > { %v4905_v49 = vsel %vm479_vm3, %v4889_v42, %v4890_v21  ;;  %v4907_v45 = vsel %vm479_vm3, %v4890_v21, %v4891_v16 }
 0xb34   : > { %v4906_v59 = vsel %vm4893_vm14, %v4875_v63, %v4905_v49  ;;  %v4908_v44 = vsel %vm4893_vm14, %v4877_v34, %v4907_v45 }
 0xb35   : > { %4923 = vst [vmem:[#allocation2 + $0xb0] sm:$0xff] %v4906_v59  ;;  %5027 = vrot.lane.b32.xlu2 %v4995_v60, %s10817_s17  ;;  %v5133_v59 = vperm.slane %v9715_v57, 0 }
 0xb36   : > { %4924 = vst [vmem:[#allocation2 + $0xb8] sm:$0xff] %v4908_v44  ;;  %v5134_v44 = vperm.slane %v9715_v57, 1 }
 0xb37   : > { %v4956_v43 = vpop.permute.xlu1 %4955 }
 0xb38   : > { %v4961_v15 = vsel %vm1333_vm8, %v4956_v43, %v4958_v8  ;;  %v4954_v31 = vpop.permute.xlu0 %4953 }
 0xb39   : > { %v4970_v54 = vmul.f32 %v4961_v15, %v12897_v46  ;;  %v4959_v1 = vsel %vm1333_vm8, %v4952_v23, %v4954_v31  ;;  %v4960_v48 = vsel %vm1333_vm8, %v4954_v31, %v4956_v43  ;;  %v4975_v8 = vmul.f32 %v4961_v15, %v13037_v7 }
 0xb3a   : > { %v4968_v63 = vmul.f32 %v4959_v1, %v12891_v28  ;;  %v4969_v10 = vmul.f32 %v4960_v48, %v12893_v38  ;;  %v4973_v25 = vmul.f32 %v4959_v1, %v13029_v47  ;;  %v4974_v24 = vmul.f32 %v4960_v48, %v13031_v61 }
 0xb3b   : > { %v4980_v26 = vmul.f32 %v4961_v15, %v12971_v5  ;;  %v4978_v53 = vmul.f32 %v4959_v1, %v12967_v62  ;;  %v4979_v19 = vmul.f32 %v4960_v48, %v12969_v4  ;;  %v4985_v42 = vmul.f32 %v4961_v15, %v12959_v33 }
 0xb3c   : > { %v4987_v17 = vpack.c.bf16 %v4968_v63, %v4967_v29  ;;  %v4988_v56 = vpack.c.bf16 %v4970_v54, %v4969_v10  ;;  %v4990_v23 = vpack.c.bf16 %v4973_v25, %v4967_v29  ;;  %v4991_v58 = vpack.c.bf16 %v4975_v8, %v4974_v24 }
 0xb3d   : > { %5033 = vrot.lane.b32.xlu2 %v4998_v40, %s10817_s17  ;;  %v4993_v16 = vpack.c.bf16 %v4978_v53, %v4967_v29  ;;  %v4994_v34 = vpack.c.bf16 %v4980_v26, %v4979_v19  ;;  %v4983_v21 = vmul.f32 %v4959_v1, %v12955_v39  ;;  %v4984_v49 = vmul.f32 %v4960_v48, %v12957_v36 }
 0xb3e   : > { %5011 = vrot.lane.b32.xlu0 %v4987_v17, %s10817_s17  ;;  %5013 = vrot.lane.b32.xlu1 %v4988_v56, %s10817_s17  ;;  %v5136_v43 = vperm.slane %v9715_v57, 3 }
 0xb3f   : > { %v4996_v45 = vpack.c.bf16 %v4983_v21, %v4967_v29  ;;  %v4997_v60 = vpack.c.bf16 %v4985_v42, %v4984_v49 }
 0xb45   : > { %5141 = vrot.lane.b32.xlu2 %v5135_v52, %s10817_s17 }
 0xb46   : > { %5017 = vrot.lane.b32.xlu0 %v4990_v23, %s10817_s17  ;;  %5019 = vrot.lane.b32.xlu1 %v4991_v58, %s10817_s17 }
 0xb4e   : > { %5023 = vrot.lane.b32.xlu0 %v4993_v16, %s10817_s17  ;;  %5025 = vrot.lane.b32.xlu1 %v4994_v34, %s10817_s17 }
 0xb56   : > { %5029 = vrot.lane.b32.xlu0 %v4996_v45, %s10817_s17  ;;  %5031 = vrot.lane.b32.xlu1 %v4997_v60, %s10817_s17 }
 0xb5e   : > { %5137 = vrot.lane.b32.xlu0 %v5133_v59, %s10817_s17  ;;  %5139 = vrot.lane.b32.xlu1 %v5134_v44, %s10817_s17 }
 0xb66   : > { %5143 = vrot.lane.b32.xlu0 %v5136_v43, %s10817_s17 }
 0xb7f   : > { %v5016_v32 = vpop.permute.xlu2 %5015 }
 0xb80   : > { %v5037_v54 = vrot.slane %v5016_v32, 4 }
 0xb87   : > { %v5022_v29 = vpop.permute.xlu2 %5021 }
 0xb88   : > { %v5040_v25 = vrot.slane %v5022_v29, 4 }
 0xb8f   : > { %v5028_v52 = vpop.permute.xlu2 %5027 }
 0xb90   : > { %v5043_v34 = vrot.slane %v5028_v52, 4 }
 0xb97   : > { %v5034_v44 = vpop.permute.xlu2 %5033 }
 0xbb0   : > { %v5012_v15 = vpop.permute.xlu0 %5011  ;;  %v5014_v31 = vpop.permute.xlu1 %5013 }
 0xbb1   : > { %v5035_v1 = vrot.slane %v5012_v15, 4  ;;  %v5036_v48 = vrot.slane %v5014_v31, 4 }
 0xbb3   : > { %v5047_v63 = vsel %vm479_vm3, %v5035_v1, %v5036_v48  ;;  %v5049_v10 = vsel %vm479_vm3, %v5036_v48, %v5037_v54 }
 0xbb4   : > { %v5048_v40 = vsel %vm1423_vm9, %v5012_v15, %v5047_v63  ;;  %v5050_v17 = vsel %vm1423_vm9, %v5014_v31, %v5049_v10  ;;  %v5046_v15 = vrot.slane %v5034_v44, 4 }
 0xbb5   : > { %5071 = vst [vmem:[#allocation2 + $0xc0] sm:$0xff] %v5048_v40 }
 0xbb6   : > { %5072 = vst [vmem:[#allocation2 + $0xc8] sm:$0xff] %v5050_v17 }
 0xbb8   : > { %v5018_v56 = vpop.permute.xlu0 %5017  ;;  %v5020_v8 = vpop.permute.xlu1 %5019 }
 0xbb9   : > { %v5038_v24 = vrot.slane %v5018_v56, 4  ;;  %v5039_v23 = vrot.slane %v5020_v8, 4 }
 0xbbb   : > { %v5051_v58 = vsel %vm479_vm3, %v5038_v24, %v5039_v23  ;;  %v5053_v57 = vsel %vm479_vm3, %v5039_v23, %v5040_v25  ;;  %v5142_v25 = vpop.permute.xlu2 %5141 }
 0xbbc   : > { %v5052_v26 = vsel %vm1423_vm9, %v5018_v56, %v5051_v58  ;;  %v5054_v53 = vsel %vm1423_vm9, %v5020_v8, %v5053_v57 }
 0xbbd   : > { %5073 = vst [vmem:[#allocation2 + $0xd0] sm:$0xff] %v5052_v26 }
 0xbbe   : > { %5074 = vst [vmem:[#allocation2 + $0xd8] sm:$0xff] %v5054_v53 }
 0xbc0   : > { %v5024_v19 = vpop.permute.xlu0 %5023  ;;  %v5026_v16 = vpop.permute.xlu1 %5025 }
 0xbc1   : > { %v5041_v42 = vrot.slane %v5024_v19, 4  ;;  %v5042_v21 = vrot.slane %v5026_v16, 4 }
 0xbc3   : > { %v5055_v49 = vsel %vm479_vm3, %v5041_v42, %v5042_v21  ;;  %v5057_v45 = vsel %vm479_vm3, %v5042_v21, %v5043_v34 }
 0xbc4   : > { %v5056_v60 = vsel %vm1423_vm9, %v5024_v19, %v5055_v49  ;;  %v5058_v59 = vsel %vm1423_vm9, %v5026_v16, %v5057_v45  ;;  %v10585_v52 = vld [vmem:[#allocation2 + $0xcc] sm:$0xf0]  ;;  %v9905_v16 = vld [vmem:[#allocation2 + $0xc0] sm:$0xf] }
 0xbc5   : > { %5075 = vst [vmem:[#allocation2 + $0xe0] sm:$0xff] %v5056_v60  ;;  %v9906_v49 = vor.u32 %v10585_v52, %v9905_v16 }
 0xbc6   : > { %5076 = vst [vmem:[#allocation2 + $0xe8] sm:$0xff] %v5058_v59  ;;  %v10581_v59 = vld [vmem:[#allocation2 + $0xac] sm:$0xf0] }
 0xbc8   : > { %v5030_v43 = vpop.permute.xlu0 %5029  ;;  %v5032_v32 = vpop.permute.xlu1 %5031 }
 0xbc9   : > { %v5044_v31 = vrot.slane %v5030_v43, 4  ;;  %v5045_v54 = vrot.slane %v5032_v32, 4 }
 0xbcb   : > { %v5059_v1 = vsel %vm479_vm3, %v5044_v31, %v5045_v54  ;;  %v5061_v48 = vsel %vm479_vm3, %v5045_v54, %v5046_v15  ;;  %v9889_v15 = vld [vmem:[#allocation2 + $0xa0] sm:$0xf]  ;;  %v10577_v54 = vld [vmem:[#allocation2 + $0x8c] sm:$0xf0] }
 0xbcc   : > { %v5060_v29 = vsel %vm1423_vm9, %v5030_v43, %v5059_v1  ;;  %v5062_v63 = vsel %vm1423_vm9, %v5032_v32, %v5061_v48  ;;  %v9921_v23 = vld [vmem:[#allocation2 + $0xe0] sm:$0xf]  ;;  %v9890_v31 = vor.u32 %v10581_v59, %v9889_v15 }
 0xbcd   : > { %5077 = vst [vmem:[#allocation2 + $0xf0] sm:$0xff] %v5060_v29  ;;  %v9873_v29 = vld [vmem:[#allocation2 + $0x80] sm:$0xf] }
 0xbce   : > { %5078 = vst [vmem:[#allocation2 + $0xf8] sm:$0xff] %v5062_v63  ;;  %v9825_v59 = vld [vmem:[#allocation2 + $0x20] sm:$0xf] }
 0xbcf   : > { %v9809_v15 = vld [vmem:[#allocation2] sm:$0xf] }
 0xbd0   : > { %v5138_v10 = vpop.permute.xlu0 %5137  ;;  %v5140_v40 = vpop.permute.xlu1 %5139 }
 0xbd1   : > { %v5145_v17 = vsel %vm1423_vm9, %v5138_v10, %v5140_v40  ;;  %v5153_v56 = vmul.f32 %v5138_v10, %v12891_v28  ;;  %v5146_v26 = vsel %vm1423_vm9, %v5140_v40, %v5142_v25  ;;  %v5158_v34 = vmul.f32 %v5138_v10, %v13029_v47 }
 0xbd2   : > { %v5154_v8 = vmul.f32 %v5145_v17, %v12893_v38  ;;  %v5159_v53 = vmul.f32 %v5145_v17, %v13031_v61  ;;  %v5155_v45 = vmul.f32 %v5146_v26, %v12897_v46  ;;  %v5164_v1 = vmul.f32 %v5145_v17, %v12969_v4 }
 0xbd3   : > { %v5163_v63 = vmul.f32 %v5138_v10, %v12967_v62  ;;  %v9874_v40 = vor.u32 %v10577_v54, %v9873_v29  ;;  %v5169_v52 = vmul.f32 %v5145_v17, %v12957_v36  ;;  %v5168_v16 = vmul.f32 %v5138_v10, %v12955_v39  ;;  %v10561_v17 = vld [vmem:[#allocation2 + $0xc] sm:$0xf0]  ;;  %v9716_v10 = vld [vmem:[%s15531_s1 + $0x27] ss:$8 sm:$0xf] }
 0xbd4   : > { %v5173_v24 = vpack.c.bf16 %v5154_v8, %v5153_v56  ;;  %v10589_v58 = vld [vmem:[#allocation2 + $0xec] sm:$0xf0]  ;;  %v5176_v32 = vpack.c.bf16 %v5159_v53, %v5158_v34  ;;  %v5160_v56 = vmul.f32 %v5146_v26, %v13037_v7  ;;  %v5170_v54 = vmul.f32 %v5146_v26, %v12959_v33 }
 0xbd5   : > { %v9922_v57 = vor.u32 %v10589_v58, %v9921_v23  ;;  %v10573_v8 = vld [vmem:[#allocation2 + $0x6c] sm:$0xf0]  ;;  %v9857_v23 = vld [vmem:[#allocation2 + $0x60] sm:$0xf]  ;;  %v5290_v29 = vperm.slane %v9716_v10, 2 }
 0xbd6   : > { %5197 = vrot.lane.b32.xlu1 %v5173_v24, %s10816_s14  ;;  %v5179_v24 = vpack.c.bf16 %v5164_v1, %v5163_v63  ;;  %v9858_v58 = vor.u32 %v10573_v8, %v9857_v23  ;;  %v5288_v1 = vperm.slane %v9716_v10, 0  ;;  %v5291_v63 = vperm.slane %v9716_v10, 3 }
 0xbd7   : > { %7997 = vmatpush.bf16.msra.mxu3 %v9922_v57  ;;  %v10569_v57 = vld [vmem:[#allocation2 + $0x4c] sm:$0xf0] }
 0xbd8   : > { %v5144_v19 = vpop.permute.xlu0 %5143 }
 0xbd9   : > { %v5147_v42 = vsel %vm1423_vm9, %v5142_v25, %v5144_v19  ;;  %v5157_v21 = vmul.f32 0.0, %v5144_v19  ;;  %v9841_v19 = vld [vmem:[#allocation2 + $0x40] sm:$0xf] }
 0xbda   : > { %v5156_v60 = vmul.f32 %v5147_v42, %v12907_v51  ;;  %v5161_v48 = vmul.f32 %v5147_v42, %v13039_v50  ;;  %v5166_v53 = vmul.f32 %v5147_v42, %v12973_v55  ;;  %v9842_v34 = vor.u32 %v10569_v57, %v9841_v19 }
 0xbdb   : > { %v5175_v44 = vpack.c.bf16 %v5157_v21, %v5157_v21  ;;  %7998 = vmatpush.bf16.msra.mxu3 %v9906_v49  ;;  %v5165_v21 = vmul.f32 %v5146_v26, %v12971_v5  ;;  %v10565_v49 = vld [vmem:[#allocation2 + $0x2c] sm:$0xf0] }
 0xbdc   : > { %v5174_v43 = vpack.c.bf16 %v5156_v60, %v5155_v45  ;;  %v5177_v25 = vpack.c.bf16 %v5161_v48, %v5160_v56  ;;  %v5182_v60 = vpack.c.bf16 %v5169_v52, %v5168_v16 }
 0xbdd   : > { %5201 = vrot.lane.b32.xlu0 %v5175_v44, %s10816_s14  ;;  %v5180_v45 = vpack.c.bf16 %v5166_v53, %v5165_v21 }
 0xbde   : > { %5199 = vrot.lane.b32.xlu2 %v5174_v43, %s10816_s14  ;;  %5203 = vrot.lane.b32.xlu1 %v5176_v32, %s10816_s14  ;;  %v9826_v43 = vor.u32 %v10565_v49, %v9825_v59  ;;  %v5171_v32 = vmul.f32 %v5147_v42, %v12961_v3 }
 0xbdf   : > { %7999 = vmatpush.bf16.msra.mxu3 %v9890_v31  ;;  %v9810_v31 = vor.u32 %v10561_v17, %v9809_v15 }
 0xbe0   : > { %v5183_v48 = vpack.c.bf16 %v5171_v32, %v5170_v54 }
 0xbe3   : > { %8000 = vmatpush.bf16.msra.mxu3 %v9874_v40  ;;  %v5289_v40 = vperm.slane %v9716_v10, 1 }
 0xbe5   : > { %5207 = vrot.lane.b32.xlu0 %v5175_v44, %s10816_s14 }
 0xbe6   : > { %5205 = vrot.lane.b32.xlu2 %v5177_v25, %s10816_s14  ;;  %5209 = vrot.lane.b32.xlu1 %v5179_v24, %s10816_s14 }
 0xbe7   : > { %8001 = vmatpush.bf16.msra.mxu3 %v9858_v58 }
 0xbeb   : > { %8002 = vmatpush.bf16.msra.mxu3 %v9842_v34 }
 0xbed   : > { %5213 = vrot.lane.b32.xlu0 %v5175_v44, %s10816_s14 }
 0xbee   : > { %5211 = vrot.lane.b32.xlu2 %v5180_v45, %s10816_s14  ;;  %5215 = vrot.lane.b32.xlu1 %v5182_v60, %s10816_s14 }
 0xbef   : > { %8003 = vmatpush.bf16.msra.mxu3 %v9826_v43 }
 0xbf3   : > { %8004 = vmatpush.bf16.msra.mxu3 %v9810_v31 }
 0xbf5   : > { %5219 = vrot.lane.b32.xlu0 %v5175_v44, %s10816_s14 }
 0xbf6   : > { %5217 = vrot.lane.b32.xlu2 %v5183_v48, %s10816_s14  ;;  %5292 = vrot.lane.b32.xlu1 %v5288_v1, %s10822_s24 }
 0xbfd   : > { %5296 = vrot.lane.b32.xlu0 %v5290_v29, %s10822_s24 }
 0xbfe   : > { %5298 = vrot.lane.b32.xlu1 %v5291_v63, %s10822_s24  ;;  %5294 = vrot.lane.b32.xlu2 %v5289_v40, %s10822_s24 }
 0xc38   : > { %v5200_v42 = vpop.permute.xlu2 %5199 }
 0xc39   : > { %v5222_v56 = vrot.slane %v5200_v42, 4 }
 0xc40   : > { %v5206_v25 = vpop.permute.xlu2 %5205 }
 0xc41   : > { %v5225_v52 = vrot.slane %v5206_v25, 4 }
 0xc48   : > { %v5198_v26 = vpop.permute.xlu1 %5197  ;;  %v5212_v21 = vpop.permute.xlu2 %5211 }
 0xc49   : > { %v5221_v8 = vrot.slane %v5198_v26, 4  ;;  %v5228_v43 = vrot.slane %v5212_v21, 4 }
 0xc4b   : > { %v5233_v44 = vsel %vm479_vm3, %v5221_v8, %v5222_v56 }
 0xc4c   : > { %v5234_v24 = vsel %vm1333_vm8, %v5198_v26, %v5233_v44 }
 0xc4d   : > { %5257 = vst [vmem:[#allocation2 + $0x140] sm:$0xff] %v5234_v24 }
 0xc4f   : > { %v5202_v23 = vpop.permute.xlu0 %5201 }
 0xc50   : > { %v5223_v58 = vrot.slane %v5202_v23, 4  ;;  %v5204_v57 = vpop.permute.xlu1 %5203  ;;  %v5218_v54 = vpop.permute.xlu2 %5217 }
 0xc51   : > { %v5224_v53 = vrot.slane %v5204_v57, 4  ;;  %v5231_v63 = vrot.slane %v5218_v54, 4 }
 0xc52   : > { %v5235_v19 = vsel %vm479_vm3, %v5222_v56, %v5223_v58 }
 0xc53   : > { %v5236_v16 = vsel %vm1333_vm8, %v5200_v42, %v5235_v19  ;;  %v5237_v34 = vsel %vm479_vm3, %v5224_v53, %v5225_v52 }
 0xc54   : > { %5258 = vst [vmem:[#allocation2 + $0x148] sm:$0xff] %v5236_v16  ;;  %v5238_v49 = vsel %vm1333_vm8, %v5204_v57, %v5237_v34 }
 0xc55   : > { %5259 = vst [vmem:[#allocation2 + $0x150] sm:$0xff] %v5238_v49 }
 0xc57   : > { %v5208_v45 = vpop.permute.xlu0 %5207 }
 0xc58   : > { %v5226_v60 = vrot.slane %v5208_v45, 4  ;;  %v5210_v59 = vpop.permute.xlu1 %5209 }
 0xc59   : > { %v5227_v17 = vrot.slane %v5210_v59, 4 }
 0xc5a   : > { %v5239_v10 = vsel %vm479_vm3, %v5225_v52, %v5226_v60 }
 0xc5b   : > { %v5240_v32 = vsel %vm1333_vm8, %v5206_v25, %v5239_v10  ;;  %v5241_v15 = vsel %vm479_vm3, %v5227_v17, %v5228_v43  ;;  %v5295_v25 = vpop.permute.xlu2 %5294 }
 0xc5c   : > { %5260 = vst [vmem:[#allocation2 + $0x158] sm:$0xff] %v5240_v32  ;;  %v5242_v31 = vsel %vm1333_vm8, %v5210_v59, %v5241_v15 }
 0xc5d   : > { %5261 = vst [vmem:[#allocation2 + $0x160] sm:$0xff] %v5242_v31 }
 0xc5f   : > { %v5214_v1 = vpop.permute.xlu0 %5213 }
 0xc60   : > { %v5229_v48 = vrot.slane %v5214_v1, 4  ;;  %v5216_v29 = vpop.permute.xlu1 %5215 }
 0xc61   : > { %v5230_v40 = vrot.slane %v5216_v29, 4 }
 0xc62   : > { %v5243_v42 = vsel %vm479_vm3, %v5228_v43, %v5229_v48 }
 0xc63   : > { %v5244_v26 = vsel %vm1333_vm8, %v5212_v21, %v5243_v42  ;;  %v5245_v56 = vsel %vm479_vm3, %v5230_v40, %v5231_v63 }
 0xc64   : > { %5262 = vst [vmem:[#allocation2 + $0x168] sm:$0xff] %v5244_v26  ;;  %v5246_v8 = vsel %vm1333_vm8, %v5216_v29, %v5245_v56 }
 0xc65   : > { %5263 = vst [vmem:[#allocation2 + $0x170] sm:$0xff] %v5246_v8  ;;  %v9724_v8 = vld [vmem:[%s15531_s1 + $0x43] ss:$8 sm:$0xf] }
 0xc67   : > { %v5220_v44 = vpop.permute.xlu0 %5219 }
 0xc68   : > { %v5232_v24 = vrot.slane %v5220_v44, 4  ;;  %v13358_v23 = vpop.permute.xlu1 %5292 }
 0xc69   : > { %v13362_v58 = vsel %vm4893_vm14, %v13358_v23, %v5295_v25  ;;  %v5309_v57 = vmul.f32 %v13358_v23, %v12891_v28  ;;  %v5314_v45 = vmul.f32 %v13358_v23, %v13029_v47  ;;  %v5319_v29 = vmul.f32 %v13358_v23, %v12967_v62 }
 0xc6a   : > { %v5247_v52 = vsel %vm479_vm3, %v5231_v63, %v5232_v24  ;;  %v5310_v53 = vmul.f32 %v13362_v58, %v12893_v38  ;;  %v5315_v60 = vmul.f32 %v13362_v58, %v13031_v61  ;;  %v5320_v63 = vmul.f32 %v13362_v58, %v12969_v4 }
 0xc6b   : > { %v5248_v19 = vsel %vm1333_vm8, %v5218_v54, %v5247_v52  ;;  %v6557_v24 = vperm.slane %v9724_v8, 0  ;;  %v6559_v52 = vperm.slane %v9724_v8, 2  ;;  %vm15688_vm8 = vcmask 588800  }
 0xc6c   : > { %5264 = vst [vmem:[#allocation2 + $0x178] sm:$0xff] %v5248_v19  ;;  %v5329_v16 = vpack.c.bf16 %v5310_v53, %v5309_v57  ;;  %v5332_v54 = vpack.c.bf16 %v5315_v60, %v5314_v45  ;;  %v5335_v26 = vpack.c.bf16 %v5320_v63, %v5319_v29  ;;  %v6560_v53 = vperm.slane %v9724_v8, 3  ;;  %v9721_v45 = vld [vmem:[%s15531_s1 + $0x7] ss:$8 sm:$0xf]  ;;  %vm15690_vm9 = vmmov %vm15688_vm8 }
 0xc6d   : > { %v6558_v19 = vperm.slane %v9724_v8, 1  ;;  %v6063_v60 = vperm.slane %v9721_v45, 0  ;;  %vm15691_vm15 = vmmov %vm15688_vm8 }
 0xc6e   : > { %5353 = vrot.lane.b32.xlu2 %v5329_v16, %s10821_s23  ;;  %v9717_v16 = vld [vmem:[%s15531_s1 + $0x40] ss:$8 sm:$0xf]  ;;  %vm15700_vm13 = vmmov %vm15688_vm8 }
 0xc6f   : > { %v5297_v34 = vpop.permute.xlu0 %5296  ;;  %vm15702_vm2 = vmmov %vm15688_vm8 }
 0xc70   : > { %v5302_v21 = vsel %vm4893_vm14, %v5295_v25, %v5297_v34  ;;  %v5299_v49 = vpop.permute.xlu1 %5298 }
 0xc71   : > { %v5311_v59 = vmul.f32 %v5302_v21, %v12897_v46  ;;  %v13378_v43 = vmul.f32 %v5302_v21, %v12959_v33  ;;  %v5303_v17 = vsel %vm4893_vm14, %v5297_v34, %v5299_v49  ;;  %v5313_v10 = vmul.f32 0.0, %v5299_v49  ;;  %vm15704_vm14 = vmmov %vm15702_vm2 }
 0xc72   : > { %v5312_v32 = vmul.f32 %v5303_v17, %v12907_v51  ;;  %v13383_v15 = vmul.f32 %v5303_v17, %v12961_v3  ;;  %v5316_v40 = vmul.f32 %v5302_v21, %v13037_v7  ;;  %v5317_v42 = vmul.f32 %v5303_v17, %v13039_v50 }
 0xc73   : > { %v13385_v31 = vpack.c.bf16 %v5313_v10, %v5313_v10  ;;  %v5321_v25 = vmul.f32 %v5302_v21, %v12971_v5  ;;  %v5322_v44 = vmul.f32 %v5303_v17, %v12973_v55  ;;  %v5445_v34 = vperm.slane %v9717_v16, 1  ;;  %v9723_v10 = vld [vmem:[%s15531_s1 + $0x40] ss:$8 sm:$0xf] }
 0xc74   : > { %v5330_v1 = vpack.c.bf16 %v5312_v32, %v5311_v59  ;;  %v5333_v56 = vpack.c.bf16 %v5317_v42, %v5316_v40  ;;  %v5446_v21 = vperm.slane %v9717_v16, 2  ;;  %v5444_v49 = vperm.slane %v9717_v16, 0  ;;  %v9720_v42 = vld [vmem:[%s15531_s1 + $0x4] ss:$8 sm:$0xf] }
 0xc75   : > { %15686 = vst [vmem:[#allocation10_spill] sm:$0xff] %v13385_v31  ;;  %5357 = vrot.lane.b32.xlu1 %v13385_v31, %s10821_s23  ;;  %v5336_v57 = vpack.c.bf16 %v5322_v44, %v5321_v25  ;;  %v6064_v59 = vperm.slane %v9721_v45, 1  ;;  %v5447_v17 = vperm.slane %v9717_v16, 3  ;;  %v6066_v32 = vperm.slane %v9721_v45, 3 }
 0xc76   : > { %5359 = vrot.lane.b32.xlu2 %v5332_v54, %s10821_s23  ;;  %5355 = vrot.lane.b32.xlu0 %v5330_v1, %s10821_s23  ;;  %v6403_v54 = vperm.slane %v9723_v10, 0  ;;  %v6065_v1 = vperm.slane %v9721_v45, 2  ;;  %v6405_v29 = vperm.slane %v9723_v10, 2  ;;  %v6406_v63 = vperm.slane %v9723_v10, 3 }
 0xc77   : > { %v6404_v40 = vperm.slane %v9723_v10, 1  ;;  %v5909_v8 = vperm.slane %v9720_v42, 0  ;;  %v9719_v25 = vld [vmem:[%s15531_s1 + $0x1] ss:$8 sm:$0xf] }
 0xc78   : > { %v5755_v44 = vperm.slane %v9719_v25, 0  ;;  %v5757_v16 = vperm.slane %v9719_v25, 2  ;;  %v9718_v45 = vld [vmem:[%s15531_s1 + $0x41] ss:$8 sm:$0xf] }
 0xc7d   : > { %5363 = vrot.lane.b32.xlu1 %v13385_v31, %s10821_s23 }
 0xc7e   : > { %5365 = vrot.lane.b32.xlu2 %v5335_v26, %s10821_s23  ;;  %5361 = vrot.lane.b32.xlu0 %v5333_v56, %s10821_s23  ;;  %v5910_v26 = vperm.slane %v9720_v42, 1  ;;  %v5911_v56 = vperm.slane %v9720_v42, 2 }
 0xc85   : > { %5369 = vrot.lane.b32.xlu1 %v13385_v31, %s10821_s23 }
 0xc86   : > { %6561 = vrot.lane.b32.xlu2 %v6557_v24, %s10810_s12  ;;  %5367 = vrot.lane.b32.xlu0 %v5336_v57, %s10821_s23  ;;  %v5756_v24 = vperm.slane %v9719_v25, 1  ;;  %v5912_v57 = vperm.slane %v9720_v42, 3 }
 0xc8d   : > { %6565 = vrot.lane.b32.xlu1 %v6559_v52, %s10810_s12  ;;  %v9722_v52 = vld [vmem:[%s15531_s1 + $0x22] ss:$8 sm:$0xf] }
 0xc8e   : > { %6567 = vrot.lane.b32.xlu2 %v6560_v53, %s10810_s12  ;;  %6563 = vrot.lane.b32.xlu0 %v6558_v19, %s10810_s12  ;;  %v5758_v53 = vperm.slane %v9719_v25, 3  ;;  %v6217_v19 = vperm.slane %v9722_v52, 0 }
 0xc95   : > { %5450 = vrot.lane.b32.xlu1 %v5445_v34, %s10815_s9  ;;  %v6219_v34 = vperm.slane %v9722_v52, 2 }
 0xc96   : > { %5452 = vrot.lane.b32.xlu2 %v5446_v21, %s10815_s9  ;;  %5448 = vrot.lane.b32.xlu0 %v5444_v49, %s10815_s9  ;;  %v6220_v21 = vperm.slane %v9722_v52, 3  ;;  %v6218_v49 = vperm.slane %v9722_v52, 1 }
 0xc9d   : > { %6067 = vrot.lane.b32.xlu1 %v6063_v60, %s10812_s20  ;;  %v5600_v60 = vperm.slane %v9718_v45, 1 }
 0xc9e   : > { %6069 = vrot.lane.b32.xlu2 %v6064_v59, %s10812_s20  ;;  %5454 = vrot.lane.b32.xlu0 %v5447_v17, %s10815_s9  ;;  %v5601_v59 = vperm.slane %v9718_v45, 2  ;;  %v5599_v17 = vperm.slane %v9718_v45, 0 }
 0xca5   : > { %6073 = vrot.lane.b32.xlu1 %v6066_v32, %s10812_s20  ;;  %v5602_v32 = vperm.slane %v9718_v45, 3 }
 0xca6   : > { %6407 = vrot.lane.b32.xlu2 %v6403_v54, %s10815_s9  ;;  %6071 = vrot.lane.b32.xlu0 %v6065_v1, %s10812_s20 }
 0xcad   : > { %6411 = vrot.lane.b32.xlu1 %v6405_v29, %s10815_s9 }
 0xcae   : > { %6413 = vrot.lane.b32.xlu2 %v6406_v63, %s10815_s9  ;;  %6409 = vrot.lane.b32.xlu0 %v6404_v40, %s10815_s9 }
 0xcb5   : > { %5915 = vrot.lane.b32.xlu1 %v5910_v26, %s10811_s15 }
 0xcb6   : > { %5917 = vrot.lane.b32.xlu2 %v5911_v56, %s10811_s15  ;;  %5913 = vrot.lane.b32.xlu0 %v5909_v8, %s10811_s15 }
 0xcbd   : > { %5759 = vrot.lane.b32.xlu1 %v5755_v44, %s10810_s12 }
 0xcbe   : > { %5761 = vrot.lane.b32.xlu2 %v5756_v24, %s10810_s12  ;;  %5919 = vrot.lane.b32.xlu0 %v5912_v57, %s10811_s15 }
 0xcc5   : > { %5765 = vrot.lane.b32.xlu1 %v5758_v53, %s10810_s12 }
 0xcc6   : > { %6221 = vrot.lane.b32.xlu2 %v6217_v19, %s10814_s30  ;;  %5763 = vrot.lane.b32.xlu0 %v5757_v16, %s10810_s12 }
 0xcc8   : > { %v5354_v10 = vpop.permute.xlu2 %5353 }
 0xcc9   : > { %v5377_v40 = vrot.slane %v5354_v10, 4 }
 0xccd   : > { %6225 = vrot.lane.b32.xlu1 %v6219_v34, %s10814_s30 }
 0xcce   : > { %6227 = vrot.lane.b32.xlu2 %v6220_v21, %s10814_s30  ;;  %6223 = vrot.lane.b32.xlu0 %v6218_v49, %s10814_s30 }
 0xcd0   : > { %v5360_v54 = vpop.permute.xlu2 %5359 }
 0xcd1   : > { %v5380_v53 = vrot.slane %v5360_v54, 4 }
 0xcd5   : > { %5605 = vrot.lane.b32.xlu1 %v5600_v60, %s10820_s10 }
 0xcd6   : > { %5607 = vrot.lane.b32.xlu2 %v5601_v59, %s10820_s10  ;;  %5603 = vrot.lane.b32.xlu0 %v5599_v17, %s10820_s10 }
 0xcd8   : > { %v5366_v26 = vpop.permute.xlu2 %5365 }
 0xcde   : > { %5609 = vrot.lane.b32.xlu0 %v5602_v32, %s10820_s10 }
 0xce0   : > { %v13472_v45 = vpop.permute.xlu2 %6561 }
 0xce7   : > { %v5358_v1 = vpop.permute.xlu1 %5357 }
 0xce8   : > { %v5379_v29 = vrot.slane %v5358_v1, 4  ;;  %v5356_v63 = vpop.permute.xlu0 %5355 }
 0xce9   : > { %v5378_v42 = vrot.slane %v5356_v63, 4 }
 0xceb   : > { %v5389_v56 = vsel %vm479_vm3, %v5377_v40, %v5378_v42  ;;  %v5392_v8 = vsel %vm479_vm3, %v5378_v42, %v5379_v29 }
 0xcec   : > { %v5391_v25 = vsel %vm4803_vm12, %v5354_v10, %v5389_v56  ;;  %v5393_v44 = vsel %vm4803_vm12, %v5356_v63, %v5392_v8  ;;  %v5383_v10 = vrot.slane %v5366_v26, 4 }
 0xced   : > { %5414 = vst [vmem:[#allocation2 + $0x180] sm:$0xff] %v5391_v25 }
 0xcee   : > { %5415 = vst [vmem:[#allocation2 + $0x188] sm:$0xff] %v5393_v44 }
 0xcef   : > { %v5364_v24 = vpop.permute.xlu1 %5363 }
 0xcf0   : > { %v5382_v57 = vrot.slane %v5364_v24, 4  ;;  %v5362_v52 = vpop.permute.xlu0 %5361  ;;  %v6592_v24 = vmul.f32 %v13472_v45, %v13069_v14 }
 0xcf1   : > { %v5381_v19 = vrot.slane %v5362_v52, 4 }
 0xcf3   : > { %v5394_v16 = vsel %vm479_vm3, %v5380_v53, %v5381_v19  ;;  %v5396_v34 = vsel %vm479_vm3, %v5381_v19, %v5382_v57  ;;  %v6587_v19 = vmul.f32 %v13472_v45, %v12981_v2 }
 0xcf4   : > { %v5395_v21 = vsel %vm4803_vm12, %v5360_v54, %v5394_v16  ;;  %v5397_v49 = vsel %vm4803_vm12, %v5362_v52, %v5396_v34  ;;  %v13478_v54 = vpop.permute.xlu2 %6567 }
 0xcf5   : > { %5416 = vst [vmem:[#allocation2 + $0x190] sm:$0xff] %v5395_v21 }
 0xcf6   : > { %5417 = vst [vmem:[#allocation2 + $0x198] sm:$0xff] %v5397_v49 }
 0xcf7   : > { %v5370_v60 = vpop.permute.xlu1 %5369  ;;  %15687 = vst [vmem:[#allocation6_spill] sm:$0xff] %v13478_v54 }
 0xcf8   : > { %v5385_v59 = vrot.slane %v5370_v60, 4  ;;  %v5368_v17 = vpop.permute.xlu0 %5367 }
 0xcf9   : > { %v5384_v32 = vrot.slane %v5368_v17, 4 }
 0xcfb   : > { %v5398_v1 = vsel %vm479_vm3, %v5383_v10, %v5384_v32  ;;  %v5400_v29 = vsel %vm479_vm3, %v5384_v32, %v5385_v59 }
 0xcfc   : > { %v5399_v63 = vsel %vm4803_vm12, %v5366_v26, %v5398_v1  ;;  %v5401_v40 = vsel %vm4803_vm12, %v5368_v17, %v5400_v29  ;;  %v5453_v10 = vpop.permute.xlu2 %5452 }
 0xcfd   : > { %5418 = vst [vmem:[#allocation2 + $0x1a0] sm:$0xff] %v5399_v63 }
 0xcfe   : > { %5419 = vst [vmem:[#allocation2 + $0x1a8] sm:$0xff] %v5401_v40 }
 0xcff   : > { %v6566_v42 = vpop.permute.xlu1 %6565 }
 0xd00   : > { %v13482_v56 = vsel %vm390_vm0, %v6566_v42, %v13478_v54  ;;  %v6564_v8 = vpop.permute.xlu0 %6563 }
 0xd01   : > { %v6590_v25 = vmul.f32 %v13482_v56, %v12989_v13  ;;  %v13488_v44 = vsel %vm390_vm0, %v13472_v45, %v6564_v8  ;;  %v13491_v26 = vsel %vm390_vm0, %v6564_v8, %v6566_v42  ;;  %v6595_v32 = vmul.f32 %v13482_v56, %v13076_v22 }
 0xd02   : > { %v6588_v57 = vmul.f32 %v13488_v44, %v12984_v6  ;;  %v6589_v52 = vmul.f32 %v13491_v26, %v12987_v27  ;;  %v6593_v53 = vmul.f32 %v13488_v44, %v13071_v20  ;;  %v6594_v1 = vmul.f32 %v13491_v26, %v13074_v12 }
 0xd04   : > { %v6604_v16 = vpack.c.bf16 %v6590_v25, %v6589_v52  ;;  %v6606_v34 = vpack.c.bf16 %v6593_v53, %v6592_v24  ;;  %v6603_v21 = vpack.c.bf16 %v6588_v57, %v6587_v19  ;;  %v6607_v42 = vpack.c.bf16 %v6595_v32, %v6594_v1 }
 0xd06   : > { %6635 = vrot.lane.b32.xlu2 %v6604_v16, %s10812_s20  ;;  %6639 = vrot.lane.b32.xlu0 %v6606_v34, %s10812_s20 }
 0xd07   : > { %v5451_v49 = vpop.permute.xlu1 %5450  ;;  %6633 = vrot.lane.b32.xlu1 %v6603_v21, %s10812_s20  ;;  %v6070_v21 = vpop.permute.xlu2 %6069 }
 0xd08   : > { %v13505_v60 = vpop.permute.xlu0 %5448  ;;  %v13521_v40 = vsel %vm1266_vm7, %v5451_v49, %v5453_v10 }
 0xd09   : > { %v13510_v59 = vsel %vm1266_vm7, %v13505_v60, %v5451_v49  ;;  %v5474_v17 = vmul.f32 %v13505_v60, %v12967_v62  ;;  %v5476_v24 = vmul.f32 %v13521_v40, %v12971_v5  ;;  %v5481_v57 = vmul.f32 %v13521_v40, %v12959_v33 }
 0xd0a   : > { %v5475_v29 = vmul.f32 %v13510_v59, %v12969_v4  ;;  %v5479_v16 = vmul.f32 %v13505_v60, %v12955_v39  ;;  %v5480_v34 = vmul.f32 %v13510_v59, %v12957_v36  ;;  %v5464_v54 = vmul.f32 %v13505_v60, %v12891_v28 }
 0xd0c   : > { %v5490_v63 = vpack.c.bf16 %v5475_v29, %v5474_v17  ;;  %v5493_v1 = vpack.c.bf16 %v5480_v34, %v5479_v16 }
 0xd0e   : > { %5520 = vrot.lane.b32.xlu2 %v5490_v63, %s10814_s30 }
 0xd0f   : > { %v6068_v8 = vpop.permute.xlu1 %6067  ;;  %6641 = vrot.lane.b32.xlu1 %v6607_v42, %s10812_s20 }
 0xd10   : > { %v13524_v25 = vpop.permute.xlu0 %5454  ;;  %v6075_v32 = vsel %vm15688_vm8, %v6068_v8, %v6070_v21  ;;  %v13544_v63 = vmul.f32 0.0, %v6068_v8  ;;  %vm15707_vm8 = vmmov %vm15694_vm1 }
 0xd11   : > { %v5458_v52 = vsel %vm1266_vm7, %v5453_v10, %v13524_v25  ;;  %v6094_v42 = vmul.f32 %v6075_v32, %v12981_v2 }
 0xd12   : > { %v5477_v53 = vmul.f32 %v5458_v52, %v12973_v55  ;;  %v5482_v19 = vmul.f32 %v5458_v52, %v12961_v3 }
 0xd14   : > { %v5494_v49 = vpack.c.bf16 %v5482_v19, %v5481_v57  ;;  %v5491_v17 = vpack.c.bf16 %v5477_v53, %v5476_v24  ;;  %v6099_v57 = vmul.f32 %v6075_v32, %v13069_v14  ;;  %v6109_v19 = vpack.c.bf16 %v6094_v42, %v13544_v63 }
 0xd15   : > { %v6578_v42 = vmul.f32 %v13488_v44, %v13053_v41 }
 0xd16   : > { %5522 = vrot.lane.b32.xlu0 %v5491_v17, %s10814_s30  ;;  %5528 = vrot.lane.b32.xlu2 %v5494_v49, %s10814_s30  ;;  %v6112_v34 = vpack.c.bf16 %v6099_v57, %v13544_v63 }
 0xd17   : > { %v13541_v29 = vpop.permute.xlu1 %6073  ;;  %5526 = vrot.lane.b32.xlu1 %v5493_v1, %s10814_s30  ;;  %v6580_v1 = vmul.f32 %v13482_v56, %v13062_v35 }
 0xd18   : > { %15689 = vst [vmem:[#allocation11_spill] sm:$0xff] %v13541_v29  ;;  %v6072_v10 = vpop.permute.xlu0 %6071 }
 0xd19   : > { %v13549_v48 = vsel %vm15690_vm9, %v6070_v21, %v6072_v10  ;;  %v13553_v24 = vsel %vm15691_vm15, %v6072_v10, %v13541_v29  ;;  %v13563_v21 = vpop.permute.xlu2 %6407  ;;  %v6579_v10 = vmul.f32 %v13491_v26, %v13059_v37  ;;  %vm15709_vm9 = vmmov %vm15694_vm1 }
 0xd1a   : > { %v6095_v53 = vmul.f32 %v13549_v48, %v12984_v6  ;;  %v6096_v8 = vmul.f32 %v13553_v24, %v12987_v27  ;;  %v6100_v49 = vmul.f32 %v13549_v48, %v13071_v20  ;;  %v6101_v17 = vmul.f32 %v13553_v24, %v13074_v12  ;;  %vm15711_vm15 = vmmov %vm15694_vm1 }
 0xd1c   : > { %v6110_v16 = vpack.c.bf16 %v6096_v8, %v6095_v53  ;;  %v6113_v57 = vpack.c.bf16 %v6101_v17, %v6100_v49  ;;  %v6577_v53 = vmul.f32 %v13472_v45, %v13049_v9  ;;  %v6598_v8 = vpack.c.bf16 %v6580_v1, %v6579_v10 }
 0xd1d   : > { %v5465_v49 = vmul.f32 %v13510_v59, %v12893_v38  ;;  %v6585_v17 = vmul.f32 %v13482_v56, %v13011_v30  ;;  %v6584_v1 = vmul.f32 %v13491_v26, %v13008_v18  ;;  %v6582_v10 = vmul.f32 %v13472_v45, %v12998_v11 }
 0xd1e   : > { %6139 = vrot.lane.b32.xlu0 %v6109_v19, %s10810_s12  ;;  %6145 = vrot.lane.b32.xlu2 %v6112_v34, %s10810_s12  ;;  %v6597_v19 = vpack.c.bf16 %v6578_v42, %v6577_v53  ;;  %v5467_v53 = vmul.f32 %v5458_v52, %v12907_v51  ;;  %v5466_v56 = vmul.f32 %v13521_v40, %v12897_v46 }
 0xd1f   : > { %6141 = vrot.lane.b32.xlu1 %v6110_v16, %s10810_s12  ;;  %v6583_v16 = vmul.f32 %v13488_v44, %v13001_v0  ;;  %v5484_v42 = vpack.c.bf16 %v5465_v49, %v5464_v54  ;;  %v5469_v26 = vmul.f32 %v13505_v60, %v13029_v47  ;;  %v5470_v45 = vmul.f32 %v13510_v59, %v13031_v61 }
 0xd20   : > { %v5471_v54 = vmul.f32 %v13521_v40, %v13037_v7  ;;  %v6089_v60 = vmul.f32 %v6075_v32, %v12998_v11  ;;  %v6085_v59 = vmul.f32 %v13549_v48, %v13053_v41  ;;  %v6086_v40 = vmul.f32 %v13553_v24, %v13059_v37 }
 0xd21   : > { %v13584_v34 = vpop.permute.xlu2 %6413  ;;  %v6600_v44 = vpack.c.bf16 %v6583_v16, %v6582_v10  ;;  %v5485_v16 = vpack.c.bf16 %v5467_v53, %v5466_v56  ;;  %v6412_v10 = vpop.permute.xlu1 %6411 }
 0xd22   : > { %15692 = vst [vmem:[#allocation16_spill] sm:$0xff] %v13584_v34  ;;  %v13624_v53 = vsel %vm1266_vm7, %v6412_v10, %v13584_v34 }
 0xd26   : > { %6147 = vrot.lane.b32.xlu0 %v6113_v57, %s10810_s12  ;;  %6623 = vrot.lane.b32.xlu2 %v6598_v8, %s10812_s20  ;;  %v6601_v57 = vpack.c.bf16 %v6585_v17, %v6584_v1  ;;  %v5472_v8 = vmul.f32 %v5458_v52, %v13039_v50  ;;  %v5487_v17 = vpack.c.bf16 %v5470_v45, %v5469_v26  ;;  %v6410_v1 = vpop.permute.xlu0 %6409 }
 0xd27   : > { %6621 = vrot.lane.b32.xlu1 %v6597_v19, %s10812_s20  ;;  %v6084_v52 = vmul.f32 %v6075_v32, %v13049_v9  ;;  %v6104_v32 = vpack.c.bf16 %v6086_v40, %v6085_v59  ;;  %v13632_v56 = vsel %vm1266_vm7, %v13563_v21, %v6410_v1  ;;  %v6090_v26 = vmul.f32 %v13549_v48, %v13001_v0 }
 0xd28   : > { %v5488_v49 = vpack.c.bf16 %v5472_v8, %v5471_v54  ;;  %v13627_v8 = vsel %vm1266_vm7, %v6410_v1, %v6412_v10  ;;  %v6436_v45 = vmul.f32 %v13624_v53, %v12989_v13  ;;  %v6433_v1 = vmul.f32 %v13563_v21, %v12981_v2 }
 0xd29   : > { %v5918_v19 = vpop.permute.xlu2 %5917  ;;  %v6435_v54 = vmul.f32 %v13627_v8, %v12987_v27  ;;  %v5324_v59 = vmul.f32 %v13358_v23, %v12955_v39  ;;  %v5325_v40 = vmul.f32 %v13362_v58, %v12957_v36  ;;  %v6441_v10 = vmul.f32 %v13624_v53, %v13076_v22 }
 0xd2b   : > { %v6450_v48 = vpack.c.bf16 %v6436_v45, %v6435_v54  ;;  %v5338_v45 = vpack.c.bf16 %v5325_v40, %v5324_v59 }
 0xd2e   : > { %6627 = vrot.lane.b32.xlu0 %v6600_v44, %s10812_s20  ;;  %5508 = vrot.lane.b32.xlu2 %v5484_v42, %s10814_s30  ;;  %v6103_v44 = vpack.c.bf16 %v6084_v52, %v13544_v63 }
 0xd2f   : > { %6629 = vrot.lane.b32.xlu1 %v6601_v57, %s10812_s20  ;;  %v6106_v57 = vpack.c.bf16 %v6089_v60, %v13544_v63  ;;  %v6091_v63 = vmul.f32 %v13553_v24, %v13008_v18  ;;  %v6439_v60 = vmul.f32 %v13632_v56, %v13071_v20 }
 0xd31   : > { %v13619_v42 = vpop.permute.xlu2 %5761 }
 0xd36   : > { %5510 = vrot.lane.b32.xlu0 %v5485_v16, %s10814_s30  ;;  %5516 = vrot.lane.b32.xlu2 %v5488_v49, %s10814_s30  ;;  %v5914_v16 = vpop.permute.xlu0 %5913  ;;  %v6434_v49 = vmul.f32 %v13632_v56, %v12984_v6 }
 0xd37   : > { %5514 = vrot.lane.b32.xlu1 %v5487_v17, %s10814_s30  ;;  %v6107_v17 = vpack.c.bf16 %v6091_v63, %v6090_v26 }
 0xd38   : > { %v6449_v24 = vpack.c.bf16 %v6434_v49, %v6433_v1 }
 0xd39   : > { %v13649_v52 = vpop.permute.xlu2 %6221 }
 0xd3e   : > { %6127 = vrot.lane.b32.xlu0 %v6103_v44, %s10810_s12  ;;  %6133 = vrot.lane.b32.xlu2 %v6106_v57, %s10810_s12  ;;  %v6440_v44 = vmul.f32 %v13627_v8, %v13074_v12  ;;  %v5916_v57 = vpop.permute.xlu1 %5915  ;;  %v13665_v26 = vpop.permute.xlu0 %5919 }
 0xd3f   : > { %6129 = vrot.lane.b32.xlu1 %v6104_v32, %s10810_s12  ;;  %v6438_v32 = vmul.f32 %v13563_v21, %v13069_v14  ;;  %15693 = vst [vmem:[#allocation13_spill] sm:$0xff] %v13665_v26  ;;  %v5923_v23 = vsel %vm15694_vm1, %v5918_v19, %v13665_v26  ;;  %v5921_v54 = vsel %vm15695_vm5, %v5914_v16, %v5916_v57  ;;  %vm15712_vm5 = vmmov %vm15702_vm2 }
 0xd40   : > { %v6453_v58 = vpack.c.bf16 %v6441_v10, %v6440_v44  ;;  %v5922_v49 = vsel %vm15696_vm10, %v5916_v57, %v5918_v19  ;;  %v5942_v1 = vmul.f32 %v5923_v23, %v12987_v27  ;;  %v15697_v10 = vpack.c.bf16 %v13383_v15, %v13378_v43  ;;  %vm15714_vm10 = vmmov %vm15702_vm2 }
 0xd41   : > { %v6452_v63 = vpack.c.bf16 %v6439_v60, %v6438_v32  ;;  %v5941_v60 = vmul.f32 %v5922_v49, %v12984_v6  ;;  %v5945_v19 = vmul.f32 %v5921_v54, %v13069_v14  ;;  %v5946_v43 = vmul.f32 %v5922_v49, %v13071_v20 }
 0xd43   : > { %v5956_v40 = vpack.c.bf16 %v5942_v1, %v5941_v60  ;;  %v6426_v60 = vmul.f32 %v13624_v53, %v13062_v35 }
 0xd46   : > { %6135 = vrot.lane.b32.xlu0 %v6107_v17, %s10810_s12  ;;  %6481 = vrot.lane.b32.xlu2 %v6450_v48, %s10814_s30  ;;  %v13674_v17 = vpop.permute.xlu2 %6227  ;;  %v5929_v48 = vmul.f32 0.0, %v5914_v16  ;;  %v5760_v59 = vpop.permute.xlu1 %5759  ;;  %v6424_v16 = vmul.f32 %v13632_v56, %v13053_v41 }
 0xd47   : > { %6479 = vrot.lane.b32.xlu1 %v6449_v24, %s10814_s30  ;;  %v5940_v24 = vmul.f32 %v5921_v54, %v12981_v2  ;;  %v5764_v32 = vpop.permute.xlu0 %5763 }
 0xd48   : > { %v5958_v15 = vpack.c.bf16 %v5945_v19, %v5929_v48 }
 0xd49   : > { %v5955_v44 = vpack.c.bf16 %v5940_v24, %v5929_v48 }
 0xd4e   : > { %6485 = vrot.lane.b32.xlu0 %v6452_v63, %s10814_s30  ;;  %5371 = vrot.lane.b32.xlu2 %v5338_v45, %s10821_s23  ;;  %v13688_v57 = vpop.permute.xlu2 %5607  ;;  %v5947_v63 = vmul.f32 %v5923_v23, %v13074_v12  ;;  %v6423_v45 = vmul.f32 %v13563_v21, %v13049_v9  ;;  %v13694_v1 = vpop.permute.xlu1 %5765 }
 0xd4f   : > { %6487 = vrot.lane.b32.xlu1 %v6453_v58, %s10814_s30  ;;  %15698 = vst [vmem:[#allocation7_spill] sm:$0xff] %v13694_v1 }
 0xd50   : > { %v6443_v58 = vpack.c.bf16 %v6424_v16, %v6423_v45  ;;  %v5959_v24 = vpack.c.bf16 %v5947_v63, %v5946_v43  ;;  %v6429_v16 = vmul.f32 %v13632_v56, %v13001_v0  ;;  %v13711_v63 = vpop.permute.xlu0 %6223  ;;  %v6428_v43 = vmul.f32 %v13563_v21, %v12998_v11 }
 0xd51   : > { %v5935_v56 = vmul.f32 %v5921_v54, %v12998_v11  ;;  %v5931_v21 = vmul.f32 %v5922_v49, %v13053_v41 }
 0xd56   : > { %5373 = vrot.lane.b32.xlu0 %v15697_v10, %s10821_s23  ;;  %5987 = vrot.lane.b32.xlu2 %v5956_v40, %s10811_s15  ;;  %v6425_v40 = vmul.f32 %v13627_v8, %v13059_v37  ;;  %v6431_v10 = vmul.f32 %v13624_v53, %v13011_v30  ;;  %v5930_v53 = vmul.f32 %v5921_v54, %v13049_v9 }
 0xd57   : > { %5985 = vrot.lane.b32.xlu1 %v5955_v44, %s10811_s15  ;;  %v6430_v44 = vmul.f32 %v13627_v8, %v13008_v18  ;;  %v13718_v8 = vpop.permute.xlu1 %6225  ;;  %v5767_v54 = vsel %vm390_vm0, %v5760_v59, %v13619_v42 }
 0xd58   : > { %v6444_v45 = vpack.c.bf16 %v6426_v60, %v6425_v40  ;;  %v5932_v60 = vmul.f32 %v5923_v23, %v13059_v37  ;;  %v5949_v40 = vpack.c.bf16 %v5930_v53, %v5929_v48 }
 0xd5e   : > { %5991 = vrot.lane.b32.xlu0 %v5958_v15, %s10811_s15  ;;  %6467 = vrot.lane.b32.xlu2 %v6443_v58, %s10814_s30  ;;  %v6447_v15 = vpack.c.bf16 %v6431_v10, %v6430_v44  ;;  %v6446_v58 = vpack.c.bf16 %v6429_v16, %v6428_v43  ;;  %v5952_v10 = vpack.c.bf16 %v5935_v56, %v5929_v48  ;;  %v5775_v56 = vmul.f32 0.0, %v5760_v59 }
 0xd5f   : > { %5993 = vrot.lane.b32.xlu1 %v5959_v24, %s10811_s15  ;;  %v5768_v44 = vsel %vm390_vm0, %v13619_v42, %v5764_v32  ;;  %v5769_v16 = vsel %vm390_vm0, %v5764_v32, %v13694_v1  ;;  %v5950_v43 = vpack.c.bf16 %v5932_v60, %v5931_v21  ;;  %v5937_v48 = vmul.f32 %v5923_v23, %v13008_v18  ;;  %v13744_v21 = vpop.permute.xlu1 %5605 }
 0xd60   : > { %v13707_v19 = vpop.permute.xlu2 %6635  ;;  %v5936_v32 = vmul.f32 %v5922_v49, %v13001_v0  ;;  %v5786_v60 = vmul.f32 %v5767_v54, %v12981_v2  ;;  %v5791_v23 = vmul.f32 %v5767_v54, %v13069_v14  ;;  %v5776_v49 = vmul.f32 %v5767_v54, %v13049_v9 }
 0xd61   : > { %15699 = vst [vmem:[#allocation12_spill] sm:$0xff] %v13707_v19  ;;  %v5792_v34 = vmul.f32 %v5768_v44, %v13071_v20  ;;  %v5777_v26 = vmul.f32 %v5768_v44, %v13053_v41  ;;  %v5778_v31 = vmul.f32 %v5769_v16, %v13059_v37 }
 0xd62   : > { %v5953_v42 = vpack.c.bf16 %v5937_v48, %v5936_v32  ;;  %v5793_v48 = vmul.f32 %v5769_v16, %v13074_v12 }
 0xd64   : > { %v5805_v1 = vpack.c.bf16 %v5793_v48, %v5792_v34 }
 0xd66   : > { %6469 = vrot.lane.b32.xlu0 %v6444_v45, %s10814_s30  ;;  %6475 = vrot.lane.b32.xlu2 %v6447_v15, %s10814_s30  ;;  %v13730_v45 = vpop.permute.xlu0 %5603  ;;  %v5787_v15 = vmul.f32 %v5768_v44, %v12984_v6 }
 0xd67   : > { %6473 = vrot.lane.b32.xlu1 %v6446_v58, %s10814_s30  ;;  %v5788_v58 = vmul.f32 %v5769_v16, %v12987_v27 }
 0xd68   : > { %v13722_v24 = vpop.permute.xlu2 %5520 }
 0xd6e   : > { %5973 = vrot.lane.b32.xlu0 %v5949_v40, %s10811_s15  ;;  %5979 = vrot.lane.b32.xlu2 %v5952_v10, %s10811_s15  ;;  %v5802_v40 = vpack.c.bf16 %v5788_v58, %v5787_v15  ;;  %v5801_v10 = vpack.c.bf16 %v5786_v60, %v5775_v56  ;;  %v15555_v58 = vrot.slane %v13707_v19, 4  ;;  %v5804_v60 = vpack.c.bf16 %v5791_v23, %v5775_v56 }
 0xd6f   : > { %5975 = vrot.lane.b32.xlu1 %v5950_v43, %s10811_s15  ;;  %v13749_v43 = vpop.permute.xlu0 %5609  ;;  %v5782_v23 = vmul.f32 %v5768_v44, %v13001_v0 }
 0xd70   : > { %v13740_v53 = vpop.permute.xlu2 %5528 }
 0xd76   : > { %5981 = vrot.lane.b32.xlu0 %v5953_v42, %s10811_s15  ;;  %5833 = vrot.lane.b32.xlu2 %v5802_v40, %s10812_s20  ;;  %v5795_v40 = vpack.c.bf16 %v5776_v49, %v5775_v56 }
 0xd77   : > { %5831 = vrot.lane.b32.xlu1 %v5801_v10, %s10812_s20 }
 0xd78   : > { %v13753_v59 = vpop.permute.xlu2 %6145  ;;  %v6640_v29 = vpop.permute.xlu0 %6639 }
 0xd79   : > { %v6634_v15 = vpop.permute.xlu1 %6633  ;;  %v6654_v34 = vrot.slane %v6640_v29, 4 }
 0xd7a   : > { %v6651_v32 = vrot.slane %v6634_v15, 4 }
 0xd7c   : > { %v6665_v42 = vsel %vm479_vm3, %v6651_v32, %v15555_v58  ;;  %v5783_v32 = vmul.f32 %v5769_v16, %v13008_v18 }
 0xd7d   : > { %v6666_v10 = vsel %vm15700_vm13, %v6634_v15, %v6665_v42  ;;  %v5781_v15 = vmul.f32 %v5767_v54, %v12998_v11  ;;  %v5796_v42 = vpack.c.bf16 %v5778_v31, %v5777_v26  ;;  %v13788_v54 = vsel %vm1176_vm6, %v13718_v8, %v13674_v17  ;;  %vm15716_vm13 = vmmov %vm15702_vm2 }
 0xd7e   : > { %5837 = vrot.lane.b32.xlu0 %v5804_v60, %s10812_s20  ;;  %6685 = vst [vmem:[#allocation2 + $0x3e0] sm:$0xff] %v6666_v10  ;;  %5819 = vrot.lane.b32.xlu2 %v5795_v40, %s10812_s20  ;;  %v13778_v40 = vsel %vm1176_vm6, %v13649_v52, %v13711_v63  ;;  %v5799_v44 = vpack.c.bf16 %v5783_v32, %v5782_v23  ;;  %v13797_v26 = vmul.f32 0.0, %v13649_v52  ;;  %v5538_v32 = vrot.slane %v13722_v24, 4 }
 0xd7f   : > { %5839 = vrot.lane.b32.xlu1 %v5805_v1, %s10812_s20  ;;  %v5798_v10 = vpack.c.bf16 %v5781_v15, %v5775_v56  ;;  %v13793_v31 = vsel %vm1176_vm6, %v13711_v63, %v13718_v8  ;;  %v6253_v23 = vmul.f32 %v13778_v40, %v13069_v14  ;;  %v6250_v52 = vmul.f32 %v13788_v54, %v12987_v27 }
 0xd80   : > { %v13769_v49 = vpop.permute.xlu2 %6623  ;;  %v6249_v15 = vmul.f32 %v13793_v31, %v12984_v6 }
 0xd81   : > { %v13772_v60 = vpop.permute.xlu1 %6641  ;;  %v6266_v58 = vpack.c.bf16 %v6253_v23, %v13797_v26 }
 0xd82   : > { %15701 = vst [vmem:[#allocation14_spill] sm:$0xff] %v13772_v60  ;;  %v15554_v48 = vrot.slane %v13772_v60, 4  ;;  %v13828_v60 = vsel %vm4582_vm4, %v13688_v57, %v13749_v43 }
 0xd84   : > { %v6669_v1 = vsel %vm479_vm3, %v6654_v34, %v15554_v48 }
 0xd85   : > { %v6670_v16 = vsel %vm15702_vm2, %v6640_v29, %v6669_v1  ;;  %v6248_v29 = vmul.f32 %v13778_v40, %v12981_v2 }
 0xd86   : > { %5821 = vrot.lane.b32.xlu0 %v5796_v42, %s10812_s20  ;;  %6687 = vst [vmem:[#allocation2 + $0x3f0] sm:$0xff] %v6670_v16  ;;  %5827 = vrot.lane.b32.xlu2 %v5799_v44, %s10812_s20  ;;  %v15561_v42 = vrot.slane %v13740_v53, 4 }
 0xd87   : > { %5825 = vrot.lane.b32.xlu1 %v5798_v10, %s10812_s20  ;;  %v6263_v10 = vpack.c.bf16 %v6248_v29, %v13797_v26  ;;  %v13835_v29 = vsel %vm4582_vm4, %v13730_v45, %v13744_v21 }
 0xd88   : > { %v13802_v56 = vpop.permute.xlu0 %5522  ;;  %v13807_v63 = vpop.permute.xlu2 %5508 }
 0xd89   : > { %v15560_v8 = vrot.slane %v13802_v56, 4  ;;  %v5527_v34 = vpop.permute.xlu1 %5526 }
 0xd8a   : > { %v5541_v1 = vrot.slane %v5527_v34, 4 }
 0xd8b   : > { %v5552_v44 = vsel %vm479_vm3, %v5538_v32, %v15560_v8  ;;  %v6264_v32 = vpack.c.bf16 %v6250_v52, %v6249_v15  ;;  %v13845_v52 = vsel %vm4582_vm4, %v13744_v21, %v13688_v57  ;;  %vm15703_vm4 = vmmov %vm15702_vm2 }
 0xd8c   : > { %v5553_v16 = vsel %vm1176_vm6, %v13722_v24, %v5552_v44  ;;  %v5556_v48 = vsel %vm479_vm3, %v5541_v1, %v15561_v42  ;;  %v10305_v24 = vld [vmem:[#allocation2 + $0x3e0] sm:$0xf]  ;;  %v6255_v1 = vmul.f32 %v13788_v54, %v13074_v12  ;;  %v5632_v57 = vmul.f32 %v13845_v52, %v12971_v5 }
 0xd8d   : > { %5572 = vst [vmem:[#allocation2 + $0x1e0] sm:$0xff] %v5553_v16  ;;  %v5557_v19 = vsel %vm1176_vm6, %v5527_v34, %v5556_v48  ;;  %v10685_v44 = vld [vmem:[#allocation2 + $0x3ec] sm:$0xf0]  ;;  %v6254_v48 = vmul.f32 %v13793_v31, %v13071_v20 }
 0xd8e   : > { %6293 = vrot.lane.b32.xlu0 %v6263_v10, %s10815_s9  ;;  %5574 = vst [vmem:[#allocation2 + $0x1f0] sm:$0xff] %v5557_v19  ;;  %6299 = vrot.lane.b32.xlu2 %v6266_v58, %s10815_s9  ;;  %v10306_v23 = vor.u32 %v10685_v44, %v10305_v24  ;;  %v5633_v19 = vmul.f32 %v13828_v60, %v12973_v55 }
 0xd8f   : > { %6295 = vrot.lane.b32.xlu1 %v6264_v32, %s10815_s9  ;;  %v5630_v10 = vmul.f32 %v13730_v45, %v12967_v62  ;;  %v5631_v24 = vmul.f32 %v13835_v29, %v12969_v4  ;;  %v6267_v32 = vpack.c.bf16 %v6255_v1, %v6254_v48  ;;  %v5635_v1 = vmul.f32 %v13730_v45, %v12955_v39 }
 0xd90   : > { %v6140_v15 = vpop.permute.xlu0 %6139  ;;  %8084 = vmatpush.bf16.msra.mxu2 %v10306_v23  ;;  %v13850_v58 = vpop.permute.xlu2 %5516  ;;  %v5647_v23 = vpack.c.bf16 %v5633_v19, %v5632_v57  ;;  %v5636_v48 = vmul.f32 %v13835_v29, %v12957_v36  ;;  %v6160_v19 = vrot.slane %v13753_v59, 4  ;;  %v5637_v57 = vmul.f32 %v13845_v52, %v12959_v33 }
 0xd91   : > { %v6157_v34 = vrot.slane %v6140_v15, 4  ;;  %v13852_v16 = vpop.permute.xlu1 %6141  ;;  %v5646_v62 = vpack.c.bf16 %v5631_v24, %v5630_v10  ;;  %v15563_v24 = vrot.slane %v13769_v49, 4  ;;  %v6240_v33 = vmul.f32 %v13788_v54, %v13059_v37 }
 0xd92   : > { %v15571_v21 = vrot.slane %v13852_v16, 4 }
 0xd94   : > { %v10049_v44 = vld [vmem:[#allocation2 + $0x1e0] sm:$0xf]  ;;  %v6171_v55 = vsel %vm479_vm3, %v6157_v34, %v15571_v21  ;;  %v5638_v34 = vmul.f32 %v13828_v60, %v12961_v3 }
 0xd95   : > { %v6172_v8 = vsel %vm390_vm0, %v6140_v15, %v6171_v55  ;;  %v10621_v42 = vld [vmem:[#allocation2 + $0x1ec] sm:$0xf0]  ;;  %v6238_v15 = vmul.f32 %v13778_v40, %v13049_v9 }
 0xd96   : > { %6301 = vrot.lane.b32.xlu0 %v6267_v32, %s10815_s9  ;;  %6191 = vst [vmem:[#allocation2 + $0x2e0] sm:$0xff] %v6172_v8  ;;  %5678 = vrot.lane.b32.xlu2 %v5647_v23, %s10819_s13  ;;  %v10050_v4 = vor.u32 %v10621_v42, %v10049_v44  ;;  %v5649_v44 = vpack.c.bf16 %v5636_v48, %v5635_v1 }
 0xd97   : > { %5676 = vrot.lane.b32.xlu1 %v5646_v62, %s10819_s13  ;;  %v6257_v3 = vpack.c.bf16 %v6238_v15, %v13797_v26  ;;  %v5650_v62 = vpack.c.bf16 %v5638_v34, %v5637_v57  ;;  %v6245_v1 = vmul.f32 %v13788_v54, %v13008_v18  ;;  %v6244_v48 = vmul.f32 %v13793_v31, %v13001_v0 }
 0xd98   : > { %v13868_v5 = vpop.permute.xlu0 %6147  ;;  %8026 = vmatpush.bf16.msra.mxu0 %v10050_v4  ;;  %v13877_v8 = vpop.permute.xlu2 %6133  ;;  %v6243_v34 = vmul.f32 %v13778_v40, %v12998_v11  ;;  %v9726_v40 = vld [vmem:[%s15531_s1 + $0x61] ss:$8 sm:$0xf] }
 0xd99   : > { %v15570_v42 = vrot.slane %v13868_v5, 4  ;;  %v6622_v10 = vpop.permute.xlu1 %6621 }
 0xd9a   : > { %v6645_v39 = vrot.slane %v6622_v10, 4 }
 0xd9b   : > { %v6175_v36 = vsel %vm479_vm3, %v6160_v19, %v15570_v42 }
 0xd9c   : > { %v6176_v32 = vsel %vm390_vm0, %v13753_v59, %v6175_v36  ;;  %v6657_v55 = vsel %vm479_vm3, %v6645_v39, %v15563_v24  ;;  %v6239_v59 = vmul.f32 %v13793_v31, %v13053_v41  ;;  %v10605_v24 = vld [vmem:[#allocation2 + $0x16c] sm:$0xf0] }
 0xd9d   : > { %6193 = vst [vmem:[#allocation2 + $0x2f0] sm:$0xff] %v6176_v32  ;;  %v6658_v23 = vsel %vm15703_vm4, %v6622_v10, %v6657_v55  ;;  %v10177_v57 = vld [vmem:[#allocation2 + $0x2e0] sm:$0xf]  ;;  %vm15722_vm4 = vmmov %vm15702_vm2 }
 0xd9e   : > { %5682 = vrot.lane.b32.xlu0 %v5649_v44, %s10819_s13  ;;  %6681 = vst [vmem:[#allocation2 + $0x3c0] sm:$0xff] %v6658_v23  ;;  %6281 = vrot.lane.b32.xlu2 %v6257_v3, %s10815_s9  ;;  %v6258_v36 = vpack.c.bf16 %v6240_v33, %v6239_v59  ;;  %v6261_v44 = vpack.c.bf16 %v6245_v1, %v6244_v48  ;;  %v15573_v1 = vrot.slane %v13850_v58, 4 }
 0xd9f   : > { %5684 = vrot.lane.b32.xlu1 %v5650_v62, %s10819_s13  ;;  %v6260_v3 = vpack.c.bf16 %v6243_v34, %v13797_v26  ;;  %v5532_v62 = vrot.slane %v13807_v63, 4  ;;  %v6865_v26 = vperm.slane %v9726_v40, 0  ;;  %v6867_v34 = vperm.slane %v9726_v40, 2 }
 0xda0   : > { %v6628_v4 = vpop.permute.xlu0 %6627  ;;  %v13906_v15 = vpop.permute.xlu2 %6481 }
 0xda1   : > { %v6648_v19 = vrot.slane %v6628_v4, 4  ;;  %v13910_v10 = vpop.permute.xlu1 %6629 }
 0xda2   : > { %v15568_v39 = vrot.slane %v13910_v10, 4 }
 0xda4   : > { %v10653_v32 = vld [vmem:[#allocation2 + $0x2ec] sm:$0xf0]  ;;  %v6661_v54 = vsel %vm479_vm3, %v6648_v19, %v15568_v39 }
 0xda5   : > { %v10178_v55 = vor.u32 %v10653_v32, %v10177_v57  ;;  %v6662_v31 = vsel %vm15704_vm14, %v6628_v4, %v6661_v54  ;;  %v6866_v57 = vperm.slane %v9726_v40, 1  ;;  %vm15723_vm14 = vmmov %vm15702_vm2 }
 0xda6   : > { %6283 = vrot.lane.b32.xlu0 %v6258_v36, %s10815_s9  ;;  %6683 = vst [vmem:[#allocation2 + $0x3d0] sm:$0xff] %v6662_v31  ;;  %6289 = vrot.lane.b32.xlu2 %v6261_v44, %s10815_s9  ;;  %v10289_v44 = vld [vmem:[#allocation2 + $0x3c0] sm:$0xf] }
 0xda7   : > { %8055 = vmatpush.bf16.msra.mxu1 %v10178_v55  ;;  %6287 = vrot.lane.b32.xlu1 %v6260_v3, %s10815_s9 }
 0xda8   : > { %v13924_v23 = vpop.permute.xlu0 %5510  ;;  %v13927_v33 = vpop.permute.xlu2 %5371 }
 0xda9   : > { %v15574_v59 = vrot.slane %v13924_v23, 4  ;;  %v5515_v4 = vpop.permute.xlu1 %5514 }
 0xdaa   : > { %v5535_v48 = vrot.slane %v5515_v4, 4 }
 0xdab   : > { %v5544_v19 = vsel %vm479_vm3, %v5532_v62, %v15574_v59 }
 0xdac   : > { %v5545_v36 = vsel %vm1176_vm6, %v13807_v63, %v5544_v19  ;;  %v5548_v32 = vsel %vm479_vm3, %v5535_v48, %v15573_v1  ;;  %v5623_v63 = vmul.f32 %v13828_v60, %v12907_v51  ;;  %v10665_v1 = vld [vmem:[#allocation2 + $0x34c] sm:$0xf0] }
 0xdad   : > { %5568 = vst [vmem:[#allocation2 + $0x1c0] sm:$0xff] %v5545_v36  ;;  %v5549_v54 = vsel %vm1176_vm6, %v5515_v4, %v5548_v32  ;;  %v10681_v55 = vld [vmem:[#allocation2 + $0x3cc] sm:$0xf0]  ;;  %v6868_v4 = vperm.slane %v9726_v40, 3  ;;  %v5622_v36 = vmul.f32 %v13845_v52, %v12897_v46 }
 0xdae   : > { %6869 = vrot.lane.b32.xlu0 %v6865_v26, %s10812_s20  ;;  %5570 = vst [vmem:[#allocation2 + $0x1d0] sm:$0xff] %v5549_v54  ;;  %6873 = vrot.lane.b32.xlu2 %v6867_v34, %s10812_s20  ;;  %v10290_v31 = vor.u32 %v10681_v55, %v10289_v44  ;;  %v5620_v26 = vmul.f32 %v13730_v45, %v12891_v28 }
 0xdaf   : > { %6871 = vrot.lane.b32.xlu1 %v6866_v57, %s10812_s20  ;;  %v5621_v34 = vmul.f32 %v13835_v29, %v12893_v38  ;;  %v5641_v54 = vpack.c.bf16 %v5623_v63, %v5622_v36  ;;  %v5625_v55 = vmul.f32 %v13730_v45, %v13029_v47  ;;  %v6154_v63 = vrot.slane %v13877_v8, 4 }
 0xdb0   : > { %v6128_v3 = vpop.permute.xlu0 %6127  ;;  %8085 = vmatpush.bf16.msra.mxu2 %v10290_v31  ;;  %v13945_v62 = vpop.permute.xlu2 %5987  ;;  %v5626_v31 = vmul.f32 %v13835_v29, %v13031_v61  ;;  %v15564_v47 = vrot.slane %v13906_v15, 4  ;;  %v5627_v36 = vmul.f32 %v13845_v52, %v13037_v7 }
 0xdb1   : > { %v6151_v48 = vrot.slane %v6128_v3, 4  ;;  %v13947_v19 = vpop.permute.xlu1 %6129  ;;  %v5640_v40 = vpack.c.bf16 %v5621_v34, %v5620_v26  ;;  %v5628_v26 = vmul.f32 %v13828_v60, %v13039_v50 }
 0xdb2   : > { %v15584_v57 = vrot.slane %v13947_v19, 4 }
 0xdb4   : > { %v10033_v32 = vld [vmem:[#allocation2 + $0x1c0] sm:$0xf]  ;;  %v6163_v51 = vsel %vm479_vm3, %v6151_v48, %v15584_v57 }
 0xdb5   : > { %v6164_v44 = vsel %vm390_vm0, %v6128_v3, %v6163_v51  ;;  %v10617_v28 = vld [vmem:[#allocation2 + $0x1cc] sm:$0xf0]  ;;  %v9725_v3 = vld [vmem:[%s15531_s1 + $0x46] ss:$8 sm:$0xf]  ;;  %v5643_v51 = vpack.c.bf16 %v5626_v31, %v5625_v55 }
 0xdb6   : > { %6875 = vrot.lane.b32.xlu0 %v6868_v4, %s10812_s20  ;;  %6187 = vst [vmem:[#allocation2 + $0x2c0] sm:$0xff] %v6164_v44  ;;  %5666 = vrot.lane.b32.xlu2 %v5641_v54, %s10819_s13  ;;  %v10034_v38 = vor.u32 %v10617_v28, %v10033_v32  ;;  %v6711_v29 = vperm.slane %v9725_v3, 0  ;;  %v5644_v54 = vpack.c.bf16 %v5628_v26, %v5627_v36  ;;  %v6713_v55 = vperm.slane %v9725_v3, 2 }
 0xdb7   : > { %5664 = vrot.lane.b32.xlu1 %v5640_v40, %s10819_s13  ;;  %v6712_v40 = vperm.slane %v9725_v3, 1 }
 0xdb8   : > { %v13963_v46 = vpop.permute.xlu0 %6135  ;;  %8027 = vmatpush.bf16.msra.mxu0 %v10034_v38  ;;  %v13973_v48 = vpop.permute.xlu2 %6467  ;;  %v6714_v38 = vperm.slane %v9725_v3, 3  ;;  %v5386_v3 = vrot.slane %v13927_v33, 4 }
 0xdb9   : > { %v15566_v4 = vrot.slane %v13963_v46, 4  ;;  %v6480_v34 = vpop.permute.xlu1 %6479 }
 0xdba   : > { %v6497_v45 = vrot.slane %v6480_v34, 4 }
 0xdbb   : > { %v6167_v61 = vsel %vm479_vm3, %v6154_v63, %v15566_v4 }
 0xdbc   : > { %v6168_v32 = vsel %vm390_vm0, %v13877_v8, %v6167_v61  ;;  %v6511_v50 = vsel %vm479_vm3, %v6497_v45, %v15564_v47 }
 0xdbd   : > { %6189 = vst [vmem:[#allocation2 + $0x2d0] sm:$0xff] %v6168_v32  ;;  %v6512_v60 = vsel %vm1176_vm6, %v6480_v34, %v6511_v50  ;;  %v10161_v31 = vld [vmem:[#allocation2 + $0x2c0] sm:$0xf]  ;;  %v15565_v32 = vrot.slane %v13945_v62, 4 }
 0xdbe   : > { %5670 = vrot.lane.b32.xlu0 %v5643_v51, %s10819_s13  ;;  %6531 = vst [vmem:[#allocation2 + $0x3a0] sm:$0xff] %v6512_v60  ;;  %6715 = vrot.lane.b32.xlu2 %v6711_v29, %s10811_s15 }
 0xdbf   : > { %5672 = vrot.lane.b32.xlu1 %v5644_v54, %s10819_s13 }
 0xdc0   : > { %v6486_v7 = vpop.permute.xlu0 %6485  ;;  %v13995_v8 = vpop.permute.xlu2 %6475 }
 0xdc1   : > { %v6500_v52 = vrot.slane %v6486_v7, 4  ;;  %v13993_v44 = vpop.permute.xlu1 %6487  ;;  %15706 = vst [vmem:[#allocation9_spill] sm:$0xff] %v13995_v8 }
 0xdc2   : > { %15705 = vst [vmem:[#allocation4_spill] sm:$0xff] %v13993_v44  ;;  %v15562_v28 = vrot.slane %v13993_v44, 4 }
 0xdc4   : > { %v10649_v63 = vld [vmem:[#allocation2 + $0x2cc] sm:$0xf0]  ;;  %v6515_v26 = vsel %vm479_vm3, %v6500_v52, %v15562_v28 }
 0xdc5   : > { %v10162_v34 = vor.u32 %v10649_v63, %v10161_v31  ;;  %v6516_v45 = vsel %vm1176_vm6, %v6486_v7, %v6515_v26 }
 0xdc6   : > { %6717 = vrot.lane.b32.xlu0 %v6712_v40, %s10811_s15  ;;  %6533 = vst [vmem:[#allocation2 + $0x3b0] sm:$0xff] %v6516_v45  ;;  %6721 = vrot.lane.b32.xlu2 %v6714_v38, %s10811_s15  ;;  %v10273_v40 = vld [vmem:[#allocation2 + $0x3a0] sm:$0xf] }
 0xdc7   : > { %8056 = vmatpush.bf16.msra.mxu1 %v10162_v34  ;;  %6719 = vrot.lane.b32.xlu1 %v6713_v55, %s10811_s15  ;;  %v10017_v45 = vld [vmem:[#allocation2 + $0x1a0] sm:$0xf] }
 0xdc8   : > { %v14005_v61 = vpop.permute.xlu0 %5373  ;;  %v14013_v60 = vpop.permute.xlu2 %5979 }
 0xdc9   : > { %v15585_v29 = vrot.slane %v14005_v61, 4  ;;  %v5986_v36 = vpop.permute.xlu1 %5985 }
 0xdca   : > { %v6003_v51 = vrot.slane %v5986_v36, 4 }
 0xdcb   : > { %v5402_v50 = vsel %vm479_vm3, %v5386_v3, %v15585_v29 }
 0xdcc   : > { %v5403_v54 = vsel %vm4803_vm12, %v13927_v33, %v5402_v50  ;;  %v6017_v7 = vsel %vm479_vm3, %v6003_v51, %v15565_v32  ;;  %v10601_v32 = vld [vmem:[#allocation2 + $0x14c] sm:$0xf0] }
 0xdcd   : > { %5420 = vst [vmem:[#allocation2 + $0x1b0] sm:$0xff] %v5403_v54  ;;  %v6018_v52 = vsel %vm15707_vm8, %v5986_v36, %v6017_v7  ;;  %v10677_v38 = vld [vmem:[#allocation2 + $0x3ac] sm:$0xf0]  ;;  %vm15724_vm8 = vmmov %vm15702_vm2 }
 0xdce   : > { %6037 = vst [vmem:[#allocation2 + $0x2a0] sm:$0xff] %v6018_v52  ;;  %v10274_v55 = vor.u32 %v10677_v38, %v10273_v40  ;;  %v10609_v54 = vld [vmem:[#allocation2 + $0x18c] sm:$0xf0]  ;;  %v10001_v52 = vld [vmem:[#allocation2 + $0x180] sm:$0xf]  ;;  %v6491_v40 = vrot.slane %v13973_v48, 4 }
 0xdd0   : > { %v5992_v31 = vpop.permute.xlu0 %5991  ;;  %8086 = vmatpush.bf16.msra.mxu2 %v10274_v55  ;;  %v14027_v50 = vpop.permute.xlu2 %5833  ;;  %v10002_v55 = vor.u32 %v10609_v54, %v10001_v52 }
 0xdd1   : > { %v6006_v63 = vrot.slane %v5992_v31, 4  ;;  %v14021_v26 = vpop.permute.xlu1 %5993  ;;  %15708 = vst [vmem:[#allocation8_spill] sm:$0xff] %v14027_v50 }
 0xdd2   : > { %v15580_v34 = vrot.slane %v14021_v26, 4 }
 0xdd4   : > { %v10613_v33 = vld [vmem:[#allocation2 + $0x1ac] sm:$0xf0]  ;;  %v6021_v3 = vsel %vm479_vm3, %v6006_v63, %v15580_v34  ;;  %v15569_v63 = vrot.slane %v13995_v8, 4 }
 0xdd5   : > { %v10018_v51 = vor.u32 %v10613_v33, %v10017_v45  ;;  %v6022_v36 = vsel %vm15709_vm9, %v5992_v31, %v6021_v3  ;;  %v9985_v3 = vld [vmem:[#allocation2 + $0x160] sm:$0xf]  ;;  %vm15725_vm9 = vmmov %vm15694_vm1 }
 0xdd6   : > { %6039 = vst [vmem:[#allocation2 + $0x2b0] sm:$0xff] %v6022_v36  ;;  %v9986_v36 = vor.u32 %v10605_v24, %v9985_v3  ;;  %v10145_v52 = vld [vmem:[#allocation2 + $0x2a0] sm:$0xf] }
 0xdd7   : > { %8028 = vmatpush.bf16.msra.mxu0 %v10018_v51 }
 0xdd8   : > { %v14030_v7 = vpop.permute.xlu0 %6469 }
 0xdd9   : > { %15710 = vst [vmem:[#allocation15_spill] sm:$0xff] %v14030_v7  ;;  %v15567_v38 = vrot.slane %v14030_v7, 4  ;;  %v6474_v28 = vpop.permute.xlu1 %6473 }
 0xdda   : > { %v6494_v45 = vrot.slane %v6474_v28, 4 }
 0xddb   : > { %v6503_v31 = vsel %vm479_vm3, %v6491_v40, %v15567_v38  ;;  %8029 = vmatpush.bf16.msra.mxu0 %v10002_v55  ;;  %v14044_v40 = vpop.permute.xlu2 %5819  ;;  %v9969_v38 = vld [vmem:[#allocation2 + $0x140] sm:$0xf] }
 0xddc   : > { %v6504_v33 = vsel %vm1176_vm6, %v13973_v48, %v6503_v31  ;;  %v6507_v51 = vsel %vm479_vm3, %v6494_v45, %v15569_v63  ;;  %v9970_v31 = vor.u32 %v10601_v32, %v9969_v38  ;;  %v9953_v45 = vld [vmem:[#allocation2 + $0x120] sm:$0xf]  ;;  %v9923_v32 = vld [vmem:[#allocation2 + $0xf0] sm:$0xf0]  ;;  %v10669_v63 = vld [vmem:[#allocation2 + $0x36c] sm:$0xf0] }
 0xddd   : > { %6527 = vst [vmem:[#allocation2 + $0x380] sm:$0xff] %v6504_v33  ;;  %v6508_v54 = vsel %vm1176_vm6, %v6474_v28, %v6507_v51  ;;  %v10645_v47 = vld [vmem:[#allocation2 + $0x2ac] sm:$0xf0]  ;;  %v10147_v44 = vld [vmem:[#allocation2 + $0x2b0] sm:$0xf0] }
 0xdde   : > { %6529 = vst [vmem:[#allocation2 + $0x390] sm:$0xff] %v6508_v54  ;;  %v10146_v4 = vor.u32 %v10645_v47, %v10145_v52  ;;  %v10597_v28 = vld [vmem:[#allocation2 + $0x12c] sm:$0xf0]  ;;  %v9937_v52 = vld [vmem:[#allocation2 + $0x100] sm:$0xf] }
 0xddf   : > { %8030 = vmatpush.bf16.msra.mxu0 %v9986_v36  ;;  %v9954_v47 = vor.u32 %v10597_v28, %v9953_v45  ;;  %v10593_v54 = vld [vmem:[#allocation2 + $0x10c] sm:$0xf0]  ;;  %v10241_v28 = vld [vmem:[#allocation2 + $0x360] sm:$0xf] }
 0xde0   : > { %v5974_v55 = vpop.permute.xlu0 %5973  ;;  %8057 = vmatpush.bf16.msra.mxu1 %v10146_v4  ;;  %v9938_v21 = vor.u32 %v10593_v54, %v9937_v52  ;;  %v10225_v54 = vld [vmem:[#allocation2 + $0x340] sm:$0xf] }
 0xde1   : > { %v5997_v48 = vrot.slane %v5974_v55, 4  ;;  %v14046_v39 = vpop.permute.xlu1 %5975 }
 0xde2   : > { %v15572_v24 = vrot.slane %v14046_v39, 4 }
 0xde3   : > { %8031 = vmatpush.bf16.msra.mxu0 %v9970_v31  ;;  %v6000_v31 = vrot.slane %v14013_v60, 4  ;;  %v14057_v45 = vpop.permute.xlu2 %5827 }
 0xde4   : > { %v10257_v33 = vld [vmem:[#allocation2 + $0x380] sm:$0xf]  ;;  %v6009_v3 = vsel %vm479_vm3, %v5997_v48, %v15572_v24  ;;  %v10587_v48 = vld [vmem:[#allocation2 + $0xe4] sm:$0xf]  ;;  %v9907_v24 = vld [vmem:[#allocation2 + $0xd0] sm:$0xf0] }
 0xde5   : > { %v6010_v51 = vsel %vm15711_vm15, %v5974_v55, %v6009_v3  ;;  %v10673_v36 = vld [vmem:[#allocation2 + $0x38c] sm:$0xf0]  ;;  %v9926_v3 = vor.u32 %v10587_v48, %v9923_v32  ;;  %v10583_v32 = vld [vmem:[#allocation2 + $0xc4] sm:$0xf]  ;;  %vm15726_vm15 = vmmov %vm15694_vm1 }
 0xde6   : > { %6033 = vst [vmem:[#allocation2 + $0x280] sm:$0xff] %v6010_v51  ;;  %v10258_v4 = vor.u32 %v10673_v36, %v10257_v33  ;;  %v10242_v36 = vor.u32 %v10669_v63, %v10241_v28  ;;  %v9910_v59 = vor.u32 %v10583_v32, %v9907_v24  ;;  %v9891_v63 = vld [vmem:[#allocation2 + $0xb0] sm:$0xf0]  ;;  %v10579_v28 = vld [vmem:[#allocation2 + $0xa4] sm:$0xf] }
 0xde7   : > { %8032 = vmatpush.bf16.msra.mxu0 %v9954_v47  ;;  %v15575_v47 = vrot.slane %v14027_v50, 4  ;;  %v10575_v24 = vld [vmem:[#allocation2 + $0x84] sm:$0xf] }
 0xde8   : > { %v14053_v38 = vpop.permute.xlu0 %5981  ;;  %8087 = vmatpush.bf16.msra.mxu2 %v10258_v4  ;;  %v10643_v50 = vld [vmem:[#allocation2 + $0x2a4] sm:$0xf] }
 0xde9   : > { %v15576_v42 = vrot.slane %v14053_v38, 4  ;;  %v5832_v55 = vpop.permute.xlu1 %5831 }
 0xdea   : > { %v5849_v33 = vrot.slane %v5832_v55, 4 }
 0xdeb   : > { %v6013_v51 = vsel %vm479_vm3, %v6000_v31, %v15576_v42  ;;  %8033 = vmatpush.bf16.msra.mxu0 %v9938_v21  ;;  %v10226_v21 = vor.u32 %v10665_v1, %v10225_v54 }
 0xdec   : > { %v6014_v4 = vsel %vm15694_vm1, %v14013_v60, %v6013_v51  ;;  %v5863_v52 = vsel %vm479_vm3, %v5849_v33, %v15575_v47  ;;  %8088 = vmatpush.bf16.msra.mxu2 %v10242_v36  ;;  %v9894_v51 = vor.u32 %v10579_v28, %v9891_v63  ;;  %v14072_v36 = vpop.permute.xlu2 %6299  ;;  %v5843_v63 = vrot.slane %v14044_v40, 4 }
 0xded   : > { %6035 = vst [vmem:[#allocation2 + $0x290] sm:$0xff] %v6014_v4  ;;  %v5864_v48 = vsel %vm15712_vm5, %v5832_v55, %v5863_v52  ;;  %v9875_v4 = vld [vmem:[#allocation2 + $0x90] sm:$0xf0]  ;;  %v10129_v55 = vld [vmem:[#allocation2 + $0x280] sm:$0xf]  ;;  %vm15734_vm5 = vmmov %vm15694_vm1 }
 0xdee   : > { %5883 = vst [vmem:[#allocation2 + $0x260] sm:$0xff] %v5864_v48  ;;  %v9878_v32 = vor.u32 %v10575_v24, %v9875_v4  ;;  %v9859_v48 = vld [vmem:[#allocation2 + $0x70] sm:$0xf0] }
 0xdef   : > { %8142 = vmatpush.bf16.msrb.mxu0 %v9926_v3  ;;  %v9843_v4 = vld [vmem:[#allocation2 + $0x50] sm:$0xf0] }
 0xdf0   : > { %v5838_v31 = vpop.permute.xlu0 %5837  ;;  %8089 = vmatpush.bf16.msra.mxu2 %v10226_v21 }
 0xdf1   : > { %v5852_v60 = vrot.slane %v5838_v31, 4  ;;  %v14069_v3 = vpop.permute.xlu1 %5839 }
 0xdf2   : > { %15713 = vst [vmem:[#allocation5_spill] sm:$0xff] %v14069_v3  ;;  %v15578_v33 = vrot.slane %v14069_v3, 4 }
 0xdf3   : > { %8143 = vmatpush.bf16.msrb.mxu0 %v9910_v59 }
 0xdf4   : > { %v10641_v52 = vld [vmem:[#allocation2 + $0x28c] sm:$0xf0]  ;;  %v5867_v1 = vsel %vm479_vm3, %v5852_v60, %v15578_v33  ;;  %v15579_v60 = vrot.slane %v14057_v45, 4  ;;  %v14091_v24 = vpop.permute.xlu2 %5678 }
 0xdf5   : > { %v10130_v59 = vor.u32 %v10641_v52, %v10129_v55  ;;  %v5868_v54 = vsel %vm15714_vm10, %v5838_v31, %v5867_v1  ;;  %vm15735_vm10 = vmmov %vm15694_vm1 }
 0xdf6   : > { %5885 = vst [vmem:[#allocation2 + $0x270] sm:$0xff] %v5868_v54 }
 0xdf7   : > { %8144 = vmatpush.bf16.msrb.mxu0 %v9894_v51  ;;  %8058 = vmatpush.bf16.msra.mxu1 %v10130_v59  ;;  %v10571_v51 = vld [vmem:[#allocation2 + $0x64] sm:$0xf] }
 0xdf8   : > { %v14078_v21 = vpop.permute.xlu0 %5821  ;;  %v9862_v42 = vor.u32 %v10571_v51, %v9859_v48  ;;  %v10567_v59 = vld [vmem:[#allocation2 + $0x44] sm:$0xf] }
 0xdf9   : > { %15715 = vst [vmem:[#allocation17_spill] sm:$0xff] %v14078_v21  ;;  %v15577_v28 = vrot.slane %v14078_v21, 4  ;;  %v5826_v47 = vpop.permute.xlu1 %5825  ;;  %v9846_v51 = vor.u32 %v10567_v59, %v9843_v4  ;;  %v10559_v4 = vld [vmem:[#allocation2 + $0x4] sm:$0xf] }
 0xdfa   : > { %v5846_v55 = vrot.slane %v5826_v47, 4 }
 0xdfb   : > { %8145 = vmatpush.bf16.msrb.mxu0 %v9878_v32  ;;  %v5855_v31 = vsel %vm479_vm3, %v5843_v63, %v15577_v28  ;;  %v10113_v32 = vld [vmem:[#allocation2 + $0x260] sm:$0xf]  ;;  %v9827_v28 = vld [vmem:[#allocation2 + $0x30] sm:$0xf0] }
 0xdfc   : > { %v5856_v52 = vsel %vm15716_vm13, %v14044_v40, %v5855_v31  ;;  %v5859_v1 = vsel %vm479_vm3, %v5846_v55, %v15579_v60  ;;  %v10563_v40 = vld [vmem:[#allocation2 + $0x24] sm:$0xf]  ;;  %v9811_v60 = vld [vmem:[#allocation2 + $0x10] sm:$0xf0]  ;;  %vm15739_vm13 = vmmov %vm15694_vm1 }
 0xdfd   : > { %5879 = vst [vmem:[#allocation2 + $0x240] sm:$0xff] %v5856_v52  ;;  %v5860_v54 = vsel %vm15702_vm2, %v5826_v47, %v5859_v1  ;;  %v10637_v48 = vld [vmem:[#allocation2 + $0x26c] sm:$0xf0]  ;;  %v9830_v55 = vor.u32 %v10563_v40, %v9827_v28  ;;  %v6314_v28 = vrot.slane %v14072_v36, 4  ;;  %vm15742_vm2 = vmmov %vm15694_vm1 }
 0xdfe   : > { %5881 = vst [vmem:[#allocation2 + $0x250] sm:$0xff] %v5860_v54  ;;  %v10114_v63 = vor.u32 %v10637_v48, %v10113_v32  ;;  %v9814_v54 = vor.u32 %v10559_v4, %v9811_v60  ;;  %v6282_v48 = vpop.permute.xlu2 %6281 }
 0xdff   : > { %8146 = vmatpush.bf16.msrb.mxu0 %v9862_v42 }
 0xe00   : > { %v6294_v33 = vpop.permute.xlu0 %6293  ;;  %8059 = vmatpush.bf16.msra.mxu1 %v10114_v63 }
 0xe01   : > { %v6311_v42 = vrot.slane %v6294_v33, 4  ;;  %v14094_v31 = vpop.permute.xlu1 %6295 }
 0xe02   : > { %15717 = vst [vmem:[#allocation18_spill] sm:$0xff] %v14094_v31  ;;  %v15581_v52 = vrot.slane %v14094_v31, 4 }
 0xe03   : > { %8147 = vmatpush.bf16.msrb.mxu0 %v9846_v51 }
 0xe04   : > { %v10097_v34 = vld [vmem:[#allocation2 + $0x240] sm:$0xf]  ;;  %v6325_v47 = vsel %vm479_vm3, %v6311_v42, %v15581_v52 }
 0xe05   : > { %v6326_v1 = vsel %vm1266_vm7, %v6294_v33, %v6325_v47  ;;  %v10633_v59 = vld [vmem:[#allocation2 + $0x24c] sm:$0xf0] }
 0xe06   : > { %6345 = vst [vmem:[#allocation2 + $0x320] sm:$0xff] %v6326_v1  ;;  %v10098_v32 = vor.u32 %v10633_v59, %v10097_v34  ;;  %v14115_v59 = vpop.permute.xlu2 %6289 }
 0xe07   : > { %8148 = vmatpush.bf16.msrb.mxu0 %v9830_v55  ;;  %v15583_v55 = vrot.slane %v14091_v24, 4  ;;  %15719 = vst [vmem:[#allocation20_spill] sm:$0xff] %v14115_v59 }
 0xe08   : > { %v14101_v51 = vpop.permute.xlu0 %6301  ;;  %8060 = vmatpush.bf16.msra.mxu1 %v10098_v32 }
 0xe09   : > { %15718 = vst [vmem:[#allocation19_spill] sm:$0xff] %v14101_v51  ;;  %v15582_v63 = vrot.slane %v14101_v51, 4  ;;  %v5677_v40 = vpop.permute.xlu1 %5676 }
 0xe0a   : > { %v5694_v42 = vrot.slane %v5677_v40, 4 }
 0xe0b   : > { %8149 = vmatpush.bf16.msrb.mxu0 %v9814_v54  ;;  %v6329_v33 = vsel %vm479_vm3, %v6314_v28, %v15582_v63  ;;  %v15590_v63 = vrot.slane %v14115_v59, 4 }
 0xe0c   : > { %v6330_v34 = vsel %vm1266_vm7, %v14072_v36, %v6329_v33  ;;  %v5709_v60 = vsel %vm479_vm3, %v5694_v42, %v15583_v55 }
 0xe0d   : > { %6347 = vst [vmem:[#allocation2 + $0x330] sm:$0xff] %v6330_v34  ;;  %v5710_v47 = vsel %vm4492_vm11, %v5677_v40, %v5709_v60  ;;  %v10209_v28 = vld [vmem:[#allocation2 + $0x320] sm:$0xf]  ;;  %v6305_v34 = vrot.slane %v6282_v48, 4 }
 0xe0e   : > { %5729 = vst [vmem:[#allocation2 + $0x220] sm:$0xff] %v5710_v47  ;;  %v6874_v29 = vpop.permute.xlu2 %6873 }
 0xe10   : > { %v5683_v4 = vpop.permute.xlu0 %5682 }
 0xe11   : > { %v5697_v1 = vrot.slane %v5683_v4, 4  ;;  %v14117_v54 = vpop.permute.xlu1 %5684 }
 0xe12   : > { %15720 = vst [vmem:[#allocation21_spill] sm:$0xff] %v14117_v54  ;;  %v15586_v32 = vrot.slane %v14117_v54, 4 }
 0xe14   : > { %v10661_v52 = vld [vmem:[#allocation2 + $0x32c] sm:$0xf0]  ;;  %v5713_v36 = vsel %vm479_vm3, %v5697_v1, %v15586_v32 }
 0xe15   : > { %v10210_v33 = vor.u32 %v10661_v52, %v10209_v28  ;;  %v5714_v42 = vsel %vm4492_vm11, %v5683_v4, %v5713_v36  ;;  %v10081_v28 = vld [vmem:[#allocation2 + $0x220] sm:$0xf] }
 0xe16   : > { %5731 = vst [vmem:[#allocation2 + $0x230] sm:$0xff] %v5714_v42 }
 0xe17   : > { %8090 = vmatpush.bf16.msra.mxu2 %v10210_v33 }
 0xe18   : > { %v14124_v40 = vpop.permute.xlu0 %6283 }
 0xe19   : > { %15721 = vst [vmem:[#allocation22_spill] sm:$0xff] %v14124_v40  ;;  %v15589_v60 = vrot.slane %v14124_v40, 4  ;;  %v6288_v47 = vpop.permute.xlu1 %6287 }
 0xe1a   : > { %v6308_v55 = vrot.slane %v6288_v47, 4 }
 0xe1b   : > { %v6317_v57 = vsel %vm479_vm3, %v6305_v34, %v15589_v60 }
 0xe1c   : > { %v6318_v52 = vsel %vm1266_vm7, %v6282_v48, %v6317_v57  ;;  %v6321_v4 = vsel %vm479_vm3, %v6308_v55, %v15590_v63  ;;  %v10651_v63 = vld [vmem:[#allocation2 + $0x2e4] sm:$0xf] }
 0xe1d   : > { %6341 = vst [vmem:[#allocation2 + $0x300] sm:$0xff] %v6318_v52  ;;  %v6322_v1 = vsel %vm1266_vm7, %v6288_v47, %v6321_v4  ;;  %v10629_v36 = vld [vmem:[#allocation2 + $0x22c] sm:$0xf0]  ;;  %v14141_v52 = vpop.permute.xlu2 %5666  ;;  %v10179_v4 = vld [vmem:[#allocation2 + $0x2f0] sm:$0xf0] }
 0xe1e   : > { %6343 = vst [vmem:[#allocation2 + $0x310] sm:$0xff] %v6322_v1  ;;  %v10082_v33 = vor.u32 %v10629_v36, %v10081_v28  ;;  %v10182_v40 = vor.u32 %v10651_v63, %v10179_v4  ;;  %v10647_v4 = vld [vmem:[#allocation2 + $0x2c4] sm:$0xf] }
 0xe20   : > { %v6870_v42 = vpop.permute.xlu0 %6869  ;;  %8061 = vmatpush.bf16.msra.mxu1 %v10082_v33 }
 0xe21   : > { %v6872_v32 = vpop.permute.xlu1 %6871  ;;  %v6895_v34 = vmul.f32 %v6870_v42, %v12981_v2  ;;  %v6900_v57 = vmul.f32 %v6870_v42, %v13069_v14 }
 0xe22   : > { %v6877_v31 = vsel %vm15722_vm4, %v6870_v42, %v6872_v32  ;;  %v14144_v1 = vsel %vm15723_vm14, %v6872_v32, %v6874_v29  ;;  %vm15746_vm4 = vmmov %vm15694_vm1 }
 0xe23   : > { %v6901_v60 = vmul.f32 %v6877_v31, %v13071_v20  ;;  %v6896_v55 = vmul.f32 %v6877_v31, %v12984_v6  ;;  %v6897_v51 = vmul.f32 %v14144_v1, %v12987_v27  ;;  %v6887_v63 = vmul.f32 %v14144_v1, %v13059_v37  ;;  %vm15747_vm14 = vmmov %vm15694_vm1 }
 0xe24   : > { %v10193_v48 = vld [vmem:[#allocation2 + $0x300] sm:$0xf] }
 0xe25   : > { %v10657_v47 = vld [vmem:[#allocation2 + $0x30c] sm:$0xf0]  ;;  %v6914_v28 = vpack.c.bf16 %v6901_v60, %v6900_v57  ;;  %v6911_v36 = vpack.c.bf16 %v6896_v55, %v6895_v34  ;;  %v15612_v55 = vrot.slane %v14141_v52, 4  ;;  %v14167_v3 = vpop.permute.xlu2 %6715 }
 0xe26   : > { %v10194_v33 = vor.u32 %v10657_v47, %v10193_v48  ;;  %v10163_v48 = vld [vmem:[#allocation2 + $0x2d0] sm:$0xf0] }
 0xe27   : > { %6947 = vrot.lane.b32.xlu2 %v6914_v28, %s10810_s12  ;;  %6941 = vrot.lane.b32.xlu0 %v6911_v36, %s10810_s12 }
 0xe28   : > { %v14146_v59 = vpop.permute.xlu0 %6875  ;;  %8091 = vmatpush.bf16.msra.mxu2 %v10194_v33  ;;  %v10166_v33 = vor.u32 %v10647_v4, %v10163_v48  ;;  %v10131_v48 = vld [vmem:[#allocation2 + $0x290] sm:$0xf0] }
 0xe29   : > { %v6879_v54 = vsel %vm15724_vm8, %v6874_v29, %v14146_v59  ;;  %v5665_v32 = vpop.permute.xlu1 %5664  ;;  %v6902_v29 = vmul.f32 %v14144_v1, %v13074_v12 }
 0xe2a   : > { %v6888_v60 = vmul.f32 %v6879_v54, %v13062_v35  ;;  %v6898_v34 = vmul.f32 %v6879_v54, %v12989_v13  ;;  %v6903_v57 = vmul.f32 %v6879_v54, %v13076_v22  ;;  %v5688_v47 = vrot.slane %v5665_v32, 4 }
 0xe2c   : > { %8200 = vmatpush.bf16.msrb.mxu2 %v10182_v40  ;;  %v6912_v28 = vpack.c.bf16 %v6898_v34, %v6897_v51  ;;  %v5700_v36 = vsel %vm479_vm3, %v5688_v47, %v15612_v55  ;;  %v6915_v8 = vpack.c.bf16 %v6903_v57, %v6902_v29  ;;  %v6906_v7 = vpack.c.bf16 %v6888_v60, %v6887_v63  ;;  %v10639_v47 = vld [vmem:[#allocation2 + $0x284] sm:$0xf] }
 0xe2d   : > { %v5702_v21 = vsel %vm4492_vm11, %v5665_v32, %v5700_v36  ;;  %v6885_v40 = vmul.f32 %v6870_v42, %v13049_v9  ;;  %v6886_v34 = vmul.f32 %v6877_v31, %v13053_v41  ;;  %v10150_v60 = vor.u32 %v10643_v50, %v10147_v44  ;;  %v10115_v50 = vld [vmem:[#allocation2 + $0x270] sm:$0xf0]  ;;  %v14184_v36 = vpop.permute.xlu2 %6721 }
 0xe2e   : > { %6943 = vrot.lane.b32.xlu1 %v6912_v28, %s10810_s12  ;;  %5725 = vst [vmem:[#allocation2 + $0x200] sm:$0xff] %v5702_v21  ;;  %v6890_v21 = vmul.f32 %v6870_v42, %v12998_v11  ;;  %v6891_v29 = vmul.f32 %v6877_v31, %v13001_v0  ;;  %v10134_v28 = vor.u32 %v10639_v47, %v10131_v48  ;;  %v10635_v31 = vld [vmem:[#allocation2 + $0x264] sm:$0xf] }
 0xe2f   : > { %6949 = vrot.lane.b32.xlu0 %v6915_v8, %s10810_s12  ;;  %6931 = vrot.lane.b32.xlu2 %v6906_v7, %s10810_s12  ;;  %v6905_v4 = vpack.c.bf16 %v6886_v34, %v6885_v40  ;;  %v6893_v42 = vmul.f32 %v6879_v54, %v13011_v30  ;;  %v10118_v40 = vor.u32 %v10635_v31, %v10115_v50  ;;  %v10631_v48 = vld [vmem:[#allocation2 + $0x244] sm:$0xf]  ;;  %v10051_v50 = vld [vmem:[#allocation2 + $0x1f0] sm:$0xf0] }
 0xe30   : > { %8201 = vmatpush.bf16.msrb.mxu2 %v10166_v33  ;;  %v5671_v51 = vpop.permute.xlu0 %5670  ;;  %v6908_v7 = vpack.c.bf16 %v6891_v29, %v6890_v21  ;;  %v10099_v21 = vld [vmem:[#allocation2 + $0x250] sm:$0xf0]  ;;  %v6741_v47 = vmul.f32 %v14167_v3, %v12981_v2 }
 0xe31   : > { %v5691_v57 = vrot.slane %v5671_v51, 4  ;;  %v14173_v32 = vpop.permute.xlu1 %5672 }
 0xe32   : > { %v15611_v63 = vrot.slane %v14173_v32, 4 }
 0xe34   : > { %8202 = vmatpush.bf16.msrb.mxu2 %v10150_v60  ;;  %v5705_v8 = vsel %vm479_vm3, %v5691_v57, %v15611_v63 }
 0xe35   : > { %v5706_v44 = vsel %vm4492_vm11, %v5671_v51, %v5705_v8  ;;  %v6892_v51 = vmul.f32 %v14144_v1, %v13008_v18  ;;  %v10102_v1 = vor.u32 %v10631_v48, %v10099_v21  ;;  %v10065_v31 = vld [vmem:[#allocation2 + $0x200] sm:$0xf]  ;;  %v10615_v21 = vld [vmem:[#allocation2 + $0x1c4] sm:$0xf] }
 0xe36   : > { %6929 = vrot.lane.b32.xlu1 %v6905_v4, %s10810_s12  ;;  %5727 = vst [vmem:[#allocation2 + $0x210] sm:$0xff] %v5706_v44  ;;  %v10619_v44 = vld [vmem:[#allocation2 + $0x1e4] sm:$0xf] }
 0xe37   : > { %6935 = vrot.lane.b32.xlu0 %v6908_v7, %s10810_s12  ;;  %v6909_v8 = vpack.c.bf16 %v6893_v42, %v6892_v51  ;;  %v10054_v51 = vor.u32 %v10619_v44, %v10051_v50  ;;  %v10623_v44 = vld [vmem:[#allocation2 + $0x204] sm:$0xf] }
 0xe38   : > { %8203 = vmatpush.bf16.msrb.mxu2 %v10134_v28  ;;  %v6718_v33 = vpop.permute.xlu0 %6717 }
 0xe39   : > { %v6723_v34 = vsel %vm15725_vm9, %v14167_v3, %v6718_v33  ;;  %v6720_v60 = vpop.permute.xlu1 %6719  ;;  %vm15753_vm9 = vmmov %vm15694_vm1 }
 0xe3a   : > { %v6742_v57 = vmul.f32 %v6723_v34, %v12984_v6  ;;  %v6725_v54 = vsel %vm15726_vm15, %v6720_v60, %v14184_v36  ;;  %v6724_v29 = vsel %vm15694_vm1, %v6718_v33, %v6720_v60  ;;  %v10083_v6 = vld [vmem:[#allocation2 + $0x230] sm:$0xf0]  ;;  %v9737_v33 = vld [vmem:[%s15533_s3 + $0x8] sm:$0xf]  ;;  %v6747_v42 = vmul.f32 %v6723_v34, %v13071_v20  ;;  %v10627_v60 = vld [vmem:[#allocation2 + $0x224] sm:$0xf] }
 0xe3b   : > { %v6744_v4 = vmul.f32 %v6725_v54, %v12989_v13  ;;  %v6743_v28 = vmul.f32 %v6724_v29, %v12987_v27  ;;  %v10542_v27 = vld [vmem:[%s15533_s3 + $0x18] sm:$0xf0]  ;;  %v10086_v48 = vor.u32 %v10627_v60, %v10083_v6  ;;  %v6731_v6 = vmul.f32 %v14167_v3, %v13049_v9  ;;  %v10607_v60 = vld [vmem:[#allocation2 + $0x184] sm:$0xf]  ;;  %vm15755_vm15 = vmmov %vm15694_vm1 }
 0xe3c   : > { %8204 = vmatpush.bf16.msrb.mxu2 %v10118_v40  ;;  %v6757_v7 = vpack.c.bf16 %v6742_v57, %v6741_v47  ;;  %v14208_v57 = vor.u32 %v10542_v27, %v9737_v33  ;;  %v10035_v47 = vld [vmem:[#allocation2 + $0x1d0] sm:$0xf0]  ;;  %v10611_v33 = vld [vmem:[#allocation2 + $0x1a4] sm:$0xf]  ;;  %v6737_v9 = vmul.f32 %v6723_v34, %v13001_v0  ;;  %v5468_v0 = vmul.f32 0.0, %v13524_v25 }
 0xe3d   : > { %v10625_v63 = vld [vmem:[#allocation2 + $0x20c] sm:$0xf0]  ;;  %v6758_v2 = vpack.c.bf16 %v6744_v4, %v6743_v28  ;;  %v6749_v4 = vmul.f32 %v6725_v54, %v13076_v22  ;;  %v10067_v20 = vld [vmem:[#allocation2 + $0x210] sm:$0xf0]  ;;  %v6732_v28 = vmul.f32 %v6723_v34, %v13053_v41  ;;  %v6734_v41 = vmul.f32 %v6725_v54, %v13062_v35 }
 0xe3e   : > { %6937 = vrot.lane.b32.xlu1 %v6909_v8, %s10810_s12  ;;  %v10066_v40 = vor.u32 %v10625_v63, %v10065_v31  ;;  %6787 = vrot.lane.b32.xlu2 %v6757_v7, %s10811_s15  ;;  %v6746_v63 = vmul.f32 %v14167_v3, %v13069_v14  ;;  %v6748_v8 = vmul.f32 %v6724_v29, %v13074_v12  ;;  %v10019_v31 = vld [vmem:[#allocation2 + $0x1b0] sm:$0xf0] }
 0xe3f   : > { %6789 = vrot.lane.b32.xlu0 %v6758_v2, %s10811_s15  ;;  %v10070_v7 = vor.u32 %v10623_v44, %v10067_v20  ;;  %v6751_v12 = vpack.c.bf16 %v6732_v28, %v6731_v6  ;;  %v6733_v2 = vmul.f32 %v6724_v29, %v13059_v37  ;;  %v10003_v27 = vld [vmem:[#allocation2 + $0x190] sm:$0xf0]  ;;  %v10591_v44 = vld [vmem:[#allocation2 + $0x104] sm:$0xf] }
 0xe40   : > { %8205 = vmatpush.bf16.msrb.mxu2 %v10102_v1  ;;  %8062 = vmatpush.bf16.msra.mxu1 %v10066_v40  ;;  %v10038_v1 = vor.u32 %v10615_v21, %v10035_v47  ;;  %v6760_v50 = vpack.c.bf16 %v6747_v42, %v6746_v63  ;;  %v6761_v14 = vpack.c.bf16 %v6749_v4, %v6748_v8  ;;  %v9987_v37 = vld [vmem:[#allocation2 + $0x170] sm:$0xf0]  ;;  %v10603_v8 = vld [vmem:[#allocation2 + $0x164] sm:$0xf] }
 0xe41   : > { %v10022_v40 = vor.u32 %v10611_v33, %v10019_v31  ;;  %v6739_v42 = vmul.f32 %v6725_v54, %v13011_v30  ;;  %v10006_v21 = vor.u32 %v10607_v60, %v10003_v27  ;;  %v6752_v47 = vpack.c.bf16 %v6734_v41, %v6733_v2  ;;  %v10599_v54 = vld [vmem:[#allocation2 + $0x144] sm:$0xf]  ;;  %v9955_v20 = vld [vmem:[#allocation2 + $0x130] sm:$0xf0]  ;;  %v9929_v31 = vld [vmem:[#allocation2 + $0xe8] sm:$0xf] }
 0xe42   : > { %v9990_v34 = vor.u32 %v10603_v8, %v9987_v37  ;;  %v9939_v25 = vld [vmem:[#allocation2 + $0x110] sm:$0xf0]  ;;  %v9913_v2 = vld [vmem:[#allocation2 + $0xc8] sm:$0xf]  ;;  %v10578_v37 = vld [vmem:[#allocation2 + $0x94] sm:$0xf0] }
 0xe43   : > { %8063 = vmatmul.bf16.vlgmr.msra.gmra.mxu1 %v14208_v57  ;;  %v15728_v41 = vld [vmem:[#allocation10_spill] sm:$0xff]  ;;  %v9897_v60 = vld [vmem:[#allocation2 + $0xa8] sm:$0xf] }
 0xe44   : > { %8171 = vmatpush.bf16.msrb.mxu1 %v10054_v51  ;;  %8206 = vmatpush.bf16.msrb.mxu2 %v10086_v48  ;;  %v6738_v51 = vmul.f32 %v6724_v29, %v13008_v18  ;;  %v6736_v48 = vmul.f32 %v14167_v3, %v12998_v11  ;;  %v9971_v18 = vld [vmem:[#allocation2 + $0x150] sm:$0xf0]  ;;  %v5486_v11 = vpack.c.bf16 %v5468_v0, %v5468_v0  ;;  %v10595_v29 = vld [vmem:[#allocation2 + $0x124] sm:$0xf]  ;;  %v15729_v8 = vld [vmem:[#allocation13_spill] sm:$0xff] }
 0xe45   : > { %v9974_v3 = vor.u32 %v10599_v54, %v9971_v18  ;;  %v9958_v28 = vor.u32 %v10595_v29, %v9955_v20  ;;  %v5943_v0 = vmul.f32 %v15729_v8, %v12989_v13  ;;  %v10574_v18 = vld [vmem:[#allocation2 + $0x74] sm:$0xf0]  ;;  %v5948_v54 = vmul.f32 %v15729_v8, %v13076_v22  ;;  %v9865_v29 = vld [vmem:[#allocation2 + $0x68] sm:$0xf] }
 0xe46   : > { %6793 = vrot.lane.b32.xlu1 %v6760_v50, %s10811_s15  ;;  %6795 = vrot.lane.b32.xlu2 %v6761_v14, %s10811_s15  ;;  %v6754_v63 = vpack.c.bf16 %v6737_v9, %v6736_v48  ;;  %v6755_v4 = vpack.c.bf16 %v6739_v42, %v6738_v51  ;;  %v15727_v50 = vld [vmem:[#allocation11_spill] sm:$0xff] }
 0xe47   : > { %6775 = vrot.lane.b32.xlu0 %v6751_v12, %s10811_s15  ;;  %v6097_v6 = vmul.f32 %v15727_v50, %v12989_v13  ;;  %v10586_v12 = vld [vmem:[#allocation2 + $0xd4] sm:$0xf0]  ;;  %v6087_v42 = vmul.f32 %v15727_v50, %v13062_v35  ;;  %v6092_v51 = vmul.f32 %v15727_v50, %v13011_v30  ;;  %v5957_v20 = vpack.c.bf16 %v5943_v0, %v5943_v0 }
 0xe48   : > { %8172 = vmatpush.bf16.msrb.mxu1 %v10038_v1  ;;  %8207 = vmatpush.bf16.msrb.mxu2 %v10070_v7  ;;  %v10590_v1 = vld [vmem:[#allocation2 + $0xf4] sm:$0xf0]  ;;  %v9942_v7 = vor.u32 %v10591_v44, %v9939_v25  ;;  %v9914_v27 = vor.u32 %v10586_v12, %v9913_v2  ;;  %v5960_v25 = vpack.c.bf16 %v5948_v54, %v5948_v54  ;;  %v9833_v2 = vld [vmem:[#allocation2 + $0x28] sm:$0xf]  ;;  %v15732_v54 = vld [vmem:[#allocation16_spill] sm:$0xff] }
 0xe49   : > { %v9930_v14 = vor.u32 %v10590_v1, %v9929_v31  ;;  %v6111_v33 = vpack.c.bf16 %v6097_v6, %v6097_v6  ;;  %v10582_v9 = vld [vmem:[#allocation2 + $0xb4] sm:$0xf0]  ;;  %v10541_v31 = vld [vmem:[%s15533_s3 + $0x10] sm:$0xf0]  ;;  %v5933_v12 = vmul.f32 %v15729_v8, %v13062_v35 }
 0xe4a   : > { %v10570_v1 = vld [vmem:[#allocation2 + $0x54] sm:$0xf0] }
 0xe4c   : > { %8173 = vmatpush.bf16.msrb.mxu1 %v10022_v40  ;;  %v6102_v40 = vmul.f32 %v15727_v50, %v13076_v22  ;;  %v9849_v50 = vld [vmem:[#allocation2 + $0x48] sm:$0xf] }
 0xe4d   : > { %v9850_v6 = vor.u32 %v10570_v1, %v9849_v50  ;;  %v10546_v1 = vld [vmem:[%s15533_s3 + $0x38] sm:$0xf0]  ;;  %v10545_v50 = vld [vmem:[%s15533_s3 + $0x34] sm:$0xf] }
 0xe4e   : > { %6777 = vrot.lane.b32.xlu1 %v6752_v47, %s10811_s15  ;;  %6781 = vrot.lane.b32.xlu2 %v6754_v63, %s10811_s15  ;;  %v6114_v48 = vpack.c.bf16 %v6102_v40, %v6102_v40  ;;  %v6105_v47 = vpack.c.bf16 %v6087_v42, %v6087_v42  ;;  %v6108_v63 = vpack.c.bf16 %v6092_v51, %v6092_v51  ;;  %v9817_v51 = vld [vmem:[#allocation2 + $0x8] sm:$0xf] }
 0xe4f   : > { %6783 = vrot.lane.b32.xlu0 %v6755_v4, %s10811_s15  ;;  %v9881_v4 = vld [vmem:[#allocation2 + $0x88] sm:$0xf] }
 0xe50   : > { %8174 = vmatpush.bf16.msrb.mxu1 %v10006_v21  ;;  %v9898_v21 = vor.u32 %v10582_v9, %v9897_v60  ;;  %v10562_v9 = vld [vmem:[#allocation2 + $0x14] sm:$0xf0] }
 0xe51   : > { %v9818_v60 = vor.u32 %v10562_v9, %v9817_v51  ;;  %v10547_v9 = vld [vmem:[%s15533_s3 + $0x40] sm:$0xf0]  ;;  %v5624_v51 = vmul.f32 0.0, %v13749_v43 }
 0xe54   : > { %8175 = vmatpush.bf16.msrb.mxu1 %v9990_v34  ;;  %v9882_v34 = vor.u32 %v10578_v37, %v9881_v4  ;;  %v15731_v37 = vld [vmem:[#allocation7_spill] sm:$0xff]  ;;  %v10539_v4 = vld [vmem:[%s15533_s3 + $0x4] sm:$0xf] }
 0xe56   : > { %5524 = vrot.lane.b32.xlu1 %v5486_v11, %s10814_s30  ;;  %5530 = vrot.lane.b32.xlu2 %v5486_v11, %s10814_s30 }
 0xe57   : > { %5512 = vrot.lane.b32.xlu0 %v5486_v11, %s10814_s30 }
 0xe58   : > { %8176 = vmatpush.bf16.msrb.mxu1 %v9974_v3 }
 0xe5c   : > { %8177 = vmatpush.bf16.msrb.mxu1 %v9958_v28  ;;  %v9866_v28 = vor.u32 %v10574_v18, %v9865_v29  ;;  %v5794_v18 = vmul.f32 %v15731_v37, %v13076_v22 }
 0xe5e   : > { %5518 = vrot.lane.b32.xlu1 %v5486_v11, %s10814_s30  ;;  %5375 = vrot.lane.b32.xlu2 %v15728_v41, %s10821_s23  ;;  %v15730_v11 = vld [vmem:[#allocation6_spill] sm:$0xff]  ;;  %v5938_v41 = vmul.f32 %v15729_v8, %v13011_v30  ;;  %v9731_v8 = vld [vmem:[%s15533_s3 + $0x14] sm:$0xf0] }
 0xe5f   : > { %6143 = vrot.lane.b32.xlu0 %v6111_v33, %s10810_s12  ;;  %v6581_v3 = vmul.f32 0.0, %v15730_v11  ;;  %v14292_v0 = vor.u32 %v10539_v4, %v9731_v8  ;;  %v6427_v11 = vmul.f32 0.0, %v15732_v54  ;;  %v10550_v4 = vld [vmem:[%s15533_s3 + $0x5c] sm:$0xf] }
 0xe60   : > { %8178 = vmatpush.bf16.msrb.mxu1 %v9942_v7  ;;  %v9729_v7 = vld [vmem:[%s15533_s3] sm:$0xf]  ;;  %v5954_v42 = vpack.c.bf16 %v5938_v41, %v5938_v41 }
 0xe61   : > { %v6599_v44 = vpack.c.bf16 %v6581_v3, %v6581_v3  ;;  %v14267_v33 = vor.u32 %v10541_v31, %v9729_v7  ;;  %8034 = vmatmul.bf16.vlgmr.msra.gmra.mxu0 %v14292_v0  ;;  %v5806_v3 = vpack.c.bf16 %v5794_v18, %v5794_v18  ;;  %v6445_v29 = vpack.c.bf16 %v6427_v11, %v6427_v11  ;;  %v9751_v41 = vld [vmem:[%s15533_s3 + $0x3c] sm:$0xf0]  ;;  %v10549_v11 = vld [vmem:[%s15533_s3 + $0x54] sm:$0xf] }
 0xe62   : > { %v5784_v7 = vmul.f32 %v15731_v37, %v13011_v30 }
 0xe63   : > { %8005 = vmatmul.bf16.vlgmr.msra.gmra.mxu3 %v14267_v33 }
 0xe64   : > { %8287 = vmatpush.bf16.msra.mxu1 %v9930_v14  ;;  %v10566_v14 = vld [vmem:[#allocation2 + $0x34] sm:$0xf0] }
 0xe65   : > { %v9834_v40 = vor.u32 %v10566_v14, %v9833_v2  ;;  %v9757_v2 = vld [vmem:[%s15533_s3 + $0x30] sm:$0xf] }
 0xe66   : > { %6149 = vrot.lane.b32.xlu1 %v6114_v48, %s10810_s12  ;;  %6131 = vrot.lane.b32.xlu2 %v6105_v47, %s10810_s12  ;;  %v10540_v48 = vld [vmem:[%s15533_s3 + $0xc] sm:$0xf] }
 0xe67   : > { %6137 = vrot.lane.b32.xlu0 %v6108_v63, %s10810_s12  ;;  %v5789_v63 = vmul.f32 %v15731_v37, %v12989_v13 }
 0xe68   : > { %8288 = vmatpush.bf16.msra.mxu1 %v9914_v27  ;;  %v5951_v27 = vpack.c.bf16 %v5933_v12, %v5933_v12  ;;  %v10544_v12 = vld [vmem:[%s15533_s3 + $0x2c] sm:$0xf] }
 0xe6c   : > { %8289 = vmatpush.bf16.msra.mxu1 %v9898_v21  ;;  %v9739_v21 = vld [vmem:[%s15533_s3 + $0x1c] sm:$0xf0] }
 0xe6d   : > { %v14281_v47 = vor.u32 %v10540_v48, %v9739_v21  ;;  %v5642_v48 = vpack.c.bf16 %v5624_v51, %v5624_v51  ;;  %v6889_v21 = vmul.f32 0.0, %v14146_v59  ;;  %v9779_v59 = vld [vmem:[%s15533_s3 + $0x6c] sm:$0xf0] }
 0xe6e   : > { %5989 = vrot.lane.b32.xlu1 %v5957_v20, %s10811_s15  ;;  %5995 = vrot.lane.b32.xlu2 %v5960_v25, %s10811_s15  ;;  %v9749_v25 = vld [vmem:[%s15533_s3 + $0x28] sm:$0xf] }
 0xe6f   : > { %6637 = vrot.lane.b32.xlu0 %v6599_v44, %s10812_s20  ;;  %8092 = vmatmul.bf16.vlgmr.msra.gmra.mxu2 %v14281_v47  ;;  %v6907_v54 = vpack.c.bf16 %v6889_v21, %v6889_v21 }
 0xe70   : > { %8290 = vmatpush.bf16.msra.mxu1 %v9882_v34  ;;  %v5803_v34 = vpack.c.bf16 %v5789_v63, %v5789_v63  ;;  %v10551_v63 = vld [vmem:[%s15533_s3 + $0x60] sm:$0xf0] }
 0xe74   : > { %8291 = vmatpush.bf16.msra.mxu1 %v9866_v28  ;;  %v5779_v28 = vmul.f32 %v15731_v37, %v13062_v35  ;;  %v9769_v37 = vld [vmem:[%s15533_s3 + $0x50] sm:$0xf] }
 0xe75   : > { %v14362_v43 = vor.u32 %v10551_v63, %v9769_v37  ;;  %v6251_v63 = vmul.f32 %v13674_v17, %v12989_v13  ;;  %v9799_v13 = vld [vmem:[%s15533_s3 + $0x94] sm:$0xf0] }
 0xe76   : > { %6643 = vrot.lane.b32.xlu1 %v6599_v44, %s10812_s20  ;;  %5977 = vrot.lane.b32.xlu2 %v5951_v27, %s10811_s15  ;;  %v5797_v14 = vpack.c.bf16 %v5779_v28, %v5779_v28  ;;  %v14338_v27 = vor.u32 %v10544_v12, %v9751_v41 }
 0xe77   : > { %5983 = vrot.lane.b32.xlu0 %v5954_v42, %s10811_s15  ;;  %v14343_v42 = vor.u32 %v10547_v9, %v9757_v2 }
 0xe78   : > { %8292 = vmatpush.bf16.msra.mxu1 %v9850_v6  ;;  %v9759_v6 = vld [vmem:[%s15533_s3 + $0x44] sm:$0xf0]  ;;  %8039 = vmatmul.bf16.gmra.mxu0 %v14338_v27 }
 0xe79   : > { %v14324_v31 = vor.u32 %v10545_v50, %v9759_v6  ;;  %8068 = vmatmul.bf16.gmra.mxu1 %v14343_v42 }
 0xe7c   : > { %8293 = vmatpush.bf16.msra.mxu1 %v9834_v40  ;;  %v5800_v40 = vpack.c.bf16 %v5784_v7, %v5784_v7 }
 0xe7e   : > { %6625 = vrot.lane.b32.xlu1 %v6599_v44, %s10812_s20  ;;  %6631 = vrot.lane.b32.xlu2 %v6599_v44, %s10812_s20  ;;  %v14314_v44 = vor.u32 %v10546_v1, %v9749_v25  ;;  %v10552_v1 = vld [vmem:[%s15533_s3 + $0x68] sm:$0xf0] }
 0xe7f   : > { %5835 = vrot.lane.b32.xlu0 %v5803_v34, %s10812_s20  ;;  %8097 = vmatmul.bf16.gmra.mxu2 %v14324_v31  ;;  %v14372_v34 = vor.u32 %v10550_v4, %v9779_v59  ;;  %v9789_v4 = vld [vmem:[%s15533_s3 + $0x78] sm:$0xf]  ;;  %v10556_v59 = vld [vmem:[%s15533_s3 + $0x88] sm:$0xf0] }
 0xe80   : > { %8294 = vmatpush.bf16.msra.mxu1 %v9818_v60  ;;  %8010 = vmatmul.bf16.gmra.mxu3 %v14314_v44 }
 0xe81   : > { %v14302_v20 = vpop.permute.xlu2 %6947 }
 0xe82   : > { %v6962_v2 = vrot.slane %v14302_v20, 4 }
 0xe86   : > { %5841 = vrot.lane.b32.xlu1 %v5806_v3, %s10812_s20  ;;  %6483 = vrot.lane.b32.xlu2 %v6445_v29, %s10814_s30  ;;  %v9771_v3 = vld [vmem:[%s15533_s3 + $0x64] sm:$0xf0] }
 0xe87   : > { %6489 = vrot.lane.b32.xlu0 %v6445_v29, %s10814_s30  ;;  %v14389_v25 = vor.u32 %v10549_v11, %v9771_v3  ;;  %v10555_v11 = vld [vmem:[%s15533_s3 + $0x84] sm:$0xf] }
 0xe89   : > { %v14350_v60 = vpop.permute.xlu2 %6931  ;;  %8044 = vmatmul.bf16.gmra.mxu0 %v14389_v25 }
 0xe8e   : > { %5823 = vrot.lane.b32.xlu1 %v5797_v14, %s10812_s20  ;;  %5829 = vrot.lane.b32.xlu2 %v5800_v40, %s10812_s20 }
 0xe8f   : > { %6471 = vrot.lane.b32.xlu0 %v6445_v29, %s10814_s30  ;;  %8102 = vmatmul.bf16.gmra.mxu2 %v14372_v34 }
 0xe90   : > { %8015 = vmatmul.bf16.gmra.mxu3 %v14362_v43 }
 0xe96   : > { %6477 = vrot.lane.b32.xlu1 %v6445_v29, %s10814_s30  ;;  %5680 = vrot.lane.b32.xlu2 %v5642_v48, %s10819_s13  ;;  %v9777_v29 = vld [vmem:[%s15533_s3 + $0x58] sm:$0xf] }
 0xe97   : > { %5686 = vrot.lane.b32.xlu0 %v5642_v48, %s10819_s13  ;;  %v14396_v7 = vor.u32 %v10552_v1, %v9777_v29  ;;  %v6256_v29 = vmul.f32 %v13674_v17, %v13076_v22  ;;  %v14439_v1 = vor.u32 %v10555_v11, %v9799_v13 }
 0xe98   : > { %v14370_v8 = vpop.permute.xlu2 %6787 }
 0xe99   : > { %v6942_v18 = vpop.permute.xlu0 %6941  ;;  %8073 = vmatmul.bf16.gmra.mxu1 %v14396_v7  ;;  %v6268_v22 = vpack.c.bf16 %v6256_v29, %v6256_v29  ;;  %v9797_v29 = vld [vmem:[%s15533_s3 + $0x80] sm:$0xf] }
 0xe9a   : > { %v6959_v50 = vrot.slane %v6942_v18, 4 }
 0xe9e   : > { %6945 = vrot.lane.b32.xlu1 %v6907_v54, %s10810_s12  ;;  %6951 = vrot.lane.b32.xlu2 %v6907_v54, %s10810_s12 }
 0xe9f   : > { %5668 = vrot.lane.b32.xlu0 %v5642_v48, %s10819_s13  ;;  %8107 = vmatmul.bf16.gmra.mxu2 %v14439_v1 }
 0xea0   : > { %v14387_v28 = vpop.permute.xlu1 %6943  ;;  %v14398_v14 = vpop.permute.xlu2 %6795 }
 0xea1   : > { %v6960_v6 = vrot.slane %v14387_v28, 4  ;;  %v14404_v41 = vpop.permute.xlu0 %6949 }
 0xea2   : > { %v6963_v9 = vrot.slane %v14404_v41, 4 }
 0xea3   : > { %v6973_v12 = vsel %vm479_vm3, %v6959_v50, %v6960_v6 }
 0xea4   : > { %v6974_v40 = vsel %vm390_vm0, %v6942_v18, %v6973_v12  ;;  %v6977_v51 = vsel %vm479_vm3, %v6962_v2, %v6963_v9  ;;  %v14427_v18 = vor.u32 %v10556_v59, %v9789_v4 }
 0xea5   : > { %6993 = vst [vmem:[#allocation2 + $0x460] sm:$0xff] %v6974_v40  ;;  %v6978_v21 = vsel %vm390_vm0, %v14302_v20, %v6977_v51  ;;  %v6265_v40 = vpack.c.bf16 %v6251_v63, %v6251_v63  ;;  %v9791_v63 = vld [vmem:[%s15533_s3 + $0x8c] sm:$0xf0] }
 0xea6   : > { %5674 = vrot.lane.b32.xlu1 %v5642_v48, %s10819_s13  ;;  %6995 = vst [vmem:[#allocation2 + $0x470] sm:$0xff] %v6978_v21  ;;  %6933 = vrot.lane.b32.xlu2 %v6907_v54, %s10810_s12  ;;  %v6954_v48 = vrot.slane %v14350_v60, 4 }
 0xea7   : > { %6939 = vrot.lane.b32.xlu0 %v6907_v54, %s10810_s12  ;;  %v6735_v54 = vmul.f32 0.0, %v14184_v36  ;;  %8020 = vmatmul.bf16.gmra.mxu3 %v14427_v18 }
 0xea8   : > { %v6930_v37 = vpop.permute.xlu1 %6929  ;;  %v14435_v3 = vpop.permute.xlu2 %6781 }
 0xea9   : > { %v6953_v20 = vrot.slane %v6930_v37, 4  ;;  %v6936_v12 = vpop.permute.xlu0 %6935  ;;  %v6753_v4 = vpack.c.bf16 %v6735_v54, %v6735_v54 }
 0xeaa   : > { %v6956_v54 = vrot.slane %v6936_v12, 4 }
 0xeab   : > { %v6965_v50 = vsel %vm479_vm3, %v6953_v20, %v6954_v48 }
 0xeac   : > { %v6966_v2 = vsel %vm390_vm0, %v6930_v37, %v6965_v50  ;;  %v10369_v51 = vld [vmem:[#allocation2 + $0x460] sm:$0xf]  ;;  %v10699_v21 = vld [vmem:[#allocation2 + $0x464] sm:$0xf]  ;;  %v10554_v37 = vld [vmem:[%s15533_s3 + $0x7c] sm:$0xf] }
 0xead   : > { %6989 = vst [vmem:[#allocation2 + $0x440] sm:$0xff] %v6966_v2  ;;  %v10701_v36 = vld [vmem:[#allocation2 + $0x46c] sm:$0xf0]  ;;  %v10371_v59 = vld [vmem:[#allocation2 + $0x470] sm:$0xf0]  ;;  %v14463_v2 = vor.u32 %v10554_v37, %v9791_v63  ;;  %v6246_v37 = vmul.f32 %v13674_v17, %v13011_v30  ;;  %v15733_v63 = vrot.slane %v13740_v53, 4 }
 0xeae   : > { %6297 = vrot.lane.b32.xlu1 %v6265_v40, %s10815_s9  ;;  %6303 = vrot.lane.b32.xlu2 %v6268_v22, %s10815_s9  ;;  %v10370_v20 = vor.u32 %v10701_v36, %v10369_v51  ;;  %v10374_v11 = vor.u32 %v10699_v21, %v10371_v59  ;;  %v10557_v40 = vld [vmem:[%s15533_s3 + $0x90] sm:$0xf0]  ;;  %v6241_v21 = vmul.f32 %v13674_v17, %v13062_v35 }
 0xeaf   : > { %6791 = vrot.lane.b32.xlu0 %v6753_v4, %s10811_s15  ;;  %v14470_v22 = vor.u32 %v10557_v40, %v9797_v29  ;;  %8049 = vmatmul.bf16.gmra.mxu0 %v14463_v2  ;;  %v6262_v40 = vpack.c.bf16 %v6246_v37, %v6246_v37 }
 0xeb0   : > { %v14450_v13 = vpop.permute.xlu1 %6937  ;;  %8117 = vmatpush.bf16.msrb.mxu3 %v10370_v20  ;;  %8262 = vmatpush.bf16.msra.mxu0 %v10374_v11  ;;  %v5531_v51 = vpop.permute.xlu2 %5530  ;;  %v6805_v20 = vrot.slane %v14370_v8, 4  ;;  %v6259_v17 = vpack.c.bf16 %v6241_v21, %v6241_v21 }
 0xeb1   : > { %v6957_v50 = vrot.slane %v14450_v13, 4  ;;  %v5543_v59 = vrot.slane %v5531_v51, 4  ;;  %v14475_v55 = vpop.permute.xlu0 %6789  ;;  %8078 = vmatmul.bf16.gmra.mxu1 %v14470_v22  ;;  %8208 = vmatmul.bf16.vlgmr.msrb.gmra.mxu2 %v14208_v57 }
 0xeb2   : > { %v15615_v35 = vrot.slane %v14475_v55, 4 }
 0xeb3   : > { %v6969_v36 = vsel %vm479_vm3, %v6956_v54, %v6957_v50  ;;  %v5558_v29 = vsel %vm479_vm3, %v15733_v63, %v5543_v59 }
 0xeb4   : > { %v6970_v11 = vsel %vm390_vm0, %v6936_v12, %v6969_v36  ;;  %v5559_v54 = vsel %vm1176_vm6, %v13740_v53, %v5558_v29  ;;  %v6819_v30 = vsel %vm479_vm3, %v6805_v20, %v15615_v35  ;;  %v15614_v36 = vrot.slane %v14398_v14, 4  ;;  %v10353_v63 = vld [vmem:[#allocation2 + $0x440] sm:$0xf]  ;;  %v10695_v29 = vld [vmem:[#allocation2 + $0x444] sm:$0xf] }
 0xeb5   : > { %6991 = vst [vmem:[#allocation2 + $0x450] sm:$0xff] %v6970_v11  ;;  %v6820_v12 = vsel %vm15734_vm5, %v14370_v8, %v6819_v30  ;;  %v15736_v30 = vrot.slane %v14005_v61, 4 }
 0xeb6   : > { %6797 = vrot.lane.b32.xlu1 %v6753_v4, %s10811_s15  ;;  %5575 = vst [vmem:[#allocation2 + $0x1f8] sm:$0xff] %v5559_v54  ;;  %6285 = vrot.lane.b32.xlu2 %v6259_v17, %s10815_s9 }
 0xeb7   : > { %6839 = vst [vmem:[#allocation2 + $0x420] sm:$0xff] %v6820_v12  ;;  %6291 = vrot.lane.b32.xlu0 %v6262_v40, %s10815_s9 }
 0xeb8   : > { %v6794_v51 = vpop.permute.xlu1 %6793  ;;  %v5376_v59 = vpop.permute.xlu2 %5375 }
 0xeb9   : > { %v6808_v53 = vrot.slane %v6794_v51, 4  ;;  %v5388_v21 = vrot.slane %v5376_v59, 4  ;;  %v6776_v11 = vpop.permute.xlu0 %6775 }
 0xeba   : > { %v6799_v59 = vrot.slane %v6776_v11, 4 }
 0xebb   : > { %v6823_v20 = vsel %vm479_vm3, %v6808_v53, %v15614_v36  ;;  %v5404_v17 = vsel %vm479_vm3, %v15736_v30, %v5388_v21 }
 0xebc   : > { %v6824_v8 = vsel %vm15735_vm10, %v6794_v51, %v6823_v20  ;;  %v10697_v37 = vld [vmem:[#allocation2 + $0x44c] sm:$0xf0]  ;;  %v10355_v54 = vld [vmem:[#allocation2 + $0x450] sm:$0xf0]  ;;  %v5405_v53 = vsel %vm4803_vm12, %v14005_v61, %v5404_v17  ;;  %vm15737_vm12 = vmmov %vm15694_vm1 }
 0xebd   : > { %6841 = vst [vmem:[#allocation2 + $0x430] sm:$0xff] %v6824_v8  ;;  %v10354_v12 = vor.u32 %v10697_v37, %v10353_v63  ;;  %v10358_v40 = vor.u32 %v10695_v29, %v10355_v54  ;;  %v6802_v54 = vrot.slane %v14435_v3, 4  ;;  %vm15758_vm1 = vmmov %vm15724_vm8 }
 0xebe   : > { %6779 = vrot.lane.b32.xlu1 %v6753_v4, %s10811_s15  ;;  %5421 = vst [vmem:[#allocation2 + $0x1b8] sm:$0xff] %v5405_v53  ;;  %6785 = vrot.lane.b32.xlu2 %v6753_v4, %s10811_s15  ;;  %v10337_v61 = vld [vmem:[#allocation2 + $0x420] sm:$0xf]  ;;  %v10691_v29 = vld [vmem:[#allocation2 + $0x424] sm:$0xf]  ;;  %vm15761_vm5 = vmmov %vm15758_vm1 }
 0xebf   : > { %8118 = vmatpush.bf16.msrb.mxu3 %v10354_v12  ;;  %8263 = vmatpush.bf16.msra.mxu0 %v10358_v40  ;;  %v15738_v40 = vrot.slane %v13947_v19, 4  ;;  %vm15763_vm10 = vmmov %vm15758_vm1 }
 0xec0   : > { %v14510_v51 = vpop.permute.xlu1 %6777  ;;  %v6132_v8 = vpop.permute.xlu2 %6131  ;;  %8150 = vmatmul.bf16.vlgmr.msrb.gmra.mxu0 %v14267_v33 }
 0xec1   : > { %v15613_v20 = vrot.slane %v14510_v51, 4  ;;  %v6153_v63 = vrot.slane %v6132_v8, 4  ;;  %v14516_v37 = vpop.permute.xlu0 %6783  ;;  %8179 = vmatmul.bf16.vlgmr.msrb.gmra.mxu1 %v14292_v0  ;;  %8213 = vmatmul.bf16.gmra.mxu2 %v14343_v42 }
 0xec2   : > { %v6803_v30 = vrot.slane %v14516_v37, 4 }
 0xec3   : > { %v6811_v21 = vsel %vm479_vm3, %v6799_v59, %v15613_v20  ;;  %v6165_v53 = vsel %vm479_vm3, %v15738_v40, %v6153_v63  ;;  %v15740_v63 = vrot.slane %v13802_v56, 4 }
 0xec4   : > { %v6812_v4 = vsel %vm15737_vm12, %v6776_v11, %v6811_v21  ;;  %v10693_v17 = vld [vmem:[#allocation2 + $0x42c] sm:$0xf0]  ;;  %v10339_v12 = vld [vmem:[#allocation2 + $0x430] sm:$0xf0]  ;;  %v6166_v20 = vsel %vm390_vm0, %v13947_v19, %v6165_v53  ;;  %v6815_v11 = vsel %vm479_vm3, %v6802_v54, %v6803_v30  ;;  %vm15765_vm12 = vmmov %vm15742_vm2 }
 0xec5   : > { %6835 = vst [vmem:[#allocation2 + $0x400] sm:$0xff] %v6812_v4  ;;  %v10338_v59 = vor.u32 %v10693_v17, %v10337_v61  ;;  %v10342_v8 = vor.u32 %v10691_v29, %v10339_v12  ;;  %v6816_v21 = vsel %vm15739_vm13, %v14435_v3, %v6815_v11  ;;  %v15741_v3 = vrot.slane %v14021_v26, 4  ;;  %vm15767_vm13 = vmmov %vm15758_vm1 }
 0xec6   : > { %6188 = vst [vmem:[#allocation2 + $0x2c8] sm:$0xff] %v6166_v20 }
 0xec7   : > { %8119 = vmatpush.bf16.msrb.mxu3 %v10338_v59  ;;  %8264 = vmatpush.bf16.msra.mxu0 %v10342_v8  ;;  %6837 = vst [vmem:[#allocation2 + $0x410] sm:$0xff] %v6816_v21  ;;  %v10307_v59 = vld [vmem:[#allocation2 + $0x3f0] sm:$0xf0]  ;;  %v10543_v8 = vld [vmem:[%s15533_s3 + $0x20] sm:$0xf0] }
 0xec8   : > { %v5525_v4 = vpop.permute.xlu1 %5524  ;;  %v5996_v35 = vpop.permute.xlu2 %5995 }
 0xec9   : > { %v5540_v36 = vrot.slane %v5525_v4, 4  ;;  %v6008_v29 = vrot.slane %v5996_v35, 4  ;;  %v5513_v19 = vpop.permute.xlu0 %5512 }
 0xeca   : > { %v5534_v54 = vrot.slane %v5513_v19, 4 }
 0xecb   : > { %v5554_v61 = vsel %vm479_vm3, %v15740_v63, %v5540_v36  ;;  %v6023_v20 = vsel %vm479_vm3, %v15741_v3, %v6008_v29  ;;  %v15743_v36 = vrot.slane %v13924_v23, 4  ;;  %v10683_v29 = vld [vmem:[#allocation2 + $0x3e4] sm:$0xf] }
 0xecc   : > { %v5555_v17 = vsel %vm1176_vm6, %v13802_v56, %v5554_v61  ;;  %v10321_v12 = vld [vmem:[#allocation2 + $0x400] sm:$0xf]  ;;  %v10687_v40 = vld [vmem:[#allocation2 + $0x404] sm:$0xf]  ;;  %v6024_v53 = vsel %vm15742_vm2, %v14021_v26, %v6023_v20  ;;  %v9745_v56 = vld [vmem:[%s15533_s3 + $0x10] sm:$0xf] }
 0xecd   : > { %5573 = vst [vmem:[#allocation2 + $0x1e8] sm:$0xff] %v5555_v17  ;;  %v5546_v35 = vsel %vm479_vm3, %v15743_v36, %v5534_v54  ;;  %v10310_v17 = vor.u32 %v10683_v29, %v10307_v59  ;;  %v14555_v54 = vor.u32 %v10543_v8, %v9745_v56  ;;  %v10291_v20 = vld [vmem:[#allocation2 + $0x3d0] sm:$0xf0]  ;;  %v10622_v56 = vld [vmem:[#allocation2 + $0x1f4] sm:$0xf0]  ;;  %v15745_v8 = vrot.slane %v14046_v39, 4 }
 0xece   : > { %6040 = vst [vmem:[#allocation2 + $0x2b8] sm:$0xff] %v6024_v53  ;;  %v5547_v11 = vsel %vm1176_vm6, %v13924_v23, %v5546_v35  ;;  %v10689_v21 = vld [vmem:[#allocation2 + $0x40c] sm:$0xf0]  ;;  %v10323_v4 = vld [vmem:[#allocation2 + $0x410] sm:$0xf0]  ;;  %v15744_v53 = vrot.slane %v13850_v58, 4 }
 0xecf   : > { %5569 = vst [vmem:[#allocation2 + $0x1c8] sm:$0xff] %v5547_v11  ;;  %v10322_v26 = vor.u32 %v10689_v21, %v10321_v12  ;;  %v10326_v63 = vor.u32 %v10687_v40, %v10323_v4  ;;  %v10679_v11 = vld [vmem:[#allocation2 + $0x3c4] sm:$0xf]  ;;  %v10275_v29 = vld [vmem:[#allocation2 + $0x3b0] sm:$0xf0] }
 0xed0   : > { %v5519_v61 = vpop.permute.xlu1 %5518  ;;  %v5978_v3 = vpop.permute.xlu2 %5977  ;;  %8155 = vmatmul.bf16.gmra.mxu0 %v14314_v44  ;;  %v10294_v4 = vor.u32 %v10679_v11, %v10291_v20 }
 0xed1   : > { %v5537_v19 = vrot.slane %v5519_v61, 4  ;;  %8120 = vmatpush.bf16.msrb.mxu3 %v10322_v26  ;;  %8265 = vmatpush.bf16.msra.mxu0 %v10326_v63  ;;  %v5999_v23 = vrot.slane %v5978_v3, 4  ;;  %v6144_v35 = vpop.permute.xlu0 %6143  ;;  %v10675_v3 = vld [vmem:[#allocation2 + $0x3a4] sm:$0xf] }
 0xed2   : > { %v6159_v40 = vrot.slane %v6144_v35, 4  ;;  %8184 = vmatmul.bf16.gmra.mxu1 %v14338_v27  ;;  %v10278_v20 = vor.u32 %v10675_v3, %v10275_v29  ;;  %v10259_v35 = vld [vmem:[#allocation2 + $0x390] sm:$0xf0]  ;;  %8218 = vmatmul.bf16.gmra.mxu2 %v14396_v7  ;;  %v15751_v29 = vrot.slane %v13963_v46, 4  ;;  %v10614_v3 = vld [vmem:[#allocation2 + $0x1b4] sm:$0xf0] }
 0xed3   : > { %v5550_v36 = vsel %vm479_vm3, %v15744_v53, %v5537_v19  ;;  %v6011_v21 = vsel %vm479_vm3, %v15745_v8, %v5999_v23  ;;  %v10671_v23 = vld [vmem:[#allocation2 + $0x384] sm:$0xf] }
 0xed4   : > { %v5551_v12 = vsel %vm1176_vm6, %v13850_v58, %v5550_v36  ;;  %v10057_v59 = vld [vmem:[#allocation2 + $0x1e8] sm:$0xf]  ;;  %10383 = vmatmul.msk.bf16.vlgmr.msrb.gmra.mxu3 %vm15746_vm4, %v14555_v54  ;;  %v6012_v63 = vsel %vm15747_vm14, %v14046_v39, %v6011_v21  ;;  %v15748_v58 = vrot.slane %v13852_v16, 4  ;;  %v15749_v39 = vrot.slane %v13868_v5, 4  ;;  %vm15771_vm4 = vmmov %vm15758_vm1 }
 0xed5   : > { %8229 = vmatpush.bf16.msra.mxu3 %v10310_v17  ;;  %5571 = vst [vmem:[#allocation2 + $0x1d8] sm:$0xff] %v5551_v12  ;;  %v10058_v26 = vor.u32 %v10622_v56, %v10057_v59  ;;  %v15750_v21 = vrot.slane %v13910_v10, 4  ;;  %vm15774_vm14 = vmmov %vm15758_vm1 }
 0xed6   : > { %v6173_v61 = vsel %vm479_vm3, %v15748_v58, %v6159_v40  ;;  %6034 = vst [vmem:[#allocation2 + $0x288] sm:$0xff] %v6012_v63  ;;  %v10041_v56 = vld [vmem:[#allocation2 + $0x1c8] sm:$0xf]  ;;  %v10243_v58 = vld [vmem:[#allocation2 + $0x370] sm:$0xf0] }
 0xed7   : > { %v6174_v19 = vsel %vm390_vm0, %v13852_v16, %v6173_v61  ;;  %8316 = vmatpush.bf16.msra.mxu2 %v10058_v26  ;;  %v10262_v26 = vor.u32 %v10671_v23, %v10259_v35 }
 0xed8   : > { %6192 = vst [vmem:[#allocation2 + $0x2e8] sm:$0xff] %v6174_v19  ;;  %v6150_v17 = vpop.permute.xlu1 %6149  ;;  %v6632_v36 = vpop.permute.xlu2 %6631  ;;  %v9765_v19 = vld [vmem:[%s15533_s3 + $0x38] sm:$0xf] }
 0xed9   : > { %8230 = vmatpush.bf16.msra.mxu3 %v10294_v4  ;;  %v6162_v53 = vrot.slane %v6150_v17, 4  ;;  %v6650_v12 = vrot.slane %v6632_v36, 4  ;;  %v6138_v40 = vpop.permute.xlu0 %6137  ;;  %v10548_v17 = vld [vmem:[%s15533_s3 + $0x48] sm:$0xf0]  ;;  %v10025_v36 = vld [vmem:[#allocation2 + $0x1a8] sm:$0xf] }
 0xeda   : > { %v6156_v59 = vrot.slane %v6138_v40, 4  ;;  %v10663_v40 = vld [vmem:[#allocation2 + $0x344] sm:$0xf] }
 0xedb   : > { %v6177_v11 = vsel %vm479_vm3, %v15749_v39, %v6162_v53  ;;  %v6663_v4 = vsel %vm479_vm3, %v15750_v21, %v6650_v12  ;;  %v14598_v39 = vor.u32 %v10548_v17, %v9765_v19  ;;  %v15756_v19 = vld [vmem:[#allocation12_spill] sm:$0xff] }
 0xedc   : > { %v6178_v16 = vsel %vm390_vm0, %v13868_v5, %v6177_v11  ;;  %v10618_v8 = vld [vmem:[#allocation2 + $0x1d4] sm:$0xf0]  ;;  %v6664_v61 = vsel %vm15724_vm8, %v13910_v10, %v6663_v4  ;;  %v6169_v5 = vsel %vm479_vm3, %v15751_v29, %v6156_v59  ;;  %v10026_v11 = vor.u32 %v10614_v3, %v10025_v36  ;;  %vm15779_vm8 = vmmov %vm15758_vm1 }
 0xedd   : > { %8231 = vmatpush.bf16.msra.mxu3 %v10278_v20  ;;  %6194 = vst [vmem:[#allocation2 + $0x2f8] sm:$0xff] %v6178_v16  ;;  %v10042_v63 = vor.u32 %v10618_v8, %v10041_v56  ;;  %v6170_v53 = vsel %vm390_vm0, %v13963_v46, %v6169_v5  ;;  %v10667_v20 = vld [vmem:[#allocation2 + $0x364] sm:$0xf]  ;;  %v10610_v16 = vld [vmem:[#allocation2 + $0x194] sm:$0xf0]  ;;  %v15752_v59 = vrot.slane %v13945_v62, 4 }
 0xede   : > { %6684 = vst [vmem:[#allocation2 + $0x3d8] sm:$0xff] %v6664_v61  ;;  %v10246_v35 = vor.u32 %v10667_v20, %v10243_v58  ;;  %v15754_v58 = vrot.slane %v13906_v15, 4  ;;  %v15757_v17 = vrot.slane %v15756_v19, 4 }
 0xedf   : > { %8317 = vmatpush.bf16.msra.mxu2 %v10042_v63  ;;  %6190 = vst [vmem:[#allocation2 + $0x2d8] sm:$0xff] %v6170_v53  ;;  %v10009_v63 = vld [vmem:[#allocation2 + $0x188] sm:$0xf]  ;;  %v10211_v53 = vld [vmem:[#allocation2 + $0x330] sm:$0xf0] }
 0xee0   : > { %v5990_v10 = vpop.permute.xlu1 %5989  ;;  %v6484_v12 = vpop.permute.xlu2 %6483  ;;  %8160 = vmatmul.bf16.gmra.mxu0 %v14362_v43  ;;  %v10010_v5 = vor.u32 %v10610_v16, %v10009_v63  ;;  %v10655_v16 = vld [vmem:[#allocation2 + $0x304] sm:$0xf] }
 0xee1   : > { %8232 = vmatpush.bf16.msra.mxu3 %v10262_v26  ;;  %v6005_v23 = vrot.slane %v5990_v10, 4  ;;  %v6499_v8 = vrot.slane %v6484_v12, 4  ;;  %v6638_v46 = vpop.permute.xlu0 %6637  ;;  %v10227_v26 = vld [vmem:[#allocation2 + $0x350] sm:$0xf0]  ;;  %v10606_v10 = vld [vmem:[#allocation2 + $0x174] sm:$0xf0] }
 0xee2   : > { %v6653_v4 = vrot.slane %v6638_v46, 4  ;;  %8189 = vmatmul.bf16.gmra.mxu1 %v14389_v25  ;;  %v10230_v29 = vor.u32 %v10663_v40, %v10227_v26  ;;  %8223 = vmatmul.bf16.gmra.mxu2 %v14470_v22 }
 0xee3   : > { %v6019_v56 = vsel %vm479_vm3, %v15752_v59, %v6005_v23  ;;  %8318 = vmatpush.bf16.msra.mxu2 %v10026_v11  ;;  %v6513_v61 = vsel %vm479_vm3, %v15754_v58, %v6499_v8  ;;  %v10659_v23 = vld [vmem:[#allocation2 + $0x324] sm:$0xf]  ;;  %v10195_v59 = vld [vmem:[#allocation2 + $0x310] sm:$0xf0] }
 0xee4   : > { %v6020_v21 = vsel %vm15753_vm9, %v13945_v62, %v6019_v56  ;;  %10384 = vmatmul.msk.bf16.gmra.mxu3 %vm15755_vm15, %v14598_v39  ;;  %v6514_v62 = vsel %vm1176_vm6, %v13906_v15, %v6513_v61  ;;  %v6667_v3 = vsel %vm479_vm3, %v15757_v17, %v6653_v4  ;;  %v10214_v12 = vor.u32 %v10659_v23, %v10211_v53  ;;  %v10602_v56 = vld [vmem:[#allocation2 + $0x154] sm:$0xf0]  ;;  %v15759_v8 = vld [vmem:[#allocation14_spill] sm:$0xff]  ;;  %v10185_v17 = vld [vmem:[#allocation2 + $0x2e8] sm:$0xf] }
 0xee5   : > { %8233 = vmatpush.bf16.msra.mxu3 %v10246_v35  ;;  %6038 = vst [vmem:[#allocation2 + $0x2a8] sm:$0xff] %v6020_v21  ;;  %v6668_v20 = vsel %vm15758_vm1, %v15756_v19, %v6667_v3  ;;  %v9993_v35 = vld [vmem:[#allocation2 + $0x168] sm:$0xf]  ;;  %v15760_v46 = vrot.slane %v15759_v8, 4  ;;  %v10654_v63 = vld [vmem:[#allocation2 + $0x2f4] sm:$0xf0]  ;;  %v10198_v19 = vor.u32 %v10655_v16, %v10195_v59  ;;  %vm15780_vm9 = vmmov %vm15742_vm2 }
 0xee6   : > { %6532 = vst [vmem:[#allocation2 + $0x3a8] sm:$0xff] %v6514_v62  ;;  %v9994_v40 = vor.u32 %v10606_v10, %v9993_v35  ;;  %v15764_v10 = vrot.slane %v14053_v38, 4  ;;  %v9785_v23 = vld [vmem:[%s15533_s3 + $0x60] sm:$0xf]  ;;  %v10553_v35 = vld [vmem:[%s15533_s3 + $0x70] sm:$0xf0]  ;;  %vm15781_vm15 = vmmov %vm15742_vm2 }
 0xee7   : > { %8319 = vmatpush.bf16.msra.mxu2 %v10010_v5  ;;  %6686 = vst [vmem:[#allocation2 + $0x3e8] sm:$0xff] %v6668_v20  ;;  %v15762_v5 = vrot.slane %v14057_v45, 4  ;;  %v10169_v59 = vld [vmem:[#allocation2 + $0x2c8] sm:$0xf]  ;;  %vm15795_vm1 = vmmov %vm15742_vm2 }
 0xee8   : > { %v6644_v36 = vpop.permute.xlu1 %6643  ;;  %v5830_v15 = vpop.permute.xlu2 %5829 }
 0xee9   : > { %8234 = vmatpush.bf16.msra.mxu3 %v10230_v29  ;;  %v6656_v11 = vrot.slane %v6644_v36, 4  ;;  %v5848_v4 = vrot.slane %v5830_v15, 4  ;;  %v5984_v26 = vpop.permute.xlu0 %5983  ;;  %v9977_v29 = vld [vmem:[#allocation2 + $0x148] sm:$0xf]  ;;  %v10186_v36 = vor.u32 %v10654_v63, %v10185_v17  ;;  %v10598_v15 = vld [vmem:[#allocation2 + $0x134] sm:$0xf0] }
 0xeea   : > { %v6002_v61 = vrot.slane %v5984_v26, 4  ;;  %v9978_v3 = vor.u32 %v10602_v56, %v9977_v29  ;;  %v14641_v56 = vor.u32 %v10553_v35, %v9785_v23  ;;  %v10594_v26 = vld [vmem:[#allocation2 + $0x114] sm:$0xf0]  ;;  %v15766_v63 = vrot.slane %v13769_v49, 4  ;;  %v10588_v35 = vld [vmem:[#allocation2 + $0xec] sm:$0xf] }
 0xeeb   : > { %v6671_v21 = vsel %vm479_vm3, %v15760_v46, %v6656_v11  ;;  %8320 = vmatpush.bf16.msra.mxu2 %v9994_v40  ;;  %v5861_v62 = vsel %vm479_vm3, %v15762_v5, %v5848_v4  ;;  %v9961_v11 = vld [vmem:[#allocation2 + $0x128] sm:$0xf]  ;;  %v9931_v5 = vld [vmem:[#allocation2 + $0xf8] sm:$0xf0] }
 0xeec   : > { %v6672_v58 = vsel %vm15761_vm5, %v15759_v8, %v6671_v21  ;;  %v5862_v53 = vsel %vm15763_vm10, %v14057_v45, %v5861_v62  ;;  %v6015_v20 = vsel %vm479_vm3, %v15764_v10, %v6002_v61  ;;  %v10650_v45 = vld [vmem:[#allocation2 + $0x2d4] sm:$0xf0]  ;;  %v9962_v8 = vor.u32 %v10598_v15, %v9961_v11  ;;  %v9945_v4 = vld [vmem:[#allocation2 + $0x108] sm:$0xf]  ;;  %v15769_v11 = vld [vmem:[#allocation8_spill] sm:$0xff] }
 0xeed   : > { %8235 = vmatpush.bf16.msra.mxu3 %v10214_v12  ;;  %6688 = vst [vmem:[#allocation2 + $0x3f8] sm:$0xff] %v6672_v58  ;;  %v6016_v12 = vsel %vm15765_vm12, %v14053_v38, %v6015_v20  ;;  %v10170_v21 = vor.u32 %v10650_v45, %v10169_v59  ;;  %v10153_v29 = vld [vmem:[#allocation2 + $0x2a8] sm:$0xf]  ;;  %v10646_v20 = vld [vmem:[#allocation2 + $0x2b4] sm:$0xf0]  ;;  %v9934_v15 = vor.u32 %v10588_v35, %v9931_v5 }
 0xeee   : > { %5882 = vst [vmem:[#allocation2 + $0x258] sm:$0xff] %v5862_v53  ;;  %v10313_v17 = vld [vmem:[#allocation2 + $0x3e8] sm:$0xf]  ;;  %v15768_v53 = vrot.slane %v14091_v24, 4 }
 0xeef   : > { %8321 = vmatpush.bf16.msra.mxu2 %v9978_v3  ;;  %6036 = vst [vmem:[#allocation2 + $0x298] sm:$0xff] %v6016_v12  ;;  %v15770_v12 = vrot.slane %v15769_v11, 4 }
 0xef0   : > { %v6626_v40 = vpop.permute.xlu1 %6625  ;;  %v5681_v46 = vpop.permute.xlu2 %5680  ;;  %8165 = vmatmul.bf16.gmra.mxu0 %v14427_v18 }
 0xef1   : > { %8236 = vmatpush.bf16.msra.mxu3 %v10198_v19  ;;  %v6647_v16 = vrot.slane %v6626_v40, 4  ;;  %v5696_v58 = vrot.slane %v5681_v46, 4  ;;  %v5836_v61 = vpop.permute.xlu0 %5835  ;;  %v10154_v40 = vor.u32 %v10646_v20, %v10153_v29  ;;  %v10682_v20 = vld [vmem:[#allocation2 + $0x3d4] sm:$0xf0] }
 0xef2   : > { %v5851_v19 = vrot.slane %v5836_v61, 4  ;;  %8194 = vmatmul.bf16.gmra.mxu1 %v14463_v2  ;;  %v15772_v61 = vld [vmem:[#allocation5_spill] sm:$0xff] }
 0xef3   : > { %v6659_v38 = vsel %vm479_vm3, %v15766_v63, %v6647_v16  ;;  %8322 = vmatpush.bf16.msra.mxu2 %v9962_v8  ;;  %v5711_v10 = vsel %vm479_vm3, %v15768_v53, %v5696_v58  ;;  %v9915_v8 = vld [vmem:[#allocation2 + $0xd8] sm:$0xf0]  ;;  %v15773_v29 = vrot.slane %v15772_v61, 4 }
 0xef4   : > { %v6660_v62 = vsel %vm15767_vm13, %v13769_v49, %v6659_v38  ;;  %v10686_v3 = vld [vmem:[#allocation2 + $0x3f4] sm:$0xf0]  ;;  %10385 = vmatmul.msk.bf16.gmra.mxu3 %vm15742_vm2, %v14641_v56  ;;  %v5712_v49 = vsel %vm4492_vm11, %v14091_v24, %v5711_v10  ;;  %v5865_v45 = vsel %vm479_vm3, %v15770_v12, %v5851_v19 }
 0xef5   : > { %8345 = vmatpush.bf16.msrb.mxu3 %v10186_v36  ;;  %6682 = vst [vmem:[#allocation2 + $0x3c8] sm:$0xff] %v6660_v62  ;;  %v9946_v36 = vor.u32 %v10594_v26, %v9945_v4  ;;  %v10314_v23 = vor.u32 %v10686_v3, %v10313_v17  ;;  %v5866_v16 = vsel %vm15771_vm4, %v15769_v11, %v5865_v45  ;;  %v10137_v4 = vld [vmem:[#allocation2 + $0x288] sm:$0xf]  ;;  %v10584_v26 = vld [vmem:[#allocation2 + $0xcc] sm:$0xf]  ;;  %v15775_v45 = vld [vmem:[#allocation4_spill] sm:$0xff] }
 0xef6   : > { %5730 = vst [vmem:[#allocation2 + $0x228] sm:$0xff] %v5712_v49  ;;  %v10642_v59 = vld [vmem:[#allocation2 + $0x294] sm:$0xf0]  ;;  %v9918_v58 = vor.u32 %v10584_v26, %v9915_v8  ;;  %v9899_v17 = vld [vmem:[#allocation2 + $0xb8] sm:$0xf0] }
 0xef7   : > { %8323 = vmatpush.bf16.msra.mxu2 %v9946_v36  ;;  %8374 = vmatpush.bf16.msrb.mxu0 %v10314_v23  ;;  %5884 = vst [vmem:[#allocation2 + $0x268] sm:$0xff] %v5866_v16  ;;  %v10138_v38 = vor.u32 %v10642_v59, %v10137_v4  ;;  %v8035_v36 = vpop.f32.mrf.mxu0  ;;  %v10580_v49 = vld [vmem:[#allocation2 + $0xac] sm:$0xf]  ;;  %v9805_v59 = vld [vmem:[%s15533_s3 + $0x88] sm:$0xf] }
 0xef8   : > { %v5842_v46 = vpop.permute.xlu1 %5841  ;;  %v6952_v63 = vpop.permute.xlu2 %6951  ;;  %v9902_v16 = vor.u32 %v10580_v49, %v9899_v17  ;;  %v10576_v26 = vld [vmem:[#allocation2 + $0x8c] sm:$0xf] }
 0xef9   : > { %8346 = vmatpush.bf16.msrb.mxu3 %v10170_v21  ;;  %v8006_v21 = vpop.f32.mrf.mxu3  ;;  %v5854_v24 = vrot.slane %v5842_v46, 4  ;;  %v6964_v62 = vrot.slane %v6952_v63, 4  ;;  %v6490_v19 = vpop.permute.xlu0 %6489  ;;  %v9883_v46 = vld [vmem:[#allocation2 + $0x98] sm:$0xf0] }
 0xefa   : > { %v6502_v53 = vrot.slane %v6490_v19, 4  ;;  %v8036_v11 = vadd.f32 %v8035_v36, %v8006_v21  ;;  %8324 = vmatmul.bf16.vlgmr.msra.gmra.mxu2 %v14292_v0  ;;  %v8064_v21 = vpop.f32.mrf.mxu1 }
 0xefb   : > { %8432 = vmatpush.bf16.msrb.mxu2 %v9934_v15  ;;  %v5869_v5 = vsel %vm479_vm3, %v15773_v29, %v5854_v24  ;;  %v6979_v23 = vsel %vm479_vm3, %v6963_v9, %v6964_v62  ;;  %v10558_v9 = vld [vmem:[%s15533_s3 + $0x98] sm:$0xf0] }
 0xefc   : > { %v5870_v3 = vsel %vm15774_vm14, %v15772_v61, %v5869_v5  ;;  %v10297_v10 = vld [vmem:[#allocation2 + $0x3c8] sm:$0xf]  ;;  %v6980_v12 = vsel %vm390_vm0, %v14404_v41, %v6979_v23  ;;  %v14684_v4 = vor.u32 %v10558_v9, %v9805_v59  ;;  %v8065_v63 = vadd.f32 %v8064_v21, %v8036_v11 }
 0xefd   : > { %8347 = vmatpush.bf16.msrb.mxu3 %v10154_v40  ;;  %5886 = vst [vmem:[#allocation2 + $0x278] sm:$0xff] %v5870_v3  ;;  %v10298_v35 = vor.u32 %v10682_v20, %v10297_v10  ;;  %v15776_v40 = vrot.slane %v15775_v45, 4  ;;  %v9886_v61 = vor.u32 %v10576_v26, %v9883_v46  ;;  %v15777_v5 = vld [vmem:[#allocation17_spill] sm:$0xff]  ;;  %v9851_v46 = vld [vmem:[#allocation2 + $0x58] sm:$0xf0] }
 0xefe   : > { %6996 = vst [vmem:[#allocation2 + $0x478] sm:$0xff] %v6980_v12  ;;  %v15778_v62 = vrot.slane %v15777_v5, 4  ;;  %v10121_v23 = vld [vmem:[#allocation2 + $0x268] sm:$0xf] }
 0xeff   : > { %8433 = vmatpush.bf16.msrb.mxu2 %v9918_v58  ;;  %v6517_v15 = vsel %vm479_vm3, %v15776_v40, %v6502_v53  ;;  %8375 = vmatpush.bf16.msrb.mxu0 %v10298_v35  ;;  %v9867_v53 = vld [vmem:[#allocation2 + $0x78] sm:$0xf0]  ;;  %v8037_v49 = vpop.f32.mrf.mxu0 }
 0xf00   : > { %v6518_v8 = vsel %vm1176_vm6, %v15775_v45, %v6517_v15  ;;  %v5824_v41 = vpop.permute.xlu1 %5823  ;;  %v6934_v58 = vpop.permute.xlu2 %6933  ;;  %10387 = vmatmul.msk.bf16.vlgmr.msra.gmra.mxu0 %vm15780_vm9, %v14555_v54  ;;  %v10572_v45 = vld [vmem:[#allocation2 + $0x6c] sm:$0xf] }
 0xf01   : > { %8348 = vmatpush.bf16.msrb.mxu3 %v10138_v38  ;;  %6534 = vst [vmem:[#allocation2 + $0x3b8] sm:$0xff] %v6518_v8  ;;  %v5845_v24 = vrot.slane %v5824_v41, 4  ;;  %v8093_v38 = vpop.f32.mrf.mxu2  ;;  %v8008_v29 = vpop.f32.mrf.mxu3  ;;  %v6955_v17 = vrot.slane %v6934_v58, 4  ;;  %v9870_v8 = vor.u32 %v10572_v45, %v9867_v53  ;;  %v10281_v41 = vld [vmem:[#allocation2 + $0x3a8] sm:$0xf] }
 0xf02   : > { %v6472_v3 = vpop.permute.xlu0 %6471  ;;  %v14689_v10 = vadd.f32 %v8093_v38, %v8065_v63  ;;  %8295 = vmatmul.bf16.vlgmr.msra.gmra.mxu1 %v14267_v33  ;;  %v8038_v40 = vadd.f32 %v8037_v49, %v8008_v29  ;;  %v8066_v63 = vpop.f32.mrf.mxu1 }
 0xf03   : > { %8434 = vmatpush.bf16.msrb.mxu2 %v9902_v16  ;;  %v5857_v19 = vsel %vm479_vm3, %v15778_v62, %v5845_v24  ;;  %v6493_v36 = vrot.slane %v6472_v3, 4  ;;  %v6967_v11 = vsel %vm479_vm3, %v6954_v48, %v6955_v17  ;;  %v15782_v16 = vld [vmem:[#allocation15_spill] sm:$0xff]  ;;  %v15784_v62 = vld [vmem:[#allocation9_spill] sm:$0xff] }
 0xf04   : > { %v5858_v20 = vsel %vm15779_vm8, %v15777_v5, %v5857_v19  ;;  %v10638_v35 = vld [vmem:[#allocation2 + $0x274] sm:$0xf0]  ;;  %10386 = vmatmul.msk.bf16.gmra.mxu3 %vm15781_vm15, %v14684_v4  ;;  %v6968_v15 = vsel %vm390_vm0, %v14350_v60, %v6967_v11  ;;  %v15783_v59 = vrot.slane %v15782_v16, 4  ;;  %v10568_v60 = vld [vmem:[#allocation2 + $0x4c] sm:$0xf]  ;;  %v8067_v58 = vadd.f32 %v8066_v63, %v8038_v40 }
 0xf05   : > { %5880 = vst [vmem:[#allocation2 + $0x248] sm:$0xff] %v5858_v20  ;;  %v10122_v12 = vor.u32 %v10638_v35, %v10121_v23  ;;  %v9854_v5 = vor.u32 %v10568_v60, %v9851_v46  ;;  %v15785_v19 = vrot.slane %v15784_v62, 4  ;;  %v9835_v20 = vld [vmem:[#allocation2 + $0x38] sm:$0xf0]  ;;  %v10634_v11 = vld [vmem:[#allocation2 + $0x254] sm:$0xf0] }
 0xf06   : > { %v6505_v9 = vsel %vm479_vm3, %v15783_v59, %v6493_v36  ;;  %6990 = vst [vmem:[#allocation2 + $0x448] sm:$0xff] %v6968_v15 }
 0xf07   : > { %8435 = vmatpush.bf16.msrb.mxu2 %v9886_v61  ;;  %v6506_v48 = vsel %vm1176_vm6, %v15782_v16, %v6505_v9  ;;  %8349 = vmatpush.bf16.msrb.mxu3 %v10122_v12  ;;  %v15786_v12 = vld [vmem:[#allocation19_spill] sm:$0xff]  ;;  %v10564_v16 = vld [vmem:[#allocation2 + $0x2c] sm:$0xf]  ;;  %v8040_v59 = vpop.f32.mrf.mxu0 }
 0xf08   : > { %v10678_v21 = vld [vmem:[#allocation2 + $0x3b4] sm:$0xf0]  ;;  %6528 = vst [vmem:[#allocation2 + $0x388] sm:$0xff] %v6506_v48  ;;  %v6478_v26 = vpop.permute.xlu1 %6477  ;;  %v6304_v29 = vpop.permute.xlu2 %6303  ;;  %v15787_v45 = vrot.slane %v15786_v12, 4 }
 0xf09   : > { %v10282_v24 = vor.u32 %v10678_v21, %v10281_v41  ;;  %v6496_v38 = vrot.slane %v6478_v26, 4  ;;  %v8095_v61 = vpop.f32.mrf.mxu2  ;;  %v6316_v3 = vrot.slane %v6304_v29, 4  ;;  %v9838_v41 = vor.u32 %v10564_v16, %v9835_v20  ;;  %v8011_v21 = vpop.f32.mrf.mxu3  ;;  %v9819_v26 = vld [vmem:[#allocation2 + $0x18] sm:$0xf0] }
 0xf0a   : > { %v5687_v53 = vpop.permute.xlu0 %5686  ;;  %v14711_v36 = vadd.f32 %v8095_v61, %v8067_v58  ;;  %8329 = vmatmul.bf16.gmra.mxu2 %v14338_v27  ;;  %v8041_v63 = vadd.f32 %v8040_v59, %v8011_v21  ;;  %v8069_v60 = vpop.f32.mrf.mxu1  ;;  %v10560_v61 = vld [vmem:[#allocation2 + $0xc] sm:$0xf]  ;;  %v15793_v16 = vrot.slane %v14141_v52, 4 }
 0xf0b   : > { %8436 = vmatpush.bf16.msrb.mxu2 %v9870_v8  ;;  %8376 = vmatpush.bf16.msrb.mxu0 %v10282_v24  ;;  %v6509_v17 = vsel %vm479_vm3, %v15785_v19, %v6496_v38  ;;  %v5699_v35 = vrot.slane %v5687_v53, 4  ;;  %v6331_v40 = vsel %vm479_vm3, %v15787_v45, %v6316_v3  ;;  %v15788_v8 = vld [vmem:[#allocation21_spill] sm:$0xff]  ;;  %v9822_v19 = vor.u32 %v10560_v61, %v9819_v26 }
 0xf0c   : > { %v6510_v23 = vsel %vm1176_vm6, %v15784_v62, %v6509_v17  ;;  %v10105_v49 = vld [vmem:[#allocation2 + $0x248] sm:$0xf]  ;;  %v6332_v9 = vsel %vm1266_vm7, %v15786_v12, %v6331_v40  ;;  %v15789_v46 = vrot.slane %v15788_v8, 4  ;;  %v8070_v29 = vadd.f32 %v8069_v60, %v8041_v63  ;;  %vm15790_vm6 = vmmov %vm15742_vm2  ;;  %v15791_v12 = vld [vmem:[#allocation22_spill] sm:$0xff] }
 0xf0d   : > { %6530 = vst [vmem:[#allocation2 + $0x398] sm:$0xff] %v6510_v23  ;;  %v10106_v15 = vor.u32 %v10634_v11, %v10105_v49  ;;  %v15792_v45 = vrot.slane %v15791_v12, 4  ;;  %v10249_v63 = vld [vmem:[#allocation2 + $0x368] sm:$0xf] }
 0xf0e   : > { %v5715_v48 = vsel %vm479_vm3, %v15789_v46, %v5699_v35  ;;  %6348 = vst [vmem:[#allocation2 + $0x338] sm:$0xff] %v6332_v9  ;;  %v10670_v9 = vld [vmem:[#allocation2 + $0x374] sm:$0xf0]  ;;  %v10233_v61 = vld [vmem:[#allocation2 + $0x348] sm:$0xf] }
 0xf0f   : > { %8437 = vmatpush.bf16.msrb.mxu2 %v9854_v5  ;;  %v5716_v24 = vsel %vm4492_vm11, %v15788_v8, %v5715_v48  ;;  %8350 = vmatpush.bf16.msrb.mxu3 %v10106_v15  ;;  %v10265_v49 = vld [vmem:[#allocation2 + $0x388] sm:$0xf]  ;;  %v8042_v15 = vpop.f32.mrf.mxu0 }
 0xf10   : > { %5732 = vst [vmem:[#allocation2 + $0x238] sm:$0xff] %v5716_v24  ;;  %v6946_v38 = vpop.permute.xlu1 %6945  ;;  %v6286_v62 = vpop.permute.xlu2 %6285  ;;  %10388 = vmatmul.msk.bf16.gmra.mxu0 %vm15790_vm6, %v14598_v39  ;;  %v10089_v48 = vld [vmem:[#allocation2 + $0x228] sm:$0xf] }
 0xf11   : > { %v6961_v58 = vrot.slane %v6946_v38, 4  ;;  %v8098_v5 = vpop.f32.mrf.mxu2  ;;  %v6307_v3 = vrot.slane %v6286_v62, 4  ;;  %v8013_v8 = vpop.f32.mrf.mxu3 }
 0xf12   : > { %v5669_v53 = vpop.permute.xlu0 %5668  ;;  %v14729_v20 = vadd.f32 %v8098_v5, %v8070_v29  ;;  %8300 = vmatmul.bf16.gmra.mxu1 %v14314_v44  ;;  %v8043_v21 = vadd.f32 %v8042_v15, %v8013_v8  ;;  %v8071_v38 = vpop.f32.mrf.mxu1 }
 0xf13   : > { %8438 = vmatpush.bf16.msrb.mxu2 %v9838_v41  ;;  %v6975_v17 = vsel %vm479_vm3, %v6960_v6, %v6961_v58  ;;  %v5690_v35 = vrot.slane %v5669_v53, 4  ;;  %v6319_v40 = vsel %vm479_vm3, %v15792_v45, %v6307_v3  ;;  %v10250_v58 = vor.u32 %v10670_v9, %v10249_v63 }
 0xf14   : > { %v6976_v23 = vsel %vm390_vm0, %v14387_v28, %v6975_v17  ;;  %v10674_v11 = vld [vmem:[#allocation2 + $0x394] sm:$0xf0]  ;;  %8237 = vmatmul.bf16.vlgmr.msra.gmra.mxu3 %v14281_v47  ;;  %v6320_v28 = vsel %vm1266_vm7, %v15791_v12, %v6319_v40  ;;  %v8072_v29 = vadd.f32 %v8071_v38, %v8043_v21  ;;  %v15794_v17 = vrot.slane %v14173_v32, 4 }
 0xf15   : > { %6994 = vst [vmem:[#allocation2 + $0x468] sm:$0xff] %v6976_v23  ;;  %v10266_v6 = vor.u32 %v10674_v11, %v10265_v49  ;;  %v5703_v59 = vsel %vm479_vm3, %v15793_v16, %v5690_v35  ;;  %v10702_v23 = vld [vmem:[#allocation2 + $0x474] sm:$0xf0]  ;;  %v10379_v35 = vld [vmem:[#allocation2 + $0x478] sm:$0xf0] }
 0xf16   : > { %6342 = vst [vmem:[#allocation2 + $0x308] sm:$0xff] %v6320_v28  ;;  %v5704_v46 = vsel %vm4492_vm11, %v14141_v52, %v5703_v59 }
 0xf17   : > { %8439 = vmatpush.bf16.msrb.mxu2 %v9822_v19  ;;  %v10630_v41 = vld [vmem:[#allocation2 + $0x234] sm:$0xf0]  ;;  %8377 = vmatpush.bf16.msrb.mxu0 %v10266_v6  ;;  %5726 = vst [vmem:[#allocation2 + $0x208] sm:$0xff] %v5704_v46  ;;  %v8045_v46 = vpop.f32.mrf.mxu0 }
 0xf18   : > { %v10090_v24 = vor.u32 %v10630_v41, %v10089_v48  ;;  %v5675_v26 = vpop.permute.xlu1 %5674  ;;  %v6786_v62 = vpop.permute.xlu2 %6785  ;;  %v10666_v19 = vld [vmem:[#allocation2 + $0x354] sm:$0xf0] }
 0xf19   : > { %v5693_v60 = vrot.slane %v5675_v26, 4  ;;  %v8100_v5 = vpop.f32.mrf.mxu2  ;;  %v6804_v3 = vrot.slane %v6786_v62, 4  ;;  %v10234_v45 = vor.u32 %v10666_v19, %v10233_v61  ;;  %v8016_v9 = vpop.f32.mrf.mxu3  ;;  %v15796_v26 = vld [vmem:[#allocation18_spill] sm:$0xff]  ;;  %v10059_v19 = vld [vmem:[#allocation2 + $0x1f8] sm:$0xf0] }
 0xf1a   : > { %8351 = vmatpush.bf16.msrb.mxu3 %v10090_v24  ;;  %v6940_v53 = vpop.permute.xlu0 %6939  ;;  %v14750_v49 = vadd.f32 %v8100_v5, %v8072_v29  ;;  %8334 = vmatmul.bf16.gmra.mxu2 %v14389_v25  ;;  %v8046_v48 = vadd.f32 %v8045_v46, %v8016_v9  ;;  %v8074_v41 = vpop.f32.mrf.mxu1  ;;  %v15797_v63 = vrot.slane %v15796_v26, 4 }
 0xf1b   : > { %v5707_v52 = vsel %vm479_vm3, %v15794_v17, %v5693_v60  ;;  %8378 = vmatpush.bf16.msrb.mxu0 %v10250_v58  ;;  %v6958_v12 = vrot.slane %v6940_v53, 4  ;;  %v6817_v15 = vsel %vm479_vm3, %v6803_v30, %v6804_v3  ;;  %v10620_v60 = vld [vmem:[#allocation2 + $0x1ec] sm:$0xf]  ;;  %v15799_v17 = vrot.slane %v14475_v55, 4  ;;  %v10361_v3 = vld [vmem:[#allocation2 + $0x448] sm:$0xf] }
 0xf1c   : > { %v5708_v11 = vsel %vm4492_vm11, %v14173_v32, %v5707_v52  ;;  %v10377_v40 = vld [vmem:[#allocation2 + $0x468] sm:$0xf]  ;;  %v10700_v6 = vld [vmem:[#allocation2 + $0x46c] sm:$0xf]  ;;  %v6818_v59 = vsel %vm15795_vm1, %v14516_v37, %v6817_v15  ;;  %v8075_v37 = vadd.f32 %v8074_v41, %v8046_v48  ;;  %v10062_v53 = vor.u32 %v10620_v60, %v10059_v19 }
 0xf1d   : > { %5728 = vst [vmem:[#allocation2 + $0x218] sm:$0xff] %v5708_v11  ;;  %v10378_v28 = vor.u32 %v10702_v23, %v10377_v40  ;;  %v10382_v16 = vor.u32 %v10700_v6, %v10379_v35  ;;  %v6971_v32 = vsel %vm479_vm3, %v6957_v50, %v6958_v12  ;;  %v10043_v23 = vld [vmem:[#allocation2 + $0x1d8] sm:$0xf0] }
 0xf1e   : > { %6838 = vst [vmem:[#allocation2 + $0x418] sm:$0xff] %v6818_v59  ;;  %v6972_v8 = vsel %vm390_vm0, %v14450_v13, %v6971_v32  ;;  %v10073_v61 = vld [vmem:[#allocation2 + $0x208] sm:$0xf]  ;;  %vm15798_vm0 = vmmov %vm15795_vm1 }
 0xf1f   : > { %8379 = vmatpush.bf16.msrb.mxu0 %v10234_v45  ;;  %8407 = vmatpush.bf16.msrb.mxu1 %v10378_v28  ;;  %6992 = vst [vmem:[#allocation2 + $0x458] sm:$0xff] %v6972_v8  ;;  %vm15800_vm11 = vmmov %vm15798_vm0  ;;  %v10696_v45 = vld [vmem:[#allocation2 + $0x44c] sm:$0xf]  ;;  %v8047_v6 = vpop.f32.mrf.mxu0 }
 0xf20   : > { %8552 = vmatpush.bf16.msra.mxu2 %v10382_v16  ;;  %v6298_v30 = vpop.permute.xlu1 %6297  ;;  %10389 = vmatmul.msk.bf16.gmra.mxu0 %vm15798_vm0, %v14641_v56  ;;  %v10616_v8 = vld [vmem:[#allocation2 + $0x1cc] sm:$0xf]  ;;  %vm15802_vm5 = vmmov %vm15798_vm0 }
 0xf21   : > { %v6313_v21 = vrot.slane %v6298_v30, 4  ;;  %v8103_v24 = vpop.f32.mrf.mxu2  ;;  %v8018_v35 = vpop.f32.mrf.mxu3  ;;  %v10046_v30 = vor.u32 %v10616_v8, %v10043_v23  ;;  %v10608_v23 = vld [vmem:[#allocation2 + $0x18c] sm:$0xf]  ;;  %vm15807_vm10 = vmmov %vm15798_vm0 }
 0xf22   : > { %v6792_v38 = vpop.permute.xlu0 %6791  ;;  %v14772_v5 = vadd.f32 %v8103_v24, %v8075_v37  ;;  %8305 = vmatmul.bf16.gmra.mxu1 %v14362_v43  ;;  %v8048_v59 = vadd.f32 %v8047_v6, %v8018_v35  ;;  %v8076_v32 = vpop.f32.mrf.mxu1  ;;  %v10027_v24 = vld [vmem:[#allocation2 + $0x1b8] sm:$0xf0]  ;;  %vm15809_vm12 = vmmov %vm15798_vm0 }
 0xf23   : > { %v6327_v50 = vsel %vm479_vm3, %v15797_v63, %v6313_v21  ;;  %v6807_v58 = vrot.slane %v6792_v38, 4  ;;  %vm15811_vm13 = vmmov %vm15798_vm0 }
 0xf24   : > { %v6328_v13 = vsel %vm1266_vm7, %v15796_v26, %v6327_v50  ;;  %v10626_v29 = vld [vmem:[#allocation2 + $0x214] sm:$0xf0]  ;;  %8242 = vmatmul.bf16.gmra.mxu3 %v14324_v31  ;;  %v8077_v48 = vadd.f32 %v8076_v32, %v8048_v59  ;;  %vm15813_vm2 = vmmov %vm15798_vm0 }
 0xf25   : > { %6346 = vst [vmem:[#allocation2 + $0x328] sm:$0xff] %v6328_v13  ;;  %v10074_v62 = vor.u32 %v10626_v29, %v10073_v61  ;;  %v6821_v52 = vsel %vm479_vm3, %v15799_v17, %v6807_v58  ;;  %v10662_v50 = vld [vmem:[#allocation2 + $0x334] sm:$0xf0]  ;;  %v10612_v13 = vld [vmem:[#allocation2 + $0x1ac] sm:$0xf]  ;;  %v15803_v58 = vld [vmem:[#allocation20_spill] sm:$0xff] }
 0xf26   : > { %v6822_v11 = vsel %vm15800_vm11, %v14475_v55, %v6821_v52  ;;  %v10698_v12 = vld [vmem:[#allocation2 + $0x454] sm:$0xf0]  ;;  %v10363_v40 = vld [vmem:[#allocation2 + $0x458] sm:$0xf0]  ;;  %v15801_v55 = vrot.slane %v14398_v14, 4  ;;  %v15804_v61 = vrot.slane %v15803_v58, 4  ;;  %vm15814_vm4 = vmmov %vm15798_vm0 }
 0xf27   : > { %8352 = vmatpush.bf16.msrb.mxu3 %v10074_v62  ;;  %6840 = vst [vmem:[#allocation2 + $0x428] sm:$0xff] %v6822_v11  ;;  %v10362_v15 = vor.u32 %v10698_v12, %v10361_v3  ;;  %v10366_v28 = vor.u32 %v10696_v45, %v10363_v40  ;;  %v10030_v62 = vor.u32 %v10612_v13, %v10027_v24  ;;  %v10011_v17 = vld [vmem:[#allocation2 + $0x198] sm:$0xf0]  ;;  %v15805_v40 = vrot.slane %v14510_v51, 4  ;;  %v10201_v24 = vld [vmem:[#allocation2 + $0x308] sm:$0xf]  ;;  %vm15815_vm14 = vmmov %vm15798_vm0 }
 0xf28   : > { %v6798_v16 = vpop.permute.xlu1 %6797  ;;  %v10014_v45 = vor.u32 %v10608_v23, %v10011_v17  ;;  %v10596_v17 = vld [vmem:[#allocation2 + $0x12c] sm:$0xf]  ;;  %vm15817_vm8 = vmmov %vm15798_vm0 }
 0xf29   : > { %v6810_v9 = vrot.slane %v6798_v16, 4  ;;  %v8105_v46 = vpop.f32.mrf.mxu2  ;;  %8408 = vmatpush.bf16.msrb.mxu1 %v10362_v15  ;;  %8553 = vmatpush.bf16.msra.mxu2 %v10366_v28  ;;  %v9995_v28 = vld [vmem:[#allocation2 + $0x178] sm:$0xf0]  ;;  %vm15818_vm9 = vmmov %vm15798_vm0 }
 0xf2a   : > { %v6292_v21 = vpop.permute.xlu0 %6291  ;;  %v14786_v38 = vadd.f32 %v8105_v46, %v8077_v48  ;;  %8339 = vmatmul.bf16.gmra.mxu2 %v14463_v2  ;;  %v8021_v19 = vpop.f32.mrf.mxu3  ;;  %v10604_v48 = vld [vmem:[#allocation2 + $0x16c] sm:$0xf] }
 0xf2b   : > { %8461 = vmatpush.bf16.msra.mxu3 %v10062_v53  ;;  %v6825_v41 = vsel %vm479_vm3, %v15801_v55, %v6810_v9  ;;  %v6310_v26 = vrot.slane %v6292_v21, 4  ;;  %v10187_v21 = vld [vmem:[#allocation2 + $0x2f8] sm:$0xf0] }
 0xf2c   : > { %v6826_v37 = vsel %vm15802_vm5, %v14398_v14, %v6825_v41  ;;  %v10217_v63 = vld [vmem:[#allocation2 + $0x328] sm:$0xf]  ;;  %v8050_v3 = vpop.f32.mrf.mxu0  ;;  %v9998_v41 = vor.u32 %v10604_v48, %v9995_v28 }
 0xf2d   : > { %6842 = vst [vmem:[#allocation2 + $0x438] sm:$0xff] %v6826_v37  ;;  %v10218_v60 = vor.u32 %v10662_v50, %v10217_v63  ;;  %v6323_v29 = vsel %vm479_vm3, %v15804_v61, %v6310_v26  ;;  %v8051_v35 = vadd.f32 %v8050_v3, %v8021_v19  ;;  %v9979_v26 = vld [vmem:[#allocation2 + $0x158] sm:$0xf0]  ;;  %v10652_v50 = vld [vmem:[#allocation2 + $0x2ec] sm:$0xf] }
 0xf2e   : > { %v6324_v14 = vsel %vm1266_vm7, %v15803_v58, %v6323_v29  ;;  %v8079_v11 = vpop.f32.mrf.mxu1  ;;  %v10345_v15 = vld [vmem:[#allocation2 + $0x428] sm:$0xf]  ;;  %vm15806_vm7 = vmmov %vm15798_vm0  ;;  %v10692_v9 = vld [vmem:[#allocation2 + $0x42c] sm:$0xf]  ;;  %v10190_v13 = vor.u32 %v10652_v50, %v10187_v21 }
 0xf2f   : > { %8462 = vmatpush.bf16.msra.mxu3 %v10046_v30  ;;  %8380 = vmatpush.bf16.msrb.mxu0 %v10218_v60  ;;  %6344 = vst [vmem:[#allocation2 + $0x318] sm:$0xff] %v6324_v14  ;;  %v8080_v16 = vadd.f32 %v8079_v11, %v8051_v35  ;;  %v10600_v58 = vld [vmem:[#allocation2 + $0x14c] sm:$0xf]  ;;  %v10171_v14 = vld [vmem:[#allocation2 + $0x2d8] sm:$0xf0] }
 0xf30   : > { %v6780_v52 = vpop.permute.xlu1 %6779  ;;  %10390 = vmatmul.msk.bf16.gmra.mxu0 %vm15807_vm10, %v14684_v4  ;;  %v9982_v19 = vor.u32 %v10600_v58, %v9979_v26  ;;  %v10690_v3 = vld [vmem:[#allocation2 + $0x414] sm:$0xf0]  ;;  %v10592_v21 = vld [vmem:[#allocation2 + $0x10c] sm:$0xf]  ;;  %v10139_v26 = vld [vmem:[#allocation2 + $0x298] sm:$0xf0] }
 0xf31   : > { %v6801_v53 = vrot.slane %v6780_v52, 4  ;;  %v8108_v12 = vpop.f32.mrf.mxu2  ;;  %v10648_v52 = vld [vmem:[#allocation2 + $0x2cc] sm:$0xf] }
 0xf32   : > { %v14802_v55 = vadd.f32 %v8108_v12, %v8080_v16  ;;  %8310 = vmatmul.bf16.gmra.mxu1 %v14427_v18  ;;  %v10331_v12 = vld [vmem:[#allocation2 + $0x418] sm:$0xf0] }
 0xf33   : > { %8463 = vmatpush.bf16.msra.mxu3 %v10030_v62  ;;  %v6813_v6 = vsel %vm479_vm3, %v15805_v40, %v6801_v53  ;;  %v10315_v53 = vld [vmem:[#allocation2 + $0x3f8] sm:$0xf0]  ;;  %vm15808_vm3 = vmmov %vm15798_vm0 }
 0xf34   : > { %v6814_v59 = vsel %vm15806_vm7, %v14510_v51, %v6813_v6  ;;  %v10694_v32 = vld [vmem:[#allocation2 + $0x434] sm:$0xf0]  ;;  %v10347_v8 = vld [vmem:[#allocation2 + $0x438] sm:$0xf0]  ;;  %8247 = vmatmul.bf16.gmra.mxu3 %v14372_v34  ;;  %v8023_v51 = vpop.f32.mrf.mxu3  ;;  %v8052_v60 = vpop.f32.mrf.mxu0 }
 0xf35   : > { %6836 = vst [vmem:[#allocation2 + $0x408] sm:$0xff] %v6814_v59  ;;  %v10346_v46 = vor.u32 %v10694_v32, %v10345_v15  ;;  %v10350_v30 = vor.u32 %v10692_v9, %v10347_v8  ;;  %v8053_v61 = vadd.f32 %v8052_v60, %v8023_v51  ;;  %v9963_v15 = vld [vmem:[#allocation2 + $0x138] sm:$0xf0]  ;;  %v10644_v59 = vld [vmem:[#allocation2 + $0x2ac] sm:$0xf] }
 0xf36   : > { %v10658_v37 = vld [vmem:[#allocation2 + $0x314] sm:$0xf0]  ;;  %v8081_v29 = vpop.f32.mrf.mxu1  ;;  %v9966_v16 = vor.u32 %v10596_v17, %v9963_v15  ;;  %v10684_v32 = vld [vmem:[#allocation2 + $0x3ec] sm:$0xf]  ;;  %v9947_v8 = vld [vmem:[#allocation2 + $0x118] sm:$0xf0] }
 0xf37   : > { %8464 = vmatpush.bf16.msra.mxu3 %v10014_v45  ;;  %8409 = vmatpush.bf16.msrb.mxu1 %v10346_v46  ;;  %v10202_v63 = vor.u32 %v10658_v37, %v10201_v24  ;;  %v8082_v23 = vadd.f32 %v8081_v29, %v8053_v61  ;;  %v10174_v45 = vor.u32 %v10648_v52, %v10171_v14  ;;  %v10155_v46 = vld [vmem:[#allocation2 + $0x2b8] sm:$0xf0]  ;;  %v10640_v60 = vld [vmem:[#allocation2 + $0x28c] sm:$0xf] }
 0xf38   : > { %8554 = vmatpush.bf16.msra.mxu2 %v10350_v30  ;;  %v10318_v9 = vor.u32 %v10684_v32, %v10315_v53  ;;  %v10680_v30 = vld [vmem:[#allocation2 + $0x3cc] sm:$0xf]  ;;  %v9950_v37 = vor.u32 %v10592_v21, %v9947_v8  ;;  %v10142_v61 = vor.u32 %v10640_v60, %v10139_v26  ;;  %v10123_v29 = vld [vmem:[#allocation2 + $0x278] sm:$0xf0] }
 0xf39   : > { %v8110_v62 = vpop.f32.mrf.mxu2  ;;  %8381 = vmatpush.bf16.msrb.mxu0 %v10202_v63  ;;  %v10636_v14 = vld [vmem:[#allocation2 + $0x26c] sm:$0xf]  ;;  %v10267_v17 = vld [vmem:[#allocation2 + $0x398] sm:$0xf0] }
 0xf3a   : > { %v14805_v28 = vadd.f32 %v8110_v62, %v8082_v23  ;;  %8440 = vmatmul.bf16.vlgmr.msrb.gmra.mxu2 %v14267_v33  ;;  %v10299_v33 = vld [vmem:[#allocation2 + $0x3d8] sm:$0xf0]  ;;  %v10676_v62 = vld [vmem:[#allocation2 + $0x3ac] sm:$0xf] }
 0xf3b   : > { %8465 = vmatpush.bf16.msra.mxu3 %v9998_v41  ;;  %v10158_v41 = vor.u32 %v10644_v59, %v10155_v46  ;;  %v10302_v50 = vor.u32 %v10680_v30, %v10299_v33  ;;  %v10091_v59 = vld [vmem:[#allocation2 + $0x238] sm:$0xf0]  ;;  %v10668_v32 = vld [vmem:[#allocation2 + $0x36c] sm:$0xf] }
 0xf3c   : > { %v10329_v35 = vld [vmem:[#allocation2 + $0x408] sm:$0xf]  ;;  %v10688_v11 = vld [vmem:[#allocation2 + $0x40c] sm:$0xf]  ;;  %v10219_v60 = vld [vmem:[#allocation2 + $0x338] sm:$0xf0] }
 0xf3d   : > { %8490 = vmatpush.bf16.msra.mxu0 %v10190_v13  ;;  %v10330_v40 = vor.u32 %v10690_v3, %v10329_v35  ;;  %v10334_v6 = vor.u32 %v10688_v11, %v10331_v12  ;;  %v8151_v48 = vpop.f32.mrf.mxu0  ;;  %v10283_v13 = vld [vmem:[#allocation2 + $0x3b8] sm:$0xf0]  ;;  %v10126_v3 = vor.u32 %v10636_v14, %v10123_v29  ;;  %v10632_v35 = vld [vmem:[#allocation2 + $0x24c] sm:$0xf] }
 0xf3e   : > { %v8180_v51 = vpop.f32.mrf.mxu1  ;;  %v10672_v11 = vld [vmem:[#allocation2 + $0x38c] sm:$0xf]  ;;  %v10203_v29 = vld [vmem:[#allocation2 + $0x318] sm:$0xf0] }
 0xf3f   : > { %8466 = vmatpush.bf16.msra.mxu3 %v9982_v19  ;;  %8410 = vmatpush.bf16.msrb.mxu1 %v10330_v40  ;;  %v8181_v63 = vadd.f32 %v8180_v51, %v8151_v48  ;;  %v10286_v19 = vor.u32 %v10676_v62, %v10283_v13  ;;  %v10107_v40 = vld [vmem:[#allocation2 + $0x258] sm:$0xf0]  ;;  %v10628_v8 = vld [vmem:[#allocation2 + $0x22c] sm:$0xf] }
 0xf40   : > { %8555 = vmatpush.bf16.msra.mxu2 %v10334_v6  ;;  %8382 = vmatmul.bf16.vlgmr.msrb.gmra.mxu0 %v14281_v47  ;;  %v10251_v6 = vld [vmem:[#allocation2 + $0x378] sm:$0xf0]  ;;  %v10664_v46 = vld [vmem:[#allocation2 + $0x34c] sm:$0xf]  ;;  %v10094_v48 = vor.u32 %v10628_v8, %v10091_v59 }
 0xf41   : > { %8491 = vmatpush.bf16.msra.mxu0 %v10174_v45  ;;  %v8209_v24 = vpop.f32.mrf.mxu2  ;;  %v10270_v45 = vor.u32 %v10672_v11, %v10267_v17  ;;  %v10075_v51 = vld [vmem:[#allocation2 + $0x218] sm:$0xf0]  ;;  %v10624_v33 = vld [vmem:[#allocation2 + $0x20c] sm:$0xf] }
 0xf42   : > { %v14809_v58 = vadd.f32 %v8209_v24, %v8181_v63  ;;  %10391 = vmatmul.msk.bf16.vlgmr.msrb.gmra.mxu1 %vm15808_vm3, %v14555_v54  ;;  %v10235_v24 = vld [vmem:[#allocation2 + $0x358] sm:$0xf0]  ;;  %v10660_v63 = vld [vmem:[#allocation2 + $0x32c] sm:$0xf] }
 0xf43   : > { %8467 = vmatpush.bf16.msra.mxu3 %v9966_v16  ;;  %8519 = vmatpush.bf16.msra.mxu1 %v10318_v9  ;;  %v10110_v16 = vor.u32 %v10632_v35, %v10107_v40  ;;  %v10254_v9 = vor.u32 %v10668_v32, %v10251_v6  ;;  %v10238_v26 = vor.u32 %v10664_v46, %v10235_v24 }
 0xf44   : > { %8252 = vmatmul.bf16.gmra.mxu3 %v14439_v1  ;;  %v10222_v13 = vor.u32 %v10660_v63, %v10219_v60 }
 0xf45   : > { %8492 = vmatpush.bf16.msra.mxu0 %v10158_v41  ;;  %v8153_v52 = vpop.f32.mrf.mxu0 }
 0xf46   : > { %v8182_v53 = vpop.f32.mrf.mxu1 }
 0xf47   : > { %8468 = vmatpush.bf16.msra.mxu3 %v9950_v37  ;;  %8520 = vmatpush.bf16.msra.mxu1 %v10302_v50  ;;  %v8183_v12 = vadd.f32 %v8182_v53, %v8153_v52  ;;  %v10078_v50 = vor.u32 %v10624_v33, %v10075_v51  ;;  %v10656_v52 = vld [vmem:[#allocation2 + $0x30c] sm:$0xf] }
 0xf48   : > { %v10206_v53 = vor.u32 %v10656_v52, %v10203_v29 }
 0xf49   : > { %8493 = vmatpush.bf16.msra.mxu0 %v10142_v61  ;;  %v8211_v23 = vpop.f32.mrf.mxu2 }
 0xf4a   : > { %v14814_v15 = vadd.f32 %v8211_v23, %v8183_v12  ;;  %8445 = vmatmul.bf16.gmra.mxu2 %v14314_v44 }
 0xf4b   : > { %8521 = vmatpush.bf16.msra.mxu1 %v10286_v19 }
 0xf4d   : > { %8494 = vmatpush.bf16.msra.mxu0 %v10126_v3  ;;  %v8156_v30 = vpop.f32.mrf.mxu0 }
 0xf4f   : > { %8522 = vmatpush.bf16.msra.mxu1 %v10270_v45  ;;  %v8185_v41 = vpop.f32.mrf.mxu1 }
 0xf50   : > { %v8186_v37 = vadd.f32 %v8185_v41, %v8156_v30  ;;  %8387 = vmatmul.bf16.gmra.mxu0 %v14324_v31 }
 0xf51   : > { %8495 = vmatpush.bf16.msra.mxu0 %v10110_v16  ;;  %v8214_v21 = vpop.f32.mrf.mxu2 }
 0xf52   : > { %v14818_v44 = vadd.f32 %v8214_v21, %v8186_v37  ;;  %10392 = vmatmul.msk.bf16.gmra.mxu1 %vm15809_vm12, %v14598_v39 }
 0xf53   : > { %8523 = vmatpush.bf16.msra.mxu1 %v10254_v9 }
 0xf54   : > { %8353 = vmatmul.bf16.vlgmr.msrb.gmra.mxu3 %v14208_v57 }
 0xf55   : > { %8496 = vmatpush.bf16.msra.mxu0 %v10094_v48  ;;  %v8158_v62 = vpop.f32.mrf.mxu0 }
 0xf57   : > { %8524 = vmatpush.bf16.msra.mxu1 %v10238_v26  ;;  %v8122_v61 = vpop.f32.mrf.mxu3  ;;  %v8187_v14 = vpop.f32.mrf.mxu1 }
 0xf58   : > { %v14824_v19 = vadd.f32 %v8122_v61, %v14689_v10  ;;  %v8188_v3 = vadd.f32 %v8187_v14, %v8158_v62 }
 0xf59   : > { %8497 = vmatpush.bf16.msra.mxu0 %v10078_v50  ;;  %v8216_v17 = vpop.f32.mrf.mxu2 }
 0xf5a   : > { %15810 = vst [vmem:[#allocation11_spill] sm:$0xff] %v14824_v19  ;;  %v14826_v23 = vadd.f32 %v8216_v17, %v8188_v3  ;;  %8450 = vmatmul.bf16.gmra.mxu2 %v14362_v43 }
 0xf5b   : > { %8525 = vmatpush.bf16.msra.mxu1 %v10222_v13 }
 0xf5d   : > { %v8161_v12 = vpop.f32.mrf.mxu0 }
 0xf5f   : > { %8526 = vmatpush.bf16.msra.mxu1 %v10206_v53  ;;  %v8124_v35 = vpop.f32.mrf.mxu3  ;;  %v8190_v45 = vpop.f32.mrf.mxu1 }
 0xf60   : > { %v14830_v11 = vadd.f32 %v8124_v35, %v14711_v36  ;;  %v8191_v40 = vadd.f32 %v8190_v45, %v8161_v12  ;;  %8392 = vmatmul.bf16.gmra.mxu0 %v14372_v34 }
 0xf61   : > { %v8219_v10 = vpop.f32.mrf.mxu2 }
 0xf62   : > { %v14833_v6 = vadd.f32 %v8219_v10, %v8191_v40  ;;  %10393 = vmatmul.msk.bf16.gmra.mxu1 %vm15811_vm13, %v14641_v56 }
 0xf64   : > { %8358 = vmatmul.bf16.gmra.mxu3 %v14343_v42 }
 0xf65   : > { %v8163_v59 = vpop.f32.mrf.mxu0 }
 0xf67   : > { %v8127_v16 = vpop.f32.mrf.mxu3  ;;  %v8192_v36 = vpop.f32.mrf.mxu1 }
 0xf68   : > { %v14839_v43 = vadd.f32 %v8127_v16, %v14729_v20  ;;  %v8193_v32 = vadd.f32 %v8192_v36, %v8163_v59 }
 0xf69   : > { %v8221_v9 = vpop.f32.mrf.mxu2 }
 0xf6a   : > { %v14841_v8 = vadd.f32 %v8221_v9, %v8193_v32  ;;  %8455 = vmatmul.bf16.gmra.mxu2 %v14427_v18 }
 0xf6d   : > { %v8166_v48 = vpop.f32.mrf.mxu0 }
 0xf6f   : > { %v8129_v46 = vpop.f32.mrf.mxu3  ;;  %v8195_v41 = vpop.f32.mrf.mxu1 }
 0xf70   : > { %v14845_v30 = vadd.f32 %v8129_v46, %v14750_v49  ;;  %v8196_v51 = vadd.f32 %v8195_v41, %v8166_v48  ;;  %8397 = vmatmul.bf16.gmra.mxu0 %v14439_v1 }
 0xf71   : > { %v8224_v21 = vpop.f32.mrf.mxu2 }
 0xf72   : > { %15812 = vst [vmem:[#allocation10_spill] sm:$0xff] %v14845_v30  ;;  %v14849_v20 = vadd.f32 %v8224_v21, %v8196_v51  ;;  %10394 = vmatmul.msk.bf16.gmra.mxu1 %vm15813_vm2, %v14684_v4 }
 0xf74   : > { %8363 = vmatmul.bf16.gmra.mxu3 %v14396_v7 }
 0xf75   : > { %v8168_v37 = vpop.f32.mrf.mxu0 }
 0xf77   : > { %v8132_v24 = vpop.f32.mrf.mxu3  ;;  %v8197_v49 = vpop.f32.mrf.mxu1 }
 0xf78   : > { %v14854_v18 = vadd.f32 %v8132_v24, %v14772_v5  ;;  %v8198_v33 = vadd.f32 %v8197_v49, %v8168_v37 }
 0xf79   : > { %v8226_v26 = vpop.f32.mrf.mxu2 }
 0xf7a   : > { %v14856_v63 = vadd.f32 %v8226_v26, %v8198_v33  ;;  %10395 = vmatmul.msk.bf16.vlgmr.msra.gmra.mxu2 %vm15814_vm4, %v14555_v54 }
 0xf7d   : > { %v8267_v13 = vpop.f32.mrf.mxu0 }
 0xf7f   : > { %v8134_v50 = vpop.f32.mrf.mxu3  ;;  %v8296_v61 = vpop.f32.mrf.mxu1 }
 0xf80   : > { %v14861_v60 = vadd.f32 %v8134_v50, %v14786_v38  ;;  %8498 = vmatmul.bf16.vlgmr.msra.gmra.mxu0 %v14208_v57 }
 0xf81   : > { %v8325_v29 = vpop.f32.mrf.mxu2 }
 0xf82   : > { %v14863_v62 = vadd.f32 %v8325_v29, %v8296_v61  ;;  %8527 = vmatmul.bf16.vlgmr.msra.gmra.mxu1 %v14281_v47 }
 0xf84   : > { %8368 = vmatmul.bf16.gmra.mxu3 %v14470_v22 }
 0xf85   : > { %v8269_v54 = vpop.f32.mrf.mxu0 }
 0xf87   : > { %v8137_v5 = vpop.f32.mrf.mxu3  ;;  %v8298_v17 = vpop.f32.mrf.mxu1 }
 0xf88   : > { %v14869_v14 = vadd.f32 %v8137_v5, %v14802_v55 }
 0xf89   : > { %v8327_v52 = vpop.f32.mrf.mxu2 }
 0xf8a   : > { %v14871_v38 = vadd.f32 %v8327_v52, %v8298_v17  ;;  %10396 = vmatmul.msk.bf16.gmra.mxu2 %vm15815_vm14, %v14598_v39 }
 0xf8d   : > { %v8272_v57 = vpop.f32.mrf.mxu0 }
 0xf8f   : > { %v8139_v3 = vpop.f32.mrf.mxu3  ;;  %v8301_v35 = vpop.f32.mrf.mxu1 }
 0xf90   : > { %v14876_v53 = vadd.f32 %v8139_v3, %v14805_v28  ;;  %8503 = vmatmul.bf16.gmra.mxu0 %v14343_v42 }
 0xf91   : > { %v8330_v12 = vpop.f32.mrf.mxu2 }
 0xf92   : > { %v14878_v47 = vadd.f32 %v8330_v12, %v8301_v35  ;;  %8532 = vmatmul.bf16.gmra.mxu1 %v14324_v31 }
 0xf94   : > { %8469 = vmatmul.bf16.vlgmr.msra.gmra.mxu3 %v14292_v0 }
 0xf95   : > { %v8274_v40 = vpop.f32.mrf.mxu0 }
 0xf97   : > { %v8238_v55 = vpop.f32.mrf.mxu3  ;;  %v8303_v39 = vpop.f32.mrf.mxu1 }
 0xf98   : > { %v8239_v45 = vadd.f32 %v8238_v55, %v14809_v58 }
 0xf99   : > { %v8332_v10 = vpop.f32.mrf.mxu2 }
 0xf9a   : > { %v14884_v16 = vadd.f32 %v8267_v13, %v8239_v45  ;;  %v14886_v28 = vadd.f32 %v8332_v10, %v8303_v39  ;;  %10397 = vmatmul.msk.bf16.gmra.mxu2 %vm15817_vm8, %v14641_v56 }
 0xf9c   : > { %15816 = vst [vmem:[#allocation13_spill] sm:$0xff] %v14884_v16 }
 0xf9d   : > { %v8277_v36 = vpop.f32.mrf.mxu0 }
 0xf9f   : > { %v8240_v59 = vpop.f32.mrf.mxu3  ;;  %v8306_v0 = vpop.f32.mrf.mxu1 }
 0xfa0   : > { %v8241_v42 = vadd.f32 %v8240_v59, %v14814_v15  ;;  %8508 = vmatmul.bf16.gmra.mxu0 %v14396_v7 }
 0xfa1   : > { %v8335_v32 = vpop.f32.mrf.mxu2 }
 0xfa2   : > { %v14891_v31 = vadd.f32 %v8269_v54, %v8241_v42  ;;  %v14893_v9 = vadd.f32 %v8335_v32, %v8306_v0  ;;  %8537 = vmatmul.bf16.gmra.mxu1 %v14372_v34 }
 0xfa4   : > { %8474 = vmatmul.bf16.gmra.mxu3 %v14338_v27 }
 0xfa5   : > { %v8279_v56 = vpop.f32.mrf.mxu0 }
 0xfa7   : > { %v8243_v58 = vpop.f32.mrf.mxu3  ;;  %v8308_v48 = vpop.f32.mrf.mxu1 }
 0xfa8   : > { %v8244_v46 = vadd.f32 %v8243_v58, %v14818_v44 }
 0xfa9   : > { %v8337_v41 = vpop.f32.mrf.mxu2 }
 0xfaa   : > { %v14899_v15 = vadd.f32 %v8272_v57, %v8244_v46  ;;  %v14901_v21 = vadd.f32 %v8337_v41, %v8308_v48  ;;  %10398 = vmatmul.msk.bf16.gmra.mxu2 %vm15818_vm9, %v14684_v4 }
 0xfad   : > { %v8282_v24 = vpop.f32.mrf.mxu0 }
 0xfaf   : > { %v8245_v51 = vpop.f32.mrf.mxu3  ;;  %v8311_v27 = vpop.f32.mrf.mxu1 }
 0xfb0   : > { %v8246_v7 = vadd.f32 %v8245_v51, %v14826_v23  ;;  %8513 = vmatmul.bf16.gmra.mxu0 %v14470_v22 }
 0xfb1   : > { %v8340_v37 = vpop.f32.mrf.mxu2 }
 0xfb2   : > { %v14906_v34 = vadd.f32 %v8274_v40, %v8246_v7  ;;  %v14908_v49 = vadd.f32 %v8340_v37, %v8311_v27  ;;  %8542 = vmatmul.bf16.gmra.mxu1 %v14439_v1 }
 0xfb4   : > { %15819 = vst [vmem:[#allocation6_spill] sm:$0xff] %v14906_v34  ;;  %8479 = vmatmul.bf16.gmra.mxu3 %v14389_v25 }
 0xfb5   : > { %v8284_v4 = vpop.f32.mrf.mxu0 }
 0xfb7   : > { %v8248_v44 = vpop.f32.mrf.mxu3  ;;  %v8313_v33 = vpop.f32.mrf.mxu1 }
 0xfb8   : > { %v8249_v26 = vadd.f32 %v8248_v44, %v14833_v6 }
 0xfb9   : > { %v8342_v50 = vpop.f32.mrf.mxu2 }
 0xfba   : > { %v14914_v23 = vadd.f32 %v8277_v36, %v8249_v26  ;;  %v14916_v13 = vadd.f32 %v8342_v50, %v8313_v33 }
 0xfbd   : > { %v8383_v5 = vpop.f32.mrf.mxu0 }
 0xfbf   : > { %v8250_v61 = vpop.f32.mrf.mxu3  ;;  %v8412_v25 = vpop.f32.mrf.mxu1 }
 0xfc0   : > { %v8251_v29 = vadd.f32 %v8250_v61, %v14841_v8 }
 0xfc1   : > { %v14919_v54 = vpop.f32.mrf.mxu2 }
 0xfc2   : > { %v14921_v22 = vadd.f32 %v8279_v56, %v8251_v29 }
 0xfc4   : > { %8484 = vmatmul.bf16.gmra.mxu3 %v14463_v2 }
 0xfc5   : > { %v8385_v17 = vpop.f32.mrf.mxu0 }
 0xfc7   : > { %v8253_v1 = vpop.f32.mrf.mxu3  ;;  %v8414_v57 = vpop.f32.mrf.mxu1 }
 0xfc8   : > { %v8254_v6 = vadd.f32 %v8253_v1, %v14849_v20 }
 0xfc9   : > { %v14925_v52 = vpop.f32.mrf.mxu2 }
 0xfca   : > { %v14927_v3 = vadd.f32 %v8282_v24, %v8254_v6 }
 0xfcd   : > { %v8388_v12 = vpop.f32.mrf.mxu0 }
 0xfcf   : > { %v8255_v35 = vpop.f32.mrf.mxu3  ;;  %v8417_v45 = vpop.f32.mrf.mxu1 }
 0xfd0   : > { %v8256_v8 = vadd.f32 %v8255_v35, %v14856_v63 }
 0xfd1   : > { %v14932_v40 = vpop.f32.mrf.mxu2 }
 0xfd2   : > { %v14930_v55 = vadd.f32 %v8284_v4, %v8256_v8 }
 0xfd5   : > { %v8390_v10 = vpop.f32.mrf.mxu0 }
 0xfd7   : > { %v8354_v39 = vpop.f32.mrf.mxu3  ;;  %v8419_v59 = vpop.f32.mrf.mxu1 }
 0xfd8   : > { %v8355_v2 = vadd.f32 %v8354_v39, %v14863_v62 }
 0xfd9   : > { %v14937_v36 = vpop.f32.mrf.mxu2 }
 0xfda   : > { %v8384_v20 = vadd.f32 %v8383_v5, %v8355_v2 }
 0xfdc   : > { %v14935_v42 = vadd.f32 %v8412_v25, %v8384_v20 }
 0xfdd   : > { %v8393_v58 = vpop.f32.mrf.mxu0 }
 0xfde   : > { %15820 = vst [vmem:[#allocation7_spill] sm:$0xff] %v14935_v42 }
 0xfdf   : > { %v8356_v0 = vpop.f32.mrf.mxu3  ;;  %v8422_v56 = vpop.f32.mrf.mxu1 }
 0xfe0   : > { %v8357_v32 = vadd.f32 %v8356_v0, %v14871_v38 }
 0xfe1   : > { %v14942_v41 = vpop.f32.mrf.mxu2 }
 0xfe2   : > { %v8386_v63 = vadd.f32 %v8385_v17, %v8357_v32 }
 0xfe4   : > { %v14940_v46 = vadd.f32 %v8414_v57, %v8386_v63 }
 0xfe5   : > { %v8395_v24 = vpop.f32.mrf.mxu0 }
 0xfe6   : > { %15821 = vst [vmem:[#allocation16_spill] sm:$0xff] %v14940_v46 }
 0xfe7   : > { %v8359_v48 = vpop.f32.mrf.mxu3  ;;  %v8424_v37 = vpop.f32.mrf.mxu1 }
 0xfe8   : > { %v8360_v62 = vadd.f32 %v8359_v48, %v14878_v47 }
 0xfe9   : > { %v14948_v26 = vpop.f32.mrf.mxu2 }
 0xfea   : > { %v8389_v51 = vadd.f32 %v8388_v12, %v8360_v62 }
 0xfec   : > { %v14945_v7 = vadd.f32 %v8417_v45, %v8389_v51 }
 0xfed   : > { %v8398_v50 = vpop.f32.mrf.mxu0 }
 0xfef   : > { %v8361_v27 = vpop.f32.mrf.mxu3  ;;  %v8427_v29 = vpop.f32.mrf.mxu1 }
 0xff0   : > { %v8362_v44 = vadd.f32 %v8361_v27, %v14886_v28 }
 0xff1   : > { %v14953_v47 = vpop.f32.mrf.mxu2 }
 0xff2   : > { %v8391_v38 = vadd.f32 %v8390_v10, %v8362_v44 }
 0xff4   : > { %v14950_v4 = vadd.f32 %v8419_v59, %v8391_v38 }
 0xff5   : > { %v8400_v17 = vpop.f32.mrf.mxu0 }
 0xff6   : > { %15822 = vst [vmem:[#allocation12_spill] sm:$0xff] %v14950_v4 }
 0xff7   : > { %v8364_v33 = vpop.f32.mrf.mxu3  ;;  %v8429_v57 = vpop.f32.mrf.mxu1 }
 0xff8   : > { %v8365_v61 = vadd.f32 %v8364_v33, %v14893_v9 }
 0xff9   : > { %v14960_v8 = vpop.f32.mrf.mxu2 }
 0xffa   : > { %v8394_v5 = vadd.f32 %v8393_v58, %v8365_v61 }
 0xffc   : > { %v14955_v25 = vadd.f32 %v8422_v56, %v8394_v5 }
 0xffd   : > { %v8499_v39 = vpop.f32.mrf.mxu0 }
 0xfff   : > { %v8366_v1 = vpop.f32.mrf.mxu3  ;;  %v8528_v10 = vpop.f32.mrf.mxu1 }
0x1000   : > { %v8367_v6 = vadd.f32 %v8366_v1, %v14901_v21 }
0x1001   : > { %v8557_v59 = vpop.f32.mrf.mxu2 }
0x1002   : > { %v8396_v28 = vadd.f32 %v8395_v24, %v8367_v6 }
0x1004   : > { %v14958_v35 = vadd.f32 %v8424_v37, %v8396_v28 }
0x1005   : > { %v8501_v63 = vpop.f32.mrf.mxu0 }
0x1007   : > { %v8369_v12 = vpop.f32.mrf.mxu3  ;;  %v8530_v56 = vpop.f32.mrf.mxu1 }
0x1008   : > { %v8370_v45 = vadd.f32 %v8369_v12, %v14908_v49  ;;  %v8577_v49 = vadd.f32 %v14884_v16, %v14824_v19 }
0x1009   : > { %v8559_v62 = vpop.f32.mrf.mxu2 }
0x100a   : > { %v8399_v9 = vadd.f32 %v8398_v50, %v8370_v45  ;;  %v8578_v27 = vadd.f32 %v8577_v49, %v14935_v42 }
0x100c   : > { %v14963_v2 = vadd.f32 %v8427_v29, %v8399_v9  ;;  %v8582_v29 = vadd.f32 %v14891_v31, %v14830_v11  ;;  %v8587_v9 = vadd.f32 %v14899_v15, %v14839_v43 }
0x100e   : > { %v8583_v1 = vadd.f32 %v8582_v29, %v14940_v46 }
0x100f   : > { %v8371_v20 = vpop.f32.mrf.mxu3  ;;  %v8533_v50 = vpop.f32.mrf.mxu1 }
0x1010   : > { %v8372_v0 = vadd.f32 %v8371_v20, %v14916_v13  ;;  %v8504_v13 = vpop.f32.mrf.mxu0  ;;  %v8588_v20 = vadd.f32 %v8587_v9, %v14945_v7 }
0x1012   : > { %v8401_v21 = vadd.f32 %v8400_v17, %v8372_v0 }
0x1014   : > { %v14966_v32 = vadd.f32 %v8429_v57, %v8401_v21 }
0x1017   : > { %v8470_v58 = vpop.f32.mrf.mxu3  ;;  %v8535_v45 = vpop.f32.mrf.mxu1 }
0x1018   : > { %v8471_v48 = vadd.f32 %v8470_v58, %v14919_v54  ;;  %v8562_v54 = vpop.f32.mrf.mxu2 }
0x101a   : > { %v8500_v51 = vadd.f32 %v8499_v39, %v8471_v48 }
0x101c   : > { %v8529_v24 = vadd.f32 %v8528_v10, %v8500_v51 }
0x101e   : > { %v14972_v37 = vadd.f32 %v8557_v59, %v8529_v24 }
0x101f   : > { %v8472_v44 = vpop.f32.mrf.mxu3 }
0x1020   : > { %v8473_v38 = vadd.f32 %v8472_v44, %v14925_v52  ;;  %v8579_v33 = vadd.f32 %v8578_v27, %v14972_v37  ;;  %v8506_v52 = vpop.f32.mrf.mxu0  ;;  %v8564_v10 = vpop.f32.mrf.mxu2 }
0x1022   : > { %v8502_v61 = vadd.f32 %v8501_v63, %v8473_v38  ;;  %8580 = vadd.xlane.f32.xlu0 %v8579_v33  ;;  %v8597_v38 = vadd.f32 %v14914_v23, %v14854_v18 }
0x1024   : > { %v8531_v5 = vadd.f32 %v8530_v56, %v8502_v61  ;;  %v8592_v56 = vadd.f32 %v14906_v34, %v14845_v30  ;;  %v8598_v61 = vadd.f32 %v8597_v38, %v14955_v25 }
0x1026   : > { %v14979_v6 = vadd.f32 %v8559_v62, %v8531_v5  ;;  %v8538_v62 = vpop.f32.mrf.mxu1  ;;  %v8593_v51 = vadd.f32 %v8592_v56, %v14950_v4 }
0x1027   : > { %v8475_v17 = vpop.f32.mrf.mxu3 }
0x1028   : > { %v8476_v28 = vadd.f32 %v8475_v17, %v14932_v40  ;;  %v8584_v57 = vadd.f32 %v8583_v1, %v14979_v6  ;;  %v8509_v58 = vpop.f32.mrf.mxu0  ;;  %v8567_v27 = vpop.f32.mrf.mxu2 }
0x102a   : > { %v8505_v12 = vadd.f32 %v8504_v13, %v8476_v28  ;;  %8585 = vadd.xlane.f32.xlu1 %v8584_v57  ;;  %v8602_v57 = vadd.f32 %v14921_v22, %v14861_v60 }
0x102c   : > { %v8534_v39 = vadd.f32 %v8533_v50, %v8505_v12  ;;  %v8603_v12 = vadd.f32 %v8602_v57, %v14958_v35  ;;  %v8612_v57 = vadd.f32 %v14930_v55, %v14876_v53 }
0x102e   : > { %v14986_v59 = vadd.f32 %v8562_v54, %v8534_v39  ;;  %v8540_v5 = vpop.f32.mrf.mxu1 }
0x102f   : > { %v8477_v0 = vpop.f32.mrf.mxu3 }
0x1030   : > { %v8478_v21 = vadd.f32 %v8477_v0, %v14937_v36  ;;  %v8589_v40 = vadd.f32 %v8588_v20, %v14986_v59  ;;  %v8511_v50 = vpop.f32.mrf.mxu0 }
0x1032   : > { %v8507_v63 = vadd.f32 %v8506_v52, %v8478_v21  ;;  %8590 = vadd.xlane.f32.xlu2 %v8589_v40  ;;  %v8625_v21 = vmul.f32 %v14824_v19, %v14824_v19  ;;  %v8627_v40 = vmul.f32 %v14935_v42, %v14935_v42 }
0x1034   : > { %v8536_v48 = vadd.f32 %v8535_v45, %v8507_v63 }
0x1036   : > { %v14993_v49 = vadd.f32 %v8564_v10, %v8536_v48  ;;  %v8626_v10 = vmul.f32 %v14884_v16, %v14884_v16  ;;  %v8543_v0 = vpop.f32.mrf.mxu1  ;;  %v8607_v48 = vadd.f32 %v14927_v3, %v14869_v14 }
0x1037   : > { %v8480_v24 = vpop.f32.mrf.mxu3 }
0x1038   : > { %15823 = vst [vmem:[#allocation14_spill] sm:$0xff] %v14993_v49  ;;  %v8481_v44 = vadd.f32 %v8480_v24, %v14942_v41  ;;  %v8594_v36 = vadd.f32 %v8593_v51, %v14993_v49  ;;  %v8569_v41 = vpop.f32.mrf.mxu2  ;;  %v8514_v39 = vpop.f32.mrf.mxu0  ;;  %v8657_v56 = vadd.f32 %v8626_v10, %v8625_v21  ;;  %v8608_v51 = vadd.f32 %v8607_v48, %v14963_v2 }
0x1039   : > { %v8633_v48 = vmul.f32 %v14839_v43, %v14839_v43 }
0x103a   : > { %v8510_v13 = vadd.f32 %v8509_v58, %v8481_v44  ;;  %8595 = vadd.xlane.f32.xlu0 %v8594_v36  ;;  %v8638_v36 = vmul.f32 %v14906_v34, %v14906_v34 }
0x103c   : > { %v8539_v33 = vadd.f32 %v8538_v62, %v8510_v13  ;;  %v8628_v62 = vmul.f32 %v14972_v37, %v14972_v37 }
0x103e   : > { %v15000_v54 = vadd.f32 %v8567_v27, %v8539_v33  ;;  %v8658_v27 = vadd.f32 %v8657_v56, %v8627_v40  ;;  %v8634_v40 = vmul.f32 %v14899_v15, %v14899_v15 }
0x103f   : > { %v8482_v29 = vpop.f32.mrf.mxu3 }
0x1040   : > { %v8483_v1 = vadd.f32 %v8482_v29, %v14948_v26  ;;  %v8599_v17 = vadd.f32 %v8598_v61, %v15000_v54  ;;  %v8572_v58 = vpop.f32.mrf.mxu2  ;;  %v8659_v38 = vadd.f32 %v8658_v27, %v8628_v62  ;;  %v8516_v61 = vpop.f32.mrf.mxu0  ;;  %v8637_v29 = vmul.f32 %v14845_v30, %v14845_v30 }
0x1041   : > { %v8642_v62 = vmul.f32 %v14914_v23, %v14914_v23  ;;  %v8635_v27 = vmul.f32 %v14945_v7, %v14945_v7 }
0x1042   : > { %v8512_v28 = vadd.f32 %v8511_v50, %v8483_v1  ;;  %8600 = vadd.xlane.f32.xlu1 %v8599_v17  ;;  %v8630_v50 = vmul.f32 %v14891_v31, %v14891_v31  ;;  %v8629_v17 = vmul.f32 %v14830_v11, %v14830_v11 }
0x1044   : > { %v8541_v52 = vadd.f32 %v8540_v5, %v8512_v28  ;;  %v8639_v5 = vmul.f32 %v14950_v4, %v14950_v4  ;;  %v8672_v28 = vadd.f32 %v8638_v36, %v8637_v29  ;;  %v8641_v36 = vmul.f32 %v14854_v18, %v14854_v18 }
0x1046   : > { %v15007_v45 = vadd.f32 %v8569_v41, %v8541_v52  ;;  %v8545_v41 = vpop.f32.mrf.mxu1  ;;  %v8640_v52 = vmul.f32 %v14993_v49, %v14993_v49  ;;  %v8677_v29 = vadd.f32 %v8642_v62, %v8641_v36  ;;  %v8885_v36 = vld [vmem:[%s15536_s6 + $0x20] sm:$0xff] }
0x1047   : > { %v8485_v9 = vpop.f32.mrf.mxu3 }
0x1048   : > { %v8486_v26 = vadd.f32 %v8485_v9, %v14953_v47  ;;  %v8604_v20 = vadd.f32 %v8603_v12, %v15007_v45  ;;  %v8662_v9 = vadd.f32 %v8630_v50, %v8629_v17  ;;  %v8574_v10 = vpop.f32.mrf.mxu2  ;;  %v8636_v50 = vmul.f32 %v14986_v59, %v14986_v59 }
0x104a   : > { %v8515_v63 = vadd.f32 %v8514_v39, %v8486_v26  ;;  %8605 = vadd.xlane.f32.xlu2 %v8604_v20  ;;  %v8632_v39 = vmul.f32 %v14979_v6, %v14979_v6  ;;  %v8613_v26 = vadd.f32 %v8612_v57, %v14966_v32 }
0x104c   : > { %v8544_v47 = vadd.f32 %v8543_v0, %v8515_v63  ;;  %v8673_v0 = vadd.f32 %v8672_v28, %v8639_v5  ;;  %v8650_v63 = vmul.f32 %v14927_v3, %v14927_v3  ;;  %v8644_v5 = vmul.f32 %v15000_v54, %v15000_v54 }
0x104e   : > { %v15022_v24 = vadd.f32 %v8572_v58, %v8544_v47  ;;  %v8674_v56 = vadd.f32 %v8673_v0, %v8640_v52  ;;  %v8654_v52 = vmul.f32 %v14930_v55, %v14930_v55 }
0x104f   : > { %v8487_v44 = vpop.f32.mrf.mxu3 }
0x1050   : > { %v8488_v13 = vadd.f32 %v8487_v44, %v14960_v8  ;;  %v8609_v33 = vadd.f32 %v8608_v51, %v15022_v24  ;;  %v8631_v8 = vmul.f32 %v14940_v46, %v14940_v46  ;;  %v8649_v51 = vmul.f32 %v14869_v14, %v14869_v14 }
0x1051   : > { %v8651_v44 = vmul.f32 %v14963_v2, %v14963_v2 }
0x1052   : > { %v8517_v1 = vadd.f32 %v8516_v61, %v8488_v13  ;;  %8660 = vadd.xlane.f32.xlu2 %v8659_v38  ;;  %8610 = vadd.xlane.f32.xlu0 %v8609_v33  ;;  %v8663_v21 = vadd.f32 %v8662_v9, %v8631_v8  ;;  %v8643_v13 = vmul.f32 %v14955_v25, %v14955_v25 }
0x1053   : > { %v8667_v38 = vadd.f32 %v8634_v40, %v8633_v48  ;;  %v8687_v33 = vadd.f32 %v8650_v63, %v8649_v51  ;;  %v8652_v61 = vmul.f32 %v15022_v24, %v15022_v24  ;;  %v8645_v9 = vmul.f32 %v14861_v60, %v14861_v60  ;;  %v8883_v51 = vld [vmem:[%s15536_s6 + $0x10] sm:$0xff] }
0x1054   : > { %v8546_v12 = vadd.f32 %v8545_v41, %v8517_v1  ;;  %v8664_v47 = vadd.f32 %v8663_v21, %v8632_v39  ;;  %v8678_v8 = vadd.f32 %v8677_v29, %v8643_v13  ;;  %v8646_v41 = vmul.f32 %v14921_v22, %v14921_v22  ;;  %v8961_v13 = vld [vmem:[%s15537_s7] sm:$0xff]  ;;  %v8963_v29 = vld [vmem:[%s15537_s7 + $0x10] sm:$0xff] }
0x1055   : > { %v8668_v1 = vadd.f32 %v8667_v38, %v8635_v27  ;;  %v8688_v17 = vadd.f32 %v8687_v33, %v8651_v44  ;;  %v8647_v39 = vmul.f32 %v14958_v35, %v14958_v35  ;;  %v8648_v21 = vmul.f32 %v15007_v45, %v15007_v45  ;;  %v8886_v27 = vld [vmem:[%s15536_s6 + $0x28] sm:$0xff]  ;;  %v8881_v44 = vld [vmem:[%s15536_s6] sm:$0xff]  ;;  %v8884_v38 = vld [vmem:[%s15536_s6 + $0x18] sm:$0xff] }
0x1056   : > { %v15045_v20 = vadd.f32 %v8574_v10, %v8546_v12  ;;  %v8679_v12 = vadd.f32 %v8678_v8, %v8644_v5  ;;  %v8653_v10 = vmul.f32 %v14876_v53, %v14876_v53  ;;  %v8682_v0 = vadd.f32 %v8646_v41, %v8645_v9  ;;  %v8888_v33 = vld [vmem:[%s15536_s6 + $0x38] sm:$0xff]  ;;  %v8967_v5 = vld [vmem:[%s15537_s7 + $0x30] sm:$0xff]  ;;  %v8965_v8 = vld [vmem:[%s15537_s7 + $0x20] sm:$0xff] }
0x1057   : > { %v8669_v28 = vadd.f32 %v8668_v1, %v8636_v50  ;;  %v8689_v57 = vadd.f32 %v8688_v17, %v8652_v61  ;;  %v8964_v50 = vld [vmem:[%s15537_s7 + $0x18] sm:$0xff]  ;;  %v8887_v61 = vld [vmem:[%s15536_s6 + $0x30] sm:$0xff]  ;;  %v8962_v1 = vld [vmem:[%s15537_s7 + $0x8] sm:$0xff] }
0x1058   : > { %v8614_v58 = vadd.f32 %v8613_v26, %v15045_v20  ;;  %v8655_v26 = vmul.f32 %v14966_v32, %v14966_v32  ;;  %v8692_v40 = vadd.f32 %v8654_v52, %v8653_v10  ;;  %v8656_v63 = vmul.f32 %v15045_v20, %v15045_v20  ;;  %v8966_v17 = vld [vmem:[%s15537_s7 + $0x28] sm:$0xff]  ;;  %v8968_v41 = vld [vmem:[%s15537_s7 + $0x38] sm:$0xff] }
0x105a   : > { %8615 = vadd.xlane.f32.xlu1 %v8614_v58  ;;  %8675 = vadd.xlane.f32.xlu2 %v8674_v56  ;;  %v8683_v58 = vadd.f32 %v8682_v0, %v8647_v39  ;;  %v8693_v56 = vadd.f32 %v8692_v40, %v8655_v26 }
0x105b   : > { %8665 = vadd.xlane.f32.xlu0 %v8664_v47  ;;  %v8882_v47 = vld [vmem:[%s15536_s6 + $0x8] sm:$0xff] }
0x105c   : > { %v8684_v48 = vadd.f32 %v8683_v58, %v8648_v21  ;;  %v8694_v62 = vadd.f32 %v8693_v56, %v8656_v63 }
0x1062   : > { %8670 = vadd.xlane.f32.xlu1 %v8669_v28  ;;  %8690 = vadd.xlane.f32.xlu2 %v8689_v57 }
0x1063   : > { %8680 = vadd.xlane.f32.xlu0 %v8679_v12 }
0x106a   : > { %8685 = vadd.xlane.f32.xlu1 %v8684_v48 }
0x106b   : > { %8695 = vadd.xlane.f32.xlu0 %v8694_v62 }
0x107a   : > { %8896 = vperm.xlu2 %10725, %v8882_v47  }
0x107f   : > { %8901 = vperm.xlu0 %10726, %v8883_v51  }
0x1082   : > { %8916 = vperm.xlu2 %10725, %v8886_v27  }
0x1083   : > { %8891 = vperm.xlu1 %10727, %v8881_v44  }
0x1087   : > { %8911 = vperm.xlu0 %10726, %v8885_v36  }
0x108a   : > { %8971 = vperm.xlu2 %10725, %v8961_v13  }
0x108b   : > { %8906 = vperm.xlu1 %10727, %v8884_v38  }
0x108f   : > { %8926 = vperm.xlu0 %10726, %v8888_v33  }
0x1092   : > { %8986 = vperm.xlu2 %10725, %v8964_v50  }
0x1093   : > { %8921 = vperm.xlu1 %10727, %v8887_v61  }
0x1095   : > { %v8581_v28 = vpop.xlane.xlu0 %8580 }
0x1096   : > { %v15136_v0 = vmul.f32 0.001953125, %v8581_v28 }
0x1097   : > { %8981 = vperm.xlu0 %10726, %v8963_v29  }
0x1098   : > { %v8705_v62 = vmul.f32 %v15136_v0, %v15136_v0 }
0x109a   : > { %9001 = vperm.xlu2 %10725, %v8967_v5  }
0x109b   : > { %8976 = vperm.xlu1 %10727, %v8962_v1  }
0x109d   : > { %v8586_v52 = vpop.xlane.xlu1 %8585 }
0x109e   : > { %v15138_v63 = vmul.f32 0.001953125, %v8586_v52 }
0x109f   : > { %8996 = vperm.xlu0 %10726, %v8966_v17  }
0x10a0   : > { %v8706_v13 = vmul.f32 %v15138_v63, %v15138_v63 }
0x10a3   : > { %8991 = vperm.xlu1 %10727, %v8965_v8  }
0x10a5   : > { %v8591_v57 = vpop.xlane.xlu2 %8590 }
0x10a6   : > { %v15144_v51 = vmul.f32 0.001953125, %v8591_v57 }
0x10a8   : > { %v8707_v50 = vmul.f32 %v15144_v51, %v15144_v51 }
0x10ab   : > { %9006 = vperm.xlu1 %10727, %v8968_v41  }
0x10ad   : > { %v8596_v12 = vpop.xlane.xlu0 %8595 }
0x10ae   : > { %v15140_v48 = vmul.f32 0.001953125, %v8596_v12 }
0x10b0   : > { %v8708_v38 = vmul.f32 %v15140_v48, %v15140_v48 }
0x10b5   : > { %v8601_v39 = vpop.xlane.xlu1 %8600 }
0x10bd   : > { %v8606_v9 = vpop.xlane.xlu2 %8605 }
0x10c5   : > { %v8661_v10 = vpop.xlane.xlu2 %8660  ;;  %v8611_v26 = vpop.xlane.xlu0 %8610 }
0x10c6   : > { %v8697_v58 = vmul.f32 0.001953125, %v8661_v10  ;;  %v15146_v27 = vmul.f32 0.001953125, %v8611_v26  ;;  %v15156_v10 = vmul.f32 0.001953125, %v8601_v39 }
0x10c8   : > { %v8713_v44 = vsub.f32 %v8697_v58, %v8705_v62  ;;  %v8711_v5 = vmul.f32 %v15146_v27, %v15146_v27  ;;  %v15160_v62 = vmul.f32 0.001953125, %v8606_v9  ;;  %v8709_v39 = vmul.f32 %v15156_v10, %v15156_v10 }
0x10ca   : > { %v8721_v1 = vmax.f32 %v8713_v44, 0.0 }
0x10cc   : > { %v15158_v26 = vadd.f32 1e-05, %v8721_v1 }
0x10cd   : > { %v8616_v21 = vpop.xlane.xlu1 %8615  ;;  %v8676_v40 = vpop.xlane.xlu2 %8675 }
0x10ce   : > { %v8666_v56 = vpop.xlane.xlu0 %8665  ;;  %v8700_v36 = vmul.f32 0.001953125, %v8676_v40  ;;  %10744 = vrsqrt.f32 %v15158_v26  ;;  %vm8775_vm6 = vweird.f32 %v15158_v26 }
0x10cf   : > { %v8698_v47 = vmul.f32 0.001953125, %v8666_v56 }
0x10d0   : > { %v8716_v17 = vsub.f32 %v8700_v36, %v8708_v38 }
0x10d1   : > { %v8714_v33 = vsub.f32 %v8698_v47, %v8706_v13 }
0x10d2   : > { %v8724_v40 = vmax.f32 %v8716_v17, 0.0 }
0x10d3   : > { %v8722_v28 = vmax.f32 %v8714_v33, 0.0 }
0x10d4   : > { %v15167_v38 = vadd.f32 1e-05, %v8724_v40  ;;  %v15181_v1 = vpop.eup %10744 }
0x10d5   : > { %v8671_v61 = vpop.xlane.xlu1 %8670  ;;  %v8691_v29 = vpop.xlane.xlu2 %8690  ;;  %v15162_v47 = vadd.f32 1e-05, %v8722_v28  ;;  %vm8776_vm15 = vweird.f32 %v15181_v1 }
0x10d6   : > { %v8699_v8 = vmul.f32 0.001953125, %v8671_v61  ;;  %v8703_v41 = vmul.f32 0.001953125, %v8691_v29  ;;  %v8681_v12 = vpop.xlane.xlu0 %8680  ;;  %v8710_v61 = vmul.f32 %v15160_v62, %v15160_v62  ;;  %vm8777_vm0 = vmor %vm8775_vm6, %vm8776_vm15  ;;  %vm8805_vm13 = vweird.f32 %v15167_v38 }
0x10d7   : > { %v8701_v13 = vmul.f32 0.001953125, %v8681_v12  ;;  %10746 = vrsqrt.f32 %v15162_v47  ;;  %vm8785_vm7 = vweird.f32 %v15162_v47 }
0x10d8   : > { %v8715_v57 = vsub.f32 %v8699_v8, %v8707_v50  ;;  %v8719_v52 = vsub.f32 %v8703_v41, %v8711_v5 }
0x10d9   : > { %v8717_v9 = vsub.f32 %v8701_v13, %v8709_v39 }
0x10da   : > { %v8723_v58 = vmax.f32 %v8715_v57, 0.0  ;;  %v8727_v56 = vmax.f32 %v8719_v52, 0.0  ;;  %v8770_v57 = vmul.f32 %v15181_v1, %v15158_v26 }
0x10db   : > { %v8725_v17 = vmax.f32 %v8717_v9, 0.0 }
0x10dc   : > { %v15164_v44 = vadd.f32 1e-05, %v8723_v58  ;;  %v15171_v33 = vadd.f32 1e-05, %v8727_v56  ;;  %v15193_v58 = vmul.f32 0.001953125, %v8616_v21 }
0x10dd   : > { %v8686_v36 = vpop.xlane.xlu1 %8685  ;;  %v15173_v50 = vpop.permute.xlu2 %8896  ;;  %v15195_v56 = vadd.f32 1e-05, %v8725_v17 }
0x10de   : > { %15824 = vst [vmem:[#allocation8_spill] sm:$0xff] %v15171_v33  ;;  %v8702_v29 = vmul.f32 0.001953125, %v8686_v36  ;;  %10748 = vrsqrt.f32 %v15164_v44  ;;  %v15183_v41 = vpop.eup %10746  ;;  %v8696_v12 = vpop.xlane.xlu0 %8695  ;;  %vm8795_vm3 = vweird.f32 %v15164_v44 }
0x10df   : > { %15825 = vst [vmem:[#allocation5_spill] sm:$0xff] %v15173_v50  ;;  %10750 = vrsqrt.f32 %v15167_v38  ;;  %v8780_v39 = vmul.f32 %v15183_v41, %v15162_v47  ;;  %vm8786_vm1 = vweird.f32 %v15183_v41  ;;  %vm8815_vm9 = vweird.f32 %v15195_v56  ;;  %v15832_v47 = vld [vmem:[#allocation13_spill] sm:$0xff] }
0x10e0   : > { %v8718_v5 = vsub.f32 %v8702_v29, %v8710_v61  ;;  %10752 = vrsqrt.f32 %v15171_v33  ;;  %v8704_v61 = vmul.f32 0.001953125, %v8696_v12  ;;  %v8712_v12 = vmul.f32 %v15193_v58, %v15193_v58  ;;  %vm8787_vm10 = vmor %vm8785_vm7, %vm8786_vm1 }
0x10e1   : > { %v8781_v16 = vmul.f32 %v15183_v41, %v8780_v39 }
0x10e2   : > { %v8726_v8 = vmax.f32 %v8718_v5, 0.0  ;;  %v8771_v5 = vmul.f32 %v15181_v1, %v8770_v57  ;;  %v8720_v29 = vsub.f32 %v8704_v61, %v8712_v12 }
0x10e4   : > { %v15185_v28 = vpop.eup %10748  ;;  %v15189_v52 = vadd.f32 1e-05, %v8726_v8  ;;  %v8772_v42 = vmul.f32 0.5, %v8771_v5 }
0x10e5   : > { %v15191_v40 = vpop.eup %10750  ;;  %v15199_v36 = vpop.permute.xlu2 %8916  ;;  %v8790_v9 = vmul.f32 %v15185_v28, %v15164_v44  ;;  %vm8796_vm11 = vweird.f32 %v15185_v28 }
0x10e6   : > { %v15197_v13 = vpop.eup %10752  ;;  %15826 = vst [vmem:[#allocation4_spill] sm:$0xff] %v15199_v36  ;;  %v8800_v21 = vmul.f32 %v15191_v40, %v15167_v38  ;;  %10754 = vrsqrt.f32 %v15189_v52  ;;  %v8728_v36 = vmax.f32 %v8720_v29, 0.0  ;;  %v8773_v30 = vsub.f32 1.5, %v8772_v42  ;;  %vm8797_vm2 = vmor %vm8795_vm3, %vm8796_vm11  ;;  %v15830_v38 = vld [vmem:[#allocation11_spill] sm:$0xff] }
0x10e7   : > { %v8830_v8 = vmul.f32 %v15197_v13, %v15171_v33  ;;  %10756 = vrsqrt.f32 %v15195_v56  ;;  %v8791_v19 = vmul.f32 %v15185_v28, %v8790_v9  ;;  %v8782_v33 = vmul.f32 0.5, %v8781_v16 }
0x10e8   : > { %v8801_v57 = vmul.f32 %v15191_v40, %v8800_v21  ;;  %v8754_v16 = vsub.f32 %v14927_v3, %v15146_v27  ;;  %v8774_v49 = vmul.f32 %v15181_v1, %v8773_v30  ;;  %vm8806_vm5 = vweird.f32 %v15191_v40 }
0x10e9   : > { %v8831_v46 = vmul.f32 %v15197_v13, %v8830_v8  ;;  %v8792_v61 = vmul.f32 0.5, %v8791_v19  ;;  %v8783_v17 = vsub.f32 1.5, %v8782_v33  ;;  %v15282_v19 = vadd.f32 1e-05, %v8728_v36  ;;  %vm8807_vm4 = vmor %vm8805_vm13, %vm8806_vm5 }
0x10ea   : > { %v8756_v33 = vsub.f32 %v15022_v24, %v15146_v27  ;;  %v8778_v24 = vsel %vm8777_vm0, %v15181_v1, %v8774_v49  ;;  %vm8836_vm12 = vweird.f32 %v15197_v13  ;;  %vm8825_vm6 = vweird.f32 %v15189_v52 }
0x10eb   : > { %v8832_v4 = vmul.f32 0.5, %v8831_v46  ;;  %v8793_v50 = vsub.f32 1.5, %v8792_v61  ;;  %10758 = vrsqrt.f32 %v15282_v19  ;;  %v15846_v30 = vsub.f32 %v14986_v59, %v15144_v51 }
0x10ec   : > { %v15244_v5 = vpop.eup %10754  ;;  %vm8845_vm5 = vweird.f32 %v15282_v19 }
0x10ed   : > { %v15256_v9 = vpop.eup %10756  ;;  %v15260_v12 = vpop.permute.xlu2 %8971  ;;  %v8820_v39 = vmul.f32 %v15244_v5, %v15189_v52  ;;  %v8833_v46 = vsub.f32 1.5, %v8832_v4  ;;  %v8784_v4 = vmul.f32 %v15183_v41, %v8783_v17  ;;  %v8794_v26 = vmul.f32 %v15185_v28, %v8793_v50 }
0x10ee   : > { %v8810_v42 = vmul.f32 %v15256_v9, %v15195_v56  ;;  %vm8816_vm15 = vweird.f32 %v15256_v9  ;;  %vm8826_vm1 = vweird.f32 %v15244_v5 }
0x10ef   : > { %v8821_v8 = vmul.f32 %v15244_v5, %v8820_v39  ;;  %v8788_v44 = vsel %vm8787_vm10, %v15183_v41, %v8784_v4  ;;  %v8798_v1 = vsel %vm8797_vm2, %v15185_v28, %v8794_v26  ;;  %v15833_v41 = vsub.f32 %v15832_v47, %v15136_v0  ;;  %v15834_v28 = vld [vmem:[#allocation7_spill] sm:$0xff]  ;;  %vm8827_vm0 = vmor %vm8825_vm6, %vm8826_vm1 }
0x10f0   : > { %v8811_v36 = vmul.f32 %v15256_v9, %v8810_v42  ;;  %v15835_v26 = vsub.f32 %v15834_v28, %v15136_v0  ;;  %vm8817_vm11 = vmor %vm8815_vm9, %vm8816_vm15 }
0x10f1   : > { %v15246_v21 = vpop.permute.xlu0 %8901  ;;  %v8822_v50 = vmul.f32 0.5, %v8821_v8  ;;  %v15829_v8 = vld [vmem:[#allocation8_spill] sm:$0xff]  ;;  %v15339_v4 = vmul.f32 %v8778_v24, %v15833_v41  ;;  %v15837_v41 = vsub.f32 %v14830_v11, %v15138_v63  ;;  %v15843_v11 = vsub.f32 %v14979_v6, %v15138_v63 }
0x10f2   : > { %15827 = vst [vmem:[#allocation17_spill] sm:$0xff] %v15246_v21  ;;  %v8802_v21 = vmul.f32 0.5, %v8801_v57  ;;  %v8755_v57 = vsub.f32 %v14963_v2, %v15146_v27  ;;  %v8812_v17 = vmul.f32 0.5, %v8811_v36  ;;  %vm8835_vm14 = vweird.f32 %v15829_v8 }
0x10f3   : > { %vm8837_vm8 = vmor %vm8835_vm14, %vm8836_vm12  ;;  %v15344_v8 = vmul.f32 %v8778_v24, %v15835_v26  ;;  %v8853_v28 = vmul.f32 %v8788_v44, %v15837_v41  ;;  %v15838_v26 = vsub.f32 %v14891_v31, %v15138_v63  ;;  %v15844_v31 = vsub.f32 %v14899_v15, %v15144_v51 }
0x10f4   : > { %v8803_v34 = vsub.f32 1.5, %v8802_v21  ;;  %v8834_v21 = vmul.f32 %v15197_v13, %v8833_v46  ;;  %v15831_v46 = vsub.f32 %v15830_v38, %v15136_v0  ;;  %v15836_v38 = vsub.f32 %v14972_v37, %v15136_v0 }
0x10f5   : > { %v15274_v29 = vpop.permute.xlu1 %8891  ;;  %v15314_v42 = vpop.permute.xlu2 %8986  ;;  %v8813_v47 = vsub.f32 1.5, %v8812_v17  ;;  %v8854_v37 = vmul.f32 %v8788_v44, %v15838_v26  ;;  %v15839_v0 = vsub.f32 %v14839_v43, %v15144_v51  ;;  %v8856_v17 = vmul.f32 %v8788_v44, %v15843_v11 }
0x10f6   : > { %v8804_v39 = vmul.f32 %v15191_v40, %v8803_v34  ;;  %15828 = vst [vmem:[#allocation15_spill] sm:$0xff] %v15314_v42  ;;  %v15328_v36 = vmul.f32 %v8778_v24, %v15831_v46  ;;  %v8838_v46 = vsel %vm8837_vm8, %v15197_v13, %v8834_v21  ;;  %v8823_v34 = vsub.f32 1.5, %v8822_v50  ;;  %v15841_v13 = vld [vmem:[#allocation16_spill] sm:$0xff] }
0x10f7   : > { %v15842_v21 = vsub.f32 %v15841_v13, %v15138_v63  ;;  %v8858_v41 = vmul.f32 %v8798_v1, %v15844_v31  ;;  %v15845_v26 = vsub.f32 %v14945_v7, %v15144_v51  ;;  %v8860_v13 = vmul.f32 %v8798_v1, %v15846_v30  ;;  %v15848_v7 = vld [vmem:[#allocation5_spill] sm:$0xff] }
0x10f8   : > { %v15331_v2 = vsel %vm8807_vm4, %v15191_v40, %v8804_v39  ;;  %v15349_v40 = vmul.f32 %v8778_v24, %v15836_v38  ;;  %v15351_v39 = vpop.eup %10758  ;;  %v8857_v24 = vmul.f32 %v8798_v1, %v15839_v0  ;;  %v8824_v63 = vmul.f32 %v15244_v5, %v8823_v34 }
0x10f9   : > { %v15296_v61 = vpop.permute.xlu0 %8911  ;;  %v8855_v50 = vmul.f32 %v8788_v44, %v15842_v21  ;;  %v8840_v43 = vmul.f32 %v15351_v39, %v15282_v19  ;;  %v8859_v0 = vmul.f32 %v8798_v1, %v15845_v26  ;;  %v15847_v21 = vsub.f32 %v14869_v14, %v15146_v27  ;;  %v15849_v59 = vld [vmem:[#allocation17_spill] sm:$0xff] }
0x10fa   : > { %v8874_v15 = vmul.f32 %v8838_v46, %v8754_v16  ;;  %v8875_v44 = vmul.f32 %v8838_v46, %v8755_v57  ;;  %v8876_v11 = vmul.f32 %v8838_v46, %v8756_v33  ;;  %v8814_v31 = vmul.f32 %v15256_v9, %v8813_v47 }
0x10fb   : > { %v8873_v6 = vmul.f32 %v8838_v46, %v15847_v21  ;;  %v8933_v26 = vmul.f32 %v15848_v7, %v8853_v28  ;;  %v8934_v42 = vmul.f32 %v15848_v7, %v8854_v37  ;;  %v8937_v51 = vmul.f32 %v15849_v59, %v8857_v24 }
0x10fc   : > { %v8841_v3 = vmul.f32 %v15351_v39, %v8840_v43  ;;  %v8938_v27 = vmul.f32 %v15849_v59, %v8858_v41  ;;  %v8939_v16 = vmul.f32 %v15849_v59, %v8859_v0  ;;  %v8940_v57 = vmul.f32 %v15849_v59, %v8860_v13 }
0x10fd   : > { %v15316_v49 = vpop.permute.xlu1 %8906  ;;  %v9002_v33 = vpop.permute.xlu2 %9001  ;;  %v8828_v34 = vsel %vm8827_vm0, %v15244_v5, %v8824_v63  ;;  %v8818_v28 = vsel %vm8817_vm11, %v15256_v9, %v8814_v31  ;;  %v8935_v37 = vmul.f32 %v15848_v7, %v8855_v50  ;;  %v8936_v24 = vmul.f32 %v15848_v7, %v8856_v17 }
0x10fe   : > { %v8842_v56 = vmul.f32 0.5, %v8841_v3  ;;  %v15850_v9 = vsub.f32 %v14861_v60, %v15160_v62  ;;  %v15851_v50 = vsub.f32 %v14921_v22, %v15160_v62  ;;  %v15852_v17 = vsub.f32 %v14958_v35, %v15160_v62  ;;  %v15855_v35 = vld [vmem:[#allocation10_spill] sm:$0xff] }
0x10ff   : > { %v15853_v7 = vsub.f32 %v15007_v45, %v15160_v62  ;;  %vm8846_vm7 = vweird.f32 %v15351_v39  ;;  %v15854_v60 = vsub.f32 %v14854_v18, %v15156_v10  ;;  %v8929_v45 = vmul.f32 %v15274_v29, %v15328_v36 }
0x1100   : > { %v8869_v5 = vmul.f32 %v8828_v34, %v15850_v9  ;;  %v8871_v63 = vmul.f32 %v8828_v34, %v15852_v17  ;;  %v15857_v62 = vsub.f32 %v14914_v23, %v15156_v10  ;;  %v15858_v3 = vsub.f32 %v14955_v25, %v15156_v10  ;;  %vm8847_vm10 = vmor %vm8845_vm5, %vm8846_vm7 }
0x1101   : > { %v15365_v38 = vpop.permute.xlu0 %8926  ;;  %v8872_v59 = vmul.f32 %v8828_v34, %v15853_v7  ;;  %v8865_v22 = vmul.f32 %v8818_v28, %v15854_v60  ;;  %v8931_v36 = vmul.f32 %v15274_v29, %v15344_v8  ;;  %v8932_v23 = vmul.f32 %v15274_v29, %v15349_v40  ;;  %v15861_v7 = vld [vmem:[#allocation6_spill] sm:$0xff] }
0x1102   : > { %15840 = vst [vmem:[#allocation9_spill] sm:$0xff] %v15365_v38  ;;  %v8867_v18 = vmul.f32 %v8818_v28, %v15858_v3 }
0x1105   : > { %v8922_v30 = vpop.permute.xlu1 %8921 }
0x1106   : > { %v8953_v1 = vmul.f32 %v8922_v30, %v8873_v6  ;;  %v8954_v14 = vmul.f32 %v8922_v30, %v8874_v15  ;;  %v8955_v21 = vmul.f32 %v8922_v30, %v8875_v44  ;;  %v8956_v38 = vmul.f32 %v8922_v30, %v8876_v11 }
0x1108   : > { %v9033_v46 = vadd.f32 %v9002_v33, %v8953_v1  ;;  %v9034_v52 = vadd.f32 %v9002_v33, %v8954_v14  ;;  %v9035_v47 = vadd.f32 %v9002_v33, %v8955_v21  ;;  %v9036_v41 = vadd.f32 %v9002_v33, %v8956_v38 }
0x1109   : > { %v8982_v43 = vpop.permute.xlu0 %8981  ;;  %v8870_v38 = vmul.f32 %v8828_v34, %v15851_v50  ;;  %v8866_v21 = vmul.f32 %v8818_v28, %v15857_v62  ;;  %v8930_v33 = vmul.f32 %v15274_v29, %v15339_v4  ;;  %v15860_v34 = vld [vmem:[#allocation4_spill] sm:$0xff]  ;;  %v9011_v50 = vadd.f32 %v15260_v12, %v8931_v36 }
0x110a   : > { %v9017_v0 = vadd.f32 %v8982_v43, %v8937_v51  ;;  %v9018_v13 = vadd.f32 %v8982_v43, %v8938_v27  ;;  %v9019_v6 = vadd.f32 %v8982_v43, %v8939_v16  ;;  %v9020_v15 = vadd.f32 %v8982_v43, %v8940_v57 }
0x110b   : > { %v15856_v51 = vsub.f32 %v15855_v35, %v15140_v48  ;;  %v15859_v27 = vsub.f32 %v15000_v54, %v15156_v10  ;;  %v8843_v57 = vsub.f32 1.5, %v8842_v56  ;;  %v8949_v25 = vmul.f32 %v15860_v34, %v8869_v5 }
0x110c   : > { %v9049_v44 = vadd.f32 %v9033_v46, %v9017_v0  ;;  %v9050_v11 = vadd.f32 %v9034_v52, %v9018_v13  ;;  %v9051_v31 = vadd.f32 %v9035_v47, %v9019_v6  ;;  %v9052_v1 = vadd.f32 %v9036_v41, %v9020_v15 }
0x110d   : > { %v8861_v30 = vmul.f32 %v15331_v2, %v15856_v51  ;;  %v8977_v14 = vpop.permute.xlu1 %8976  ;;  %v8868_v16 = vmul.f32 %v8818_v28, %v15859_v27  ;;  %v8950_v46 = vmul.f32 %v15860_v34, %v8870_v38  ;;  %v8951_v54 = vmul.f32 %v15860_v34, %v8871_v63  ;;  %v15865_v51 = vld [vmem:[#allocation14_spill] sm:$0xff] }
0x110e   : > { %9065 = vst [vmem:[%s15417_s19 + $0x40] sm:$0xff] %v9049_v44  ;;  %v8952_v10 = vmul.f32 %v15860_v34, %v8872_v59  ;;  %v8945_v52 = vmul.f32 %v15296_v61, %v8865_v22  ;;  %v9013_v4 = vadd.f32 %v8977_v14, %v8933_v26  ;;  %v9014_v47 = vadd.f32 %v8977_v14, %v8934_v42  ;;  %v15863_v22 = vld [vmem:[#allocation12_spill] sm:$0xff]  ;;  %v15871_v34 = vld [vmem:[#allocation9_spill] sm:$0xff] }
0x110f   : > { %9066 = vst [vmem:[%s15417_s19 + $0x48] sm:$0xff] %v9050_v11  ;;  %v9015_v28 = vadd.f32 %v8977_v14, %v8935_v37  ;;  %v8844_v0 = vmul.f32 %v15351_v39, %v8843_v57  ;;  %v8946_v13 = vmul.f32 %v15296_v61, %v8866_v21  ;;  %v8947_v6 = vmul.f32 %v15296_v61, %v8867_v18 }
0x1110   : > { %9067 = vst [vmem:[%s15417_s19 + $0x50] sm:$0xff] %v9051_v31  ;;  %v9016_v15 = vadd.f32 %v8977_v14, %v8936_v24  ;;  %v8948_v56 = vmul.f32 %v15296_v61, %v8868_v16  ;;  %v9009_v42 = vadd.f32 %v15260_v12, %v8929_v45  ;;  %v9010_v37 = vadd.f32 %v15260_v12, %v8930_v33 }
0x1111   : > { %9068 = vst [vmem:[%s15417_s19 + $0x58] sm:$0xff] %v9052_v1  ;;  %v8997_v8 = vpop.permute.xlu0 %8996  ;;  %v8848_v11 = vsel %vm8847_vm10, %v15351_v39, %v8844_v0  ;;  %v9012_v31 = vadd.f32 %v15260_v12, %v8932_v23  ;;  %v15862_v59 = vsub.f32 %v15861_v7, %v15140_v48  ;;  %v15864_v19 = vsub.f32 %v15863_v22, %v15140_v48 }
0x1112   : > { %v9029_v41 = vadd.f32 %v8997_v8, %v8949_v25  ;;  %v9030_v43 = vadd.f32 %v8997_v8, %v8950_v46  ;;  %v9031_v29 = vadd.f32 %v8997_v8, %v8951_v54  ;;  %v9032_v40 = vadd.f32 %v8997_v8, %v8952_v10  ;;  %v15872_v54 = vld [vmem:[#allocation15_spill] sm:$0xff] }
0x1113   : > { %v8862_v60 = vmul.f32 %v15331_v2, %v15862_v59  ;;  %v8863_v35 = vmul.f32 %v15331_v2, %v15864_v19  ;;  %v15866_v1 = vsub.f32 %v15865_v51, %v15140_v48  ;;  %v8941_v62 = vmul.f32 %v15316_v49, %v8861_v30 }
0x1114   : > { %v9045_v9 = vadd.f32 %v9029_v41, %v9013_v4  ;;  %v9046_v5 = vadd.f32 %v9030_v43, %v9014_v47  ;;  %v9047_v26 = vadd.f32 %v9031_v29, %v9015_v28  ;;  %v9048_v38 = vadd.f32 %v9032_v40, %v9016_v15 }
0x1115   : > { %v8992_v17 = vpop.permute.xlu1 %8991  ;;  %v8864_v14 = vmul.f32 %v15331_v2, %v15866_v1  ;;  %v8942_v21 = vmul.f32 %v15316_v49, %v8862_v60  ;;  %v8943_v3 = vmul.f32 %v15316_v49, %v8863_v35  ;;  %v15867_v48 = vsub.f32 %v14876_v53, %v15193_v58 }
0x1116   : > { %9061 = vst [vmem:[%s15417_s19 + $0x20] sm:$0xff] %v9045_v9  ;;  %v9025_v61 = vadd.f32 %v8992_v17, %v8945_v52  ;;  %v9026_v24 = vadd.f32 %v8992_v17, %v8946_v13  ;;  %v9027_v63 = vadd.f32 %v8992_v17, %v8947_v6  ;;  %v9028_v44 = vadd.f32 %v8992_v17, %v8948_v56 }
0x1117   : > { %9062 = vst [vmem:[%s15417_s19 + $0x28] sm:$0xff] %v9046_v5  ;;  %v8877_v2 = vmul.f32 %v8848_v11, %v15867_v48  ;;  %v15868_v27 = vsub.f32 %v14930_v55, %v15193_v58  ;;  %v15869_v57 = vsub.f32 %v14966_v32, %v15193_v58  ;;  %v15870_v33 = vsub.f32 %v15045_v20, %v15193_v58 }
0x1118   : > { %9063 = vst [vmem:[%s15417_s19 + $0x30] sm:$0xff] %v9047_v26  ;;  %v9041_v12 = vadd.f32 %v9025_v61, %v9009_v42  ;;  %v9042_v39 = vadd.f32 %v9026_v24, %v9010_v37  ;;  %v9043_v45 = vadd.f32 %v9027_v63, %v9011_v50  ;;  %v9044_v18 = vadd.f32 %v9028_v44, %v9012_v31 }
0x1119   : > { %9064 = vst [vmem:[%s15417_s19 + $0x38] sm:$0xff] %v9048_v38  ;;  %v8878_v16 = vmul.f32 %v8848_v11, %v15868_v27  ;;  %v8879_v30 = vmul.f32 %v8848_v11, %v15869_v57  ;;  %v8880_v36 = vmul.f32 %v8848_v11, %v15870_v33  ;;  %v8944_v23 = vmul.f32 %v15316_v49, %v8864_v14 }
0x111a   : > { %9057 = vst [vmem:[%s15417_s19] sm:$0xff] %v9041_v12  ;;  %v8957_v25 = vmul.f32 %v15871_v34, %v8877_v2  ;;  %v9021_v20 = vadd.f32 %v15872_v54, %v8941_v62  ;;  %v9022_v58 = vadd.f32 %v15872_v54, %v8942_v21  ;;  %v9023_v49 = vadd.f32 %v15872_v54, %v8943_v3 }
0x111b   : > { %9058 = vst [vmem:[%s15417_s19 + $0x8] sm:$0xff] %v9042_v39  ;;  %v8958_v53 = vmul.f32 %v15871_v34, %v8878_v16  ;;  %v8959_v46 = vmul.f32 %v15871_v34, %v8879_v30  ;;  %v8960_v55 = vmul.f32 %v15871_v34, %v8880_v36  ;;  %v9024_v28 = vadd.f32 %v15872_v54, %v8944_v23 }
0x111c   : > { %9059 = vst [vmem:[%s15417_s19 + $0x10] sm:$0xff] %v9043_v45 }
0x111d   : > { %9060 = vst [vmem:[%s15417_s19 + $0x18] sm:$0xff] %v9044_v18  ;;  %v9007_v32 = vpop.permute.xlu1 %9006 }
0x111e   : > { %v9037_v10 = vadd.f32 %v9007_v32, %v8957_v25  ;;  %v9038_v52 = vadd.f32 %v9007_v32, %v8958_v53  ;;  %v9039_v4 = vadd.f32 %v9007_v32, %v8959_v46  ;;  %v9040_v47 = vadd.f32 %v9007_v32, %v8960_v55 }
0x1120   : > { %v9053_v8 = vadd.f32 %v9037_v10, %v9021_v20  ;;  %v9054_v41 = vadd.f32 %v9038_v52, %v9022_v58  ;;  %v9055_v43 = vadd.f32 %v9039_v4, %v9023_v49  ;;  %v9056_v29 = vadd.f32 %v9040_v47, %v9024_v28 }
0x1122   : > { %9069 = vst [vmem:[%s15417_s19 + $0x60] sm:$0xff] %v9053_v8 }
0x1123   : > { %9070 = vst [vmem:[%s15417_s19 + $0x68] sm:$0xff] %v9054_v41 }
0x1124   : > { %9071 = vst [vmem:[%s15417_s19 + $0x70] sm:$0xff] %v9055_v43 }
0x1125   : > { %9072 = vst [vmem:[%s15417_s19 + $0x78] sm:$0xff] %v9056_v29 }
0x1126 PF: > { %s18_s27 = sadd.s32 1, %s10807_s27  }
0x1127   : > { %p15_p4 = scmp.ge.s32.totalorder %s18_s27, 4  }
0x1129   :  { %17 = sbr.rel (!%p15_p4) target bundleno = 1 (0x1), region = 100 }

</bundles_post_ra>
